<compile_context>
chip_gen: v7x
topology: tpu7x:2x2x1
jax: 0.10.0
libtpu: 0.0.40
codegen_flags: <defaults>
</compile_context>

<pallas_src>
import jax
import jax.numpy as jnp
from jax.experimental import pallas as pl
from jax.experimental.pallas import tpu as pltpu

NODE_DIM = 16
EDGE_DIM = 8
HIDDEN = 32          # hidden_dim (small synthetic size; module default is 512)
N_NODES = 16
N_EDGES = 48
OUT_PAD = 128        # lane-dense width for the coord output (real width is 3)

VMEM = pltpu.MemorySpace.VMEM


def _leaky_relu(v, slope):
    return jnp.where(v > 0, v, slope * v)


def _elu(v):
    return jnp.where(v > 0, v, jnp.exp(jnp.minimum(v, 0.0)) - 1.0)


def _gat_layer(h, e2, adj3, neg_bias, w_l, b_l, w_r, b_r, w_e, att_exp, bias,
               *, heads, ch, head_mean=None):
    """One GATv2Conv (inference) on a dense adjacency; lane-dense, fully in VMEM."""
    # TODO(synk): attention dropout (p=0.2 / 0.1) is training-only; inference semantics used.
    n = adj3.shape[0]
    hc = heads * ch
    xl = jnp.dot(h, w_l, preferred_element_type=jnp.float32) + b_l      # [N, HC]   lin_l (source)
    xr = jnp.dot(h, w_r, preferred_element_type=jnp.float32) + b_r      # [N, HC]   lin_r (target)
    ep = jnp.dot(e2, w_e, preferred_element_type=jnp.float32)           # [N*N, HC] lin_edge (no bias)

    pre = xr[:, None, :] + xl[None, :, :] + ep.reshape(n, n, hc)        # [Ndst, Nsrc, HC]
    pre = _leaky_relu(pre, 0.2)

    # Block-diagonal attention matmul on the MXU (full H*C lane width, one push):
    #   q[i, j, h*C + c] == score(i <- j, head h) broadcast across the head's channel block.
    q = jnp.dot(pre.reshape(n * n, hc), att_exp,
                preferred_element_type=jnp.float32).reshape(n, n, hc)
    q = q + neg_bias                                                    # -1e30 on non-edges
    m = jnp.max(q, axis=1, keepdims=True)                               # [N, 1, HC]
    p = jnp.exp(q - m) * adj3                                           # unnormalized alpha
    denom = jnp.sum(p, axis=1)                                          # [N, HC]
    inv = pl.reciprocal(jnp.maximum(denom, 1e-20), approx=True)         # guard + EUP slot

    # Deferred softmax normalization: aggregate first, then one row-scale.
    out = jnp.sum(p * xl[None, :, :], axis=1) * inv                     # [N, HC]

    if head_mean is None:                                               # concat=True
        return out + bias                                               # [N, H*C]
    # concat=False: mean over heads as one lane-dense MXU matmul (no lane slicing).
    return jnp.dot(out, head_mean, preferred_element_type=jnp.float32) + bias   # [N, C]


def _forward_kernel(*refs):
    (x_ref, adj3_ref, e2_ref,
     c1_wl, c1_bl, c1_wr, c1_br, c1_we, c1_att, c1_b,
     res_w, res_b,
     c2_wl, c2_bl, c2_wr, c2_br, c2_we, c2_att, c2_b, c2_hm,
     c3_wl, c3_bl, c3_wr, c3_br, c3_we, c3_att, c3_b,
     cw1, cb1, cw2, cb2,
     o_ref) = refs

    x = x_ref[...]
    e2 = e2_ref[...]
    adj3 = adj3_ref[...]                                                # [Ndst, Nsrc, 1]
    neg_bias = (adj3 - 1.0) * jnp.float32(1e30)                         # hoisted mask bias

    # conv1 (heads=8, concat) + residual + leaky_relu(0.2)
    h1 = _gat_layer(x, e2, adj3, neg_bias,
                    c1_wl[...], c1_bl[...], c1_wr[...], c1_br[...],
                    c1_we[...], c1_att[...], c1_b[...], heads=8, ch=HIDDEN)
    res = jnp.dot(x, res_w[...], preferred_element_type=jnp.float32) + res_b[...]
    h = _leaky_relu(h1 + res, 0.2)

    # conv2 (heads=4, mean over heads) + ELU
    h2 = _gat_layer(h, e2, adj3, neg_bias,
                    c2_wl[...], c2_bl[...], c2_wr[...], c2_br[...],
                    c2_we[...], c2_att[...], c2_b[...], heads=4, ch=HIDDEN,
                    head_mean=c2_hm[...])
    h = _elu(h2)

    # conv3 (heads=1, concat) + ELU
    h3 = _gat_layer(h, e2, adj3, neg_bias,
                    c3_wl[...], c3_bl[...], c3_wr[...], c3_br[...],
                    c3_we[...], c3_att[...], c3_b[...], heads=1, ch=HIDDEN)
    h = _elu(h3)

    # coord_pred MLP epilogue; output weights zero-padded to 128 lanes -> unmasked store.
    g = _elu(jnp.dot(h, cw1[...], preferred_element_type=jnp.float32) + cb1[...])
    o_ref[...] = jnp.dot(g, cw2[...], preferred_element_type=jnp.float32) + cb2[...]


# ------------------------------- forward -----------------------------------

def enhanced_gat_forward(params, x, adj3, e2):
    n = x.shape[0]

    def layer_args(c):
        return [c["w_l"], c["b_l"], c["w_r"], c["b_r"], c["w_e"], c["att_exp"], c["bias"]]

    args = ([x, adj3, e2]
            + layer_args(params["conv1"])
            + [params["res_w"], params["res_b"]]
            + layer_args(params["conv2"]) + [params["conv2"]["head_mean"]]
            + layer_args(params["conv3"])
            + [params["cp_w1"], params["cp_b1"], params["cp_w2"], params["cp_b2"]])

    out_pad = pl.pallas_call(
        _forward_kernel,
        out_shape=jax.ShapeDtypeStruct((n, OUT_PAD), jnp.float32),
        in_specs=[pl.BlockSpec(memory_space=VMEM)] * len(args),
        out_specs=pl.BlockSpec(memory_space=VMEM),
        compiler_params=pltpu.CompilerParams(vmem_limit_bytes=64 << 20),
    )(*args)
    return out_pad[:, :3]


# ------------------------------ init / glue ---------------------------------

def glorot(key, shape):
    lim = (6.0 / (shape[0] + shape[1])) ** 0.5
    return jax.random.uniform(key, shape, jnp.float32, -lim, lim)


def build_att_expand(att, heads, ch):
    """[HC, HC] block-diagonal expansion of att [H, C]: column block h gets att[h] rows."""
    hc = heads * ch
    head_of = jnp.arange(hc) // ch
    mask = (head_of[:, None] == head_of[None, :]).astype(jnp.float32)
    return att.reshape(hc, 1) * mask


def build_head_mean(heads, ch):
    """[HC, C] matrix M with M[h*C + c, c'] = (c == c') / heads  (mean over heads)."""
    rows = jnp.arange(heads * ch) % ch
    cols = jnp.arange(ch)
    return (rows[:, None] == cols[None, :]).astype(jnp.float32) / heads


def init_gat_layer(key, in_dim, edge_dim, heads, ch, concat):
    ks = jax.random.split(key, 4)
    hc = heads * ch
    att = glorot(ks[3], (heads, ch))
    p = {
        "w_l": glorot(ks[0], (in_dim, hc)),
        "b_l": jnp.zeros((1, hc), jnp.float32),
        "w_r": glorot(ks[1], (in_dim, hc)),
        "b_r": jnp.zeros((1, hc), jnp.float32),
        "w_e": glorot(ks[2], (edge_dim, hc)),
        "att_exp": build_att_expand(att, heads, ch),
        "bias": jnp.zeros((1, hc if concat else ch), jnp.float32),
    }
    if not concat:
        p["head_mean"] = build_head_mean(heads, ch)
    return p


if __name__ == "__main__":
    key = jax.random.PRNGKey(0)
    k_x, k_e, k_ea, kp = jax.random.split(key, 4)

    x = jax.random.normal(k_x, (N_NODES, NODE_DIM), jnp.float32)
    src = jax.random.randint(k_e, (N_EDGES,), 0, N_NODES)
    off = jax.random.randint(jax.random.fold_in(k_e, 1), (N_EDGES,), 0, N_NODES - 1)
    dst = (src + 1 + off) % N_NODES                       # no self-loops in raw edges
    edge_attr = jax.random.normal(k_ea, (N_EDGES, EDGE_DIM), jnp.float32)

    # Densify graph (glue): adjacency + dense edge attrs, add self-loops with
    # fill_value='mean' (mean of incoming edge attrs per destination node).
    adj = jnp.zeros((N_NODES, N_NODES), jnp.float32).at[dst, src].set(1.0)
    sums = jnp.zeros((N_NODES, EDGE_DIM), jnp.float32).at[dst].add(edge_attr)
    cnt = jnp.zeros((N_NODES,), jnp.float32).at[dst].add(1.0)
    loop_attr = sums / jnp.maximum(cnt, 1.0)[:, None]
    e_dense = jnp.zeros((N_NODES, N_NODES, EDGE_DIM), jnp.float32).at[dst, src].set(edge_attr)
    diag = jnp.arange(N_NODES)
    e_dense = e_dense.at[diag, diag].set(loop_attr)
    adj = adj.at[diag, diag].set(1.0)
    adj3 = adj.reshape(N_NODES, N_NODES, 1)               # (dst, src, 1) mask for the kernel
    e2 = e_dense.reshape(N_NODES * N_NODES, EDGE_DIM)     # flattened (dst, src) rows

    ks = jax.random.split(kp, 8)
    cp_w2_core = glorot(ks[5], (HIDDEN // 2, 3))
    params = {
        "conv1": init_gat_layer(ks[0], NODE_DIM, EDGE_DIM, 8, HIDDEN, True),
        "conv2": init_gat_layer(ks[1], HIDDEN * 8, EDGE_DIM, 4, HIDDEN, False),
        "conv3": init_gat_layer(ks[2], HIDDEN, EDGE_DIM, 1, HIDDEN, True),
        "res_w": glorot(ks[3], (NODE_DIM, HIDDEN * 8)),
        "res_b": jnp.zeros((1, HIDDEN * 8), jnp.float32),
        "cp_w1": glorot(ks[4], (HIDDEN, HIDDEN // 2)),
        "cp_b1": jnp.zeros((1, HIDDEN // 2), jnp.float32),
        "cp_w2": jnp.zeros((HIDDEN // 2, OUT_PAD), jnp.float32).at[:, :3].set(cp_w2_core),
        "cp_b2": jnp.zeros((1, OUT_PAD), jnp.float32),
    }

    out = jax.block_until_ready(enhanced_gat_forward(params, x, adj3, e2))
    assert out.shape == (N_NODES, 3), out.shape
    assert bool(jnp.all(jnp.isfinite(out)))
    print("KERNEL_OK")
</pallas_src>

<mosaic_0001>
module attributes {stable_mosaic.version = 11 : i64} {
  func.func @_forward_kernel(%arg0: memref<16x16xf32, #tpu.memory_space<vmem>>, %arg1: memref<16x16x1xf32, #tpu.memory_space<vmem>>, %arg2: memref<256x8xf32, #tpu.memory_space<vmem>>, %arg3: memref<16x256xf32, #tpu.memory_space<vmem>>, %arg4: memref<1x256xf32, #tpu.memory_space<vmem>>, %arg5: memref<16x256xf32, #tpu.memory_space<vmem>>, %arg6: memref<1x256xf32, #tpu.memory_space<vmem>>, %arg7: memref<8x256xf32, #tpu.memory_space<vmem>>, %arg8: memref<256x256xf32, #tpu.memory_space<vmem>>, %arg9: memref<1x256xf32, #tpu.memory_space<vmem>>, %arg10: memref<16x256xf32, #tpu.memory_space<vmem>>, %arg11: memref<1x256xf32, #tpu.memory_space<vmem>>, %arg12: memref<256x128xf32, #tpu.memory_space<vmem>>, %arg13: memref<1x128xf32, #tpu.memory_space<vmem>>, %arg14: memref<256x128xf32, #tpu.memory_space<vmem>>, %arg15: memref<1x128xf32, #tpu.memory_space<vmem>>, %arg16: memref<8x128xf32, #tpu.memory_space<vmem>>, %arg17: memref<128x128xf32, #tpu.memory_space<vmem>>, %arg18: memref<1x32xf32, #tpu.memory_space<vmem>>, %arg19: memref<128x32xf32, #tpu.memory_space<vmem>>, %arg20: memref<32x32xf32, #tpu.memory_space<vmem>>, %arg21: memref<1x32xf32, #tpu.memory_space<vmem>>, %arg22: memref<32x32xf32, #tpu.memory_space<vmem>>, %arg23: memref<1x32xf32, #tpu.memory_space<vmem>>, %arg24: memref<8x32xf32, #tpu.memory_space<vmem>>, %arg25: memref<32x32xf32, #tpu.memory_space<vmem>>, %arg26: memref<1x32xf32, #tpu.memory_space<vmem>>, %arg27: memref<32x16xf32, #tpu.memory_space<vmem>>, %arg28: memref<1x16xf32, #tpu.memory_space<vmem>>, %arg29: memref<16x128xf32, #tpu.memory_space<vmem>>, %arg30: memref<1x128xf32, #tpu.memory_space<vmem>>, %arg31: memref<16x128xf32, #tpu.memory_space<vmem>>) attributes {dimension_semantics = [], scalar_prefetch = 0 : i64, scratch_operands = 0 : i64, tpu.core_type = #tpu.core_type<tc>} {
    %c0 = arith.constant 0 : index
    %c0_0 = arith.constant 0 : index
    %0 = vector.load %arg0[%c0, %c0_0] : memref<16x16xf32, #tpu.memory_space<vmem>>, vector<16x16xf32>
    %c0_1 = arith.constant 0 : index
    %c0_2 = arith.constant 0 : index
    %1 = vector.load %arg2[%c0_1, %c0_2] : memref<256x8xf32, #tpu.memory_space<vmem>>, vector<256x8xf32>
    %c0_3 = arith.constant 0 : index
    %c0_4 = arith.constant 0 : index
    %c0_5 = arith.constant 0 : index
    %2 = vector.load %arg1[%c0_3, %c0_4, %c0_5] : memref<16x16x1xf32, #tpu.memory_space<vmem>>, vector<16x16x1xf32>
    %cst = arith.constant 1.000000e+00 : f32
    %3 = vector.broadcast %cst : f32 to vector<16x16x1xf32>
    %4 = arith.subf %2, %3 : vector<16x16x1xf32>
    %cst_6 = arith.constant 1.000000e+30 : f32
    %5 = vector.broadcast %cst_6 : f32 to vector<16x16x1xf32>
    %6 = arith.mulf %4, %5 : vector<16x16x1xf32>
    %c0_7 = arith.constant 0 : index
    %c0_8 = arith.constant 0 : index
    %7 = vector.load %arg3[%c0_7, %c0_8] : memref<16x256xf32, #tpu.memory_space<vmem>>, vector<16x256xf32>
    %c0_9 = arith.constant 0 : index
    %c0_10 = arith.constant 0 : index
    %8 = vector.load %arg4[%c0_9, %c0_10] : memref<1x256xf32, #tpu.memory_space<vmem>>, vector<1x256xf32>
    %c0_11 = arith.constant 0 : index
    %c0_12 = arith.constant 0 : index
    %9 = vector.load %arg5[%c0_11, %c0_12] : memref<16x256xf32, #tpu.memory_space<vmem>>, vector<16x256xf32>
    %c0_13 = arith.constant 0 : index
    %c0_14 = arith.constant 0 : index
    %10 = vector.load %arg6[%c0_13, %c0_14] : memref<1x256xf32, #tpu.memory_space<vmem>>, vector<1x256xf32>
    %c0_15 = arith.constant 0 : index
    %c0_16 = arith.constant 0 : index
    %11 = vector.load %arg7[%c0_15, %c0_16] : memref<8x256xf32, #tpu.memory_space<vmem>>, vector<8x256xf32>
    %c0_17 = arith.constant 0 : index
    %c0_18 = arith.constant 0 : index
    %12 = vector.load %arg8[%c0_17, %c0_18] : memref<256x256xf32, #tpu.memory_space<vmem>>, vector<256x256xf32>
    %c0_19 = arith.constant 0 : index
    %c0_20 = arith.constant 0 : index
    %13 = vector.load %arg9[%c0_19, %c0_20] : memref<1x256xf32, #tpu.memory_space<vmem>>, vector<1x256xf32>
    %cst_21 = arith.constant dense<0.000000e+00> : vector<16x256xf32>
    %14 = tpu.matmul %0, %7, %cst_21 {dimension_numbers = #tpu.dot_dimension_numbers<[1], [0], [0], [1], [0, 0, 1, 1], [], []>} : vector<16x16xf32>, vector<16x256xf32>, vector<16x256xf32> -> vector<16x256xf32>
    %15 = vector.broadcast %8 : vector<1x256xf32> to vector<16x256xf32>
    %16 = arith.addf %14, %15 : vector<16x256xf32>
    %cst_22 = arith.constant dense<0.000000e+00> : vector<16x256xf32>
    %17 = tpu.matmul %0, %9, %cst_22 {dimension_numbers = #tpu.dot_dimension_numbers<[1], [0], [0], [1], [0, 0, 1, 1], [], []>} : vector<16x16xf32>, vector<16x256xf32>, vector<16x256xf32> -> vector<16x256xf32>
    %18 = vector.broadcast %10 : vector<1x256xf32> to vector<16x256xf32>
    %19 = arith.addf %17, %18 : vector<16x256xf32>
    %cst_23 = arith.constant dense<0.000000e+00> : vector<256x256xf32>
    %20 = tpu.matmul %1, %11, %cst_23 {dimension_numbers = #tpu.dot_dimension_numbers<[1], [0], [0], [1], [0, 0, 1, 1], [], []>} : vector<256x8xf32>, vector<8x256xf32>, vector<256x256xf32> -> vector<256x256xf32>
    %21 = vector.shape_cast %19 : vector<16x256xf32> to vector<16x1x256xf32>
    %22 = vector.shape_cast %16 : vector<16x256xf32> to vector<1x16x256xf32>
    %23 = vector.broadcast %21 : vector<16x1x256xf32> to vector<16x16x256xf32>
    %24 = vector.broadcast %22 : vector<1x16x256xf32> to vector<16x16x256xf32>
    %25 = arith.addf %23, %24 : vector<16x16x256xf32>
    %26 = vector.shape_cast %20 : vector<256x256xf32> to vector<16x16x256xf32>
    %27 = arith.addf %25, %26 : vector<16x16x256xf32>
    %cst_24 = arith.constant 0.000000e+00 : f32
    %28 = vector.broadcast %cst_24 : f32 to vector<16x16x256xf32>
    %29 = arith.cmpf ogt, %27, %28 : vector<16x16x256xf32>
    %cst_25 = arith.constant 2.000000e-01 : f32
    %30 = vector.broadcast %cst_25 : f32 to vector<16x16x256xf32>
    %31 = arith.mulf %30, %27 : vector<16x16x256xf32>
    %32 = arith.select %29, %27, %31 : vector<16x16x256xi1>, vector<16x16x256xf32>
    %33 = vector.shape_cast %32 : vector<16x16x256xf32> to vector<256x256xf32>
    %cst_26 = arith.constant dense<0.000000e+00> : vector<256x256xf32>
    %34 = tpu.matmul %33, %12, %cst_26 {dimension_numbers = #tpu.dot_dimension_numbers<[1], [0], [0], [1], [0, 0, 1, 1], [], []>} : vector<256x256xf32>, vector<256x256xf32>, vector<256x256xf32> -> vector<256x256xf32>
    %35 = vector.shape_cast %34 : vector<256x256xf32> to vector<16x16x256xf32>
    %36 = vector.broadcast %6 : vector<16x16x1xf32> to vector<16x16x256xf32>
    %37 = arith.addf %35, %36 : vector<16x16x256xf32>
    %cst_27 = arith.constant dense<0xFF800000> : vector<16x256xf32>
    %38 = vector.multi_reduction <maximumf>, %37, %cst_27 [1] : vector<16x16x256xf32> to vector<16x256xf32>
    %39 = vector.shape_cast %38 : vector<16x256xf32> to vector<16x1x256xf32>
    %40 = vector.broadcast %39 : vector<16x1x256xf32> to vector<16x16x256xf32>
    %41 = arith.subf %37, %40 : vector<16x16x256xf32>
    %42 = math.exp %41 : vector<16x16x256xf32>
    %43 = vector.broadcast %2 : vector<16x16x1xf32> to vector<16x16x256xf32>
    %44 = arith.mulf %42, %43 : vector<16x16x256xf32>
    %cst_28 = arith.constant dense<0.000000e+00> : vector<16x256xf32>
    %45 = vector.multi_reduction <add>, %44, %cst_28 [1] : vector<16x16x256xf32> to vector<16x256xf32>
    %cst_29 = arith.constant 9.99999968E-21 : f32
    %46 = vector.broadcast %cst_29 : f32 to vector<16x256xf32>
    %47 = arith.maximumf %45, %46 : vector<16x256xf32>
    %48 = tpu.reciprocal %47 {approx = true} : vector<16x256xf32> -> vector<16x256xf32>
    %49 = vector.shape_cast %16 : vector<16x256xf32> to vector<1x16x256xf32>
    %50 = vector.broadcast %49 : vector<1x16x256xf32> to vector<16x16x256xf32>
    %51 = arith.mulf %44, %50 : vector<16x16x256xf32>
    %cst_30 = arith.constant dense<0.000000e+00> : vector<16x256xf32>
    %52 = vector.multi_reduction <add>, %51, %cst_30 [1] : vector<16x16x256xf32> to vector<16x256xf32>
    %53 = arith.mulf %52, %48 : vector<16x256xf32>
    %54 = vector.broadcast %13 : vector<1x256xf32> to vector<16x256xf32>
    %55 = arith.addf %53, %54 : vector<16x256xf32>
    %c0_31 = arith.constant 0 : index
    %c0_32 = arith.constant 0 : index
    %56 = vector.load %arg10[%c0_31, %c0_32] : memref<16x256xf32, #tpu.memory_space<vmem>>, vector<16x256xf32>
    %cst_33 = arith.constant dense<0.000000e+00> : vector<16x256xf32>
    %57 = tpu.matmul %0, %56, %cst_33 {dimension_numbers = #tpu.dot_dimension_numbers<[1], [0], [0], [1], [0, 0, 1, 1], [], []>} : vector<16x16xf32>, vector<16x256xf32>, vector<16x256xf32> -> vector<16x256xf32>
    %c0_34 = arith.constant 0 : index
    %c0_35 = arith.constant 0 : index
    %58 = vector.load %arg11[%c0_34, %c0_35] : memref<1x256xf32, #tpu.memory_space<vmem>>, vector<1x256xf32>
    %59 = vector.broadcast %58 : vector<1x256xf32> to vector<16x256xf32>
    %60 = arith.addf %57, %59 : vector<16x256xf32>
    %61 = arith.addf %55, %60 : vector<16x256xf32>
    %cst_36 = arith.constant 0.000000e+00 : f32
    %62 = vector.broadcast %cst_36 : f32 to vector<16x256xf32>
    %63 = arith.cmpf ogt, %61, %62 : vector<16x256xf32>
    %cst_37 = arith.constant 2.000000e-01 : f32
    %64 = vector.broadcast %cst_37 : f32 to vector<16x256xf32>
    %65 = arith.mulf %64, %61 : vector<16x256xf32>
    %66 = arith.select %63, %61, %65 : vector<16x256xi1>, vector<16x256xf32>
    %c0_38 = arith.constant 0 : index
    %c0_39 = arith.constant 0 : index
    %67 = vector.load %arg12[%c0_38, %c0_39] : memref<256x128xf32, #tpu.memory_space<vmem>>, vector<256x128xf32>
    %c0_40 = arith.constant 0 : index
    %c0_41 = arith.constant 0 : index
    %68 = vector.load %arg13[%c0_40, %c0_41] : memref<1x128xf32, #tpu.memory_space<vmem>>, vector<1x128xf32>
    %c0_42 = arith.constant 0 : index
    %c0_43 = arith.constant 0 : index
    %69 = vector.load %arg14[%c0_42, %c0_43] : memref<256x128xf32, #tpu.memory_space<vmem>>, vector<256x128xf32>
    %c0_44 = arith.constant 0 : index
    %c0_45 = arith.constant 0 : index
    %70 = vector.load %arg15[%c0_44, %c0_45] : memref<1x128xf32, #tpu.memory_space<vmem>>, vector<1x128xf32>
    %c0_46 = arith.constant 0 : index
    %c0_47 = arith.constant 0 : index
    %71 = vector.load %arg16[%c0_46, %c0_47] : memref<8x128xf32, #tpu.memory_space<vmem>>, vector<8x128xf32>
    %c0_48 = arith.constant 0 : index
    %c0_49 = arith.constant 0 : index
    %72 = vector.load %arg17[%c0_48, %c0_49] : memref<128x128xf32, #tpu.memory_space<vmem>>, vector<128x128xf32>
    %c0_50 = arith.constant 0 : index
    %c0_51 = arith.constant 0 : index
    %73 = vector.load %arg18[%c0_50, %c0_51] : memref<1x32xf32, #tpu.memory_space<vmem>>, vector<1x32xf32>
    %c0_52 = arith.constant 0 : index
    %c0_53 = arith.constant 0 : index
    %74 = vector.load %arg19[%c0_52, %c0_53] : memref<128x32xf32, #tpu.memory_space<vmem>>, vector<128x32xf32>
    %cst_54 = arith.constant dense<0.000000e+00> : vector<16x128xf32>
    %75 = tpu.matmul %66, %67, %cst_54 {dimension_numbers = #tpu.dot_dimension_numbers<[1], [0], [0], [1], [0, 0, 1, 1], [], []>} : vector<16x256xf32>, vector<256x128xf32>, vector<16x128xf32> -> vector<16x128xf32>
    %76 = vector.broadcast %68 : vector<1x128xf32> to vector<16x128xf32>
    %77 = arith.addf %75, %76 : vector<16x128xf32>
    %cst_55 = arith.constant dense<0.000000e+00> : vector<16x128xf32>
    %78 = tpu.matmul %66, %69, %cst_55 {dimension_numbers = #tpu.dot_dimension_numbers<[1], [0], [0], [1], [0, 0, 1, 1], [], []>} : vector<16x256xf32>, vector<256x128xf32>, vector<16x128xf32> -> vector<16x128xf32>
    %79 = vector.broadcast %70 : vector<1x128xf32> to vector<16x128xf32>
    %80 = arith.addf %78, %79 : vector<16x128xf32>
    %cst_56 = arith.constant dense<0.000000e+00> : vector<256x128xf32>
    %81 = tpu.matmul %1, %71, %cst_56 {dimension_numbers = #tpu.dot_dimension_numbers<[1], [0], [0], [1], [0, 0, 1, 1], [], []>} : vector<256x8xf32>, vector<8x128xf32>, vector<256x128xf32> -> vector<256x128xf32>
    %82 = vector.shape_cast %80 : vector<16x128xf32> to vector<16x1x128xf32>
    %83 = vector.shape_cast %77 : vector<16x128xf32> to vector<1x16x128xf32>
    %84 = vector.broadcast %82 : vector<16x1x128xf32> to vector<16x16x128xf32>
    %85 = vector.broadcast %83 : vector<1x16x128xf32> to vector<16x16x128xf32>
    %86 = arith.addf %84, %85 : vector<16x16x128xf32>
    %87 = vector.shape_cast %81 : vector<256x128xf32> to vector<16x16x128xf32>
    %88 = arith.addf %86, %87 : vector<16x16x128xf32>
    %cst_57 = arith.constant 0.000000e+00 : f32
    %89 = vector.broadcast %cst_57 : f32 to vector<16x16x128xf32>
    %90 = arith.cmpf ogt, %88, %89 : vector<16x16x128xf32>
    %cst_58 = arith.constant 2.000000e-01 : f32
    %91 = vector.broadcast %cst_58 : f32 to vector<16x16x128xf32>
    %92 = arith.mulf %91, %88 : vector<16x16x128xf32>
    %93 = arith.select %90, %88, %92 : vector<16x16x128xi1>, vector<16x16x128xf32>
    %94 = vector.shape_cast %93 : vector<16x16x128xf32> to vector<256x128xf32>
    %cst_59 = arith.constant dense<0.000000e+00> : vector<256x128xf32>
    %95 = tpu.matmul %94, %72, %cst_59 {dimension_numbers = #tpu.dot_dimension_numbers<[1], [0], [0], [1], [0, 0, 1, 1], [], []>} : vector<256x128xf32>, vector<128x128xf32>, vector<256x128xf32> -> vector<256x128xf32>
    %96 = vector.shape_cast %95 : vector<256x128xf32> to vector<16x16x128xf32>
    %97 = vector.broadcast %6 : vector<16x16x1xf32> to vector<16x16x128xf32>
    %98 = arith.addf %96, %97 : vector<16x16x128xf32>
    %cst_60 = arith.constant dense<0xFF800000> : vector<16x128xf32>
    %99 = vector.multi_reduction <maximumf>, %98, %cst_60 [1] : vector<16x16x128xf32> to vector<16x128xf32>
    %100 = vector.shape_cast %99 : vector<16x128xf32> to vector<16x1x128xf32>
    %101 = vector.broadcast %100 : vector<16x1x128xf32> to vector<16x16x128xf32>
    %102 = arith.subf %98, %101 : vector<16x16x128xf32>
    %103 = math.exp %102 : vector<16x16x128xf32>
    %104 = vector.broadcast %2 : vector<16x16x1xf32> to vector<16x16x128xf32>
    %105 = arith.mulf %103, %104 : vector<16x16x128xf32>
    %cst_61 = arith.constant dense<0.000000e+00> : vector<16x128xf32>
    %106 = vector.multi_reduction <add>, %105, %cst_61 [1] : vector<16x16x128xf32> to vector<16x128xf32>
    %cst_62 = arith.constant 9.99999968E-21 : f32
    %107 = vector.broadcast %cst_62 : f32 to vector<16x128xf32>
    %108 = arith.maximumf %106, %107 : vector<16x128xf32>
    %109 = tpu.reciprocal %108 {approx = true} : vector<16x128xf32> -> vector<16x128xf32>
    %110 = vector.shape_cast %77 : vector<16x128xf32> to vector<1x16x128xf32>
    %111 = vector.broadcast %110 : vector<1x16x128xf32> to vector<16x16x128xf32>
    %112 = arith.mulf %105, %111 : vector<16x16x128xf32>
    %cst_63 = arith.constant dense<0.000000e+00> : vector<16x128xf32>
    %113 = vector.multi_reduction <add>, %112, %cst_63 [1] : vector<16x16x128xf32> to vector<16x128xf32>
    %114 = arith.mulf %113, %109 : vector<16x128xf32>
    %cst_64 = arith.constant dense<0.000000e+00> : vector<16x32xf32>
    %115 = tpu.matmul %114, %74, %cst_64 {dimension_numbers = #tpu.dot_dimension_numbers<[1], [0], [0], [1], [0, 0, 1, 1], [], []>} : vector<16x128xf32>, vector<128x32xf32>, vector<16x32xf32> -> vector<16x32xf32>
    %116 = vector.broadcast %73 : vector<1x32xf32> to vector<16x32xf32>
    %117 = arith.addf %115, %116 : vector<16x32xf32>
    %cst_65 = arith.constant 0.000000e+00 : f32
    %118 = vector.broadcast %cst_65 : f32 to vector<16x32xf32>
    %119 = arith.cmpf ogt, %117, %118 : vector<16x32xf32>
    %cst_66 = arith.constant 0.000000e+00 : f32
    %120 = vector.broadcast %cst_66 : f32 to vector<16x32xf32>
    %121 = arith.minimumf %117, %120 : vector<16x32xf32>
    %122 = math.exp %121 : vector<16x32xf32>
    %cst_67 = arith.constant 1.000000e+00 : f32
    %123 = vector.broadcast %cst_67 : f32 to vector<16x32xf32>
    %124 = arith.subf %122, %123 : vector<16x32xf32>
    %125 = arith.select %119, %117, %124 : vector<16x32xi1>, vector<16x32xf32>
    %c0_68 = arith.constant 0 : index
    %c0_69 = arith.constant 0 : index
    %126 = vector.load %arg20[%c0_68, %c0_69] : memref<32x32xf32, #tpu.memory_space<vmem>>, vector<32x32xf32>
    %c0_70 = arith.constant 0 : index
    %c0_71 = arith.constant 0 : index
    %127 = vector.load %arg21[%c0_70, %c0_71] : memref<1x32xf32, #tpu.memory_space<vmem>>, vector<1x32xf32>
    %c0_72 = arith.constant 0 : index
    %c0_73 = arith.constant 0 : index
    %128 = vector.load %arg22[%c0_72, %c0_73] : memref<32x32xf32, #tpu.memory_space<vmem>>, vector<32x32xf32>
    %c0_74 = arith.constant 0 : index
    %c0_75 = arith.constant 0 : index
    %129 = vector.load %arg23[%c0_74, %c0_75] : memref<1x32xf32, #tpu.memory_space<vmem>>, vector<1x32xf32>
    %c0_76 = arith.constant 0 : index
    %c0_77 = arith.constant 0 : index
    %130 = vector.load %arg24[%c0_76, %c0_77] : memref<8x32xf32, #tpu.memory_space<vmem>>, vector<8x32xf32>
    %c0_78 = arith.constant 0 : index
    %c0_79 = arith.constant 0 : index
    %131 = vector.load %arg25[%c0_78, %c0_79] : memref<32x32xf32, #tpu.memory_space<vmem>>, vector<32x32xf32>
    %c0_80 = arith.constant 0 : index
    %c0_81 = arith.constant 0 : index
    %132 = vector.load %arg26[%c0_80, %c0_81] : memref<1x32xf32, #tpu.memory_space<vmem>>, vector<1x32xf32>
    %cst_82 = arith.constant dense<0.000000e+00> : vector<16x32xf32>
    %133 = tpu.matmul %125, %126, %cst_82 {dimension_numbers = #tpu.dot_dimension_numbers<[1], [0], [0], [1], [0, 0, 1, 1], [], []>} : vector<16x32xf32>, vector<32x32xf32>, vector<16x32xf32> -> vector<16x32xf32>
    %134 = vector.broadcast %127 : vector<1x32xf32> to vector<16x32xf32>
    %135 = arith.addf %133, %134 : vector<16x32xf32>
    %cst_83 = arith.constant dense<0.000000e+00> : vector<16x32xf32>
    %136 = tpu.matmul %125, %128, %cst_83 {dimension_numbers = #tpu.dot_dimension_numbers<[1], [0], [0], [1], [0, 0, 1, 1], [], []>} : vector<16x32xf32>, vector<32x32xf32>, vector<16x32xf32> -> vector<16x32xf32>
    %137 = vector.broadcast %129 : vector<1x32xf32> to vector<16x32xf32>
    %138 = arith.addf %136, %137 : vector<16x32xf32>
    %cst_84 = arith.constant dense<0.000000e+00> : vector<256x32xf32>
    %139 = tpu.matmul %1, %130, %cst_84 {dimension_numbers = #tpu.dot_dimension_numbers<[1], [0], [0], [1], [0, 0, 1, 1], [], []>} : vector<256x8xf32>, vector<8x32xf32>, vector<256x32xf32> -> vector<256x32xf32>
    %140 = vector.shape_cast %138 : vector<16x32xf32> to vector<16x1x32xf32>
    %141 = vector.shape_cast %135 : vector<16x32xf32> to vector<1x16x32xf32>
    %142 = vector.broadcast %140 : vector<16x1x32xf32> to vector<16x16x32xf32>
    %143 = vector.broadcast %141 : vector<1x16x32xf32> to vector<16x16x32xf32>
    %144 = arith.addf %142, %143 : vector<16x16x32xf32>
    %145 = vector.shape_cast %139 : vector<256x32xf32> to vector<16x16x32xf32>
    %146 = arith.addf %144, %145 : vector<16x16x32xf32>
    %cst_85 = arith.constant 0.000000e+00 : f32
    %147 = vector.broadcast %cst_85 : f32 to vector<16x16x32xf32>
    %148 = arith.cmpf ogt, %146, %147 : vector<16x16x32xf32>
    %cst_86 = arith.constant 2.000000e-01 : f32
    %149 = vector.broadcast %cst_86 : f32 to vector<16x16x32xf32>
    %150 = arith.mulf %149, %146 : vector<16x16x32xf32>
    %151 = arith.select %148, %146, %150 : vector<16x16x32xi1>, vector<16x16x32xf32>
    %152 = vector.shape_cast %151 : vector<16x16x32xf32> to vector<256x32xf32>
    %cst_87 = arith.constant dense<0.000000e+00> : vector<256x32xf32>
    %153 = tpu.matmul %152, %131, %cst_87 {dimension_numbers = #tpu.dot_dimension_numbers<[1], [0], [0], [1], [0, 0, 1, 1], [], []>} : vector<256x32xf32>, vector<32x32xf32>, vector<256x32xf32> -> vector<256x32xf32>
    %154 = vector.shape_cast %153 : vector<256x32xf32> to vector<16x16x32xf32>
    %155 = vector.broadcast %6 : vector<16x16x1xf32> to vector<16x16x32xf32>
    %156 = arith.addf %154, %155 : vector<16x16x32xf32>
    %cst_88 = arith.constant dense<0xFF800000> : vector<16x32xf32>
    %157 = vector.multi_reduction <maximumf>, %156, %cst_88 [1] : vector<16x16x32xf32> to vector<16x32xf32>
    %158 = vector.shape_cast %157 : vector<16x32xf32> to vector<16x1x32xf32>
    %159 = vector.broadcast %158 : vector<16x1x32xf32> to vector<16x16x32xf32>
    %160 = arith.subf %156, %159 : vector<16x16x32xf32>
    %161 = math.exp %160 : vector<16x16x32xf32>
    %162 = vector.broadcast %2 : vector<16x16x1xf32> to vector<16x16x32xf32>
    %163 = arith.mulf %161, %162 : vector<16x16x32xf32>
    %cst_89 = arith.constant dense<0.000000e+00> : vector<16x32xf32>
    %164 = vector.multi_reduction <add>, %163, %cst_89 [1] : vector<16x16x32xf32> to vector<16x32xf32>
    %cst_90 = arith.constant 9.99999968E-21 : f32
    %165 = vector.broadcast %cst_90 : f32 to vector<16x32xf32>
    %166 = arith.maximumf %164, %165 : vector<16x32xf32>
    %167 = tpu.reciprocal %166 {approx = true} : vector<16x32xf32> -> vector<16x32xf32>
    %168 = vector.shape_cast %135 : vector<16x32xf32> to vector<1x16x32xf32>
    %169 = vector.broadcast %168 : vector<1x16x32xf32> to vector<16x16x32xf32>
    %170 = arith.mulf %163, %169 : vector<16x16x32xf32>
    %cst_91 = arith.constant dense<0.000000e+00> : vector<16x32xf32>
    %171 = vector.multi_reduction <add>, %170, %cst_91 [1] : vector<16x16x32xf32> to vector<16x32xf32>
    %172 = arith.mulf %171, %167 : vector<16x32xf32>
    %173 = vector.broadcast %132 : vector<1x32xf32> to vector<16x32xf32>
    %174 = arith.addf %172, %173 : vector<16x32xf32>
    %cst_92 = arith.constant 0.000000e+00 : f32
    %175 = vector.broadcast %cst_92 : f32 to vector<16x32xf32>
    %176 = arith.cmpf ogt, %174, %175 : vector<16x32xf32>
    %cst_93 = arith.constant 0.000000e+00 : f32
    %177 = vector.broadcast %cst_93 : f32 to vector<16x32xf32>
    %178 = arith.minimumf %174, %177 : vector<16x32xf32>
    %179 = math.exp %178 : vector<16x32xf32>
    %cst_94 = arith.constant 1.000000e+00 : f32
    %180 = vector.broadcast %cst_94 : f32 to vector<16x32xf32>
    %181 = arith.subf %179, %180 : vector<16x32xf32>
    %182 = arith.select %176, %174, %181 : vector<16x32xi1>, vector<16x32xf32>
    %c0_95 = arith.constant 0 : index
    %c0_96 = arith.constant 0 : index
    %183 = vector.load %arg27[%c0_95, %c0_96] : memref<32x16xf32, #tpu.memory_space<vmem>>, vector<32x16xf32>
    %cst_97 = arith.constant dense<0.000000e+00> : vector<16x16xf32>
    %184 = tpu.matmul %182, %183, %cst_97 {dimension_numbers = #tpu.dot_dimension_numbers<[1], [0], [0], [1], [0, 0, 1, 1], [], []>} : vector<16x32xf32>, vector<32x16xf32>, vector<16x16xf32> -> vector<16x16xf32>
    %c0_98 = arith.constant 0 : index
    %c0_99 = arith.constant 0 : index
    %185 = vector.load %arg28[%c0_98, %c0_99] : memref<1x16xf32, #tpu.memory_space<vmem>>, vector<1x16xf32>
    %186 = vector.broadcast %185 : vector<1x16xf32> to vector<16x16xf32>
    %187 = arith.addf %184, %186 : vector<16x16xf32>
    %cst_100 = arith.constant 0.000000e+00 : f32
    %188 = vector.broadcast %cst_100 : f32 to vector<16x16xf32>
    %189 = arith.cmpf ogt, %187, %188 : vector<16x16xf32>
    %cst_101 = arith.constant 0.000000e+00 : f32
    %190 = vector.broadcast %cst_101 : f32 to vector<16x16xf32>
    %191 = arith.minimumf %187, %190 : vector<16x16xf32>
    %192 = math.exp %191 : vector<16x16xf32>
    %cst_102 = arith.constant 1.000000e+00 : f32
    %193 = vector.broadcast %cst_102 : f32 to vector<16x16xf32>
    %194 = arith.subf %192, %193 : vector<16x16xf32>
    %195 = arith.select %189, %187, %194 : vector<16x16xi1>, vector<16x16xf32>
    %c0_103 = arith.constant 0 : index
    %c0_104 = arith.constant 0 : index
    %196 = vector.load %arg29[%c0_103, %c0_104] : memref<16x128xf32, #tpu.memory_space<vmem>>, vector<16x128xf32>
    %cst_105 = arith.constant dense<0.000000e+00> : vector<16x128xf32>
    %197 = tpu.matmul %195, %196, %cst_105 {dimension_numbers = #tpu.dot_dimension_numbers<[1], [0], [0], [1], [0, 0, 1, 1], [], []>} : vector<16x16xf32>, vector<16x128xf32>, vector<16x128xf32> -> vector<16x128xf32>
    %c0_106 = arith.constant 0 : index
    %c0_107 = arith.constant 0 : index
    %198 = vector.load %arg30[%c0_106, %c0_107] : memref<1x128xf32, #tpu.memory_space<vmem>>, vector<1x128xf32>
    %199 = vector.broadcast %198 : vector<1x128xf32> to vector<16x128xf32>
    %200 = arith.addf %197, %199 : vector<16x128xf32>
    %c0_108 = arith.constant 0 : index
    %c0_109 = arith.constant 0 : index
    %201 = vector.load %arg31[%c0_108, %c0_109] : memref<16x128xf32, #tpu.memory_space<vmem>>, vector<16x128xf32>
    tpu.vector_store %arg31[%c0_108, %c0_109], %200 {strides = array<i32>} : memref<16x128xf32, #tpu.memory_space<vmem>>, vector<16x128xf32>,
    return
  }
}

</mosaic_0001>

<bundles_post_ra>
// kernel: tpu_custom_call.1
= control target key start
LH: loop header
LB: loop body
LE: loop exit
PB: predicated region body
PF: predicated region fallthrough
CT: control target
= control target key end

     0   :  { %s10271_s6 = smov 1   ;;  %s10272_s10 = smov 2   ;;  %s13486_s0 = inlined_call_operand.smem [shape: u32[32], index: -1, kind: input, shape index: {}] }
   0x1   :  { %s10349_s5 = sld [smem:[%s13486_s0]]   ;;  %s10273_s14 = smov 3  }
   0x2   :  { %s10354_s9 = sld [smem:[%s13486_s0 + %s10271_s6]]   ;;  %s10274_s18 = smov 4  }
   0x3   :  { %s10359_s13 = sld [smem:[%s13486_s0 + %s10272_s10]]   ;;  %s10275_s22 = smov 5  }
   0x4   :  { %s10364_s17 = sld [smem:[%s13486_s0 + %s10273_s14]]   ;;  %s10276_s26 = smov 6  }
   0x5   :  { %s10369_s21 = sld [smem:[%s13486_s0 + %s10274_s18]]   ;;  %s10277_s30 = smov 7  }
   0x6   :  { %s10374_s25 = sld [smem:[%s13486_s0 + %s10275_s22]]   ;;  %s10278_s4 = smov 8  }
   0x7   :  { %13651 = sst [smem:[#allocation68_spill]] %s10349_s5  ;;  %s10279_s10 = smov 9  }
   0x8   :  { %s10379_s29 = sld [smem:[%s13486_s0 + %s10276_s26]]   ;;  %s10280_s15 = smov 10  }
   0x9   :  { %13652 = sst [smem:[#allocation69_spill]] %s10359_s13  ;;  %s10281_s20 = smov 11  }
   0xa   :  { %s10384_s3 = sld [smem:[%s13486_s0 + %s10277_s30]]   ;;  %s10282_s26 = smov 12  }
   0xb   :  { %13653 = sst [smem:[#allocation70_spill]] %s10369_s21  ;;  %s10283_s1 = smov 13  }
   0xc   :  { %s10389_s8 = sld [smem:[%s13486_s0 + %s10278_s4]]   ;;  %s10284_s7 = smov 14  }
   0xd   :  { %s10394_s14 = sld [smem:[%s13486_s0 + %s10279_s10]]   ;;  %s10286_s22 = smov 16  }
   0xe   :  { %13654 = sst [smem:[#allocation71_spill]] %s10379_s29  ;;  %s10287_s28 = smov 17  }
   0xf   :  { %s10399_s19 = sld [smem:[%s13486_s0 + %s10280_s15]]   ;;  %s10285_s15 = smov 15  }
  0x10   :  { %s10404_s24 = sld [smem:[%s13486_s0 + %s10281_s20]]  }
  0x11   :  { %s10409_s30 = sld [smem:[%s13486_s0 + %s10282_s26]]  }
  0x12   :  { %13655 = sst [smem:[#allocation72_spill]] %s10389_s8 }
  0x13   :  { %s10414_s6 = sld [smem:[%s13486_s0 + %s10283_s1]]  }
  0x14   :  { %s10419_s12 = sld [smem:[%s13486_s0 + %s10284_s7]]   ;;  %s10288_s7 = smov 18  }
  0x15   :  { %13656 = sst [smem:[#allocation73_spill]] %s10399_s19 }
  0x16   :  { %s10424_s20 = sld [smem:[%s13486_s0 + %s10285_s15]]   ;;  %s10289_s15 = smov 19  }
  0x17   :  { %13657 = sst [smem:[#allocation74_spill]] %s10409_s30 }
  0x18   :  { %s10429_s27 = sld [smem:[%s13486_s0 + %s10286_s22]]   ;;  %s10290_s22 = smov 20  }
  0x19   :  { %s10434_s4 = sld [smem:[%s13486_s0 + %s10287_s28]]   ;;  %s10291_s28 = smov 21  }
  0x1a   :  { %13658 = sst [smem:[#allocation75_spill]] %s10419_s12 }
  0x1b   :  { %s10439_s12 = sld [smem:[%s13486_s0 + %s10288_s7]]   ;;  %s10292_s7 = smov 22  }
  0x1c   :  { %s10444_s30 = sld [smem:[%s13486_s0 + %s10289_s15]]   ;;  %s10293_s15 = smov 23  }
  0x1d   :  { %s10454_s19 = sld [smem:[%s13486_s0 + %s10291_s28]]   ;;  %s10295_s28 = smov 25  }
  0x1e   :  { %13659 = sst [smem:[#allocation76_spill]] %s10429_s27 }
  0x1f   :  { %s10449_s27 = sld [smem:[%s13486_s0 + %s10290_s22]]   ;;  %s10294_s22 = smov 24  }
  0x20   :  { %s10464_s8 = sld [smem:[%s13486_s0 + %s10293_s15]]   ;;  %s10297_s15 = smov 27  }
  0x21   :  { %13660 = sst [smem:[#allocation77_spill]] %s10439_s12 }
  0x22   :  { %s10459_s12 = sld [smem:[%s13486_s0 + %s10292_s7]]   ;;  %s10296_s7 = smov 26  }
  0x23   :  { %s10474_s29 = sld [smem:[%s13486_s0 + %s10295_s28]]   ;;  %s10299_s28 = smov 29  }
  0x24   :  { %s10484_s21 = sld [smem:[%s13486_s0 + %s10297_s15]]   ;;  %s10301_s15 = smov 31  }
  0x25   :  { %13661 = sst [smem:[#allocation78_spill]] %s10449_s27 }
  0x26   :  { %s10469_s27 = sld [smem:[%s13486_s0 + %s10294_s22]]   ;;  %s10298_s22 = smov 28  }
  0x27   :  { %s10494_s13 = sld [smem:[%s13486_s0 + %s10299_s28]]  }
  0x28   :  { %13662 = sst [smem:[#allocation79_spill]] %s10459_s12 }
  0x29   :  { %s10479_s12 = sld [smem:[%s13486_s0 + %s10296_s7]]   ;;  %s10300_s7 = smov 30  }
  0x2a   :  { %s10504_s5 = sld [smem:[%s13486_s0 + %s10301_s15]]  }
  0x2c   :  { %13663 = sst [smem:[#allocation80_spill]] %s10469_s27 }
  0x2d   :  { %s10489_s27 = sld [smem:[%s13486_s0 + %s10298_s22]]  }
  0x2f   :  { %13664 = sst [smem:[#allocation81_spill]] %s10479_s12 }
  0x30   :  { %s10499_s12 = sld [smem:[%s13486_s0 + %s10300_s7]]  }
  0x31   :  { %68 = vsyncpa [#allocation3], 0 }
  0x32   :  { %69 = vsyncpa [#allocation6], 0 }
  0x33   :  { %70 = vsyncpa [#allocation9], 0 }
  0x34   :  { %71 = vsyncpa [#allocation12], 0 }
  0x35   :  { %72 = vsyncpa [#allocation15], 0 }
  0x36   :  { %73 = vsyncpa [#allocation18], 0 }
  0x37   :  { %74 = vsyncpa [#allocation21], 0 }
  0x38   :  { %75 = vsyncpa [#allocation24], 0 }
  0x39   :  { %76 = vsyncpa [#allocation27], 0 }
  0x3a   :  { %77 = vsyncpa [#allocation30], 0 }
  0x3b   :  { %78 = vsyncpa [#allocation33], 0 }
  0x3c   :  { %79 = vsyncpa [#allocation36], 0 }
  0x3d   :  { %80 = vsyncpa [#allocation39], 0 }
  0x3e   :  { %81 = vsyncpa [#allocation42], 0 }
  0x3f   :  { %82 = vsyncpa [#allocation45], 0 }
  0x40   :  { %83 = vsyncpa [#allocation48], 0 }
  0x41   :  { %84 = vsyncpa [#allocation4], 0  ;;  %s10302_s0 = smov [#allocation5]   ;;  %s10303_s23 = smov [#allocation8]  }
  0x42   :  { %s102_s22 = sshll.u32 %s10302_s0, 4  ;;  %s126_s26 = sshll.u32 %s10303_s23, 4  ;;  %s103_s22 = int_to_ptr.vmem [resolvable:$true] %s102_s22  ;;  %s10506_s26 = int_to_ptr.vmem [resolvable:$true] %s126_s26 }
  0x43   :  { %s9533_s28 = scalar_lea.hbm %s10354_s9, 4096 }
  0x44   :  { %p9534_p0 = scmp.ne.s32.totalorder %s10354_s9, %s9533_s28  ;;  %p9537_p1 = scmp.lt.u32.totalorder %s9533_s28, %s10354_s9 }
  0x46   :  { %p9539_p2 = pnand %p9537_p1, %p9534_p0 }
  0x48   :  { %9542 = shalt.err (!%p9539_p2)
}
  0x49   :  { %s9543_s1 = scalar_lea.vmem %s103_s22, 4096  ;;  %p9548_p4 = scmp.lt.s32.totalorder %s103_s22, %s103_s22 }
  0x4a   :  { %p9544_p3 = scmp.ne.s32.totalorder %s103_s22, %s9543_s1  ;;  %p9549_p5 = scmp.lt.s32.totalorder %s9543_s1, %s9543_s1 }
  0x4c   :  { %p9550_p6 = por %p9549_p5, %p9548_p4 }
  0x4e   :  { %p9551_p7 = pnand %p9550_p6, %p9544_p3 }
  0x50   :  { %9554 = shalt.err (!%p9551_p7)
}
  0x51   :  { %s10304_s2 = smov 128   ;;  %s10305_s7 = smov 8  }
  0x52   :  { %108 = dma.hbm_to_vmem [thread:$0]  %s10354_s9, 4096, %s103_s22, [#allocation6], %s10304_s2, %s10304_s2, %s10305_s7  }
  0x53   :  { %s9555_s10 = scalar_lea.hbm %s10364_s17, 512 }
  0x54   :  { %p9556_p8 = scmp.ne.s32.totalorder %s10364_s17, %s9555_s10  ;;  %p9559_p9 = scmp.lt.u32.totalorder %s9555_s10, %s10364_s17 }
  0x56   :  { %p9561_p10 = pnand %p9559_p9, %p9556_p8 }
  0x58   :  { %9564 = shalt.err (!%p9561_p10)
}
  0x59   :  { %s9565_s11 = scalar_lea.vmem %s10506_s26, 512  ;;  %p9570_p12 = scmp.lt.s32.totalorder %s10506_s26, %s10506_s26 }
  0x5a   :  { %p9566_p11 = scmp.ne.s32.totalorder %s10506_s26, %s9565_s11  ;;  %p9571_p13 = scmp.lt.s32.totalorder %s9565_s11, %s9565_s11 }
  0x5c   :  { %p9572_p0 = por %p9571_p13, %p9570_p12 }
  0x5e   :  { %p9573_p1 = pnand %p9572_p0, %p9566_p11 }
  0x60   :  { %9576 = shalt.err (!%p9573_p1)
}
  0x61   :  { %s10306_s15 = smov 256   ;;  %s10307_s9 = smov 16  }
  0x62   :  { %132 = dma.hbm_to_vmem [thread:$0]  %s10364_s17, 512, %s10506_s26, [#allocation9], %s10306_s15, %s10306_s15, %s10307_s9  }
  0x63   :  { %s10308_s16 = smov [#allocation11]   ;;  %s10309_s0 = smov [#allocation14]  }
  0x64   :  { %s148_s18 = sshll.u32 %s10308_s16, 4  ;;  %s171_s22 = sshll.u32 %s10309_s0, 4  ;;  %s149_s18 = int_to_ptr.vmem [resolvable:$true] %s148_s18  ;;  %s172_s22 = int_to_ptr.vmem [resolvable:$true] %s171_s22 }
  0x65   :  { %s9577_s23 = scalar_lea.hbm %s10374_s25, 512 }
  0x66   :  { %p9578_p2 = scmp.ne.s32.totalorder %s10374_s25, %s9577_s23  ;;  %p9581_p3 = scmp.lt.u32.totalorder %s9577_s23, %s10374_s25 }
  0x68   :  { %p9583_p4 = pnand %p9581_p3, %p9578_p2 }
  0x6a   :  { %9586 = shalt.err (!%p9583_p4)
}
  0x6b   :  { %s9587_s28 = scalar_lea.vmem %s149_s18, 512  ;;  %p9592_p6 = scmp.lt.s32.totalorder %s149_s18, %s149_s18 }
  0x6c   :  { %p9588_p5 = scmp.ne.s32.totalorder %s149_s18, %s9587_s28  ;;  %p9593_p7 = scmp.lt.s32.totalorder %s9587_s28, %s9587_s28 }
  0x6e   :  { %p9594_p8 = por %p9593_p7, %p9592_p6 }
  0x70   :  { %p9595_p9 = pnand %p9594_p8, %p9588_p5 }
  0x72   :  { %9598 = shalt.err (!%p9595_p9)
}
  0x73   :  { %154 = dma.hbm_to_vmem [thread:$0]  %s10374_s25, 512, %s149_s18, [#allocation12], %s10306_s15, %s10306_s15, %s10307_s9  }
  0x74   :  { %s9599_s17 = scalar_lea.hbm %s10384_s3, 256 }
  0x75   :  { %p9600_p10 = scmp.ne.s32.totalorder %s10384_s3, %s9599_s17  ;;  %p9603_p11 = scmp.lt.u32.totalorder %s9599_s17, %s10384_s3 }
  0x77   :  { %p9605_p12 = pnand %p9603_p11, %p9600_p10 }
  0x79   :  { %9608 = shalt.err (!%p9605_p12)
}
  0x7a   :  { %s9609_s26 = scalar_lea.vmem %s172_s22, 256  ;;  %p9614_p0 = scmp.lt.s32.totalorder %s172_s22, %s172_s22 }
  0x7b   :  { %p9610_p13 = scmp.ne.s32.totalorder %s172_s22, %s9609_s26  ;;  %p9615_p1 = scmp.lt.s32.totalorder %s9609_s26, %s9609_s26 }
  0x7d   :  { %p9616_p2 = por %p9615_p1, %p9614_p0 }
  0x7f   :  { %p9617_p3 = pnand %p9616_p2, %p9610_p13 }
  0x81   :  { %9620 = shalt.err (!%p9617_p3)
}
  0x82   :  { %174 = dma.hbm_to_vmem [thread:$0]  %s10384_s3, 256, %s172_s22, [#allocation15]  }
  0x83   :  { %s10310_s1 = smov [#allocation17]   ;;  %s10311_s25 = smov [#allocation20]  }
  0x84   :  { %s193_s10 = sshll.u32 %s10310_s1, 4  ;;  %s215_s11 = sshll.u32 %s10311_s25, 4  ;;  %s194_s10 = int_to_ptr.vmem [resolvable:$true] %s193_s10  ;;  %s216_s11 = int_to_ptr.vmem [resolvable:$true] %s215_s11 }
  0x85   :  { %s9621_s16 = scalar_lea.hbm %s10394_s14, 32 }
  0x86   :  { %p9622_p4 = scmp.ne.s32.totalorder %s10394_s14, %s9621_s16  ;;  %p9625_p5 = scmp.lt.u32.totalorder %s9621_s16, %s10394_s14 }
  0x88   :  { %p9627_p6 = pnand %p9625_p5, %p9622_p4 }
  0x8a   :  { %9630 = shalt.err (!%p9627_p6)
}
  0x8b   :  { %s9631_s18 = scalar_lea.vmem %s194_s10, 32  ;;  %p9636_p8 = scmp.lt.s32.totalorder %s194_s10, %s194_s10 }
  0x8c   :  { %p9632_p7 = scmp.ne.s32.totalorder %s194_s10, %s9631_s18  ;;  %p9637_p9 = scmp.lt.s32.totalorder %s9631_s18, %s9631_s18 }
  0x8e   :  { %p9638_p10 = por %p9637_p9, %p9636_p8 }
  0x90   :  { %p9639_p11 = pnand %p9638_p10, %p9632_p7 }
  0x92   :  { %9642 = shalt.err (!%p9639_p11)
}
  0x93   :  { %196 = dma.hbm_to_vmem [thread:$0]  %s10394_s14, 32, %s194_s10, [#allocation18]  }
  0x94   :  { %s9643_s3 = scalar_lea.hbm %s10404_s24, 32 }
  0x95   :  { %p9644_p12 = scmp.ne.s32.totalorder %s10404_s24, %s9643_s3  ;;  %p9647_p13 = scmp.lt.u32.totalorder %s9643_s3, %s10404_s24 }
  0x97   :  { %p9649_p0 = pnand %p9647_p13, %p9644_p12 }
  0x99   :  { %9652 = shalt.err (!%p9649_p0)
}
  0x9a   :  { %s9653_s0 = scalar_lea.vmem %s216_s11, 32  ;;  %p9658_p2 = scmp.lt.s32.totalorder %s216_s11, %s216_s11 }
  0x9b   :  { %p9654_p1 = scmp.ne.s32.totalorder %s216_s11, %s9653_s0  ;;  %p9659_p3 = scmp.lt.s32.totalorder %s9653_s0, %s9653_s0 }
  0x9d   :  { %p9660_p4 = por %p9659_p3, %p9658_p2 }
  0x9f   :  { %p9661_p5 = pnand %p9660_p4, %p9654_p1 }
  0xa1   :  { %9664 = shalt.err (!%p9661_p5)
}
  0xa2   :  { %218 = dma.hbm_to_vmem [thread:$0]  %s10404_s24, 32, %s216_s11, [#allocation21]  }
  0xa3   :  { %s10312_s22 = smov [#allocation23]   ;;  %s10313_s14 = smov [#allocation26]  }
  0xa4   :  { %s237_s23 = sshll.u32 %s10312_s22, 4  ;;  %s259_s28 = sshll.u32 %s10313_s14, 4  ;;  %s238_s23 = int_to_ptr.vmem [resolvable:$true] %s237_s23  ;;  %s260_s28 = int_to_ptr.vmem [resolvable:$true] %s259_s28 }
  0xa5   :  { %s9665_s17 = scalar_lea.hbm %s10414_s6, 16 }
  0xa6   :  { %p9666_p6 = scmp.ne.s32.totalorder %s10414_s6, %s9665_s17  ;;  %p9669_p7 = scmp.lt.u32.totalorder %s9665_s17, %s10414_s6 }
  0xa8   :  { %p9671_p8 = pnand %p9669_p7, %p9666_p6 }
  0xaa   :  { %9674 = shalt.err (!%p9671_p8)
}
  0xab   :  { %s9675_s26 = scalar_lea.vmem %s238_s23, 16  ;;  %s9679_s1 = scalar_lea.vmem %s238_s23, 32 }
  0xac   :  { %p9676_p9 = scmp.ne.s32.totalorder %s238_s23, %s9675_s26  ;;  %p9680_p10 = scmp.lt.s32.totalorder %s238_s23, %s238_s23 }
  0xad   :  { %p9681_p11 = scmp.lt.s32.totalorder %s9679_s1, %s9675_s26 }
  0xaf   :  { %p9682_p12 = por %p9681_p11, %p9680_p10 }
  0xb1   :  { %p9683_p13 = pnand %p9682_p12, %p9676_p9 }
  0xb3   :  { %9686 = shalt.err (!%p9683_p13)
}
  0xb4   :  { %240 = dma.hbm_to_vmem [thread:$0]  %s10414_s6, 16, %s238_s23, [#allocation24]  }
  0xb5   :  { %s9687_s24 = scalar_lea.hbm %s10424_s20, 16 }
  0xb6   :  { %p9688_p0 = scmp.ne.s32.totalorder %s10424_s20, %s9687_s24  ;;  %p9691_p1 = scmp.lt.u32.totalorder %s9687_s24, %s10424_s20 }
  0xb8   :  { %p9693_p2 = pnand %p9691_p1, %p9688_p0 }
  0xba   :  { %9696 = shalt.err (!%p9693_p2)
}
  0xbb   :  { %s9697_s10 = scalar_lea.vmem %s260_s28, 16  ;;  %s9701_s25 = scalar_lea.vmem %s260_s28, 32 }
  0xbc   :  { %p9698_p3 = scmp.ne.s32.totalorder %s260_s28, %s9697_s10  ;;  %p9702_p4 = scmp.lt.s32.totalorder %s260_s28, %s260_s28 }
  0xbd   :  { %p9703_p5 = scmp.lt.s32.totalorder %s9701_s25, %s9697_s10 }
  0xbf   :  { %p9704_p6 = por %p9703_p5, %p9702_p4 }
  0xc1   :  { %p9705_p7 = pnand %p9704_p6, %p9698_p3 }
  0xc3   :  { %9708 = shalt.err (!%p9705_p7)
}
  0xc4   :  { %262 = dma.hbm_to_vmem [thread:$0]  %s10424_s20, 16, %s260_s28, [#allocation27]  }
  0xc5   :  { %s10314_s11 = smov [#allocation29]   ;;  %s10315_s16 = smov [#allocation32]  }
  0xc6   :  { %s278_s6 = sshll.u32 %s10314_s11, 4  ;;  %s300_s18 = sshll.u32 %s10315_s16, 4  ;;  %s279_s6 = int_to_ptr.vmem [resolvable:$true] %s278_s6  ;;  %s10554_s18 = int_to_ptr.vmem [resolvable:$true] %s300_s18 }
  0xc7   :  { %s9709_s3 = scalar_lea.hbm %s10434_s4, 2048 }
  0xc8   :  { %p9710_p8 = scmp.ne.s32.totalorder %s10434_s4, %s9709_s3  ;;  %p9713_p9 = scmp.lt.u32.totalorder %s9709_s3, %s10434_s4 }
  0xca   :  { %p9715_p10 = pnand %p9713_p9, %p9710_p8 }
  0xcc   :  { %9718 = shalt.err (!%p9715_p10)
}
  0xcd   :  { %s9719_s0 = scalar_lea.vmem %s279_s6, 2048  ;;  %p9724_p12 = scmp.lt.s32.totalorder %s279_s6, %s279_s6 }
  0xce   :  { %p9720_p11 = scmp.ne.s32.totalorder %s279_s6, %s9719_s0  ;;  %p9725_p13 = scmp.lt.s32.totalorder %s9719_s0, %s9719_s0 }
  0xd0   :  { %p9726_p0 = por %p9725_p13, %p9724_p12 }
  0xd2   :  { %p9727_p1 = pnand %p9726_p0, %p9720_p11 }
  0xd4   :  { %9730 = shalt.err (!%p9727_p1)
}
  0xd5   :  { %284 = dma.hbm_to_vmem [thread:$0]  %s10434_s4, 2048, %s279_s6, [#allocation30], %s10304_s2, %s10304_s2, %s10305_s7  }
  0xd6   :  { %s9731_s20 = scalar_lea.hbm %s10444_s30, 2048 }
  0xd7   :  { %p9732_p2 = scmp.ne.s32.totalorder %s10444_s30, %s9731_s20  ;;  %p9735_p3 = scmp.lt.u32.totalorder %s9731_s20, %s10444_s30 }
  0xd9   :  { %p9737_p4 = pnand %p9735_p3, %p9732_p2 }
  0xdb   :  { %9740 = shalt.err (!%p9737_p4)
}
  0xdc   :  { %s9741_s22 = scalar_lea.vmem %s10554_s18, 2048  ;;  %p9746_p6 = scmp.lt.s32.totalorder %s10554_s18, %s10554_s18 }
  0xdd   :  { %p9742_p5 = scmp.ne.s32.totalorder %s10554_s18, %s9741_s22  ;;  %p9747_p7 = scmp.lt.s32.totalorder %s9741_s22, %s9741_s22 }
  0xdf   :  { %p9748_p8 = por %p9747_p7, %p9746_p6 }
  0xe1   :  { %p9749_p9 = pnand %p9748_p8, %p9742_p5 }
  0xe3   :  { %9752 = shalt.err (!%p9749_p9)
}
  0xe4   :  { %306 = dma.hbm_to_vmem [thread:$0]  %s10444_s30, 2048, %s10554_s18, [#allocation33], %s10304_s2, %s10304_s2, %s10305_s7  }
  0xe5   :  { %s10316_s4 = smov [#allocation35]   ;;  %s10317_s14 = smov [#allocation38]  }
  0xe6   :  { %s325_s23 = sshll.u32 %s10316_s4, 4  ;;  %s347_s28 = sshll.u32 %s10317_s14, 4  ;;  %s326_s23 = int_to_ptr.vmem [resolvable:$true] %s325_s23  ;;  %s348_s28 = int_to_ptr.vmem [resolvable:$true] %s347_s28 }
  0xe7   :  { %s9753_s17 = scalar_lea.hbm %s10454_s19, 16 }
  0xe8   :  { %p9754_p10 = scmp.ne.s32.totalorder %s10454_s19, %s9753_s17  ;;  %p9757_p11 = scmp.lt.u32.totalorder %s9753_s17, %s10454_s19 }
  0xea   :  { %p9759_p12 = pnand %p9757_p11, %p9754_p10 }
  0xec   :  { %9762 = shalt.err (!%p9759_p12)
}
  0xed   :  { %s9763_s26 = scalar_lea.vmem %s326_s23, 16  ;;  %s9767_s1 = scalar_lea.vmem %s326_s23, 32 }
  0xee   :  { %p9764_p13 = scmp.ne.s32.totalorder %s326_s23, %s9763_s26  ;;  %p9768_p0 = scmp.lt.s32.totalorder %s326_s23, %s326_s23 }
  0xef   :  { %p9769_p1 = scmp.lt.s32.totalorder %s9767_s1, %s9763_s26 }
  0xf1   :  { %p9770_p2 = por %p9769_p1, %p9768_p0 }
  0xf3   :  { %p9771_p3 = pnand %p9770_p2, %p9764_p13 }
  0xf5   :  { %9774 = shalt.err (!%p9771_p3)
}
  0xf6   :  { %328 = dma.hbm_to_vmem [thread:$0]  %s10454_s19, 16, %s326_s23, [#allocation36]  }
  0xf7   :  { %s9775_s30 = scalar_lea.hbm %s10464_s8, 16 }
  0xf8   :  { %p9776_p4 = scmp.ne.s32.totalorder %s10464_s8, %s9775_s30  ;;  %p9779_p5 = scmp.lt.u32.totalorder %s9775_s30, %s10464_s8 }
  0xfa   :  { %p9781_p6 = pnand %p9779_p5, %p9776_p4 }
  0xfc   :  { %9784 = shalt.err (!%p9781_p6)
}
  0xfd   :  { %s9785_s24 = scalar_lea.vmem %s348_s28, 16  ;;  %s9789_s10 = scalar_lea.vmem %s348_s28, 32 }
  0xfe   :  { %p9786_p7 = scmp.ne.s32.totalorder %s348_s28, %s9785_s24  ;;  %p9790_p8 = scmp.lt.s32.totalorder %s348_s28, %s348_s28 }
  0xff   :  { %p9791_p9 = scmp.lt.s32.totalorder %s9789_s10, %s9785_s24 }
 0x101   :  { %p9792_p10 = por %p9791_p9, %p9790_p8 }
 0x103   :  { %p9793_p11 = pnand %p9792_p10, %p9786_p7 }
 0x105   :  { %9796 = shalt.err (!%p9793_p11)
}
 0x106   :  { %350 = dma.hbm_to_vmem [thread:$0]  %s10464_s8, 16, %s348_s28, [#allocation39]  }
 0x107   :  { %s10318_s25 = smov [#allocation41]   ;;  %s10319_s11 = smov [#allocation44]  }
 0x108   :  { %s366_s19 = sshll.u32 %s10318_s25, 4  ;;  %s388_s6 = sshll.u32 %s10319_s11, 4  ;;  %s367_s19 = int_to_ptr.vmem [resolvable:$true] %s366_s19  ;;  %s10583_s6 = int_to_ptr.vmem [resolvable:$true] %s388_s6 }
 0x109   :  { %s9797_s16 = scalar_lea.hbm %s10474_s29, 512 }
 0x10a   :  { %p9798_p12 = scmp.ne.s32.totalorder %s10474_s29, %s9797_s16  ;;  %p9801_p13 = scmp.lt.u32.totalorder %s9797_s16, %s10474_s29 }
 0x10c   :  { %p9803_p0 = pnand %p9801_p13, %p9798_p12 }
 0x10e   :  { %9806 = shalt.err (!%p9803_p0)
}
 0x10f   :  { %s9807_s18 = scalar_lea.vmem %s367_s19, 512  ;;  %p9812_p2 = scmp.lt.s32.totalorder %s367_s19, %s367_s19 }
 0x110   :  { %p9808_p1 = scmp.ne.s32.totalorder %s367_s19, %s9807_s18  ;;  %p9813_p3 = scmp.lt.s32.totalorder %s9807_s18, %s9807_s18 }
 0x112   :  { %p9814_p4 = por %p9813_p3, %p9812_p2 }
 0x114   :  { %p9815_p5 = pnand %p9814_p4, %p9808_p1 }
 0x116   :  { %9818 = shalt.err (!%p9815_p5)
}
 0x117   :  { %372 = dma.hbm_to_vmem [thread:$0]  %s10474_s29, 512, %s367_s19, [#allocation42], %s10304_s2, %s10304_s2, %s10305_s7  }
 0x118   :  { %s9819_s8 = scalar_lea.hbm %s10484_s21, 512 }
 0x119   :  { %p9820_p6 = scmp.ne.s32.totalorder %s10484_s21, %s9819_s8  ;;  %p9823_p7 = scmp.lt.u32.totalorder %s9819_s8, %s10484_s21 }
 0x11b   :  { %p9825_p8 = pnand %p9823_p7, %p9820_p6 }
 0x11d   :  { %9828 = shalt.err (!%p9825_p8)
}
 0x11e   :  { %s9829_s3 = scalar_lea.vmem %s10583_s6, 512  ;;  %p9834_p10 = scmp.lt.s32.totalorder %s10583_s6, %s10583_s6 }
 0x11f   :  { %p9830_p9 = scmp.ne.s32.totalorder %s10583_s6, %s9829_s3  ;;  %p9835_p11 = scmp.lt.s32.totalorder %s9829_s3, %s9829_s3 }
 0x121   :  { %p9836_p12 = por %p9835_p11, %p9834_p10 }
 0x123   :  { %p9837_p13 = pnand %p9836_p12, %p9830_p9 }
 0x125   :  { %9840 = shalt.err (!%p9837_p13)
}
 0x126   :  { %394 = dma.hbm_to_vmem [thread:$0]  %s10484_s21, 512, %s10583_s6, [#allocation45], %s10304_s2, %s10304_s2, %s10305_s7  }
 0x127   :  { %s10320_s29 = smov [#allocation47]   ;;  %s10321_s20 = smov [#allocation2]  }
 0x128   :  { %s410_s0 = sshll.u32 %s10320_s29, 4  ;;  %s90_s22 = sshll.u32 %s10321_s20, 4  ;;  %s411_s0 = int_to_ptr.vmem [resolvable:$true] %s410_s0  ;;  %s10604_s22 = int_to_ptr.vmem [resolvable:$true] %s90_s22 }
 0x129   :  { %s9841_s4 = scalar_lea.hbm %s10494_s13, 256 }
 0x12a   :  { %p9842_p0 = scmp.ne.s32.totalorder %s10494_s13, %s9841_s4  ;;  %p9845_p1 = scmp.lt.u32.totalorder %s9841_s4, %s10494_s13 }
 0x12c   :  { %p9847_p2 = pnand %p9845_p1, %p9842_p0 }
 0x12e   :  { %9850 = shalt.err (!%p9847_p2)
}
 0x12f   :  { %s9851_s23 = scalar_lea.vmem %s411_s0, 256  ;;  %p9856_p4 = scmp.lt.s32.totalorder %s411_s0, %s411_s0 }
 0x130   :  { %p9852_p3 = scmp.ne.s32.totalorder %s411_s0, %s9851_s23  ;;  %p9857_p5 = scmp.lt.s32.totalorder %s9851_s23, %s9851_s23 }
 0x132   :  { %p9858_p6 = por %p9857_p5, %p9856_p4 }
 0x134   :  { %p9859_p7 = pnand %p9858_p6, %p9852_p3 }
 0x136   :  { %9862 = shalt.err (!%p9859_p7)
}
 0x137   :  { %s13665_s21 = sld [smem:[#allocation68_spill]] }
 0x138   :  { %416 = dma.hbm_to_vmem [thread:$0]  %s10494_s13, 256, %s411_s0, [#allocation48], %s10304_s2, %s10304_s2, %s10305_s7  }
 0x13d   :  { %s9863_s14 = scalar_lea.hbm %s13665_s21, 256 }
 0x13e   :  { %p9864_p8 = scmp.ne.s32.totalorder %s13665_s21, %s9863_s14  ;;  %p9867_p9 = scmp.lt.u32.totalorder %s9863_s14, %s13665_s21 }
 0x140   :  { %p9869_p10 = pnand %p9867_p9, %p9864_p8 }
 0x142   :  { %9872 = shalt.err (!%p9869_p10)
}
 0x143   :  { %s9873_s28 = scalar_lea.vmem %s10604_s22, 256  ;;  %p9878_p12 = scmp.lt.s32.totalorder %s10604_s22, %s10604_s22 }
 0x144   :  { %p9874_p11 = scmp.ne.s32.totalorder %s10604_s22, %s9873_s28  ;;  %p9879_p13 = scmp.lt.s32.totalorder %s9873_s28, %s9873_s28 }
 0x146   :  { %p9880_p0 = por %p9879_p13, %p9878_p12 }
 0x148   :  { %p9881_p1 = pnand %p9880_p0, %p9874_p11 }
 0x14a   :  { %9884 = shalt.err (!%p9881_p1)
}
 0x14b   :  { %s13666_s13 = sld [smem:[#allocation69_spill]]  ;;  %s10322_s17 = smov [#allocation7]  }
 0x14c   :  { %96 = dma.hbm_to_vmem [thread:$0]  %s13665_s21, 256, %s10604_s22, [#allocation3], %s10304_s2, %s10304_s2, %s10305_s7  }
 0x14d   :  { %s114_s26 = sshll.u32 %s10322_s17, 4  ;;  %s10323_s1 = smov [#allocation10]   ;;  %s115_s26 = int_to_ptr.vmem [resolvable:$true] %s114_s26 }
 0x14e   :  { %s139_s30 = sshll.u32 %s10323_s1, 4  ;;  %s140_s30 = int_to_ptr.vmem [resolvable:$true] %s139_s30 }
 0x151   :  { %s9885_s24 = scalar_lea.hbm %s13666_s13, 4096 }
 0x152   :  { %p9886_p2 = scmp.ne.s32.totalorder %s13666_s13, %s9885_s24  ;;  %p9889_p3 = scmp.lt.u32.totalorder %s9885_s24, %s13666_s13 }
 0x154   :  { %p9891_p4 = pnand %p9889_p3, %p9886_p2 }
 0x156   :  { %9894 = shalt.err (!%p9891_p4)
}
 0x157   :  { %s9895_s10 = scalar_lea.vmem %s115_s26, 4096  ;;  %p9900_p6 = scmp.lt.s32.totalorder %s115_s26, %s115_s26 }
 0x158   :  { %p9896_p5 = scmp.ne.s32.totalorder %s115_s26, %s9895_s10  ;;  %p9901_p7 = scmp.lt.s32.totalorder %s9895_s10, %s9895_s10 }
 0x15a   :  { %p9902_p8 = por %p9901_p7, %p9900_p6 }
 0x15c   :  { %p9903_p9 = pnand %p9902_p8, %p9896_p5 }
 0x15e   :  { %9906 = shalt.err (!%p9903_p9)
}
 0x15f   :  { %s13667_s25 = sld [smem:[#allocation70_spill]] }
 0x160   :  { %120 = dma.hbm_to_vmem [thread:$0]  %s13666_s13, 4096, %s115_s26, [#allocation6], %s10304_s2, %s10304_s2, %s10305_s7  }
 0x165   :  { %s9907_s19 = scalar_lea.hbm %s13667_s25, 32 }
 0x166   :  { %p9908_p10 = scmp.ne.s32.totalorder %s13667_s25, %s9907_s19  ;;  %p9911_p11 = scmp.lt.u32.totalorder %s9907_s19, %s13667_s25 }
 0x168   :  { %p9913_p12 = pnand %p9911_p11, %p9908_p10 }
 0x16a   :  { %9916 = shalt.err (!%p9913_p12)
}
 0x16b   :  { %s9917_s11 = scalar_lea.vmem %s140_s30, 32  ;;  %p9922_p0 = scmp.lt.s32.totalorder %s140_s30, %s140_s30 }
 0x16c   :  { %p9918_p13 = scmp.ne.s32.totalorder %s140_s30, %s9917_s11  ;;  %p9923_p1 = scmp.lt.s32.totalorder %s9917_s11, %s9917_s11 }
 0x16e   :  { %p9924_p2 = por %p9923_p1, %p9922_p0 }
 0x170   :  { %p9925_p3 = pnand %p9924_p2, %p9918_p13 }
 0x172   :  { %9928 = shalt.err (!%p9925_p3)
}
 0x173   :  { %s13668_s6 = sld [smem:[#allocation71_spill]]  ;;  %s10324_s16 = smov [#allocation13]  }
 0x174   :  { %142 = dma.hbm_to_vmem [thread:$0]  %s13667_s25, 32, %s140_s30, [#allocation9]  }
 0x175   :  { %s161_s18 = sshll.u32 %s10324_s16, 4  ;;  %s10325_s8 = smov [#allocation16]   ;;  %s162_s18 = int_to_ptr.vmem [resolvable:$true] %s161_s18 }
 0x176   :  { %s180_s3 = sshll.u32 %s10325_s8, 4  ;;  %s10636_s3 = int_to_ptr.vmem [resolvable:$true] %s180_s3 }
 0x179   :  { %s9929_s29 = scalar_lea.hbm %s13668_s6, 32 }
 0x17a   :  { %p9930_p4 = scmp.ne.s32.totalorder %s13668_s6, %s9929_s29  ;;  %p9933_p5 = scmp.lt.u32.totalorder %s9929_s29, %s13668_s6 }
 0x17c   :  { %p9935_p6 = pnand %p9933_p5, %p9930_p4 }
 0x17e   :  { %9938 = shalt.err (!%p9935_p6)
}
 0x17f   :  { %s9939_s0 = scalar_lea.vmem %s162_s18, 32  ;;  %p9944_p8 = scmp.lt.s32.totalorder %s162_s18, %s162_s18 }
 0x180   :  { %p9940_p7 = scmp.ne.s32.totalorder %s162_s18, %s9939_s0  ;;  %p9945_p9 = scmp.lt.s32.totalorder %s9939_s0, %s9939_s0 }
 0x182   :  { %p9946_p10 = por %p9945_p9, %p9944_p8 }
 0x184   :  { %p9947_p11 = pnand %p9946_p10, %p9940_p7 }
 0x186   :  { %9950 = shalt.err (!%p9947_p11)
}
 0x187   :  { %s13669_s20 = sld [smem:[#allocation72_spill]] }
 0x188   :  { %164 = dma.hbm_to_vmem [thread:$0]  %s13668_s6, 32, %s162_s18, [#allocation12]  }
 0x18d   :  { %s9951_s22 = scalar_lea.hbm %s13669_s20, 8192 }
 0x18e   :  { %p9952_p12 = scmp.ne.s32.totalorder %s13669_s20, %s9951_s22  ;;  %p9955_p13 = scmp.lt.u32.totalorder %s9951_s22, %s13669_s20 }
 0x190   :  { %p9957_p0 = pnand %p9955_p13, %p9952_p12 }
 0x192   :  { %9960 = shalt.err (!%p9957_p0)
}
 0x193   :  { %s9961_s4 = scalar_lea.vmem %s10636_s3, 8192  ;;  %p9966_p2 = scmp.lt.s32.totalorder %s10636_s3, %s10636_s3 }
 0x194   :  { %p9962_p1 = scmp.ne.s32.totalorder %s10636_s3, %s9961_s4  ;;  %p9967_p3 = scmp.lt.s32.totalorder %s9961_s4, %s9961_s4 }
 0x196   :  { %p9968_p4 = por %p9967_p3, %p9966_p2 }
 0x198   :  { %p9969_p5 = pnand %p9968_p4, %p9962_p1 }
 0x19a   :  { %9972 = shalt.err (!%p9969_p5)
}
 0x19b   :  { %s13670_s23 = sld [smem:[#allocation73_spill]]  ;;  %s10326_s21 = smov [#allocation19]  }
 0x19c   :  { %186 = dma.hbm_to_vmem [thread:$0]  %s13669_s20, 8192, %s10636_s3, [#allocation15], %s10306_s15, %s10306_s15, %s10307_s9  }
 0x19d   :  { %s202_s14 = sshll.u32 %s10326_s21, 4  ;;  %s10327_s28 = smov [#allocation22]   ;;  %s203_s14 = int_to_ptr.vmem [resolvable:$true] %s202_s14 }
 0x19e   :  { %s224_s13 = sshll.u32 %s10327_s28, 4  ;;  %s10654_s13 = int_to_ptr.vmem [resolvable:$true] %s224_s13 }
 0x1a1   :  { %s9973_s17 = scalar_lea.hbm %s13670_s23, 512 }
 0x1a2   :  { %p9974_p6 = scmp.ne.s32.totalorder %s13670_s23, %s9973_s17  ;;  %p9977_p7 = scmp.lt.u32.totalorder %s9973_s17, %s13670_s23 }
 0x1a4   :  { %p9979_p8 = pnand %p9977_p7, %p9974_p6 }
 0x1a6   :  { %9982 = shalt.err (!%p9979_p8)
}
 0x1a7   :  { %s9983_s26 = scalar_lea.vmem %s203_s14, 512  ;;  %p9988_p10 = scmp.lt.s32.totalorder %s203_s14, %s203_s14 }
 0x1a8   :  { %p9984_p9 = scmp.ne.s32.totalorder %s203_s14, %s9983_s26  ;;  %p9989_p11 = scmp.lt.s32.totalorder %s9983_s26, %s9983_s26 }
 0x1aa   :  { %p9990_p12 = por %p9989_p11, %p9988_p10 }
 0x1ac   :  { %p9991_p13 = pnand %p9990_p12, %p9984_p9 }
 0x1ae   :  { %9994 = shalt.err (!%p9991_p13)
}
 0x1af   :  { %s13671_s1 = sld [smem:[#allocation74_spill]] }
 0x1b0   :  { %208 = dma.hbm_to_vmem [thread:$0]  %s13670_s23, 512, %s203_s14, [#allocation18], %s10306_s15, %s10306_s15, %s10307_s9  }
 0x1b5   :  { %s9995_s30 = scalar_lea.hbm %s13671_s1, 4096 }
 0x1b6   :  { %p9996_p0 = scmp.ne.s32.totalorder %s13671_s1, %s9995_s30  ;;  %p9999_p1 = scmp.lt.u32.totalorder %s9995_s30, %s13671_s1 }
 0x1b8   :  { %p10001_p2 = pnand %p9999_p1, %p9996_p0 }
 0x1ba   :  { %10004 = shalt.err (!%p10001_p2)
}
 0x1bb   :  { %s10005_s24 = scalar_lea.vmem %s10654_s13, 4096  ;;  %p10010_p4 = scmp.lt.s32.totalorder %s10654_s13, %s10654_s13 }
 0x1bc   :  { %p10006_p3 = scmp.ne.s32.totalorder %s10654_s13, %s10005_s24  ;;  %p10011_p5 = scmp.lt.s32.totalorder %s10005_s24, %s10005_s24 }
 0x1be   :  { %p10012_p6 = por %p10011_p5, %p10010_p4 }
 0x1c0   :  { %p10013_p7 = pnand %p10012_p6, %p10006_p3 }
 0x1c2   :  { %10016 = shalt.err (!%p10013_p7)
}
 0x1c3   :  { %s13672_s15 = sld [smem:[#allocation75_spill]]  ;;  %s10328_s9 = smov [#allocation25]  }
 0x1c4   :  { %230 = dma.hbm_to_vmem [thread:$0]  %s13671_s1, 4096, %s10654_s13, [#allocation21], %s10304_s2, %s10304_s2, %s10305_s7  }
 0x1c5   :  { %s246_s10 = sshll.u32 %s10328_s9, 4  ;;  %s10329_s25 = smov [#allocation28]   ;;  %s247_s10 = int_to_ptr.vmem [resolvable:$true] %s246_s10 }
 0x1c6   :  { %s269_s19 = sshll.u32 %s10329_s25, 4  ;;  %s270_s19 = int_to_ptr.vmem [resolvable:$true] %s269_s19 }
 0x1c9   :  { %s10017_s11 = scalar_lea.hbm %s13672_s15, 4096 }
 0x1ca   :  { %p10018_p8 = scmp.ne.s32.totalorder %s13672_s15, %s10017_s11  ;;  %p10021_p9 = scmp.lt.u32.totalorder %s10017_s11, %s13672_s15 }
 0x1cc   :  { %p10023_p10 = pnand %p10021_p9, %p10018_p8 }
 0x1ce   :  { %10026 = shalt.err (!%p10023_p10)
}
 0x1cf   :  { %s10027_s6 = scalar_lea.vmem %s247_s10, 4096  ;;  %p10032_p12 = scmp.lt.s32.totalorder %s247_s10, %s247_s10 }
 0x1d0   :  { %p10028_p11 = scmp.ne.s32.totalorder %s247_s10, %s10027_s6  ;;  %p10033_p13 = scmp.lt.s32.totalorder %s10027_s6, %s10027_s6 }
 0x1d2   :  { %p10034_p0 = por %p10033_p13, %p10032_p12 }
 0x1d4   :  { %p10035_p1 = pnand %p10034_p0, %p10028_p11 }
 0x1d6   :  { %10038 = shalt.err (!%p10035_p1)
}
 0x1d7   :  { %s13673_s16 = sld [smem:[#allocation76_spill]] }
 0x1d8   :  { %252 = dma.hbm_to_vmem [thread:$0]  %s13672_s15, 4096, %s247_s10, [#allocation24], %s10304_s2, %s10304_s2, %s10305_s7  }
 0x1dd   :  { %s10039_s18 = scalar_lea.hbm %s13673_s16, 128 }
 0x1de   :  { %p10040_p2 = scmp.ne.s32.totalorder %s13673_s16, %s10039_s18  ;;  %p10043_p3 = scmp.lt.u32.totalorder %s10039_s18, %s13673_s16 }
 0x1e0   :  { %p10045_p4 = pnand %p10043_p3, %p10040_p2 }
 0x1e2   :  { %10048 = shalt.err (!%p10045_p4)
}
 0x1e3   :  { %s10049_s8 = scalar_lea.vmem %s270_s19, 128  ;;  %p10054_p6 = scmp.lt.s32.totalorder %s270_s19, %s270_s19 }
 0x1e4   :  { %p10050_p5 = scmp.ne.s32.totalorder %s270_s19, %s10049_s8  ;;  %p10055_p7 = scmp.lt.s32.totalorder %s10049_s8, %s10049_s8 }
 0x1e6   :  { %p10056_p8 = por %p10055_p7, %p10054_p6 }
 0x1e8   :  { %p10057_p9 = pnand %p10056_p8, %p10050_p5 }
 0x1ea   :  { %10060 = shalt.err (!%p10057_p9)
}
 0x1eb   :  { %s13674_s3 = sld [smem:[#allocation77_spill]]  ;;  %s10330_s29 = smov [#allocation31]  }
 0x1ec   :  { %272 = dma.hbm_to_vmem [thread:$0]  %s13673_s16, 128, %s270_s19, [#allocation27]  }
 0x1ed   :  { %s291_s0 = sshll.u32 %s10330_s29, 4  ;;  %s10331_s20 = smov [#allocation34]   ;;  %s292_s0 = int_to_ptr.vmem [resolvable:$true] %s291_s0 }
 0x1ee   :  { %s312_s22 = sshll.u32 %s10331_s20, 4  ;;  %s10686_s22 = int_to_ptr.vmem [resolvable:$true] %s312_s22 }
 0x1f1   :  { %s10061_s4 = scalar_lea.hbm %s13674_s3, 16 }
 0x1f2   :  { %p10062_p10 = scmp.ne.s32.totalorder %s13674_s3, %s10061_s4  ;;  %p10065_p11 = scmp.lt.u32.totalorder %s10061_s4, %s13674_s3 }
 0x1f4   :  { %p10067_p12 = pnand %p10065_p11, %p10062_p10 }
 0x1f6   :  { %10070 = shalt.err (!%p10067_p12)
}
 0x1f7   :  { %s10071_s23 = scalar_lea.vmem %s292_s0, 16  ;;  %s10075_s21 = scalar_lea.vmem %s292_s0, 32 }
 0x1f8   :  { %p10072_p13 = scmp.ne.s32.totalorder %s292_s0, %s10071_s23  ;;  %p10076_p0 = scmp.lt.s32.totalorder %s292_s0, %s292_s0 }
 0x1f9   :  { %p10077_p1 = scmp.lt.s32.totalorder %s10075_s21, %s10071_s23 }
 0x1fb   :  { %p10078_p2 = por %p10077_p1, %p10076_p0 }
 0x1fd   :  { %p10079_p3 = pnand %p10078_p2, %p10072_p13 }
 0x1ff   :  { %10082 = shalt.err (!%p10079_p3)
}
 0x200   :  { %s13675_s14 = sld [smem:[#allocation78_spill]] }
 0x201   :  { %294 = dma.hbm_to_vmem [thread:$0]  %s13674_s3, 16, %s292_s0, [#allocation30]  }
 0x206   :  { %s10083_s28 = scalar_lea.hbm %s13675_s14, 512 }
 0x207   :  { %p10084_p4 = scmp.ne.s32.totalorder %s13675_s14, %s10083_s28  ;;  %p10087_p5 = scmp.lt.u32.totalorder %s10083_s28, %s13675_s14 }
 0x209   :  { %p10089_p6 = pnand %p10087_p5, %p10084_p4 }
 0x20b   :  { %10092 = shalt.err (!%p10089_p6)
}
 0x20c   :  { %s10093_s13 = scalar_lea.vmem %s10686_s22, 512  ;;  %p10098_p8 = scmp.lt.s32.totalorder %s10686_s22, %s10686_s22 }
 0x20d   :  { %p10094_p7 = scmp.ne.s32.totalorder %s10686_s22, %s10093_s13  ;;  %p10099_p9 = scmp.lt.s32.totalorder %s10093_s13, %s10093_s13 }
 0x20f   :  { %p10100_p10 = por %p10099_p9, %p10098_p8 }
 0x211   :  { %p10101_p11 = pnand %p10100_p10, %p10094_p7 }
 0x213   :  { %10104 = shalt.err (!%p10101_p11)
}
 0x214   :  { %s13676_s17 = sld [smem:[#allocation79_spill]]  ;;  %s10332_s26 = smov [#allocation37]  }
 0x215   :  { %318 = dma.hbm_to_vmem [thread:$0]  %s13675_s14, 512, %s10686_s22, [#allocation33], %s10304_s2, %s10304_s2, %s10305_s7  }
 0x216   :  { %s334_s1 = sshll.u32 %s10332_s26, 4  ;;  %s10333_s30 = smov [#allocation40]   ;;  %s335_s1 = int_to_ptr.vmem [resolvable:$true] %s334_s1 }
 0x217   :  { %s357_s24 = sshll.u32 %s10333_s30, 4  ;;  %s358_s24 = int_to_ptr.vmem [resolvable:$true] %s357_s24 }
 0x21a   :  { %s10105_s15 = scalar_lea.hbm %s13676_s17, 512 }
 0x21b   :  { %p10106_p12 = scmp.ne.s32.totalorder %s13676_s17, %s10105_s15  ;;  %p10109_p13 = scmp.lt.u32.totalorder %s10105_s15, %s13676_s17 }
 0x21d   :  { %p10111_p0 = pnand %p10109_p13, %p10106_p12 }
 0x21f   :  { %10114 = shalt.err (!%p10111_p0)
}
 0x220   :  { %s10115_s9 = scalar_lea.vmem %s335_s1, 512  ;;  %p10120_p2 = scmp.lt.s32.totalorder %s335_s1, %s335_s1 }
 0x221   :  { %p10116_p1 = scmp.ne.s32.totalorder %s335_s1, %s10115_s9  ;;  %p10121_p3 = scmp.lt.s32.totalorder %s10115_s9, %s10115_s9 }
 0x223   :  { %p10122_p4 = por %p10121_p3, %p10120_p2 }
 0x225   :  { %p10123_p5 = pnand %p10122_p4, %p10116_p1 }
 0x227   :  { %10126 = shalt.err (!%p10123_p5)
}
 0x228   :  { %s13677_s10 = sld [smem:[#allocation80_spill]] }
 0x229   :  { %340 = dma.hbm_to_vmem [thread:$0]  %s13676_s17, 512, %s335_s1, [#allocation36], %s10304_s2, %s10304_s2, %s10305_s7  }
 0x22e   :  { %s10127_s25 = scalar_lea.hbm %s13677_s10, 128 }
 0x22f   :  { %p10128_p6 = scmp.ne.s32.totalorder %s13677_s10, %s10127_s25  ;;  %p10131_p7 = scmp.lt.u32.totalorder %s10127_s25, %s13677_s10 }
 0x231   :  { %p10133_p8 = pnand %p10131_p7, %p10128_p6 }
 0x233   :  { %10136 = shalt.err (!%p10133_p8)
}
 0x234   :  { %s10137_s19 = scalar_lea.vmem %s358_s24, 128  ;;  %p10142_p10 = scmp.lt.s32.totalorder %s358_s24, %s358_s24 }
 0x235   :  { %p10138_p9 = scmp.ne.s32.totalorder %s358_s24, %s10137_s19  ;;  %p10143_p11 = scmp.lt.s32.totalorder %s10137_s19, %s10137_s19 }
 0x237   :  { %p10144_p12 = por %p10143_p11, %p10142_p10 }
 0x239   :  { %p10145_p13 = pnand %p10144_p12, %p10138_p9 }
 0x23b   :  { %10148 = shalt.err (!%p10145_p13)
}
 0x23c   :  { %s13678_s11 = sld [smem:[#allocation81_spill]]  ;;  %s10334_s6 = smov [#allocation43]  }
 0x23d   :  { %360 = dma.hbm_to_vmem [thread:$0]  %s13677_s10, 128, %s358_s24, [#allocation39]  }
 0x23e   :  { %s379_s16 = sshll.u32 %s10334_s6, 4  ;;  %s10335_s18 = smov [#allocation46]   ;;  %s380_s16 = int_to_ptr.vmem [resolvable:$true] %s379_s16 }
 0x23f   :  { %s401_s8 = sshll.u32 %s10335_s18, 4  ;;  %s402_s8 = int_to_ptr.vmem [resolvable:$true] %s401_s8 }
 0x242   :  { %s10149_s3 = scalar_lea.hbm %s13678_s11, 16 }
 0x243   :  { %p10150_p0 = scmp.ne.s32.totalorder %s13678_s11, %s10149_s3  ;;  %p10153_p1 = scmp.lt.u32.totalorder %s10149_s3, %s13678_s11 }
 0x245   :  { %p10155_p2 = pnand %p10153_p1, %p10150_p0 }
 0x247   :  { %10158 = shalt.err (!%p10155_p2)
}
 0x248   :  { %s10159_s29 = scalar_lea.vmem %s380_s16, 16  ;;  %s10163_s0 = scalar_lea.vmem %s380_s16, 32 }
 0x249   :  { %p10160_p3 = scmp.ne.s32.totalorder %s380_s16, %s10159_s29  ;;  %p10164_p4 = scmp.lt.s32.totalorder %s380_s16, %s380_s16 }
 0x24a   :  { %p10165_p5 = scmp.lt.s32.totalorder %s10163_s0, %s10159_s29 }
 0x24c   :  { %p10166_p6 = por %p10165_p5, %p10164_p4 }
 0x24e   :  { %p10167_p7 = pnand %p10166_p6, %p10160_p3 }
 0x250   :  { %10170 = shalt.err (!%p10167_p7)
}
 0x251   :  { %382 = dma.hbm_to_vmem [thread:$0]  %s13678_s11, 16, %s380_s16, [#allocation42]  }
 0x252   :  { %s10171_s20 = scalar_lea.hbm %s10489_s27, 16 }
 0x253   :  { %p10172_p8 = scmp.ne.s32.totalorder %s10489_s27, %s10171_s20  ;;  %p10175_p9 = scmp.lt.u32.totalorder %s10171_s20, %s10489_s27 }
 0x255   :  { %p10177_p10 = pnand %p10175_p9, %p10172_p8 }
 0x257   :  { %10180 = shalt.err (!%p10177_p10)
}
 0x258   :  { %s10181_s22 = scalar_lea.vmem %s402_s8, 16  ;;  %s10185_s4 = scalar_lea.vmem %s402_s8, 32 }
 0x259   :  { %p10182_p11 = scmp.ne.s32.totalorder %s402_s8, %s10181_s22  ;;  %p10186_p12 = scmp.lt.s32.totalorder %s402_s8, %s402_s8 }
 0x25a   :  { %p10187_p13 = scmp.lt.s32.totalorder %s10185_s4, %s10181_s22 }
 0x25c   :  { %p10188_p0 = por %p10187_p13, %p10186_p12 }
 0x25e   :  { %p10189_p1 = pnand %p10188_p0, %p10182_p11 }
 0x260   :  { %10192 = shalt.err (!%p10189_p1)
}
 0x261   :  { %404 = dma.hbm_to_vmem [thread:$0]  %s10489_s27, 16, %s402_s8, [#allocation45]  }
 0x262   :  { %s10336_s23 = smov [#allocation49]   ;;  %s10193_s14 = scalar_lea.hbm %s10499_s12, 16 }
 0x263   :  { %s423_s21 = sshll.u32 %s10336_s23, 4  ;;  %p10194_p2 = scmp.ne.s32.totalorder %s10499_s12, %s10193_s14  ;;  %s424_s21 = int_to_ptr.vmem [resolvable:$true] %s423_s21 }
 0x264   :  { %p10197_p3 = scmp.lt.u32.totalorder %s10193_s14, %s10499_s12 }
 0x266   :  { %p10199_p4 = pnand %p10197_p3, %p10194_p2 }
 0x268   :  { %10202 = shalt.err (!%p10199_p4)
}
 0x269   :  { %s10203_s28 = scalar_lea.vmem %s424_s21, 16  ;;  %s10207_s13 = scalar_lea.vmem %s424_s21, 32 }
 0x26a   :  { %p10204_p5 = scmp.ne.s32.totalorder %s424_s21, %s10203_s28  ;;  %p10208_p6 = scmp.lt.s32.totalorder %s424_s21, %s424_s21 }
 0x26b   :  { %p10209_p7 = scmp.lt.s32.totalorder %s10207_s13, %s10203_s28 }
 0x26d   :  { %p10210_p8 = por %p10209_p7, %p10208_p6 }
 0x26f   :  { %p10211_p9 = pnand %p10210_p8, %p10204_p5 }
 0x271   :  { %10214 = shalt.err (!%p10211_p9)
}
 0x272   :  { %426 = dma.hbm_to_vmem [thread:$0]  %s10499_s12, 16, %s424_s21, [#allocation48]  }
 0x273   :  { %10237 = dma.done.wait [#allocation3], 256  }
 0x274   :  { %10238 = vsyncadd [#allocation3], 4294967040 }
 0x275   :  { %10239 = dma.done.wait [#allocation6], 8192  }
 0x276   :  { %10240 = vsyncadd [#allocation6], 4294959104 }
 0x277   :  { %10241 = dma.done.wait [#allocation9], 544  }
 0x278   :  { %10242 = vsyncadd [#allocation9], 4294966752 }
 0x279   :  { %10243 = dma.done.wait [#allocation12], 544  }
 0x27a   :  { %10244 = vsyncadd [#allocation12], 4294966752 }
 0x27b   :  { %10245 = dma.done.wait [#allocation15], 8448  }
 0x27c   :  { %10246 = vsyncadd [#allocation15], 4294958848 }
 0x27d   :  { %10247 = dma.done.wait [#allocation18], 544  }
 0x27e   :  { %10248 = vsyncadd [#allocation18], 4294966752 }
 0x27f   :  { %10249 = dma.done.wait [#allocation21], 4128  }
 0x280   :  { %10250 = vsyncadd [#allocation21], 4294963168 }
 0x281   :  { %10251 = dma.done.wait [#allocation24], 4112  }
 0x282   :  { %10252 = vsyncadd [#allocation24], 4294963184 }
 0x283   :  { %10253 = dma.done.wait [#allocation27], 144  }
 0x284   :  { %10254 = vsyncadd [#allocation27], 4294967152 }
 0x285   :  { %10255 = dma.done.wait [#allocation30], 2064  }
 0x286   :  { %10256 = vsyncadd [#allocation30], 4294965232 }
 0x287   :  { %10257 = dma.done.wait [#allocation33], 2560  }
 0x288   :  { %10258 = vsyncadd [#allocation33], 4294964736 }
 0x289   :  { %10259 = dma.done.wait [#allocation36], 528  }
 0x28a   :  { %10260 = vsyncadd [#allocation36], 4294966768 }
 0x28b   :  { %10261 = dma.done.wait [#allocation39], 144  }
 0x28c   :  { %10262 = vsyncadd [#allocation39], 4294967152 }
 0x28d   :  { %10263 = dma.done.wait [#allocation42], 528  }
 0x28e   :  { %10264 = vsyncadd [#allocation42], 4294966768 }
 0x28f   :  { %10265 = dma.done.wait [#allocation45], 528  }
 0x290   :  { %10266 = vsyncadd [#allocation45], 4294966768 }
 0x291   :  { %10267 = dma.done.wait [#allocation48], 272  }
 0x292   :  { %10268 = vsyncadd [#allocation48], 4294967024  ;;  %v10337_v0 = vmov 0.0   ;;  %v651_v1 = vld [vmem:[#allocation8 + $0x8] sm:$0xff]  ;;  %v653_v2 = vld [vmem:[#allocation8 + $0x18] sm:$0xff]  ;;  %vm13650_vm0 = vcmask 130048  }
 0x293   :  { %809 = vmatprep.mubr.f32.mxu0 %v10337_v0  ;;  %897 = vmatprep.mubr.f32.mxu1 %v10337_v0  ;;  %v656_v3 = vld [vmem:[#allocation11 + $0x8] sm:$0xff]  ;;  %v8698_v4 = vpack.c.bf16 %v653_v2, %v651_v1  ;;  %v658_v5 = vld [vmem:[#allocation11 + $0x18] sm:$0xff]  ;;  %v655_v10 = vld [vmem:[#allocation11] sm:$0xff]  ;;  %vm910_vm1 = vcmask 64512   ;;  %s10340_s12 = smov [#allocation50]  }
 0x294   :  { %v650_v6 = vld [vmem:[#allocation8] sm:$0xff]  ;;  %v652_v7 = vld [vmem:[#allocation8 + $0x10] sm:$0xff]  ;;  %v8702_v8 = vpack.c.bf16 %v658_v5, %v656_v3  ;;  %v521_v16 = vld [vmem:[#allocation2 + $0x8] sm:$0xff]  ;;  %s7861_s27 = sshll.u32 %s10340_s12, 4  ;;  %s7862_s27 = int_to_ptr.vmem [resolvable:$true] %s7861_s27 }
 0x295   :  { %v8700_v9 = vpack.c.bf16 %v652_v7, %v650_v6  ;;  %v657_v11 = vld [vmem:[#allocation11 + $0x10] sm:$0xff]  ;;  %8699 = vmatprep.subr.bf16.mxu0 %v8698_v4  ;;  %v660_v15 = vld [vmem:[#allocation14] sm:$0xff]  ;;  %v663_v18 = vld [vmem:[#allocation16 + $0x8] sm:$0xff]  ;;  %s10215_s17 = scalar_lea.vmem %s7862_s27, 256  ;;  %p10220_p11 = scmp.lt.s32.totalorder %s7862_s27, %s7862_s27 }
 0x296   :  { %v8704_v12 = vpack.c.bf16 %v657_v11, %v655_v10  ;;  %v661_v13 = vld [vmem:[#allocation14 + $0x8] sm:$0xff]  ;;  %8703 = vmatprep.subr.bf16.mxu1 %v8702_v8  ;;  %v522_v17 = vld [vmem:[#allocation7] sm:$0xff]  ;;  %v662_v20 = vld [vmem:[#allocation16] sm:$0xff]  ;;  %p10216_p10 = scmp.ne.s32.totalorder %s7862_s27, %s10215_s17  ;;  %p10221_p12 = scmp.lt.s32.totalorder %s10215_s17, %s10215_s17 }
 0x297   :  { %8701 = vmatpush1.bf16.msra.mxu0 %v8700_v9  ;;  %v520_v14 = vld [vmem:[#allocation2] sm:$0xff]  ;;  %v664_v21 = vld [vmem:[#allocation16 + $0x10] sm:$0xff]  ;;  %v667_v25 = vld [vmem:[#allocation16 + $0x28] sm:$0xff] }
 0x298   :  { %8705 = vmatpush1.bf16.msra.mxu1 %v8704_v12  ;;  %1007 = vmatprep.subr.mxu0 %v661_v13  ;;  %v665_v19 = vld [vmem:[#allocation16 + $0x18] sm:$0xff]  ;;  %v8708_v24 = vpack.c.bf16 %v664_v21, %v662_v20  ;;  %v666_v28 = vld [vmem:[#allocation16 + $0x20] sm:$0xff]  ;;  %v668_v29 = vld [vmem:[#allocation16 + $0x30] sm:$0xff]  ;;  %p10222_p13 = por %p10221_p12, %p10220_p11 }
 0x299   :  { %v523_v22 = vld [vmem:[#allocation7 + $0x8] sm:$0xff]  ;;  %v8706_v23 = vpack.c.bf16 %v665_v19, %v663_v18  ;;  %v671_v30 = vld [vmem:[#allocation16 + $0x48] sm:$0xff]  ;;  %v524_v32 = vld [vmem:[#allocation7 + $0x10] sm:$0xff]  ;;  %v8712_v33 = vpack.c.bf16 %v668_v29, %v666_v28 }
 0x29a   :  { %7951 = vmatmul.mubr.msk.f32.vlgmr.msra.gmra.mrb[0].mxu0 %vm13650_vm0, %v520_v14  ;;  %v669_v26 = vld [vmem:[#allocation16 + $0x38] sm:$0xff]  ;;  %v670_v35 = vld [vmem:[#allocation16 + $0x40] sm:$0xff]  ;;  %v672_v36 = vld [vmem:[#allocation16 + $0x50] sm:$0xff]  ;;  %p10223_p0 = pnand %p10222_p13, %p10216_p10 }
 0x29b   :  { %7953 = vmatmul.mubr.msk.f32.vlgmr.msra.gmra.mrb[0].mxu1 %vm13650_vm0, %v520_v14  ;;  %1008 = vmatpush1.msra.mxu0 %v660_v15  ;;  %v8710_v27 = vpack.c.bf16 %v669_v26, %v667_v25  ;;  %v673_v31 = vld [vmem:[#allocation16 + $0x58] sm:$0xff]  ;;  %v675_v37 = vld [vmem:[#allocation16 + $0x68] sm:$0xff]  ;;  %v8716_v40 = vpack.c.bf16 %v672_v36, %v670_v35  ;;  %v674_v42 = vld [vmem:[#allocation16 + $0x60] sm:$0xff] }
 0x29c   :  { %815 = vmatprep.mubr.f32.mxu0 %v10337_v0  ;;  %903 = vmatprep.mubr.f32.mxu1 %v10337_v0  ;;  %v8714_v34 = vpack.c.bf16 %v673_v31, %v671_v30  ;;  %v677_v38 = vld [vmem:[#allocation16 + $0x78] sm:$0xff]  ;;  %v525_v39 = vld [vmem:[#allocation7 + $0x18] sm:$0xff]  ;;  %v676_v43 = vld [vmem:[#allocation16 + $0x70] sm:$0xff] }
 0x29d   :  { %8707 = vmatprep.subr.bf16.mxu0 %v8706_v23  ;;  %8938 = vmatprep.subr.bf16.mxu1 %v8706_v23  ;;  %v8718_v41 = vpack.c.bf16 %v677_v38, %v675_v37  ;;  %v679_v44 = vld [vmem:[#allocation16 + $0x88] sm:$0xff]  ;;  %v681_v45 = vld [vmem:[#allocation16 + $0x98] sm:$0xff]  ;;  %v8720_v47 = vpack.c.bf16 %v676_v43, %v674_v42  ;;  %v678_v49 = vld [vmem:[#allocation16 + $0x80] sm:$0xff] }
 0x29e   :  { %7952 = vmatmul.mubr.msk.f32.gmra.mrb[2].mxu0 %vm13650_vm0, %v521_v16  ;;  %8954 = vmatpush1.bf16.msra.mxu1 %v8708_v24  ;;  %v526_v46 = vld [vmem:[#allocation7 + $0x20] sm:$0xff]  ;;  %v8722_v48 = vpack.c.bf16 %v681_v45, %v679_v44  ;;  %v685_v52 = vld [vmem:[#allocation16 + $0xb8] sm:$0xff]  ;;  %v682_v56 = vld [vmem:[#allocation16 + $0xa0] sm:$0xff] }
 0x29f   :  { %7954 = vmatmul.mubr.msk.f32.gmra.mrb[2].mxu1 %vm13650_vm0, %v521_v16  ;;  %1071 = vmatprep.mubr.f32.mxu0 %v10337_v0  ;;  %v680_v50 = vld [vmem:[#allocation16 + $0x90] sm:$0xff]  ;;  %v683_v51 = vld [vmem:[#allocation16 + $0xa8] sm:$0xff]  ;;  %v689_v59 = vld [vmem:[#allocation16 + $0xd8] sm:$0xff] }
 0x2a0   :  { %8939 = vmatprep.subr.bf16.mxu1 %v8710_v27  ;;  %v527_v53 = vld [vmem:[#allocation7 + $0x28] sm:$0xff]  ;;  %v8724_v54 = vpack.c.bf16 %v680_v50, %v678_v49  ;;  %v8726_v55 = vpack.c.bf16 %v685_v52, %v683_v51  ;;  %v687_v58 = vld [vmem:[#allocation16 + $0xc8] sm:$0xff]  ;;  %v528_v60 = vld [vmem:[#allocation7 + $0x30] sm:$0xff] }
 0x2a1   :  { %v684_v57 = vld [vmem:[#allocation16 + $0xb0] sm:$0xff]  ;;  %v8730_v62 = vpack.c.bf16 %v689_v59, %v687_v58  ;;  %v686_v63 = vld [vmem:[#allocation16 + $0xc0] sm:$0xff]  ;;  %v691_v2 = vld [vmem:[#allocation16 + $0xe8] sm:$0xff] }
 0x2a2   :  { %7955 = vmatmul.mubr.msk.f32.vlgmr.msra.gmra.mrb[4].mxu0 %vm910_vm1, %v522_v17  ;;  %8955 = vmatpush1.bf16.msra.mxu1 %v8712_v33  ;;  %v8728_v61 = vpack.c.bf16 %v684_v57, %v682_v56  ;;  %v688_v1 = vld [vmem:[#allocation16 + $0xd0] sm:$0xff]  ;;  %v693_v3 = vld [vmem:[#allocation16 + $0xf8] sm:$0xff]  ;;  %v529_v4 = vld [vmem:[#allocation7 + $0x38] sm:$0xff] }
 0x2a3   :  { %1077 = vmatprep.mubr.f32.mxu0 %v10337_v0  ;;  %8709 = vmatpush1.bf16.msra.mxu0 %v8708_v24  ;;  %v8732_v5 = vpack.c.bf16 %v688_v1, %v686_v63  ;;  %v8734_v6 = vpack.c.bf16 %v693_v3, %v691_v2  ;;  %v690_v7 = vld [vmem:[#allocation16 + $0xe0] sm:$0xff]  ;;  %v692_v8 = vld [vmem:[#allocation16 + $0xf0] sm:$0xff]  ;;  %v695_v9 = vld [vmem:[#allocation16 + $0x108] sm:$0xff]  ;;  %v10338_v1 = vmov 0  }
 0x2a4   :  { %8711 = vmatprep.subr.bf16.mxu0 %v8710_v27  ;;  %8940 = vmatprep.subr.bf16.mxu1 %v8714_v34  ;;  %v697_v10 = vld [vmem:[#allocation16 + $0x118] sm:$0xff]  ;;  %v530_v11 = vld [vmem:[#allocation7 + $0x40] sm:$0xff]  ;;  %v8736_v12 = vpack.c.bf16 %v692_v8, %v690_v7  ;;  %v694_v14 = vld [vmem:[#allocation16 + $0x100] sm:$0xff] }
 0x2a5   :  { %v8738_v13 = vpack.c.bf16 %v697_v10, %v695_v9  ;;  %v696_v15 = vld [vmem:[#allocation16 + $0x110] sm:$0xff]  ;;  %v699_v16 = vld [vmem:[#allocation16 + $0x128] sm:$0xff]  ;;  %v701_v17 = vld [vmem:[#allocation16 + $0x138] sm:$0xff]  ;;  %9041 = vset.pattern.permute.xlu1 %v10338_v1  ;;  %9040 = vset.pattern.permute.xlu0 %v10338_v1 }
 0x2a6   :  { %7956 = vmatmul.mubr.msk.f32.gmra.mrb[6].mxu0 %vm910_vm1, %v523_v22  ;;  %8956 = vmatpush1.bf16.msra.mxu1 %v8716_v40  ;;  %v531_v18 = vld [vmem:[#allocation7 + $0x48] sm:$0xff]  ;;  %v8740_v19 = vpack.c.bf16 %v696_v15, %v694_v14  ;;  %v8742_v20 = vpack.c.bf16 %v701_v17, %v699_v16  ;;  %v698_v21 = vld [vmem:[#allocation16 + $0x120] sm:$0xff]  ;;  %v703_v23 = vld [vmem:[#allocation16 + $0x148] sm:$0xff] }
 0x2a7   :  { %1083 = vmatprep.mubr.f32.mxu0 %v10337_v0  ;;  %8713 = vmatpush1.bf16.msra.mxu0 %v8712_v33  ;;  %v700_v22 = vld [vmem:[#allocation16 + $0x130] sm:$0xff]  ;;  %v705_v24 = vld [vmem:[#allocation16 + $0x158] sm:$0xff]  ;;  %v702_v28 = vld [vmem:[#allocation16 + $0x140] sm:$0xff] }
 0x2a8   :  { %8715 = vmatprep.subr.bf16.mxu0 %v8714_v34  ;;  %8941 = vmatprep.subr.bf16.mxu1 %v8718_v41  ;;  %v532_v25 = vld [vmem:[#allocation7 + $0x50] sm:$0xff]  ;;  %v8744_v26 = vpack.c.bf16 %v700_v22, %v698_v21  ;;  %v8746_v27 = vpack.c.bf16 %v705_v24, %v703_v23  ;;  %v704_v29 = vld [vmem:[#allocation16 + $0x150] sm:$0xff]  ;;  %v533_v30 = vld [vmem:[#allocation7 + $0x58] sm:$0xff] }
 0x2a9   :  { %v8748_v31 = vpack.c.bf16 %v704_v29, %v702_v28  ;;  %v535_v33 = vld [vmem:[#allocation7 + $0x68] sm:$0xff]  ;;  %v536_v34 = vld [vmem:[#allocation7 + $0x70] sm:$0xff]  ;;  %v537_v35 = vld [vmem:[#allocation7 + $0x78] sm:$0xff] }
 0x2aa   :  { %7957 = vmatmul.mubr.msk.f32.gmra.mrb[8].mxu0 %vm910_vm1, %v524_v32  ;;  %8957 = vmatpush1.bf16.msra.mxu1 %v8720_v47  ;;  %v534_v32 = vld [vmem:[#allocation7 + $0x60] sm:$0xff]  ;;  %v539_v37 = vld [vmem:[#allocation7 + $0x88] sm:$0xff]  ;;  %v540_v38 = vld [vmem:[#allocation7 + $0x90] sm:$0xff] }
 0x2ab   :  { %1089 = vmatprep.mubr.f32.mxu0 %v10337_v0  ;;  %8717 = vmatpush1.bf16.msra.mxu0 %v8716_v40  ;;  %v538_v36 = vld [vmem:[#allocation7 + $0x80] sm:$0xff]  ;;  %v706_v43 = vld [vmem:[#allocation16 + $0x160] sm:$0xff]  ;;  %v717_v59 = vld [vmem:[#allocation16 + $0x1b8] sm:$0xff] }
 0x2ac   :  { %8719 = vmatprep.subr.bf16.mxu0 %v8718_v41  ;;  %8942 = vmatprep.subr.bf16.mxu1 %v8722_v48  ;;  %v707_v40 = vld [vmem:[#allocation16 + $0x168] sm:$0xff]  ;;  %v709_v41 = vld [vmem:[#allocation16 + $0x178] sm:$0xff]  ;;  %v708_v44 = vld [vmem:[#allocation16 + $0x170] sm:$0xff] }
 0x2ad   :  { %v8750_v42 = vpack.c.bf16 %v709_v41, %v707_v40  ;;  %v8752_v45 = vpack.c.bf16 %v708_v44, %v706_v43  ;;  %v710_v50 = vld [vmem:[#allocation16 + $0x180] sm:$0xff]  ;;  %v712_v51 = vld [vmem:[#allocation16 + $0x190] sm:$0xff]  ;;  %v715_v58 = vld [vmem:[#allocation16 + $0x1a8] sm:$0xff] }
 0x2ae   :  { %7958 = vmatmul.mubr.msk.f32.gmra.mrb[10].mxu0 %vm910_vm1, %v525_v39  ;;  %8958 = vmatpush1.bf16.msra.mxu1 %v8724_v54  ;;  %v541_v39 = vld [vmem:[#allocation7 + $0x98] sm:$0xff]  ;;  %v8756_v52 = vpack.c.bf16 %v712_v51, %v710_v50  ;;  %v716_v2 = vld [vmem:[#allocation16 + $0x1b0] sm:$0xff]  ;;  %v721_v10 = vld [vmem:[#allocation16 + $0x1d8] sm:$0xff] }
 0x2af   :  { %1095 = vmatprep.mubr.f32.mxu0 %v10337_v0  ;;  %8721 = vmatpush1.bf16.msra.mxu0 %v8720_v47  ;;  %v711_v47 = vld [vmem:[#allocation16 + $0x188] sm:$0xff]  ;;  %v714_v63 = vld [vmem:[#allocation16 + $0x1a0] sm:$0xff]  ;;  %v10785_v3 = vld [vmem:[#allocation5 + $0x28] sm:$0xff] }
 0x2b0   :  { %8723 = vmatprep.subr.bf16.mxu0 %v8722_v48  ;;  %8943 = vmatprep.subr.bf16.mxu1 %v8726_v55  ;;  %v713_v48 = vld [vmem:[#allocation16 + $0x198] sm:$0xff]  ;;  %v7924_v7 = vadd.f32 -1.0, %v10785_v3  ;;  %v719_v9 = vld [vmem:[#allocation16 + $0x1c8] sm:$0xff]  ;;  %v718_v14 = vld [vmem:[#allocation16 + $0x1c0] sm:$0xff] }
 0x2b1   :  { %v8754_v49 = vpack.c.bf16 %v713_v48, %v711_v47  ;;  %v720_v15 = vld [vmem:[#allocation16 + $0x1d0] sm:$0xff]  ;;  %v545_v17 = vld [vmem:[#allocation7 + $0xb8] sm:$0xff]  ;;  %v725_v24 = vld [vmem:[#allocation16 + $0x1f8] sm:$0xff] }
 0x2b2   :  { %7959 = vmatmul.mubr.msk.f32.gmra.mrb[12].mxu0 %vm910_vm1, %v526_v46  ;;  %8959 = vmatpush1.bf16.msra.mxu1 %v8728_v61  ;;  %v542_v46 = vld [vmem:[#allocation7 + $0xa0] sm:$0xff]  ;;  %v8764_v16 = vpack.c.bf16 %v720_v15, %v718_v14  ;;  %v722_v28 = vld [vmem:[#allocation16 + $0x1e0] sm:$0xff]  ;;  %v10852_v15 = vld [vmem:[#allocation5 + $0xa8] sm:$0xff] }
 0x2b3   :  { %1101 = vmatprep.mubr.f32.mxu0 %v10337_v0  ;;  %8725 = vmatpush1.bf16.msra.mxu0 %v8724_v54  ;;  %v10779_v54 = vld [vmem:[#allocation5 + $0x10] sm:$0xff]  ;;  %v546_v22 = vld [vmem:[#allocation7 + $0xc0] sm:$0xff] }
 0x2b4   :  { %8727 = vmatprep.subr.bf16.mxu0 %v8726_v55  ;;  %8944 = vmatprep.subr.bf16.mxu1 %v8730_v62  ;;  %v543_v55 = vld [vmem:[#allocation7 + $0xa8] sm:$0xff]  ;;  %v7921_v57 = vadd.f32 -1.0, %v10779_v54  ;;  %v723_v23 = vld [vmem:[#allocation16 + $0x1e8] sm:$0xff]  ;;  %v10822_v47 = vld [vmem:[#allocation5 + $0x50] sm:$0xff] }
 0x2b5   :  { %v724_v29 = vld [vmem:[#allocation16 + $0x1f0] sm:$0xff] }
 0x2b6   :  { %7960 = vmatmul.mubr.msk.f32.gmra.mrb[14].mxu0 %vm910_vm1, %v527_v53  ;;  %8960 = vmatpush1.bf16.msra.mxu1 %v8732_v5  ;;  %v10777_v53 = vld [vmem:[#allocation5 + $0x20] sm:$0xff] }
 0x2b7   :  { %1107 = vmatprep.mubr.f32.mxu0 %v10337_v0  ;;  %8729 = vmatpush1.bf16.msra.mxu0 %v8728_v61  ;;  %v7923_v56 = vadd.f32 -1.0, %v10777_v53  ;;  %v10814_v40 = vld [vmem:[#allocation5 + $0x40] sm:$0xff] }
 0x2b8   :  { %8731 = vmatprep.subr.bf16.mxu0 %v8730_v62  ;;  %8945 = vmatprep.subr.bf16.mxu1 %v8734_v6  ;;  %v620_v62 = vmul.f32 1e+30, %v7921_v57  ;;  %v550_v50 = vld [vmem:[#allocation7 + $0xe0] sm:$0xff] }
 0x2b9   :  { %v622_v61 = vmul.f32 1e+30, %v7923_v56  ;;  %v10830_v56 = vld [vmem:[#allocation5 + $0x60] sm:$0xff] }
 0x2ba   :  { %7961 = vmatmul.mubr.msk.f32.gmra.mrb[16].mxu0 %vm910_vm1, %v528_v60  ;;  %8961 = vmatpush1.bf16.msra.mxu1 %v8736_v12  ;;  %v8758_v60 = vpack.c.bf16 %v717_v59, %v715_v58  ;;  %v7931_v58 = vadd.f32 -1.0, %v10830_v56  ;;  %v551_v59 = vld [vmem:[#allocation7 + $0xe8] sm:$0xff] }
 0x2bb   :  { %1113 = vmatprep.mubr.f32.mxu0 %v10337_v0  ;;  %8733 = vmatpush1.bf16.msra.mxu0 %v8732_v5  ;;  %v544_v5 = vld [vmem:[#allocation7 + $0xb0] sm:$0xff] }
 0x2bc   :  { %8735 = vmatprep.subr.bf16.mxu0 %v8734_v6  ;;  %8946 = vmatprep.subr.bf16.mxu1 %v8738_v13  ;;  %v8760_v6 = vpack.c.bf16 %v716_v2, %v714_v63  ;;  %v10838_v63 = vld [vmem:[#allocation5 + $0x70] sm:$0xff] }
 0x2bd   :  { %2127 = vperm.xlu1 %9041, %v622_v61   ;;  %2117 = vperm.xlu0 %9040, %v620_v62   ;;  %v630_v61 = vmul.f32 1e+30, %v7931_v58  ;;  %v10836_v62 = vld [vmem:[#allocation5 + $0x78] sm:$0xff]  ;;  %v7933_v2 = vadd.f32 -1.0, %v10838_v63  ;;  %v10885_v58 = vld [vmem:[#allocation5 + $0xe0] sm:$0xff] }
 0x2be   :  { %7962 = vmatmul.mubr.msk.f32.gmra.mrb[18].mxu0 %vm910_vm1, %v529_v4  ;;  %8962 = vmatpush1.bf16.msra.mxu1 %v8740_v19  ;;  %v10787_v4 = vld [vmem:[#allocation5 + $0x18] sm:$0xff]  ;;  %v7934_v1 = vadd.f32 -1.0, %v10836_v62 }
 0x2bf   :  { %1119 = vmatprep.mubr.f32.mxu0 %v10337_v0  ;;  %8737 = vmatpush1.bf16.msra.mxu0 %v8736_v12  ;;  %v7922_v8 = vadd.f32 -1.0, %v10787_v4  ;;  %v623_v12 = vmul.f32 1e+30, %v7924_v7  ;;  %v632_v7 = vmul.f32 1e+30, %v7933_v2  ;;  %v10889_v2 = vld [vmem:[#allocation5 + $0xf8] sm:$0xff] }
 0x2c0   :  { %8739 = vmatprep.subr.bf16.mxu0 %v8738_v13  ;;  %8947 = vmatprep.subr.bf16.mxu1 %v8742_v20 }
 0x2c1   :  { %v621_v13 = vmul.f32 1e+30, %v7922_v8  ;;  %2132 = vperm.xlu1 %9041, %v623_v12   ;;  %v10844_v8 = vld [vmem:[#allocation5 + $0x98] sm:$0xff] }
 0x2c2   :  { %7963 = vmatmul.mubr.msk.f32.gmra.mrb[20].mxu0 %vm910_vm1, %v530_v11  ;;  %8963 = vmatpush1.bf16.msra.mxu1 %v8744_v26  ;;  %v8762_v11 = vpack.c.bf16 %v721_v10, %v719_v9  ;;  %v10846_v9 = vld [vmem:[#allocation5 + $0x90] sm:$0xff]  ;;  %v7938_v10 = vadd.f32 -1.0, %v10844_v8  ;;  %v553_v12 = vld [vmem:[#allocation7 + $0xf8] sm:$0xff] }
 0x2c3   :  { %1125 = vmatprep.mubr.f32.mxu0 %v10337_v0  ;;  %8741 = vmatpush1.bf16.msra.mxu0 %v8740_v19  ;;  %v10796_v19 = vld [vmem:[#allocation5] sm:$0xff] }
 0x2c4   :  { %8743 = vmatprep.subr.bf16.mxu0 %v8742_v20  ;;  %8948 = vmatprep.subr.bf16.mxu1 %v8746_v27  ;;  %v7919_v21 = vadd.f32 -1.0, %v10796_v19 }
 0x2c5   :  { %2122 = vperm.xlu0 %9040, %v621_v13   ;;  %v637_v13 = vmul.f32 1e+30, %v7938_v10 }
 0x2c6   :  { %7964 = vmatmul.mubr.msk.f32.gmra.mrb[22].mxu0 %vm910_vm1, %v531_v18  ;;  %8964 = vmatpush1.bf16.msra.mxu1 %v8748_v31  ;;  %v10794_v18 = vld [vmem:[#allocation5 + $0x8] sm:$0xff] }
 0x2c7   :  { %1131 = vmatprep.mubr.f32.mxu0 %v10337_v0  ;;  %8745 = vmatpush1.bf16.msra.mxu0 %v8744_v26  ;;  %v7920_v20 = vadd.f32 -1.0, %v10794_v18 }
 0x2c8   :  { %8747 = vmatprep.subr.bf16.mxu0 %v8746_v27  ;;  %8949 = vmatprep.subr.bf16.mxu1 %v8750_v42  ;;  %v618_v27 = vmul.f32 1e+30, %v7919_v21 }
 0x2c9   :  { %v619_v26 = vmul.f32 1e+30, %v7920_v20 }
 0x2ca   :  { %7965 = vmatmul.mubr.msk.f32.gmra.mrb[24].mxu0 %vm910_vm1, %v532_v25  ;;  %8965 = vmatpush1.bf16.msra.mxu1 %v8752_v45  ;;  %v8766_v25 = vpack.c.bf16 %v725_v24, %v723_v23  ;;  %v10859_v23 = vld [vmem:[#allocation5 + $0x88] sm:$0xff]  ;;  %v10861_v24 = vld [vmem:[#allocation5 + $0x80] sm:$0xff] }
 0x2cb   :  { %1137 = vmatprep.mubr.f32.mxu0 %v10337_v0  ;;  %8749 = vmatpush1.bf16.msra.mxu0 %v8748_v31  ;;  %v10802_v31 = vld [vmem:[#allocation5 + $0x38] sm:$0xff] }
 0x2cc   :  { %8751 = vmatprep.subr.bf16.mxu0 %v8750_v42  ;;  %8950 = vmatprep.subr.bf16.mxu1 %v8754_v49  ;;  %v7927_v42 = vadd.f32 -1.0, %v10814_v40 }
 0x2cd   :  { %2112 = vperm.xlu1 %9041, %v619_v26   ;;  %2107 = vperm.xlu0 %9040, %v618_v27   ;;  %v7935_v26 = vadd.f32 -1.0, %v10861_v24 }
 0x2ce   :  { %7966 = vmatmul.mubr.msk.f32.gmra.mrb[26].mxu0 %vm910_vm1, %v533_v30  ;;  %8966 = vmatpush1.bf16.msra.mxu1 %v8756_v52  ;;  %v8768_v30 = vpack.c.bf16 %v724_v29, %v722_v28  ;;  %v626_v44 = vmul.f32 1e+30, %v7927_v42  ;;  %v10865_v29 = vld [vmem:[#allocation5 + $0xb8] sm:$0xff] }
 0x2cf   :  { %1143 = vmatprep.mubr.f32.mxu0 %v10337_v0  ;;  %8753 = vmatpush1.bf16.msra.mxu0 %v8752_v45  ;;  %v549_v45 = vld [vmem:[#allocation7 + $0xd8] sm:$0xff]  ;;  %v634_v28 = vmul.f32 1e+30, %v7935_v26 }
 0x2d0   :  { %8755 = vmatprep.subr.bf16.mxu0 %v8754_v49  ;;  %8951 = vmatprep.subr.bf16.mxu1 %v8758_v60  ;;  %v7929_v49 = vadd.f32 -1.0, %v10822_v47 }
 0x2d2   :  { %7967 = vmatmul.mubr.msk.f32.gmra.mrb[28].mxu0 %vm910_vm1, %v534_v32  ;;  %8967 = vmatpush1.bf16.msra.mxu1 %v8760_v6  ;;  %v10804_v32 = vld [vmem:[#allocation5 + $0x30] sm:$0xff] }
 0x2d3   :  { %1149 = vmatprep.mubr.f32.mxu0 %v10337_v0  ;;  %8757 = vmatpush1.bf16.msra.mxu0 %v8756_v52  ;;  %v628_v52 = vmul.f32 1e+30, %v7929_v49 }
 0x2d4   :  { %8759 = vmatprep.subr.bf16.mxu0 %v8758_v60  ;;  %8952 = vmatprep.subr.bf16.mxu1 %v8762_v11 }
 0x2d6   :  { %7968 = vmatmul.mubr.msk.f32.gmra.mrb[30].mxu0 %vm910_vm1, %v535_v33  ;;  %8968 = vmatpush1.bf16.msra.mxu1 %v8764_v16  ;;  %v7926_v33 = vadd.f32 -1.0, %v10802_v31 }
 0x2d7   :  { %1155 = vmatprep.mubr.f32.mxu0 %v10337_v0  ;;  %8761 = vmatpush1.bf16.msra.mxu0 %v8760_v6  ;;  %v633_v6 = vmul.f32 1e+30, %v7934_v1 }
 0x2d8   :  { %8763 = vmatprep.subr.bf16.mxu0 %v8762_v11  ;;  %8953 = vmatprep.subr.bf16.mxu1 %v8766_v25  ;;  %v7937_v11 = vadd.f32 -1.0, %v10846_v9 }
 0x2da   :  { %7969 = vmatmul.mubr.msk.f32.gmra.mrb[32].mxu0 %vm910_vm1, %v536_v34  ;;  %v7925_v34 = vadd.f32 -1.0, %v10804_v32  ;;  %8969 = vmatpush1.bf16.msra.mxu1 %v8768_v30  ;;  %v636_v14 = vmul.f32 1e+30, %v7937_v11 }
 0x2db   :  { %1161 = vmatprep.mubr.f32.mxu0 %v10337_v0  ;;  %8765 = vmatpush1.bf16.msra.mxu0 %v8764_v16  ;;  %v10854_v16 = vld [vmem:[#allocation5 + $0xa0] sm:$0xff] }
 0x2dc   :  { %8767 = vmatprep.subr.bf16.mxu0 %v8766_v25  ;;  %v7939_v20 = vadd.f32 -1.0, %v10854_v16  ;;  %v7936_v25 = vadd.f32 -1.0, %v10859_v23 }
 0x2de   :  { %7970 = vmatmul.mubr.msk.f32.gmra.mrb[34].mxu0 %vm910_vm1, %v537_v35  ;;  %v547_v35 = vld [vmem:[#allocation7 + $0xc8] sm:$0xff]  ;;  %v635_v27 = vmul.f32 1e+30, %v7936_v25 }
 0x2df   :  { %1167 = vmatprep.mubr.f32.mxu0 %v10337_v0  ;;  %8769 = vmatpush1.bf16.msra.mxu0 %v8768_v30  ;;  %v10867_v30 = vld [vmem:[#allocation5 + $0xb0] sm:$0xff] }
 0x2e2   :  { %7971 = vmatmul.mubr.msk.f32.gmra.mrb[36].mxu0 %vm910_vm1, %v538_v36  ;;  %v625_v36 = vmul.f32 1e+30, %v7926_v33  ;;  %v7942_v33 = vadd.f32 -1.0, %v10865_v29 }
 0x2e3   :  { %1173 = vmatprep.mubr.f32.mxu0 %v10337_v0 }
 0x2e4   :  { %2142 = vperm.xlu1 %9041, %v625_v36  }
 0x2e6   :  { %7972 = vmatmul.mubr.msk.f32.gmra.mrb[38].mxu0 %vm910_vm1, %v539_v37  ;;  %v624_v37 = vmul.f32 1e+30, %v7925_v34  ;;  %v7941_v34 = vadd.f32 -1.0, %v10867_v30 }
 0x2e7   :  { %1179 = vmatprep.mubr.f32.mxu0 %v10337_v0 }
 0x2e8   :  { %2137 = vperm.xlu0 %9040, %v624_v37   ;;  %v640_v36 = vmul.f32 1e+30, %v7941_v34  ;;  %v10871_v37 = vld [vmem:[#allocation5 + $0xc8] sm:$0xff] }
 0x2ea   :  { %7973 = vmatmul.mubr.msk.f32.gmra.mrb[40].mxu0 %vm910_vm1, %v540_v38  ;;  %v548_v38 = vld [vmem:[#allocation7 + $0xd0] sm:$0xff] }
 0x2eb   :  { %1185 = vmatprep.mubr.f32.mxu0 %v10337_v0 }
 0x2ec   :  { %2147 = vperm.xlu0 %9040, %v626_v44  }
 0x2ee   :  { %7974 = vmatmul.mubr.msk.f32.gmra.mrb[42].mxu0 %vm910_vm1, %v541_v39  ;;  %v10812_v39 = vld [vmem:[#allocation5 + $0x48] sm:$0xff] }
 0x2ef   :  { %1191 = vmatprep.mubr.f32.mxu0 %v10337_v0  ;;  %v7928_v41 = vadd.f32 -1.0, %v10812_v39 }
 0x2f0   :  { %2157 = vperm.xlu0 %9040, %v628_v52  }
 0x2f1   :  { %v627_v43 = vmul.f32 1e+30, %v7928_v41  ;;  %v7944_v41 = vadd.f32 -1.0, %v10871_v37 }
 0x2f2   :  { %7975 = vmatmul.mubr.msk.f32.gmra.mrb[44].mxu0 %vm910_vm1, %v542_v46  ;;  %v10820_v46 = vld [vmem:[#allocation5 + $0x58] sm:$0xff] }
 0x2f3   :  { %1197 = vmatprep.mubr.f32.mxu0 %v10337_v0  ;;  %2152 = vperm.xlu1 %9041, %v627_v43   ;;  %v7930_v48 = vadd.f32 -1.0, %v10820_v46  ;;  %v643_v43 = vmul.f32 1e+30, %v7944_v41 }
 0x2f4   :  { %2167 = vperm.xlu0 %9040, %v630_v61  }
 0x2f5   :  { %v629_v51 = vmul.f32 1e+30, %v7930_v48  ;;  %v10879_v48 = vld [vmem:[#allocation5 + $0xd0] sm:$0xff] }
 0x2f6   :  { %7976 = vmatmul.mubr.msk.f32.gmra.mrb[46].mxu0 %vm910_vm1, %v543_v55  ;;  %v10828_v55 = vld [vmem:[#allocation5 + $0x68] sm:$0xff] }
 0x2f7   :  { %1203 = vmatprep.mubr.f32.mxu0 %v10337_v0  ;;  %2162 = vperm.xlu1 %9041, %v629_v51   ;;  %v7932_v57 = vadd.f32 -1.0, %v10828_v55 }
 0x2f8   :  { %2177 = vperm.xlu0 %9040, %v632_v7  }
 0x2f9   :  { %v631_v60 = vmul.f32 1e+30, %v7932_v57  ;;  %v10883_v57 = vld [vmem:[#allocation5 + $0xe8] sm:$0xff] }
 0x2fa   :  { %7977 = vmatmul.mubr.msk.f32.gmra.mrb[48].mxu0 %vm910_vm1, %v544_v5  ;;  %v552_v5 = vld [vmem:[#allocation7 + $0xf0] sm:$0xff] }
 0x2fb   :  { %1209 = vmatprep.mubr.f32.mxu0 %v10337_v0  ;;  %2172 = vperm.xlu1 %9041, %v631_v60   ;;  %v7947_v60 = vadd.f32 -1.0, %v10885_v58 }
 0x2fc   :  { %2197 = vperm.xlu0 %9040, %v636_v14  }
 0x2fd   :  { %v646_v1 = vmul.f32 1e+30, %v7947_v60 }
 0x2fe   :  { %7978 = vmatmul.mubr.msk.f32.gmra.mrb[50].mxu0 %vm910_vm1, %v545_v17  ;;  %v7940_v17 = vadd.f32 -1.0, %v10852_v15 }
 0x2ff   :  { %1215 = vmatprep.mubr.f32.mxu0 %v10337_v0  ;;  %2182 = vperm.xlu1 %9041, %v633_v6   ;;  %v7950_v6 = vadd.f32 -1.0, %v10889_v2 }
 0x300   :  { %v639_v21 = vmul.f32 1e+30, %v7940_v17 }
 0x301   :  { %v649_v10 = vmul.f32 1e+30, %v7950_v6 }
 0x302   :  { %7979 = vmatmul.mubr.msk.f32.gmra.mrb[52].mxu0 %vm910_vm1, %v546_v22  ;;  %v638_v22 = vmul.f32 1e+30, %v7939_v20 }
 0x303   :  { %1221 = vmatprep.mubr.f32.mxu0 %v10337_v0  ;;  %2202 = vperm.xlu1 %9041, %v637_v13   ;;  %v3623_v13 = vld [vmem:[#allocation19 + $0x18] sm:$0xff] }
 0x304   :  { %2207 = vperm.xlu0 %9040, %v638_v22  }
 0x306   :  { %7980 = vmatmul.mubr.msk.f32.gmra.mrb[54].mxu0 %vm910_vm1, %v547_v35  ;;  %v641_v35 = vmul.f32 1e+30, %v7942_v33 }
 0x307   :  { %1227 = vmatprep.mubr.f32.mxu0 %v10337_v0  ;;  %2212 = vperm.xlu1 %9041, %v639_v21  }
 0x308   :  { %2187 = vperm.xlu0 %9040, %v634_v28  }
 0x30a   :  { %7981 = vmatmul.mubr.msk.f32.gmra.mrb[56].mxu0 %vm910_vm1, %v548_v38  ;;  %v10873_v38 = vld [vmem:[#allocation5 + $0xc0] sm:$0xff] }
 0x30b   :  { %1233 = vmatprep.mubr.f32.mxu0 %v10337_v0  ;;  %2192 = vperm.xlu1 %9041, %v635_v27   ;;  %v7943_v42 = vadd.f32 -1.0, %v10873_v38 }
 0x30c   :  { %2217 = vperm.xlu0 %9040, %v640_v36  }
 0x30d   :  { %v642_v44 = vmul.f32 1e+30, %v7943_v42 }
 0x30e   :  { %7982 = vmatmul.mubr.msk.f32.gmra.mrb[58].mxu0 %vm910_vm1, %v549_v45  ;;  %v10877_v45 = vld [vmem:[#allocation5 + $0xd8] sm:$0xff] }
 0x30f   :  { %1239 = vmatprep.mubr.f32.mxu0 %v10337_v0  ;;  %2222 = vperm.xlu1 %9041, %v641_v35   ;;  %v7946_v49 = vadd.f32 -1.0, %v10877_v45 }
 0x310   :  { %2227 = vperm.xlu0 %9040, %v642_v44  }
 0x311   :  { %v645_v51 = vmul.f32 1e+30, %v7946_v49 }
 0x312   :  { %7983 = vmatmul.mubr.msk.f32.gmra.mrb[60].mxu0 %vm910_vm1, %v550_v50  ;;  %v7945_v50 = vadd.f32 -1.0, %v10879_v48 }
 0x313   :  { %1245 = vmatprep.mubr.f32.mxu0 %v10337_v0  ;;  %2232 = vperm.xlu1 %9041, %v643_v43  }
 0x314   :  { %v644_v52 = vmul.f32 1e+30, %v7945_v50 }
 0x316   :  { %7984 = vmatmul.mubr.msk.f32.gmra.mrb[62].mxu0 %vm910_vm1, %v551_v59  ;;  %2237 = vperm.xlu0 %9040, %v644_v52   ;;  %v7948_v59 = vadd.f32 -1.0, %v10883_v57 }
 0x317   :  { %1251 = vmatprep.mubr.f32.mxu0 %v10337_v0  ;;  %2242 = vperm.xlu1 %9041, %v645_v51  }
 0x318   :  { %v647_v61 = vmul.f32 1e+30, %v7948_v59  ;;  %v3622_v59 = vld [vmem:[#allocation19 + $0x10] sm:$0xff] }
 0x31a   :  { %7985 = vmatmul.mubr.msk.f32.gmra.mrb[64].mxu0 %vm910_vm1, %v552_v5  ;;  %v10891_v5 = vld [vmem:[#allocation5 + $0xf0] sm:$0xff]  ;;  %2247 = vperm.xlu0 %9040, %v646_v1  }
 0x31b   :  { %1257 = vmatprep.mubr.f32.mxu0 %v10337_v0  ;;  %2252 = vperm.xlu1 %9041, %v647_v61   ;;  %v7949_v7 = vadd.f32 -1.0, %v10891_v5 }
 0x31d   :  { %v648_v11 = vmul.f32 1e+30, %v7949_v7 }
 0x31e   :  { %7986 = vmatmul.mubr.msk.f32.gmra.mrb[66].mxu0 %vm910_vm1, %v553_v12  ;;  %v3621_v12 = vld [vmem:[#allocation19 + $0x8] sm:$0xff] }
 0x31f   :  { %2262 = vperm.xlu1 %9041, %v649_v10   ;;  %2257 = vperm.xlu0 %9040, %v648_v11   ;;  %v8770_v14 = vpack.c.bf16 %v3623_v13, %v3621_v12 }
 0x321   :  { %8771 = vmatprep.subr.bf16.mxu0 %v8770_v14 }
 0x323   :  { %2762 = vperm.xlu1 %9041, %v10787_v4   ;;  %2757 = vperm.xlu0 %9040, %v10779_v54   ;;  %v659_v4 = vld [vmem:[#allocation13] sm:$0x3] }
 0x327   :  { %2772 = vperm.xlu1 %9041, %v10785_v3   ;;  %2767 = vperm.xlu0 %9040, %v10777_v53   ;;  %v728_v53 = vlaneseq }
 0x329   :  { %v729_v54 = vshrl.u32 %v728_v53, 7 }
 0x32b   :  { %2752 = vperm.xlu1 %9041, %v10794_v18   ;;  %2747 = vperm.xlu0 %9040, %v10796_v19   ;;  %v10917_v3 = vsub.s32 0, %v729_v54  ;;  %v10919_v18 = vsub.s32 1, %v729_v54  ;;  %v10339_v19 = vmov 1966171168  }
 0x32d   :  { %13679 = vst [vmem:[#allocation82_spill] sm:$0xff] %v10917_v3  ;;  %13680 = vst [vmem:[#allocation83_spill] sm:$0xff] %v10919_v18 }
 0x32f   :  { %2782 = vperm.xlu1 %9041, %v10802_v31   ;;  %2777 = vperm.xlu0 %9040, %v10804_v32   ;;  %v1271_v31 = vunpack.c.l.s4 %v10339_v19  ;;  %v826_v32 = vrot.slane %v659_v4, %v10917_v3 }
 0x333   :  { %2792 = vperm.xlu1 %9041, %v10812_v39   ;;  %2787 = vperm.xlu0 %9040, %v10814_v40   ;;  %v830_v39 = vrot.slane %v659_v4, %v10919_v18  ;;  %v1272_v40 = vunpack.c.0.s8 %v1271_v31 }
 0x337   :  { %2802 = vperm.xlu1 %9041, %v10820_v46   ;;  %2797 = vperm.xlu0 %9040, %v10822_v47  }
 0x33b   :  { %2812 = vperm.xlu1 %9041, %v10828_v55   ;;  %2807 = vperm.xlu0 %9040, %v10830_v56  }
 0x33f   :  { %2822 = vperm.xlu1 %9041, %v10836_v62   ;;  %2817 = vperm.xlu0 %9040, %v10838_v63   ;;  %v654_v63 = vld [vmem:[#allocation10] sm:$0x3] }
 0x340   :  { %v731_v22 = vrot.slane %v654_v63, %v10917_v3 }
 0x343   :  { %2842 = vperm.xlu1 %9041, %v10844_v8   ;;  %2837 = vperm.xlu0 %9040, %v10846_v9   ;;  %v10931_v9 = vsub.s32 %v1272_v40, %v729_v54 }
 0x345   :  { %13681 = vst [vmem:[#allocation84_spill] sm:$0xff] %v10931_v9 }
 0x347   :  { %2852 = vperm.xlu1 %9041, %v10852_v15   ;;  %2847 = vperm.xlu0 %9040, %v10854_v16  }
 0x34b   :  { %2832 = vperm.xlu1 %9041, %v10859_v23   ;;  %2827 = vperm.xlu0 %9040, %v10861_v24   ;;  %v735_v23 = vrot.slane %v654_v63, %v10919_v18 }
 0x34f   :  { %2862 = vperm.xlu1 %9041, %v10865_v29   ;;  %2857 = vperm.xlu0 %9040, %v10867_v30  }
 0x353   :  { %2872 = vperm.xlu1 %9041, %v10871_v37   ;;  %2867 = vperm.xlu0 %9040, %v10873_v38  }
 0x357   :  { %2882 = vperm.xlu1 %9041, %v10877_v45   ;;  %2877 = vperm.xlu0 %9040, %v10879_v48  }
 0x35b   :  { %2892 = vperm.xlu1 %9041, %v10883_v57   ;;  %2887 = vperm.xlu0 %9040, %v10885_v58   ;;  %v3620_v58 = vld [vmem:[#allocation19] sm:$0xff] }
 0x35c   :  { %v8772_v11 = vpack.c.bf16 %v3622_v59, %v3620_v58 }
 0x35f   :  { %2902 = vperm.xlu1 %9041, %v10889_v2   ;;  %2897 = vperm.xlu0 %9040, %v10891_v5  }
 0x36d   :  { %v811_v46 = vpop.f32.mrb[0].mxu0 }
 0x36e   :  { %v899_v47 = vpop.f32.mrb[0].mxu1  ;;  %v813_v55 = vpop.f32.mrb[1].mxu0  ;;  %v10949_v34 = vadd.f32 %v811_v46, %v731_v22 }
 0x36f   :  { %v10927_v56 = vadd.f32 %v899_v47, %v826_v32  ;;  %v901_v62 = vpop.f32.mrb[1].mxu1  ;;  %v10951_v35 = vadd.f32 %v813_v55, %v735_v23 }
 0x370   :  { %v10929_v8 = vadd.f32 %v901_v62, %v830_v39 }
 0x371   :  { %v817_v15 = vpop.f32.mrb[2].mxu0 }
 0x372   :  { %v1268_v16 = vcombine.low %v10927_v56, %v10929_v8  ;;  %v1269_v17 = vcombine.high %v10927_v56, %v10929_v8  ;;  %v905_v20 = vpop.f32.mrb[2].mxu1  ;;  %v819_v21 = vpop.f32.mrb[3].mxu0  ;;  %v10957_v38 = vadd.f32 %v817_v15, %v731_v22 }
 0x373   :  { %v10941_v24 = vadd.f32 %v905_v20, %v826_v32  ;;  %v907_v25 = vpop.f32.mrb[3].mxu1  ;;  %v10959_v41 = vadd.f32 %v819_v21, %v735_v23 }
 0x374   :  { %v1276_v26 = vrot.slane %v1268_v16, %v10931_v9  ;;  %v10944_v27 = vadd.f32 %v907_v25, %v830_v39 }
 0x375   :  { %v1073_v28 = vpop.f32.mrb[4].mxu0 }
 0x376   :  { %v1284_v29 = vcombine.high %v1276_v26, %v1276_v26  ;;  %v1292_v30 = vrot.slane %v1276_v26, %v10931_v9  ;;  %v1075_v33 = vpop.f32.mrb[5].mxu0  ;;  %v1318_v36 = vcombine.low %v10941_v24, %v10944_v27  ;;  %v1319_v37 = vcombine.high %v10941_v24, %v10944_v27 }
 0x378   :  { %v1371_v42 = vrot.slane %v1292_v30, %v10917_v3  ;;  %v1375_v43 = vrot.slane %v1292_v30, %v10919_v18  ;;  %v10964_v44 = vrot.slane %v1284_v29, %v10931_v9  ;;  %v1314_v48 = vcombine.high %v1292_v30, %v1292_v30 }
 0x379   :  { %v1079_v45 = vpop.f32.mrb[6].mxu0 }
 0x37a   :  { %v1528_v49 = vadd.f32 %v1371_v42, %v10949_v34  ;;  %v1529_v50 = vadd.f32 %v1375_v43, %v10951_v35  ;;  %v1530_v51 = vadd.f32 %v1371_v42, %v10957_v38  ;;  %v1081_v52 = vpop.f32.mrb[7].mxu0  ;;  %v1531_v57 = vadd.f32 %v1375_v43, %v10959_v41 }
 0x37b   :  { %v1379_v2 = vrot.slane %v10964_v44, %v10917_v3  ;;  %v1383_v10 = vrot.slane %v10964_v44, %v10919_v18  ;;  %v1387_v53 = vrot.slane %v1314_v48, %v10917_v3  ;;  %v1391_v25 = vrot.slane %v1314_v48, %v10919_v18 }
 0x37c   :  { %v1592_v60 = vadd.f32 %v1528_v49, %v1073_v28  ;;  %v1593_v61 = vadd.f32 %v1529_v50, %v1075_v33  ;;  %v1594_v1 = vadd.f32 %v1530_v51, %v1079_v45  ;;  %v1595_v6 = vadd.f32 %v1531_v57, %v1081_v52 }
 0x37d   :  { %v1085_v7 = vpop.f32.mrb[8].mxu0  ;;  %v1532_v4 = vadd.f32 %v1379_v2, %v10949_v34  ;;  %v1533_v19 = vadd.f32 %v1383_v10, %v10951_v35  ;;  %v1534_v32 = vadd.f32 %v1379_v2, %v10957_v38  ;;  %v1535_v39 = vadd.f32 %v1383_v10, %v10959_v41  ;;  %v9466_v10 = vld [vmem:[#allocation2] sm:$0xff] }
 0x37e   :  { %vm1656_vm2 = vcmp.gt.f32.partialorder %v1592_v60, 0.0  ;;  %v1720_v12 = vmul.f32 0.2, %v1592_v60  ;;  %v1721_v13 = vmul.f32 0.2, %v1593_v61  ;;  %v1087_v14 = vpop.f32.mrb[9].mxu0  ;;  %v1536_v23 = vadd.f32 %v1387_v53, %v10949_v34 }
 0x37f   :  { %v1722_v54 = vmul.f32 0.2, %v1594_v1  ;;  %v1723_v5 = vmul.f32 0.2, %v1595_v6  ;;  %vm1657_vm3 = vcmp.gt.f32.partialorder %v1593_v61, 0.0  ;;  %v1596_v40 = vadd.f32 %v1532_v4, %v1085_v7 }
 0x380   :  { %v1784_v31 = vsel %vm1656_vm2, %v1592_v60, %v1720_v12  ;;  %v1597_v46 = vadd.f32 %v1533_v19, %v1087_v14  ;;  %v1785_v47 = vsel %vm1657_vm3, %v1593_v61, %v1721_v13  ;;  %vm1659_vm4 = vcmp.gt.f32.partialorder %v1595_v6, 0.0 }
 0x381   :  { %v1091_v55 = vpop.f32.mrb[10].mxu0  ;;  %1912 = vmatprep.mubr.f32.mxu0 %v1785_v47  ;;  %v1787_v15 = vsel %vm1659_vm4, %v1595_v6, %v1723_v5  ;;  %vm1658_vm5 = vcmp.gt.f32.partialorder %v1594_v1, 0.0  ;;  %vm1660_vm6 = vcmp.gt.f32.partialorder %v1596_v40, 0.0  ;;  %v1724_v16 = vmul.f32 0.2, %v1596_v40 }
 0x382   :  { %v1598_v62 = vadd.f32 %v1534_v32, %v1091_v55  ;;  %v1093_v63 = vpop.f32.mrb[11].mxu0  ;;  %v1725_v20 = vmul.f32 0.2, %v1597_v46  ;;  %1913 = vmatmul.mubr.f32.vlgmr.msra.gmra.mrb[68].mxu0 %v1784_v31  ;;  %vm1661_vm7 = vcmp.gt.f32.partialorder %v1597_v46, 0.0  ;;  %v1786_v30 = vsel %vm1658_vm5, %v1594_v1, %v1722_v54 }
 0x383   :  { %v1599_v21 = vadd.f32 %v1535_v39, %v1093_v63  ;;  %1918 = vmatprep.mubr.f32.mxu0 %v1787_v15  ;;  %8773 = vmatpush1.bf16.msra.mxu0 %v8772_v11  ;;  %v1788_v33 = vsel %vm1660_vm6, %v1596_v40, %v1724_v16  ;;  %v1537_v45 = vadd.f32 %v1391_v25, %v10951_v35  ;;  %v9467_v40 = vld [vmem:[#allocation2 + $0x8] sm:$0xff] }
 0x384   :  { %v1726_v22 = vmul.f32 0.2, %v1598_v62  ;;  %v1789_v28 = vsel %vm1661_vm7, %v1597_v46, %v1725_v20  ;;  %vm1662_vm9 = vcmp.gt.f32.partialorder %v1598_v62, 0.0  ;;  %v1283_v49 = vrot.slane %v1269_v17, %v10931_v9 }
 0x385   :  { %v1727_v26 = vmul.f32 0.2, %v1599_v21  ;;  %v1097_v29 = vpop.f32.mrb[12].mxu0  ;;  %vm1663_vm8 = vcmp.gt.f32.partialorder %v1599_v21, 0.0  ;;  %1924 = vmatprep.mubr.f32.mxu1 %v1789_v28  ;;  %v1538_v51 = vadd.f32 %v1387_v53, %v10957_v38  ;;  %v1316_v52 = vcombine.high %v10964_v44, %v10964_v44 }
 0x386   :  { %v1600_v42 = vadd.f32 %v1536_v23, %v1097_v29  ;;  %v1099_v43 = vpop.f32.mrb[13].mxu0  ;;  %1919 = vmatmul.mubr.f32.gmra.mrb[70].mxu0 %v1786_v30  ;;  %1925 = vmatmul.mubr.f32.vlgmr.msra.gmra.mrb[4].mxu1 %v1788_v33  ;;  %v1790_v59 = vsel %vm1662_vm9, %v1598_v62, %v1726_v22  ;;  %v1539_v60 = vadd.f32 %v1391_v25, %v10959_v41 }
 0x387   :  { %v1791_v48 = vsel %vm1663_vm8, %v1599_v21, %v1727_v26  ;;  %v1601_v50 = vadd.f32 %v1537_v45, %v1099_v43  ;;  %3700 = vmatprep.mubr.f32.mxu0 %v10337_v0  ;;  %v1395_v17 = vrot.slane %v1316_v52, %v10917_v3  ;;  %v1399_v6 = vrot.slane %v1316_v52, %v10919_v18 }
 0x388   :  { %1930 = vmatprep.mubr.f32.mxu1 %v1791_v48  ;;  %v1728_v57 = vmul.f32 0.2, %v1600_v42  ;;  %vm1664_vm11 = vcmp.gt.f32.partialorder %v1600_v42, 0.0  ;;  %v10997_v44 = vrot.slane %v1283_v49, %v10931_v9  ;;  %v1285_v31 = vcombine.high %v1283_v49, %v1283_v49 }
 0x389   :  { %v1103_v58 = vpop.f32.mrb[14].mxu0  ;;  %v1729_v61 = vmul.f32 0.2, %v1601_v50  ;;  %vm1665_vm10 = vcmp.gt.f32.partialorder %v1601_v50, 0.0  ;;  %v1540_v2 = vadd.f32 %v1395_v17, %v10949_v34  ;;  %v1541_v13 = vadd.f32 %v1399_v6, %v10951_v35 }
 0x38a   :  { %v1602_v56 = vadd.f32 %v1538_v51, %v1103_v58  ;;  %v1105_v8 = vpop.f32.mrb[15].mxu0  ;;  %1931 = vmatmul.mubr.f32.gmra.mrb[6].mxu1 %v1790_v59  ;;  %7987 = vmatmul.mubr.msk.f32.vlgmr.msra.gmra.mrb[72].mxu0 %vm13650_vm0, %v9466_v10  ;;  %v1792_v54 = vsel %vm1664_vm11, %v1600_v42, %v1728_v57  ;;  %v1542_v32 = vadd.f32 %v1395_v17, %v10957_v38 }
 0x38b   :  { %v1603_v1 = vadd.f32 %v1539_v60, %v1105_v8  ;;  %v1793_v7 = vsel %vm1665_vm10, %v1601_v50, %v1729_v61  ;;  %3706 = vmatprep.mubr.f32.mxu0 %v10337_v0  ;;  %v1403_v39 = vrot.slane %v10997_v44, %v10917_v3  ;;  %v1543_v47 = vadd.f32 %v1399_v6, %v10959_v41 }
 0x38c   :  { %1936 = vmatprep.mubr.f32.mxu1 %v1793_v7  ;;  %v1730_v14 = vmul.f32 0.2, %v1602_v56  ;;  %vm1666_vm13 = vcmp.gt.f32.partialorder %v1602_v56, 0.0  ;;  %v1407_v55 = vrot.slane %v10997_v44, %v10919_v18  ;;  %v11011_v22 = vrot.slane %v1285_v31, %v10931_v9 }
 0x38d   :  { %v1731_v11 = vmul.f32 0.2, %v1603_v1  ;;  %v1109_v12 = vpop.f32.mrb[16].mxu0  ;;  %vm1667_vm12 = vcmp.gt.f32.partialorder %v1603_v1, 0.0  ;;  %v1544_v23 = vadd.f32 %v1403_v39, %v10949_v34  ;;  %v1546_v49 = vadd.f32 %v1403_v39, %v10957_v38 }
 0x38e   :  { %v1604_v53 = vadd.f32 %v1540_v2, %v1109_v12  ;;  %v1111_v5 = vpop.f32.mrb[17].mxu0  ;;  %1937 = vmatmul.mubr.f32.gmra.mrb[8].mxu1 %v1792_v54  ;;  %7988 = vmatmul.mubr.msk.f32.gmra.mrb[74].mxu0 %vm13650_vm0, %v9467_v40  ;;  %v1794_v15 = vsel %vm1666_vm13, %v1602_v56, %v1730_v14  ;;  %v1545_v28 = vadd.f32 %v1407_v55, %v10951_v35 }
 0x38f   :  { %v1605_v4 = vadd.f32 %v1541_v13, %v1111_v5  ;;  %v1795_v19 = vsel %vm1667_vm12, %v1603_v1, %v1731_v11  ;;  %v1411_v48 = vrot.slane %v11011_v22, %v10917_v3  ;;  %v1547_v52 = vadd.f32 %v1407_v55, %v10959_v41 }
 0x390   :  { %1942 = vmatprep.mubr.f32.mxu1 %v1795_v19  ;;  %v1732_v62 = vmul.f32 0.2, %v1604_v53  ;;  %vm1668_vm15 = vcmp.gt.f32.partialorder %v1604_v53, 0.0  ;;  %v1415_v57 = vrot.slane %v11011_v22, %v10919_v18  ;;  %v1315_v1 = vcombine.high %v10997_v44, %v10997_v44 }
 0x391   :  { %v1733_v46 = vmul.f32 0.2, %v1605_v4  ;;  %v1115_v0 = vpop.f32.mrb[18].mxu0  ;;  %vm1669_vm14 = vcmp.gt.f32.partialorder %v1605_v4, 0.0  ;;  %v1548_v17 = vadd.f32 %v1411_v48, %v10949_v34  ;;  %v1550_v54 = vadd.f32 %v1411_v48, %v10957_v38 }
 0x392   :  { %v1606_v63 = vadd.f32 %v1542_v32, %v1115_v0  ;;  %v1117_v16 = vpop.f32.mrb[19].mxu0  ;;  %1943 = vmatmul.mubr.f32.gmra.mrb[10].mxu1 %v1794_v15  ;;  %v1796_v33 = vsel %vm1668_vm15, %v1604_v53, %v1732_v62  ;;  %v1549_v2 = vadd.f32 %v1415_v57, %v10951_v35  ;;  %v1419_v5 = vrot.slane %v1315_v1, %v10917_v3 }
 0x393   :  { %v1607_v20 = vadd.f32 %v1543_v47, %v1117_v16  ;;  %v1797_v21 = vsel %vm1669_vm14, %v1605_v4, %v1733_v46  ;;  %v1551_v19 = vadd.f32 %v1415_v57, %v10959_v41  ;;  %v1423_v31 = vrot.slane %v1315_v1, %v10919_v18 }
 0x394   :  { %1948 = vmatprep.mubr.f32.mxu1 %v1797_v21  ;;  %v1734_v29 = vmul.f32 0.2, %v1606_v63  ;;  %vm1670_vm3 = vcmp.gt.f32.partialorder %v1606_v63, 0.0  ;;  %v1552_v55 = vadd.f32 %v1419_v5, %v10949_v34  ;;  %v1317_v62 = vcombine.high %v11011_v22, %v11011_v22 }
 0x395   :  { %v1735_v25 = vmul.f32 0.2, %v1607_v20  ;;  %v1121_v26 = vpop.f32.mrb[20].mxu0  ;;  %vm1671_vm2 = vcmp.gt.f32.partialorder %v1607_v20, 0.0  ;;  %v1553_v16 = vadd.f32 %v1423_v31, %v10951_v35  ;;  %v1554_v22 = vadd.f32 %v1419_v5, %v10957_v38 }
 0x396   :  { %v1608_v30 = vadd.f32 %v1544_v23, %v1121_v26  ;;  %v1123_v42 = vpop.f32.mrb[21].mxu0  ;;  %1949 = vmatmul.mubr.f32.gmra.mrb[12].mxu1 %v1796_v33  ;;  %v1798_v60 = vsel %vm1670_vm3, %v1606_v63, %v1734_v29  ;;  %v1326_v29 = vrot.slane %v1318_v36, %v10931_v9 }
 0x397   :  { %v1609_v43 = vadd.f32 %v1545_v28, %v1123_v42  ;;  %v1799_v45 = vsel %vm1671_vm2, %v1607_v20, %v1735_v25 }
 0x398   :  { %1954 = vmatprep.mubr.f32.mxu1 %v1799_v45  ;;  %v1736_v58 = vmul.f32 0.2, %v1608_v30  ;;  %vm1672_vm5 = vcmp.gt.f32.partialorder %v1608_v30, 0.0  ;;  %v1431_v45 = vrot.slane %v1317_v62, %v10919_v18  ;;  %v11042_v36 = vrot.slane %v1326_v29, %v10931_v9 }
 0x399   :  { %v1737_v50 = vmul.f32 0.2, %v1609_v43  ;;  %v1127_v51 = vpop.f32.mrb[22].mxu0  ;;  %vm1673_vm4 = vcmp.gt.f32.partialorder %v1609_v43, 0.0 }
 0x39a   :  { %v1610_v59 = vadd.f32 %v1546_v49, %v1127_v51  ;;  %v1129_v61 = vpop.f32.mrb[23].mxu0  ;;  %1955 = vmatmul.mubr.f32.gmra.mrb[14].mxu1 %v1798_v60  ;;  %v1800_v12 = vsel %vm1672_vm5, %v1608_v30, %v1736_v58  ;;  %v1427_v30 = vrot.slane %v1317_v62, %v10917_v3 }
 0x39b   :  { %v1611_v56 = vadd.f32 %v1547_v52, %v1129_v61  ;;  %v1801_v8 = vsel %vm1673_vm4, %v1609_v43, %v1737_v50  ;;  %v1555_v43 = vadd.f32 %v1423_v31, %v10959_v41  ;;  %v1557_v61 = vadd.f32 %v1431_v45, %v10951_v35 }
 0x39c   :  { %1960 = vmatprep.mubr.f32.mxu1 %v1801_v8  ;;  %v1738_v10 = vmul.f32 0.2, %v1610_v59  ;;  %vm1674_vm7 = vcmp.gt.f32.partialorder %v1610_v59, 0.0  ;;  %v1556_v58 = vadd.f32 %v1427_v30, %v10949_v34 }
 0x39d   :  { %v1739_v6 = vmul.f32 0.2, %v1611_v56  ;;  %v1133_v7 = vpop.f32.mrb[24].mxu0  ;;  %vm1675_vm6 = vcmp.gt.f32.partialorder %v1611_v56, 0.0 }
 0x39e   :  { %v1612_v11 = vadd.f32 %v1548_v17, %v1133_v7  ;;  %v1135_v13 = vpop.f32.mrb[25].mxu0  ;;  %1961 = vmatmul.mubr.f32.gmra.mrb[16].mxu1 %v1800_v12  ;;  %v1802_v40 = vsel %vm1674_vm7, %v1610_v59, %v1738_v10  ;;  %v1558_v10 = vadd.f32 %v1427_v30, %v10957_v38 }
 0x39f   :  { %v1613_v14 = vadd.f32 %v1549_v2, %v1135_v13  ;;  %v1803_v53 = vsel %vm1675_vm6, %v1611_v56, %v1739_v6  ;;  %v1334_v2 = vcombine.high %v1326_v29, %v1326_v29 }
 0x3a0   :  { %1966 = vmatprep.mubr.f32.mxu1 %v1803_v53  ;;  %v1740_v32 = vmul.f32 0.2, %v1612_v11  ;;  %vm1676_vm9 = vcmp.gt.f32.partialorder %v1612_v11, 0.0  ;;  %v1439_v53 = vrot.slane %v11042_v36, %v10919_v18 }
 0x3a1   :  { %v1741_v4 = vmul.f32 0.2, %v1613_v14  ;;  %v1139_v44 = vpop.f32.mrb[26].mxu0  ;;  %vm1677_vm8 = vcmp.gt.f32.partialorder %v1613_v14, 0.0 }
 0x3a2   :  { %v1614_v39 = vadd.f32 %v1550_v54, %v1139_v44  ;;  %v1141_v46 = vpop.f32.mrb[27].mxu0  ;;  %1967 = vmatmul.mubr.f32.gmra.mrb[18].mxu1 %v1802_v40  ;;  %v1804_v23 = vsel %vm1676_vm9, %v1612_v11, %v1740_v32  ;;  %v1435_v11 = vrot.slane %v11042_v36, %v10917_v3  ;;  %v11053_v32 = vrot.slane %v1334_v2, %v10931_v9 }
 0x3a3   :  { %v1615_v0 = vadd.f32 %v1551_v19, %v1141_v46  ;;  %v1805_v47 = vsel %vm1677_vm8, %v1613_v14, %v1741_v4  ;;  %v1559_v14 = vadd.f32 %v1431_v45, %v10959_v41 }
 0x3a4   :  { %1972 = vmatprep.mubr.f32.mxu1 %v1805_v47  ;;  %v1742_v20 = vmul.f32 0.2, %v1614_v39  ;;  %vm1678_vm11 = vcmp.gt.f32.partialorder %v1614_v39, 0.0 }
 0x3a5   :  { %v1743_v63 = vmul.f32 0.2, %v1615_v0  ;;  %v1145_v15 = vpop.f32.mrb[28].mxu0  ;;  %vm1679_vm10 = vcmp.gt.f32.partialorder %v1615_v0, 0.0 }
 0x3a6   :  { %v1616_v21 = vadd.f32 %v1552_v55, %v1145_v15  ;;  %v1147_v25 = vpop.f32.mrb[29].mxu0  ;;  %1973 = vmatmul.mubr.f32.gmra.mrb[20].mxu1 %v1804_v23  ;;  %v1806_v50 = vsel %vm1678_vm11, %v1614_v39, %v1742_v20  ;;  %v1560_v39 = vadd.f32 %v1435_v11, %v10949_v34  ;;  %v1562_v20 = vadd.f32 %v1435_v11, %v10957_v38 }
 0x3a7   :  { %v1617_v26 = vadd.f32 %v1553_v16, %v1147_v25  ;;  %v1807_v28 = vsel %vm1679_vm10, %v1615_v0, %v1743_v63  ;;  %v1561_v0 = vadd.f32 %v1439_v53, %v10951_v35 }
 0x3a8   :  { %1978 = vmatprep.mubr.f32.mxu1 %v1807_v28  ;;  %v1744_v49 = vmul.f32 0.2, %v1616_v21  ;;  %vm1680_vm13 = vcmp.gt.f32.partialorder %v1616_v21, 0.0  ;;  %v1447_v28 = vrot.slane %v11053_v32, %v10919_v18 }
 0x3a9   :  { %v1745_v33 = vmul.f32 0.2, %v1617_v26  ;;  %v1151_v42 = vpop.f32.mrb[30].mxu0  ;;  %vm1681_vm12 = vcmp.gt.f32.partialorder %v1617_v26, 0.0 }
 0x3aa   :  { %v1618_v48 = vadd.f32 %v1554_v22, %v1151_v42  ;;  %v1153_v51 = vpop.f32.mrb[31].mxu0  ;;  %1979 = vmatmul.mubr.f32.gmra.mrb[22].mxu1 %v1806_v50  ;;  %v1808_v17 = vsel %vm1680_vm13, %v1616_v21, %v1744_v49  ;;  %v1443_v21 = vrot.slane %v11053_v32, %v10917_v3  ;;  %v1364_v49 = vcombine.high %v11042_v36, %v11042_v36 }
 0x3ab   :  { %v1619_v52 = vadd.f32 %v1555_v43, %v1153_v51  ;;  %v1809_v57 = vsel %vm1681_vm12, %v1617_v26, %v1745_v33  ;;  %v1563_v26 = vadd.f32 %v1439_v53, %v10959_v41  ;;  %v1565_v51 = vadd.f32 %v1447_v28, %v10951_v35 }
 0x3ac   :  { %1984 = vmatprep.mubr.f32.mxu1 %v1809_v57  ;;  %v1746_v56 = vmul.f32 0.2, %v1618_v48  ;;  %vm1682_vm15 = vcmp.gt.f32.partialorder %v1618_v48, 0.0  ;;  %v1564_v45 = vadd.f32 %v1443_v21, %v10949_v34  ;;  %v1366_v53 = vcombine.high %v11053_v32, %v11053_v32 }
 0x3ad   :  { %v1747_v59 = vmul.f32 0.2, %v1619_v52  ;;  %v1157_v60 = vpop.f32.mrb[32].mxu0  ;;  %vm1683_vm14 = vcmp.gt.f32.partialorder %v1619_v52, 0.0 }
 0x3ae   :  { %v1620_v8 = vadd.f32 %v1556_v58, %v1157_v60  ;;  %v1159_v1 = vpop.f32.mrb[33].mxu0  ;;  %1985 = vmatmul.mubr.f32.gmra.mrb[24].mxu1 %v1808_v17  ;;  %v1810_v4 = vsel %vm1682_vm15, %v1618_v48, %v1746_v56  ;;  %v1566_v56 = vadd.f32 %v1443_v21, %v10957_v38 }
 0x3af   :  { %v1621_v6 = vadd.f32 %v1557_v61, %v1159_v1  ;;  %v1811_v7 = vsel %vm1683_vm14, %v1619_v52, %v1747_v59  ;;  %v1567_v1 = vadd.f32 %v1447_v28, %v10959_v41 }
 0x3b0   :  { %1990 = vmatprep.mubr.f32.mxu1 %v1811_v7  ;;  %v1748_v54 = vmul.f32 0.2, %v1620_v8  ;;  %vm1684_vm3 = vcmp.gt.f32.partialorder %v1620_v8, 0.0 }
 0x3b1   :  { %v1749_v12 = vmul.f32 0.2, %v1621_v6  ;;  %v1163_v13 = vpop.f32.mrb[34].mxu0  ;;  %vm1685_vm2 = vcmp.gt.f32.partialorder %v1621_v6, 0.0 }
 0x3b2   :  { %v1622_v5 = vadd.f32 %v1558_v10, %v1163_v13  ;;  %v1165_v44 = vpop.f32.mrb[35].mxu0  ;;  %1991 = vmatmul.mubr.f32.gmra.mrb[26].mxu1 %v1810_v4  ;;  %v1812_v62 = vsel %vm1684_vm3, %v1620_v8, %v1748_v54  ;;  %v1451_v8 = vrot.slane %v1364_v49, %v10917_v3 }
 0x3b3   :  { %v1623_v19 = vadd.f32 %v1559_v14, %v1165_v44  ;;  %v1813_v31 = vsel %vm1685_vm2, %v1621_v6, %v1749_v12  ;;  %v1455_v6 = vrot.slane %v1364_v49, %v10919_v18 }
 0x3b4   :  { %1996 = vmatprep.mubr.f32.mxu1 %v1813_v31  ;;  %v1750_v47 = vmul.f32 0.2, %v1622_v5  ;;  %vm1686_vm5 = vcmp.gt.f32.partialorder %v1622_v5, 0.0  ;;  %v1568_v14 = vadd.f32 %v1451_v8, %v10949_v34  ;;  %v1570_v32 = vadd.f32 %v1451_v8, %v10957_v38 }
 0x3b5   :  { %v1751_v40 = vmul.f32 0.2, %v1623_v19  ;;  %v1169_v46 = vpop.f32.mrb[36].mxu0  ;;  %vm1687_vm4 = vcmp.gt.f32.partialorder %v1623_v19, 0.0  ;;  %v1569_v4 = vadd.f32 %v1455_v6, %v10951_v35 }
 0x3b6   :  { %v1624_v55 = vadd.f32 %v1560_v39, %v1169_v46  ;;  %v1171_v63 = vpop.f32.mrb[37].mxu0  ;;  %1997 = vmatmul.mubr.f32.gmra.mrb[28].mxu1 %v1812_v62  ;;  %v1814_v30 = vsel %vm1686_vm5, %v1622_v5, %v1750_v47  ;;  %v1459_v47 = vrot.slane %v1366_v53, %v10917_v3 }
 0x3b7   :  { %v1625_v15 = vadd.f32 %v1561_v0, %v1171_v63  ;;  %v1815_v16 = vsel %vm1687_vm4, %v1623_v19, %v1751_v40  ;;  %v1333_v0 = vrot.slane %v1319_v37, %v10931_v9  ;;  %v1571_v63 = vadd.f32 %v1455_v6, %v10959_v41 }
 0x3b8   :  { %2002 = vmatprep.mubr.f32.mxu1 %v1815_v16  ;;  %v1752_v29 = vmul.f32 0.2, %v1624_v55  ;;  %vm1688_vm7 = vcmp.gt.f32.partialorder %v1624_v55, 0.0  ;;  %v1572_v37 = vadd.f32 %v1459_v47, %v10949_v34 }
 0x3b9   :  { %v1753_v23 = vmul.f32 0.2, %v1625_v15  ;;  %v1175_v25 = vpop.f32.mrb[38].mxu0  ;;  %vm1689_vm6 = vcmp.gt.f32.partialorder %v1625_v15, 0.0  ;;  %v11084_v27 = vrot.slane %v1333_v0, %v10931_v9  ;;  %v1335_v49 = vcombine.high %v1333_v0, %v1333_v0 }
 0x3ba   :  { %v1626_v22 = vadd.f32 %v1562_v20, %v1175_v25  ;;  %v1177_v33 = vpop.f32.mrb[39].mxu0  ;;  %2003 = vmatmul.mubr.f32.gmra.mrb[30].mxu1 %v1814_v30  ;;  %v1816_v58 = vsel %vm1688_vm7, %v1624_v55, %v1752_v29 }
 0x3bb   :  { %v1627_v42 = vadd.f32 %v1563_v26, %v1177_v33  ;;  %v1817_v43 = vsel %vm1689_vm6, %v1625_v15, %v1753_v23  ;;  %v1463_v15 = vrot.slane %v1366_v53, %v10919_v18 }
 0x3bc   :  { %2008 = vmatprep.mubr.f32.mxu1 %v1817_v43  ;;  %v1754_v52 = vmul.f32 0.2, %v1626_v22  ;;  %vm1690_vm9 = vcmp.gt.f32.partialorder %v1626_v22, 0.0 }
 0x3bd   :  { %v1755_v48 = vmul.f32 0.2, %v1627_v42  ;;  %v1181_v50 = vpop.f32.mrb[40].mxu0  ;;  %vm1691_vm8 = vcmp.gt.f32.partialorder %v1627_v42, 0.0  ;;  %v1573_v29 = vadd.f32 %v1463_v15, %v10951_v35 }
 0x3be   :  { %v1628_v57 = vadd.f32 %v1564_v45, %v1181_v50  ;;  %v1183_v59 = vpop.f32.mrb[41].mxu0  ;;  %2009 = vmatmul.mubr.f32.gmra.mrb[32].mxu1 %v1816_v58  ;;  %v1818_v10 = vsel %vm1690_vm9, %v1626_v22, %v1754_v52  ;;  %v1467_v50 = vrot.slane %v11084_v27, %v10917_v3  ;;  %v1471_v58 = vrot.slane %v11084_v27, %v10919_v18 }
 0x3bf   :  { %v1629_v60 = vadd.f32 %v1565_v51, %v1183_v59  ;;  %v1819_v61 = vsel %vm1691_vm8, %v1627_v42, %v1755_v48  ;;  %v1574_v48 = vadd.f32 %v1459_v47, %v10957_v38 }
 0x3c0   :  { %2014 = vmatprep.mubr.f32.mxu1 %v1819_v61  ;;  %v1756_v7 = vmul.f32 0.2, %v1628_v57  ;;  %vm1692_vm11 = vcmp.gt.f32.partialorder %v1628_v57, 0.0 }
 0x3c1   :  { %v1757_v17 = vmul.f32 0.2, %v1629_v60  ;;  %v1187_v36 = vpop.f32.mrb[42].mxu0  ;;  %vm1693_vm10 = vcmp.gt.f32.partialorder %v1629_v60, 0.0 }
 0x3c2   :  { %v1630_v2 = vadd.f32 %v1566_v56, %v1187_v36  ;;  %v1189_v11 = vpop.f32.mrb[43].mxu0  ;;  %2015 = vmatmul.mubr.f32.gmra.mrb[34].mxu1 %v1818_v10  ;;  %v1820_v31 = vsel %vm1692_vm11, %v1628_v57, %v1756_v7  ;;  %v1575_v57 = vadd.f32 %v1463_v15, %v10959_v41  ;;  %v11095_v36 = vrot.slane %v1335_v49, %v10931_v9 }
 0x3c3   :  { %v1631_v12 = vadd.f32 %v1567_v1, %v1189_v11  ;;  %v1821_v13 = vsel %vm1693_vm10, %v1629_v60, %v1757_v17  ;;  %v1576_v1 = vadd.f32 %v1467_v50, %v10949_v34 }
 0x3c4   :  { %2020 = vmatprep.mubr.f32.mxu1 %v1821_v13  ;;  %v1758_v44 = vmul.f32 0.2, %v1630_v2  ;;  %vm1694_vm13 = vcmp.gt.f32.partialorder %v1630_v2, 0.0 }
 0x3c5   :  { %v1759_v54 = vmul.f32 0.2, %v1631_v12  ;;  %v1193_v5 = vpop.f32.mrb[44].mxu0  ;;  %vm1695_vm12 = vcmp.gt.f32.partialorder %v1631_v12, 0.0 }
 0x3c6   :  { %v1632_v19 = vadd.f32 %v1568_v14, %v1193_v5  ;;  %v1195_v39 = vpop.f32.mrb[45].mxu0  ;;  %2021 = vmatmul.mubr.f32.gmra.mrb[36].mxu1 %v1820_v31  ;;  %v1822_v21 = vsel %vm1694_vm13, %v1630_v2, %v1758_v44  ;;  %v1577_v2 = vadd.f32 %v1471_v58, %v10951_v35  ;;  %v1475_v5 = vrot.slane %v11095_v36, %v10917_v3 }
 0x3c7   :  { %v1633_v40 = vadd.f32 %v1569_v4, %v1195_v39  ;;  %v1823_v46 = vsel %vm1695_vm12, %v1631_v12, %v1759_v54  ;;  %v1578_v54 = vadd.f32 %v1467_v50, %v10957_v38  ;;  %v1479_v31 = vrot.slane %v11095_v36, %v10919_v18 }
 0x3c8   :  { %2026 = vmatprep.mubr.f32.mxu1 %v1823_v46  ;;  %v1760_v16 = vmul.f32 0.2, %v1632_v19  ;;  %vm1696_vm15 = vcmp.gt.f32.partialorder %v1632_v19, 0.0 }
 0x3c9   :  { %v1761_v55 = vmul.f32 0.2, %v1633_v40  ;;  %v1199_v62 = vpop.f32.mrb[46].mxu0  ;;  %vm1697_vm14 = vcmp.gt.f32.partialorder %v1633_v40, 0.0 }
 0x3ca   :  { %v1634_v20 = vadd.f32 %v1570_v32, %v1199_v62  ;;  %v1201_v23 = vpop.f32.mrb[47].mxu0  ;;  %2027 = vmatmul.mubr.f32.gmra.mrb[38].mxu1 %v1822_v21  ;;  %v1824_v33 = vsel %vm1696_vm15, %v1632_v19, %v1760_v16  ;;  %v1579_v19 = vadd.f32 %v1471_v58, %v10959_v41  ;;  %v1365_v62 = vcombine.high %v11084_v27, %v11084_v27 }
 0x3cb   :  { %v1635_v25 = vadd.f32 %v1571_v63, %v1201_v23  ;;  %v1825_v24 = vsel %vm1697_vm14, %v1633_v40, %v1761_v55  ;;  %v1580_v55 = vadd.f32 %v1475_v5, %v10949_v34  ;;  %v1581_v16 = vadd.f32 %v1479_v31, %v10951_v35 }
 0x3cc   :  { %2032 = vmatprep.mubr.f32.mxu1 %v1825_v24  ;;  %v1762_v22 = vmul.f32 0.2, %v1634_v20  ;;  %vm1698_vm3 = vcmp.gt.f32.partialorder %v1634_v20, 0.0 }
 0x3cd   :  { %v1763_v26 = vmul.f32 0.2, %v1635_v25  ;;  %v1205_v28 = vpop.f32.mrb[48].mxu0  ;;  %vm1699_vm2 = vcmp.gt.f32.partialorder %v1635_v25, 0.0 }
 0x3ce   :  { %v1636_v30 = vadd.f32 %v1572_v37, %v1205_v28  ;;  %v1207_v42 = vpop.f32.mrb[49].mxu0  ;;  %2033 = vmatmul.mubr.f32.gmra.mrb[40].mxu1 %v1824_v33  ;;  %v1826_v61 = vsel %vm1698_vm3, %v1634_v20, %v1762_v22  ;;  %v1483_v28 = vrot.slane %v1365_v62, %v10917_v3  ;;  %v1583_v22 = vadd.f32 %v1479_v31, %v10959_v41 }
 0x3cf   :  { %v1637_v43 = vadd.f32 %v1573_v29, %v1207_v42  ;;  %v1827_v45 = vsel %vm1699_vm2, %v1635_v25, %v1763_v26  ;;  %v1582_v26 = vadd.f32 %v1475_v5, %v10957_v38 }
 0x3d0   :  { %2038 = vmatprep.mubr.f32.mxu1 %v1827_v45  ;;  %v1764_v59 = vmul.f32 0.2, %v1636_v30  ;;  %vm1700_vm5 = vcmp.gt.f32.partialorder %v1636_v30, 0.0  ;;  %v1584_v50 = vadd.f32 %v1483_v28, %v10949_v34 }
 0x3d1   :  { %v1765_v51 = vmul.f32 0.2, %v1637_v43  ;;  %v1211_v52 = vpop.f32.mrb[50].mxu0  ;;  %vm1701_vm4 = vcmp.gt.f32.partialorder %v1637_v43, 0.0 }
 0x3d2   :  { %v1638_v60 = vadd.f32 %v1574_v48, %v1211_v52  ;;  %v1213_v56 = vpop.f32.mrb[51].mxu0  ;;  %2039 = vmatmul.mubr.f32.gmra.mrb[42].mxu1 %v1826_v61  ;;  %v1828_v12 = vsel %vm1700_vm5, %v1636_v30, %v1764_v59  ;;  %v1487_v30 = vrot.slane %v1365_v62, %v10919_v18 }
 0x3d3   :  { %v1639_v8 = vadd.f32 %v1575_v57, %v1213_v56  ;;  %v1829_v17 = vsel %vm1701_vm4, %v1637_v43, %v1765_v51  ;;  %v1367_v51 = vcombine.high %v11095_v36, %v11095_v36 }
 0x3d4   :  { %2044 = vmatprep.mubr.f32.mxu1 %v1829_v17  ;;  %v1766_v10 = vmul.f32 0.2, %v1638_v60  ;;  %vm1702_vm7 = vcmp.gt.f32.partialorder %v1638_v60, 0.0  ;;  %v1585_v58 = vadd.f32 %v1487_v30, %v10951_v35 }
 0x3d5   :  { %v1767_v6 = vmul.f32 0.2, %v1639_v8  ;;  %v1217_v7 = vpop.f32.mrb[52].mxu0  ;;  %vm1703_vm6 = vcmp.gt.f32.partialorder %v1639_v8, 0.0 }
 0x3d6   :  { %v1640_v11 = vadd.f32 %v1576_v1, %v1217_v7  ;;  %v1219_v13 = vpop.f32.mrb[53].mxu0  ;;  %2045 = vmatmul.mubr.f32.gmra.mrb[44].mxu1 %v1828_v12  ;;  %v1830_v46 = vsel %vm1702_vm7, %v1638_v60, %v1766_v10  ;;  %v1586_v1 = vadd.f32 %v1483_v28, %v10957_v38  ;;  %v1495_v10 = vrot.slane %v1367_v51, %v10919_v18 }
 0x3d7   :  { %v1641_v14 = vadd.f32 %v1577_v2, %v1219_v13  ;;  %v1831_v53 = vsel %vm1703_vm6, %v1639_v8, %v1767_v6  ;;  %v1491_v6 = vrot.slane %v1367_v51, %v10917_v3  ;;  %v1587_v2 = vadd.f32 %v1487_v30, %v10959_v41 }
 0x3d8   :  { %2050 = vmatprep.mubr.f32.mxu1 %v1831_v53  ;;  %v1768_v39 = vmul.f32 0.2, %v1640_v11  ;;  %vm1704_vm9 = vcmp.gt.f32.partialorder %v1640_v11, 0.0 }
 0x3d9   :  { %v1769_v4 = vmul.f32 0.2, %v1641_v14  ;;  %v1223_v44 = vpop.f32.mrb[54].mxu0  ;;  %vm1705_vm8 = vcmp.gt.f32.partialorder %v1641_v14, 0.0  ;;  %v1588_v5 = vadd.f32 %v1491_v6, %v10949_v34 }
 0x3da   :  { %v1642_v40 = vadd.f32 %v1578_v54, %v1223_v44  ;;  %v1225_v0 = vpop.f32.mrb[55].mxu0  ;;  %2051 = vmatmul.mubr.f32.gmra.mrb[46].mxu1 %v1830_v46  ;;  %v1832_v23 = vsel %vm1704_vm9, %v1640_v11, %v1768_v39 }
 0x3db   :  { %v1643_v32 = vadd.f32 %v1579_v19, %v1225_v0  ;;  %v1833_v47 = vsel %vm1705_vm8, %v1641_v14, %v1769_v4  ;;  %v1589_v19 = vadd.f32 %v1495_v10, %v10951_v35 }
 0x3dc   :  { %2056 = vmatprep.mubr.f32.mxu1 %v1833_v47  ;;  %v1770_v20 = vmul.f32 0.2, %v1642_v40  ;;  %vm1706_vm11 = vcmp.gt.f32.partialorder %v1642_v40, 0.0  ;;  %v1590_v47 = vadd.f32 %v1491_v6, %v10957_v38 }
 0x3dd   :  { %v1771_v63 = vmul.f32 0.2, %v1643_v32  ;;  %v1229_v15 = vpop.f32.mrb[56].mxu0  ;;  %vm1707_vm10 = vcmp.gt.f32.partialorder %v1643_v32, 0.0 }
 0x3de   :  { %v1644_v21 = vadd.f32 %v1580_v55, %v1229_v15  ;;  %v1231_v25 = vpop.f32.mrb[57].mxu0  ;;  %2057 = vmatmul.mubr.f32.gmra.mrb[48].mxu1 %v1832_v23  ;;  %v1834_v43 = vsel %vm1706_vm11, %v1642_v40, %v1770_v20 }
 0x3df   :  { %v1645_v24 = vadd.f32 %v1581_v16, %v1231_v25  ;;  %v1835_v37 = vsel %vm1707_vm10, %v1643_v32, %v1771_v63  ;;  %v1591_v63 = vadd.f32 %v1495_v10, %v10959_v41 }
 0x3e0   :  { %2062 = vmatprep.mubr.f32.mxu1 %v1835_v37  ;;  %v1772_v33 = vmul.f32 0.2, %v1644_v21  ;;  %vm1708_vm13 = vcmp.gt.f32.partialorder %v1644_v21, 0.0 }
 0x3e1   :  { %v1773_v29 = vmul.f32 0.2, %v1645_v24  ;;  %v1235_v27 = vpop.f32.mrb[58].mxu0  ;;  %vm1709_vm12 = vcmp.gt.f32.partialorder %v1645_v24, 0.0 }
 0x3e2   :  { %v1646_v42 = vadd.f32 %v1582_v26, %v1235_v27  ;;  %v1237_v45 = vpop.f32.mrb[59].mxu0  ;;  %2063 = vmatmul.mubr.f32.gmra.mrb[50].mxu1 %v1834_v43  ;;  %v1836_v61 = vsel %vm1708_vm13, %v1644_v21, %v1772_v33  ;;  %v11125_v27 = vpop.permute.xlu0 %2117 }
 0x3e3   :  { %v1647_v49 = vadd.f32 %v1583_v22, %v1237_v45  ;;  %v1837_v48 = vsel %vm1709_vm12, %v1645_v24, %v1773_v29  ;;  %13682 = vst [vmem:[#allocation85_spill] sm:$0xff] %v11125_v27  ;;  %v11127_v22 = vpop.permute.xlu1 %2127 }
 0x3e4   :  { %2068 = vmatprep.mubr.f32.mxu1 %v1837_v48  ;;  %v1774_v59 = vmul.f32 0.2, %v1646_v42  ;;  %vm1710_vm15 = vcmp.gt.f32.partialorder %v1646_v42, 0.0  ;;  %13683 = vst [vmem:[#allocation86_spill] sm:$0xff] %v11127_v22 }
 0x3e5   :  { %v1775_v52 = vmul.f32 0.2, %v1647_v49  ;;  %v1241_v57 = vpop.f32.mrb[60].mxu0  ;;  %vm1711_vm14 = vcmp.gt.f32.partialorder %v1647_v49, 0.0 }
 0x3e6   :  { %v1648_v60 = vadd.f32 %v1584_v50, %v1241_v57  ;;  %v1243_v56 = vpop.f32.mrb[61].mxu0  ;;  %2069 = vmatmul.mubr.f32.gmra.mrb[52].mxu1 %v1836_v61  ;;  %v1838_v13 = vsel %vm1710_vm15, %v1646_v42, %v1774_v59  ;;  %v11129_v30 = vpop.permute.xlu0 %2122 }
 0x3e7   :  { %v1649_v8 = vadd.f32 %v1585_v58, %v1243_v56  ;;  %v1839_v17 = vsel %vm1711_vm14, %v1647_v49, %v1775_v52  ;;  %13684 = vst [vmem:[#allocation87_spill] sm:$0xff] %v11129_v30  ;;  %v11131_v33 = vpop.permute.xlu1 %2132 }
 0x3e8   :  { %2074 = vmatprep.mubr.f32.mxu1 %v1839_v17  ;;  %v1776_v11 = vmul.f32 0.2, %v1648_v60  ;;  %vm1712_vm3 = vcmp.gt.f32.partialorder %v1648_v60, 0.0  ;;  %13685 = vst [vmem:[#allocation88_spill] sm:$0xff] %v11131_v33 }
 0x3e9   :  { %v1777_v7 = vmul.f32 0.2, %v1649_v8  ;;  %v1247_v36 = vpop.f32.mrb[62].mxu0  ;;  %vm1713_vm2 = vcmp.gt.f32.partialorder %v1649_v8, 0.0 }
 0x3ea   :  { %v1650_v12 = vadd.f32 %v1586_v1, %v1247_v36  ;;  %v1249_v14 = vpop.f32.mrb[63].mxu0  ;;  %2075 = vmatmul.mubr.f32.gmra.mrb[54].mxu1 %v1838_v13  ;;  %v1840_v40 = vsel %vm1712_vm3, %v1648_v60, %v1776_v11  ;;  %v11133_v42 = vpop.permute.xlu0 %2107 }
 0x3eb   :  { %v1651_v53 = vadd.f32 %v1587_v2, %v1249_v14  ;;  %v1841_v54 = vsel %vm1713_vm2, %v1649_v8, %v1777_v7  ;;  %13686 = vst [vmem:[#allocation89_spill] sm:$0xff] %v11133_v42  ;;  %v11135_v43 = vpop.permute.xlu1 %2112 }
 0x3ec   :  { %2080 = vmatprep.mubr.f32.mxu1 %v1841_v54  ;;  %v1778_v31 = vmul.f32 0.2, %v1650_v12  ;;  %vm1714_vm5 = vcmp.gt.f32.partialorder %v1650_v12, 0.0  ;;  %13687 = vst [vmem:[#allocation90_spill] sm:$0xff] %v11135_v43 }
 0x3ed   :  { %v1779_v4 = vmul.f32 0.2, %v1651_v53  ;;  %v1253_v44 = vpop.f32.mrb[64].mxu0  ;;  %vm1715_vm4 = vcmp.gt.f32.partialorder %v1651_v53, 0.0 }
 0x3ee   :  { %v1652_v39 = vadd.f32 %v1588_v5, %v1253_v44  ;;  %v1255_v46 = vpop.f32.mrb[65].mxu0  ;;  %2081 = vmatmul.mubr.f32.gmra.mrb[56].mxu1 %v1840_v40  ;;  %v1842_v20 = vsel %vm1714_vm5, %v1650_v12, %v1778_v31  ;;  %v11137_v45 = vpop.permute.xlu0 %2137  ;;  %vm4047_vm5 = vcmask 1042434  }
 0x3ef   :  { %v1653_v0 = vadd.f32 %v1589_v19, %v1255_v46  ;;  %v1843_v32 = vsel %vm1715_vm4, %v1651_v53, %v1779_v4  ;;  %13688 = vst [vmem:[#allocation91_spill] sm:$0xff] %v11137_v45  ;;  %v11139_v49 = vpop.permute.xlu1 %2142  ;;  %vm4044_vm4 = vcmask 1041409  }
 0x3f0   :  { %2086 = vmatprep.mubr.f32.mxu1 %v1843_v32  ;;  %v1780_v15 = vmul.f32 0.2, %v1652_v39  ;;  %vm1716_vm7 = vcmp.gt.f32.partialorder %v1652_v39, 0.0  ;;  %13689 = vst [vmem:[#allocation92_spill] sm:$0xff] %v11139_v49 }
 0x3f1   :  { %v1781_v55 = vmul.f32 0.2, %v1653_v0  ;;  %v1259_v62 = vpop.f32.mrb[66].mxu0  ;;  %vm1717_vm6 = vcmp.gt.f32.partialorder %v1653_v0, 0.0 }
 0x3f2   :  { %v1654_v16 = vadd.f32 %v1590_v47, %v1259_v62  ;;  %v1261_v21 = vpop.f32.mrb[67].mxu0  ;;  %2087 = vmatmul.mubr.f32.gmra.mrb[58].mxu1 %v1842_v20  ;;  %v1844_v26 = vsel %vm1716_vm7, %v1652_v39, %v1780_v15  ;;  %v11141_v48 = vpop.permute.xlu0 %2147  ;;  %vm4053_vm7 = vcmask 1044484  }
 0x3f3   :  { %v1655_v23 = vadd.f32 %v1591_v63, %v1261_v21  ;;  %v1845_v25 = vsel %vm1717_vm6, %v1653_v0, %v1781_v55  ;;  %13690 = vst [vmem:[#allocation93_spill] sm:$0xff] %v11141_v48  ;;  %v11143_v50 = vpop.permute.xlu1 %2152  ;;  %vm4050_vm6 = vcmask 1043459  }
 0x3f4   :  { %2092 = vmatprep.mubr.f32.mxu1 %v1845_v25  ;;  %v1782_v37 = vmul.f32 0.2, %v1654_v16  ;;  %vm1718_vm9 = vcmp.gt.f32.partialorder %v1654_v16, 0.0  ;;  %13691 = vst [vmem:[#allocation94_spill] sm:$0xff] %v11143_v50 }
 0x3f5   :  { %v1783_v24 = vmul.f32 0.2, %v1655_v23  ;;  %vm1719_vm8 = vcmp.gt.f32.partialorder %v1655_v23, 0.0 }
 0x3f6   :  { %2093 = vmatmul.mubr.f32.gmra.mrb[60].mxu1 %v1844_v26  ;;  %v1846_v29 = vsel %vm1718_vm9, %v1654_v16, %v1782_v37  ;;  %v11145_v51 = vpop.permute.xlu0 %2157  ;;  %vm4059_vm9 = vcmask 1046534  }
 0x3f7   :  { %v1847_v28 = vsel %vm1719_vm8, %v1655_v23, %v1783_v24  ;;  %13692 = vst [vmem:[#allocation95_spill] sm:$0xff] %v11145_v51  ;;  %v11147_v52 = vpop.permute.xlu1 %2162  ;;  %vm4056_vm8 = vcmask 1045509  }
 0x3f8   :  { %2098 = vmatprep.mubr.f32.mxu1 %v1847_v28  ;;  %13693 = vst [vmem:[#allocation96_spill] sm:$0xff] %v11147_v52  ;;  %v726_v28 = vld [vmem:[#allocation17] sm:$0x3] }
 0x3fa   :  { %2099 = vmatmul.mubr.f32.gmra.mrb[62].mxu1 %v1846_v29  ;;  %v11149_v57 = vpop.permute.xlu0 %2167 }
 0x3fb   :  { %13694 = vst [vmem:[#allocation97_spill] sm:$0xff] %v11149_v57  ;;  %v11151_v58 = vpop.permute.xlu1 %2172 }
 0x3fc   :  { %13695 = vst [vmem:[#allocation98_spill] sm:$0xff] %v11151_v58 }
 0x3fe   :  { %v11153_v59 = vpop.permute.xlu0 %2177 }
 0x3ff   :  { %13696 = vst [vmem:[#allocation99_spill] sm:$0xff] %v11153_v59  ;;  %v11155_v60 = vpop.permute.xlu1 %2182 }
 0x400   :  { %13697 = vst [vmem:[#allocation100_spill] sm:$0xff] %v11155_v60 }
 0x402   :  { %v11157_v61 = vpop.permute.xlu0 %2197 }
 0x403   :  { %13698 = vst [vmem:[#allocation101_spill] sm:$0xff] %v11157_v61  ;;  %v11159_v56 = vpop.permute.xlu1 %2202 }
 0x404   :  { %13699 = vst [vmem:[#allocation102_spill] sm:$0xff] %v11159_v56 }
 0x406   :  { %v11161_v8 = vpop.permute.xlu0 %2207 }
 0x407   :  { %13700 = vst [vmem:[#allocation103_spill] sm:$0xff] %v11161_v8  ;;  %v11163_v17 = vpop.permute.xlu1 %2212 }
 0x408   :  { %13701 = vst [vmem:[#allocation104_spill] sm:$0xff] %v11163_v17 }
 0x40a   :  { %v11165_v1 = vpop.permute.xlu0 %2187 }
 0x40b   :  { %13702 = vst [vmem:[#allocation105_spill] sm:$0xff] %v11165_v1  ;;  %v11167_v6 = vpop.permute.xlu1 %2192 }
 0x40c   :  { %13703 = vst [vmem:[#allocation106_spill] sm:$0xff] %v11167_v6 }
 0x40e   :  { %v11169_v7 = vpop.permute.xlu0 %2217 }
 0x40f   :  { %13704 = vst [vmem:[#allocation107_spill] sm:$0xff] %v11169_v7  ;;  %v11171_v36 = vpop.permute.xlu1 %2222 }
 0x410   :  { %13705 = vst [vmem:[#allocation108_spill] sm:$0xff] %v11171_v36 }
 0x412   :  { %v11173_v2 = vpop.permute.xlu0 %2227 }
 0x413   :  { %13706 = vst [vmem:[#allocation109_spill] sm:$0xff] %v11173_v2  ;;  %v11175_v10 = vpop.permute.xlu1 %2232 }
 0x414   :  { %13707 = vst [vmem:[#allocation110_spill] sm:$0xff] %v11175_v10 }
 0x416   :  { %v11177_v13 = vpop.permute.xlu0 %2237 }
 0x417   :  { %13708 = vst [vmem:[#allocation111_spill] sm:$0xff] %v11177_v13  ;;  %v11185_v19 = vpop.permute.xlu1 %2242 }
 0x418   :  { %13709 = vst [vmem:[#allocation112_spill] sm:$0xff] %v11185_v19 }
 0x41a   :  { %v11209_v21 = vpop.permute.xlu0 %2247 }
 0x41b   :  { %13710 = vst [vmem:[#allocation113_spill] sm:$0xff] %v11209_v21  ;;  %v11215_v37 = vpop.permute.xlu1 %2252 }
 0x41c   :  { %13711 = vst [vmem:[#allocation114_spill] sm:$0xff] %v11215_v37 }
 0x455   :  { %v1914_v11 = vpop.f32.mrb[68].mxu0 }
 0x456   :  { %v1916_v12 = vpop.f32.mrb[69].mxu0  ;;  %v11180_v54 = vadd.f32 %v11133_v42, %v1914_v11 }
 0x457   :  { %v11188_v31 = vadd.f32 %v11133_v42, %v1916_v12 }
 0x459   :  { %v1920_v14 = vpop.f32.mrb[70].mxu0  ;;  %v1926_v53 = vpop.f32.mrb[4].mxu1 }
 0x45a   :  { %v11183_v5 = vadd.f32 %v11135_v43, %v1920_v14  ;;  %v1922_v4 = vpop.f32.mrb[71].mxu0  ;;  %v1928_v44 = vpop.f32.mrb[5].mxu1  ;;  %v11198_v47 = vadd.f32 %v11125_v27, %v1926_v53 }
 0x45b   :  { %v11191_v39 = vadd.f32 %v11135_v43, %v1922_v4  ;;  %v11204_v15 = vadd.f32 %v11125_v27, %v1928_v44  ;;  %v3624_v4 = vld [vmem:[#allocation20] sm:$0x3]  ;;  %v11220_v27 = vrot.slane %v726_v28, %v10917_v3 }
 0x45c   :  { %v2329_v40 = vmax.f32 %v11180_v54, %v11183_v5 }
 0x45d   :  { %v2336_v46 = vmax.f32 %v11188_v31, %v11191_v39  ;;  %v1932_v0 = vpop.f32.mrb[6].mxu1  ;;  %v3702_v20 = vpop.f32.mrb[72].mxu0  ;;  %13712 = vst [vmem:[#allocation115_spill] sm:$0xff] %v11220_v27 }
 0x45e   :  { %v2330_v32 = vrot.slane %v2329_v40, 4  ;;  %v11201_v55 = vadd.f32 %v11129_v30, %v1932_v0  ;;  %v1934_v62 = vpop.f32.mrb[7].mxu1  ;;  %v11213_v24 = vpop.f32.mrb[73].mxu0 }
 0x45f   :  { %v2337_v63 = vrot.slane %v2336_v46, 4  ;;  %v11207_v16 = vadd.f32 %v11129_v30, %v1934_v62 }
 0x460   :  { %v2331_v23 = vmax.f32 %v2329_v40, %v2330_v32  ;;  %v2343_v25 = vmax.f32 %v11198_v47, %v11201_v55 }
 0x461   :  { %v2338_v26 = vmax.f32 %v2336_v46, %v2337_v63  ;;  %v2350_v29 = vmax.f32 %v11204_v15, %v11207_v16  ;;  %v1938_v11 = vpop.f32.mrb[8].mxu1  ;;  %v11223_v46 = vrot.slane %v3624_v4, %v10917_v3  ;;  %v11225_v63 = vpop.permute.xlu0 %2257 }
 0x462   :  { %v2332_v12 = vrot.slane %v2331_v23, 2  ;;  %v2344_v14 = vrot.slane %v2343_v25, 4  ;;  %v1940_v53 = vpop.f32.mrb[9].mxu1  ;;  %13714 = vst [vmem:[#allocation117_spill] sm:$0xff] %v11225_v63  ;;  %v11228_v37 = vadd.f32 %v11127_v22, %v1938_v11 }
 0x463   :  { %v2339_v44 = vrot.slane %v2338_v26, 2  ;;  %v2351_v0 = vrot.slane %v2350_v29, 4  ;;  %13713 = vst [vmem:[#allocation116_spill] sm:$0xff] %v11223_v46 }
 0x464   :  { %v2333_v40 = vmax.f32 %v2331_v23, %v2332_v12  ;;  %v2345_v32 = vmax.f32 %v2343_v25, %v2344_v14  ;;  %v11233_v25 = vpop.permute.xlu1 %2262 }
 0x465   :  { %v2340_v62 = vmax.f32 %v2338_v26, %v2339_v44  ;;  %v2352_v30 = vmax.f32 %v2350_v29, %v2351_v0  ;;  %v1944_v42 = vpop.f32.mrb[10].mxu1  ;;  %13715 = vst [vmem:[#allocation118_spill] sm:$0xff] %v11233_v25  ;;  %v11236_v29 = vadd.f32 %v11127_v22, %v1940_v53  ;;  %v11244_v0 = vrot.slane %v3624_v4, %v10919_v18 }
 0x466   :  { %v2334_v43 = vrot.slane %v2333_v40, 1  ;;  %v2346_v9 = vrot.slane %v2345_v32, 2  ;;  %v11231_v21 = vadd.f32 %v11131_v33, %v1944_v42  ;;  %v1946_v23 = vpop.f32.mrb[11].mxu1  ;;  %v11249_v53 = vadd.f32 %v3702_v20, %v11223_v46 }
 0x467   :  { %v2341_v26 = vrot.slane %v2340_v62, 1  ;;  %v2353_v28 = vrot.slane %v2352_v30, 2  ;;  %v11239_v12 = vadd.f32 %v11131_v33, %v1946_v23  ;;  %13716 = vst [vmem:[#allocation119_spill] sm:$0xff] %v11244_v0 }
 0x468   :  { %v2335_v14 = vmax.f32 %v2333_v40, %v2334_v43  ;;  %v2347_v44 = vmax.f32 %v2345_v32, %v2346_v9  ;;  %v2357_v11 = vmax.f32 %v11228_v37, %v11231_v21  ;;  %13717 = vst [vmem:[#allocation120_spill] sm:$0xff] %v11249_v53  ;;  %v11257_v53 = vpop.permute.xlu1 %2762 }
 0x469   :  { %v2342_v42 = vmax.f32 %v2340_v62, %v2341_v26  ;;  %v2354_v3 = vmax.f32 %v2352_v30, %v2353_v28  ;;  %v2364_v25 = vmax.f32 %v11236_v29, %v11239_v12  ;;  %v1950_v63 = vpop.f32.mrb[12].mxu1  ;;  %v11255_v26 = vpop.permute.xlu0 %2757  ;;  %13719 = vst [vmem:[#allocation122_spill] sm:$0xff] %v11257_v53 }
 0x46a   :  { %v2553_v23 = vsub.f32 %v11180_v54, %v2335_v14  ;;  %v2555_v43 = vsub.f32 %v11183_v5, %v2335_v14  ;;  %v2348_v9 = vrot.slane %v2347_v44, 1  ;;  %v2358_v40 = vrot.slane %v2357_v11, 4  ;;  %v1952_v32 = vpop.f32.mrb[13].mxu1  ;;  %13718 = vst [vmem:[#allocation121_spill] sm:$0xff] %v11255_v26 }
 0x46b   :  { %v2554_v22 = vsub.f32 %v11188_v31, %v2342_v42  ;;  %v2556_v4 = vsub.f32 %v11191_v39, %v2342_v42  ;;  %v2355_v62 = vrot.slane %v2354_v3, 1  ;;  %v2365_v30 = vrot.slane %v2364_v25, 4 }
 0x46c   :  { %v2617_v28 = vmul.f32 1.442695, %v2553_v23  ;;  %v2621_v33 = vmul.f32 1.442695, %v2555_v43  ;;  %v2349_v18 = vmax.f32 %v2347_v44, %v2348_v9  ;;  %v2359_v20 = vmax.f32 %v2357_v11, %v2358_v40 }
 0x46d   :  { %v2619_v54 = vmul.f32 1.442695, %v2554_v22  ;;  %v2623_v46 = vmul.f32 1.442695, %v2556_v4  ;;  %v2356_v5 = vmax.f32 %v2354_v3, %v2355_v62  ;;  %v2366_v14 = vmax.f32 %v2364_v25, %v2365_v30  ;;  %v1956_v19 = vpop.f32.mrb[14].mxu1 }
 0x46e   :  { %9042 = vpow2.f32 %v2617_v28  ;;  %v2557_v31 = vsub.f32 %v11198_v47, %v2349_v18  ;;  %v2559_v39 = vsub.f32 %v11201_v55, %v2349_v18  ;;  %v2360_v42 = vrot.slane %v2359_v20, 2  ;;  %v1958_v13 = vpop.f32.mrb[15].mxu1  ;;  %v11263_v47 = vpop.permute.xlu0 %2767 }
 0x46f   :  { %9044 = vpow2.f32 %v2621_v33  ;;  %v2558_v23 = vsub.f32 %v11204_v15, %v2356_v5  ;;  %v2560_v44 = vsub.f32 %v11207_v16, %v2356_v5  ;;  %v2367_v11 = vrot.slane %v2366_v14, 2  ;;  %13720 = vst [vmem:[#allocation123_spill] sm:$0xff] %v11263_v47  ;;  %v11271_v16 = vpop.permute.xlu1 %2772 }
 0x470   :  { %9046 = vpow2.f32 %v2619_v54  ;;  %v2625_v43 = vmul.f32 1.442695, %v2557_v31  ;;  %v2629_v22 = vmul.f32 1.442695, %v2559_v39  ;;  %v2361_v9 = vmax.f32 %v2359_v20, %v2360_v42  ;;  %13721 = vst [vmem:[#allocation124_spill] sm:$0xff] %v11271_v16 }
 0x471   :  { %9048 = vpow2.f32 %v2623_v46  ;;  %v2627_v3 = vmul.f32 1.442695, %v2558_v23  ;;  %v2631_v25 = vmul.f32 1.442695, %v2560_v44  ;;  %v2368_v40 = vmax.f32 %v2366_v14, %v2367_v11  ;;  %v1962_v4 = vpop.f32.mrb[16].mxu1 }
 0x472   :  { %9050 = vpow2.f32 %v2625_v43  ;;  %v2362_v18 = vrot.slane %v2361_v9, 1  ;;  %v11266_v33 = vadd.f32 %v11137_v45, %v1950_v63  ;;  %v11269_v55 = vadd.f32 %v11137_v45, %v1952_v32  ;;  %v1964_v15 = vpop.f32.mrb[17].mxu1 }
 0x473   :  { %9052 = vpow2.f32 %v2629_v22  ;;  %v2369_v62 = vrot.slane %v2368_v40, 1  ;;  %v11274_v46 = vadd.f32 %v11139_v49, %v1956_v19  ;;  %v11277_v30 = vadd.f32 %v11139_v49, %v1958_v13  ;;  %v11300_v22 = vpop.permute.xlu0 %2747 }
 0x474   :  { %9054 = vpow2.f32 %v2627_v3  ;;  %v2363_v28 = vmax.f32 %v2361_v9, %v2362_v18  ;;  %v11280_v20 = vadd.f32 %v11141_v48, %v1962_v4  ;;  %v11284_v63 = vadd.f32 %v11213_v24, %v11244_v0  ;;  %13723 = vst [vmem:[#allocation126_spill] sm:$0xff] %v11300_v22 }
 0x475   :  { %9056 = vpow2.f32 %v2631_v25  ;;  %v2370_v32 = vmax.f32 %v2368_v40, %v2369_v62  ;;  %v2371_v54 = vmax.f32 %v11266_v33, %v11274_v46  ;;  %v2378_v19 = vmax.f32 %v11269_v55, %v11277_v30  ;;  %v1968_v5 = vpop.f32.mrb[18].mxu1  ;;  %v11309_v40 = vpop.permute.xlu1 %2752 }
 0x476   :  { %13722 = vst [vmem:[#allocation125_spill] sm:$0xff] %v11284_v63  ;;  %v2561_v13 = vsub.f32 %v11228_v37, %v2363_v28  ;;  %v2563_v14 = vsub.f32 %v11231_v21, %v2363_v28  ;;  %v11293_v31 = vadd.f32 %v11141_v48, %v1964_v15  ;;  %v11296_v39 = vadd.f32 %v11143_v50, %v1968_v5  ;;  %v1970_v24 = vpop.f32.mrb[19].mxu1 }
 0x477   :  { %v2562_v42 = vsub.f32 %v11236_v29, %v2370_v32  ;;  %v2564_v23 = vsub.f32 %v11239_v12, %v2370_v32  ;;  %v2372_v44 = vrot.slane %v2371_v54, 4  ;;  %v2379_v11 = vrot.slane %v2378_v19, 4  ;;  %13724 = vst [vmem:[#allocation127_spill] sm:$0xff] %v11309_v40 }
 0x478   :  { %v9043_v43 = vpop.eup %9042  ;;  %v2633_v9 = vmul.f32 1.442695, %v2561_v13  ;;  %v2637_v37 = vmul.f32 1.442695, %v2563_v14  ;;  %v11304_v21 = vmax.f32 %v11280_v20, %v11296_v39  ;;  %v11307_v3 = vadd.f32 %v11143_v50, %v1970_v24 }
 0x479   :  { %v9045_v25 = vpop.eup %9044  ;;  %v2905_v29 = vmul.f32 %v9043_v43, %v11300_v22  ;;  %v2635_v12 = vmul.f32 1.442695, %v2562_v42  ;;  %v2639_v4 = vmul.f32 1.442695, %v2564_v23  ;;  %v2373_v18 = vmax.f32 %v2371_v54, %v2372_v44  ;;  %v11312_v15 = vpop.f32.mrb[20].mxu1 }
 0x47a   :  { %v9047_v62 = vpop.eup %9046  ;;  %v2907_v28 = vmul.f32 %v9045_v25, %v11309_v40  ;;  %9058 = vpow2.f32 %v2633_v9  ;;  %v11315_v32 = vmax.f32 %v2378_v19, %v2379_v11  ;;  %v11318_v13 = vpop.f32.mrb[21].mxu1 }
 0x47b   :  { %v9049_v14 = vpop.eup %9048  ;;  %v3257_v24 = vmul.f32 %v2905_v29, %v10949_v34  ;;  %v2906_v43 = vmul.f32 %v9047_v62, %v11300_v22  ;;  %9060 = vpow2.f32 %v2637_v37  ;;  %v2374_v42 = vrot.slane %v2373_v18, 2 }
 0x47c   :  { %v9051_v54 = vpop.eup %9050  ;;  %v2969_v23 = vadd.f32 %v2907_v28, %v2905_v29  ;;  %v3259_v44 = vmul.f32 %v2907_v28, %v10957_v38  ;;  %v2908_v25 = vmul.f32 %v9049_v14, %v11309_v40  ;;  %9062 = vpow2.f32 %v2635_v12 }
 0x47d   :  { %v9053_v19 = vpop.eup %9052  ;;  %v3258_v11 = vmul.f32 %v2906_v43, %v10951_v35  ;;  %v2909_v9 = vmul.f32 %v9051_v54, %v11255_v26  ;;  %9064 = vpow2.f32 %v2639_v4  ;;  %v11326_v5 = vmax.f32 %v2373_v18, %v2374_v42  ;;  %v11328_v48 = vpop.f32.mrb[22].mxu1 }
 0x47e   :  { %v9055_v62 = vpop.eup %9054  ;;  %v2970_v37 = vrot.slane %v2969_v23, 4  ;;  %v3321_v22 = vadd.f32 %v3259_v44, %v3257_v24  ;;  %v2976_v50 = vadd.f32 %v2908_v25, %v2906_v43  ;;  %v3260_v29 = vmul.f32 %v2908_v25, %v10959_v41  ;;  %v11331_v28 = vpop.f32.mrb[23].mxu1 }
 0x47f   :  { %v9057_v14 = vpop.eup %9056  ;;  %v2911_v12 = vmul.f32 %v9053_v19, %v11257_v53  ;;  %v3261_v40 = vmul.f32 %v2909_v9, %v10949_v34  ;;  %v2910_v54 = vmul.f32 %v9055_v62, %v11255_v26 }
 0x480   :  { %v2971_v18 = vadd.f32 %v2970_v37, %v2969_v23  ;;  %v3322_v42 = vrot.slane %v3321_v22, 4  ;;  %v2977_v45 = vrot.slane %v2976_v50, 4  ;;  %v3328_v49 = vadd.f32 %v3260_v29, %v3258_v11 }
 0x481   :  { %v2983_v63 = vadd.f32 %v2911_v12, %v2909_v9  ;;  %v3263_v24 = vmul.f32 %v2911_v12, %v10957_v38  ;;  %v2912_v43 = vmul.f32 %v9057_v14, %v11257_v53  ;;  %v3262_v44 = vmul.f32 %v2910_v54, %v10951_v35  ;;  %v11340_v25 = vpop.f32.mrb[24].mxu1 }
 0x482   :  { %v2972_v19 = vrot.slane %v2971_v18, 2  ;;  %v3323_v0 = vadd.f32 %v3322_v42, %v3321_v22  ;;  %v2978_v10 = vadd.f32 %v2977_v45, %v2976_v50  ;;  %v3329_v2 = vrot.slane %v3328_v49, 4  ;;  %v11342_v62 = vpop.f32.mrb[25].mxu1 }
 0x483   :  { %v2984_v4 = vrot.slane %v2983_v63, 4  ;;  %v3335_v23 = vadd.f32 %v3263_v24, %v3261_v40  ;;  %v2990_v37 = vadd.f32 %v2912_v43, %v2910_v54  ;;  %v3264_v11 = vmul.f32 %v2912_v43, %v10959_v41 }
 0x484   :  { %v9059_v9 = vpop.eup %9058  ;;  %v2973_v29 = vadd.f32 %v2972_v19, %v2971_v18  ;;  %v3324_v12 = vrot.slane %v3323_v0, 2  ;;  %v2979_v26 = vrot.slane %v2978_v10, 2  ;;  %v3330_v14 = vadd.f32 %v3329_v2, %v3328_v49 }
 0x485   :  { %v9061_v53 = vpop.eup %9060  ;;  %v2985_v36 = vadd.f32 %v2984_v4, %v2983_v63  ;;  %v3336_v7 = vrot.slane %v3335_v23, 4  ;;  %v2991_v17 = vrot.slane %v2990_v37, 4  ;;  %v3342_v8 = vadd.f32 %v3264_v11, %v3262_v44  ;;  %v11345_v22 = vpop.f32.mrb[26].mxu1 }
 0x486   :  { %v9063_v45 = vpop.eup %9062  ;;  %v2974_v50 = vrot.slane %v2973_v29, 1  ;;  %v3325_v42 = vadd.f32 %v3324_v12, %v3323_v0  ;;  %v2980_v56 = vadd.f32 %v2979_v26, %v2978_v10  ;;  %v3331_v40 = vrot.slane %v3330_v14, 2  ;;  %v11347_v54 = vpop.f32.mrb[27].mxu1 }
 0x487   :  { %13725 = vst [vmem:[#allocation128_spill] sm:$0xff] %v11347_v54  ;;  %v9065_v24 = vpop.eup %9064  ;;  %v2986_v43 = vrot.slane %v2985_v36, 2  ;;  %v3337_v18 = vadd.f32 %v3336_v7, %v3335_v23  ;;  %v2992_v19 = vadd.f32 %v2991_v17, %v2990_v37  ;;  %v3343_v61 = vrot.slane %v3342_v8, 4 }
 0x488   :  { %v2975_v49 = vadd.f32 %v2974_v50, %v2973_v29  ;;  %v3326_v2 = vrot.slane %v3325_v42, 1  ;;  %v2981_v63 = vrot.slane %v2980_v56, 1  ;;  %v3332_v4 = vadd.f32 %v3331_v40, %v3330_v14 }
 0x489   :  { %v2987_v6 = vadd.f32 %v2986_v43, %v2985_v36  ;;  %v3338_v44 = vrot.slane %v3337_v18, 2  ;;  %v2993_v11 = vrot.slane %v2992_v19, 2  ;;  %v3344_v1 = vadd.f32 %v3343_v61, %v3342_v8  ;;  %v11349_v60 = vpop.f32.mrb[28].mxu1 }
 0x48a   :  { %v3193_v0 = vmax.f32 %v2975_v49, 1e-20  ;;  %v3327_v10 = vadd.f32 %v3326_v2, %v3325_v42  ;;  %v2982_v26 = vadd.f32 %v2981_v63, %v2980_v56  ;;  %v3333_v12 = vrot.slane %v3332_v4, 1  ;;  %v11351_v59 = vpop.f32.mrb[29].mxu1 }
 0x48b   :  { %v2988_v54 = vrot.slane %v2987_v6, 1  ;;  %v3339_v7 = vadd.f32 %v3338_v44, %v3337_v18  ;;  %v2994_v17 = vadd.f32 %v2993_v11, %v2992_v19  ;;  %v3345_v23 = vrot.slane %v3344_v1, 2 }
 0x48c   :  { %9066 = vrcp.f32 %v3193_v0  ;;  %v3194_v37 = vmax.f32 %v2982_v26, 1e-20  ;;  %v11353_v29 = vadd.f32 %v3333_v12, %v3332_v4  ;;  %v2913_v36 = vmul.f32 %v9059_v9, %v11263_v47 }
 0x48d   :  { %v2989_v14 = vadd.f32 %v2988_v54, %v2987_v6  ;;  %v3340_v61 = vrot.slane %v3339_v7, 1  ;;  %v2995_v8 = vrot.slane %v2994_v17, 1  ;;  %v3346_v50 = vadd.f32 %v3345_v23, %v3344_v1  ;;  %v11356_v40 = vpop.f32.mrb[30].mxu1 }
 0x48e   :  { %13726 = vst [vmem:[#allocation129_spill] sm:$0xff] %v11353_v29  ;;  %9068 = vrcp.f32 %v3194_v37  ;;  %v2915_v56 = vmul.f32 %v9061_v53, %v11271_v16  ;;  %v3265_v42 = vmul.f32 %v2913_v36, %v10949_v34  ;;  %v2914_v43 = vmul.f32 %v9063_v45, %v11263_v47  ;;  %v11361_v18 = vpop.f32.mrb[31].mxu1 }
 0x48f   :  { %v3195_v19 = vmax.f32 %v2989_v14, 1e-20  ;;  %v3341_v49 = vadd.f32 %v3340_v61, %v3339_v7  ;;  %v2996_v2 = vadd.f32 %v2995_v8, %v2994_v17  ;;  %v3347_v63 = vrot.slane %v3346_v50, 1 }
 0x490   :  { %v2997_v9 = vadd.f32 %v2915_v56, %v2913_v36  ;;  %v3267_v6 = vmul.f32 %v2915_v56, %v10957_v38  ;;  %v2916_v1 = vmul.f32 %v9065_v24, %v11271_v16  ;;  %v3266_v54 = vmul.f32 %v2914_v43, %v10951_v35 }
 0x491   :  { %9070 = vrcp.f32 %v3195_v19  ;;  %v3196_v4 = vmax.f32 %v2996_v2, 1e-20  ;;  %v3348_v53 = vadd.f32 %v3347_v63, %v3346_v50  ;;  %v13727_v44 = vrot.slane %v11326_v5, 1  ;;  %v11369_v11 = vpop.f32.mrb[32].mxu1 }
 0x492   :  { %v2998_v0 = vrot.slane %v2997_v9, 4  ;;  %v3349_v26 = vadd.f32 %v3267_v6, %v3265_v42  ;;  %v3004_v12 = vadd.f32 %v2916_v1, %v2914_v43  ;;  %v3268_v7 = vmul.f32 %v2916_v1, %v10959_v41  ;;  %v11372_v17 = vpop.f32.mrb[33].mxu1 }
 0x493   :  { %v2377_v45 = vmax.f32 %v11326_v5, %v13727_v44  ;;  %9072 = vrcp.f32 %v3196_v4  ;;  %v2381_v37 = vrot.slane %v11315_v32, 2  ;;  %v13728_v42 = vrot.slane %v11304_v21, 4 }
 0x494   :  { %v2999_v36 = vadd.f32 %v2998_v0, %v2997_v9  ;;  %v3350_v14 = vrot.slane %v3349_v26, 4  ;;  %v3005_v61 = vrot.slane %v3004_v12, 4  ;;  %v3356_v5 = vadd.f32 %v3268_v7, %v3266_v54 }
 0x495   :  { %v2565_v24 = vsub.f32 %v11266_v33, %v2377_v45  ;;  %v2567_v23 = vsub.f32 %v11274_v46, %v2377_v45  ;;  %v2382_v56 = vmax.f32 %v11315_v32, %v2381_v37  ;;  %v2387_v43 = vmax.f32 %v11304_v21, %v13728_v42  ;;  %v11381_v19 = vpop.f32.mrb[34].mxu1 }
 0x496   :  { %v9067_v2 = vpop.eup %9066  ;;  %v3000_v33 = vrot.slane %v2999_v36, 2  ;;  %v3351_v63 = vadd.f32 %v3350_v14, %v3349_v26  ;;  %v3006_v46 = vadd.f32 %v3005_v61, %v3004_v12  ;;  %v3357_v6 = vrot.slane %v3356_v5, 4  ;;  %v11383_v1 = vpop.f32.mrb[35].mxu1 }
 0x497   :  { %v2641_v8 = vmul.f32 1.442695, %v2565_v24  ;;  %v2645_v50 = vmul.f32 1.442695, %v2567_v23  ;;  %v11385_v9 = vmul.f32 %v9067_v2, %v3327_v10  ;;  %v2383_v54 = vrot.slane %v2382_v56, 1 }
 0x498   :  { %v2388_v4 = vrot.slane %v2387_v43, 2  ;;  %v11387_v44 = vpop.eup %9068  ;;  %v3001_v32 = vadd.f32 %v3000_v33, %v2999_v36  ;;  %v3352_v45 = vrot.slane %v3351_v63, 2  ;;  %v3007_v0 = vrot.slane %v3006_v46, 2 }
 0x499   :  { %13729 = vst [vmem:[#allocation130_spill] sm:$0xff] %v11385_v9  ;;  %9074 = vpow2.f32 %v2641_v8  ;;  %13730 = vst [vmem:[#allocation131_spill] sm:$0xff] %v11387_v44  ;;  %v3358_v21 = vadd.f32 %v3357_v6, %v3356_v5  ;;  %v2384_v7 = vmax.f32 %v2382_v56, %v2383_v54  ;;  %v2392_v26 = vmax.f32 %v11293_v31, %v11307_v3  ;;  %v11391_v12 = vpop.f32.mrb[36].mxu1 }
 0x49a   :  { %9076 = vpow2.f32 %v2645_v50  ;;  %v2389_v24 = vmax.f32 %v2387_v43, %v2388_v4  ;;  %v3002_v23 = vrot.slane %v3001_v32, 1  ;;  %v3353_v10 = vadd.f32 %v3352_v45, %v3351_v63  ;;  %v11393_v61 = vpop.f32.mrb[37].mxu1 }
 0x49b   :  { %v3008_v37 = vadd.f32 %v3007_v0, %v3006_v46  ;;  %v3359_v14 = vrot.slane %v3358_v21, 2  ;;  %v9071_v8 = vpop.eup %9070  ;;  %v2566_v36 = vsub.f32 %v11269_v55, %v2384_v7  ;;  %v2568_v42 = vsub.f32 %v11277_v30, %v2384_v7 }
 0x49c   :  { %v2390_v5 = vrot.slane %v2389_v24, 1  ;;  %v2393_v50 = vrot.slane %v2392_v26, 4  ;;  %v3547_v56 = vmul.f32 %v9071_v8, %v3341_v49  ;;  %v3003_v43 = vadd.f32 %v3002_v23, %v3001_v32  ;;  %v11414_v8 = vpop.permute.xlu0 %2777 }
 0x49d   :  { %v3354_v2 = vrot.slane %v3353_v10, 1  ;;  %v3009_v33 = vrot.slane %v3008_v37, 1  ;;  %v9073_v6 = vpop.eup %9072  ;;  %v3360_v54 = vadd.f32 %v3359_v14, %v3358_v21  ;;  %v2643_v4 = vmul.f32 1.442695, %v2566_v36  ;;  %v11397_v46 = vpop.f32.mrb[38].mxu1  ;;  %13733 = vst [vmem:[#allocation134_spill] sm:$0xff] %v11414_v8 }
 0x49e   :  { %v2647_v16 = vmul.f32 1.442695, %v2568_v42  ;;  %v2391_v63 = vmax.f32 %v2389_v24, %v2390_v5  ;;  %v11400_v45 = vadd.f32 %v11220_v27, %v3547_v56  ;;  %v11402_v0 = vmul.f32 %v9073_v6, %v3348_v53  ;;  %v11406_v7 = vpop.f32.mrb[39].mxu1 }
 0x49f   :  { %v3197_v55 = vmax.f32 %v3003_v43, 1e-20  ;;  %v11404_v30 = vadd.f32 %v3354_v2, %v3353_v10  ;;  %v3010_v49 = vadd.f32 %v3009_v33, %v3008_v37  ;;  %v3361_v32 = vrot.slane %v3360_v54, 1 }
 0x4a0   :  { %13731 = vst [vmem:[#allocation132_spill] sm:$0xff] %v11400_v45  ;;  %13732 = vst [vmem:[#allocation133_spill] sm:$0xff] %v11402_v0  ;;  %9078 = vpow2.f32 %v2643_v4  ;;  %v2569_v21 = vsub.f32 %v11280_v20, %v2391_v63  ;;  %v2571_v24 = vsub.f32 %v11296_v39, %v2391_v63  ;;  %v2394_v23 = vmax.f32 %v2392_v26, %v2393_v50  ;;  %v11427_v50 = vpop.permute.xlu1 %2782 }
 0x4a1   :  { %9080 = vrcp.f32 %v3197_v55  ;;  %v11412_v14 = vadd.f32 %v11145_v51, %v11312_v15  ;;  %v3198_v10 = vmax.f32 %v3010_v49, 1e-20  ;;  %v11416_v36 = vadd.f32 %v3361_v32, %v3360_v54  ;;  %v11418_v42 = vpop.f32.mrb[40].mxu1  ;;  %13735 = vst [vmem:[#allocation136_spill] sm:$0xff] %v11427_v50 }
 0x4a2   :  { %9082 = vpow2.f32 %v2647_v16  ;;  %v2649_v37 = vmul.f32 1.442695, %v2569_v21  ;;  %v2653_v5 = vmul.f32 1.442695, %v2571_v24  ;;  %v2395_v56 = vrot.slane %v2394_v23, 2  ;;  %v11425_v15 = vpop.f32.mrb[41].mxu1 }
 0x4a3   :  { %v9075_v53 = vpop.eup %9074  ;;  %13734 = vst [vmem:[#allocation135_spill] sm:$0xff] %v11416_v36  ;;  %v11423_v39 = vadd.f32 %v11145_v51, %v11318_v13  ;;  %9084 = vrcp.f32 %v3198_v10  ;;  %v11431_v16 = vadd.f32 %v11147_v52, %v11328_v48  ;;  %v11435_v43 = vadd.f32 %v11147_v52, %v11331_v28 }
 0x4a4   :  { %v2917_v20 = vmul.f32 %v9075_v53, %v11414_v8  ;;  %v9077_v26 = vpop.eup %9076  ;;  %v11439_v2 = vadd.f32 %v11149_v57, %v11340_v25  ;;  %9086 = vpow2.f32 %v2649_v37  ;;  %v2396_v6 = vmax.f32 %v2394_v23, %v2395_v56  ;;  %v13736_v23 = vld [vmem:[#allocation128_spill] sm:$0xff] }
 0x4a5   :  { %v2919_v13 = vmul.f32 %v9077_v26, %v11427_v50  ;;  %9088 = vpow2.f32 %v2653_v5  ;;  %v2399_v54 = vmax.f32 %v11412_v14, %v11431_v16  ;;  %v2406_v48 = vmax.f32 %v11423_v39, %v11435_v43  ;;  %v11451_v4 = vpop.f32.mrb[42].mxu1 }
 0x4a6   :  { %v3269_v33 = vmul.f32 %v2917_v20, %v10949_v34  ;;  %v11449_v28 = vadd.f32 %v11149_v57, %v11342_v62  ;;  %v2397_v55 = vrot.slane %v2396_v6, 1  ;;  %v11456_v49 = vadd.f32 %v11151_v58, %v11345_v22  ;;  %v11458_v32 = vpop.f32.mrb[43].mxu1  ;;  %v13737_v62 = vld [vmem:[#allocation99_spill] sm:$0xff] }
 0x4a7   :  { %v3011_v25 = vadd.f32 %v2919_v13, %v2917_v20  ;;  %v3271_v63 = vmul.f32 %v2919_v13, %v10957_v38  ;;  %v2400_v21 = vrot.slane %v2399_v54, 4  ;;  %v2407_v24 = vrot.slane %v2406_v48, 4 }
 0x4a8   :  { %v11462_v53 = vadd.f32 %v11151_v58, %v13736_v23  ;;  %v11466_v10 = vadd.f32 %v13737_v62, %v11349_v60  ;;  %v2398_v5 = vmax.f32 %v2396_v6, %v2397_v55  ;;  %v11470_v56 = vmax.f32 %v11439_v2, %v11456_v49 }
 0x4a9   :  { %v3012_v37 = vrot.slane %v3011_v25, 4  ;;  %v3363_v20 = vadd.f32 %v3271_v63, %v3269_v33  ;;  %v2401_v26 = vmax.f32 %v2399_v54, %v2400_v21  ;;  %v2408_v13 = vmax.f32 %v2406_v48, %v2407_v24  ;;  %v11480_v60 = vpop.f32.mrb[44].mxu1 }
 0x4aa   :  { %v9079_v22 = vpop.eup %9078  ;;  %v11474_v47 = vmax.f32 %v11449_v28, %v11462_v53  ;;  %v11478_v23 = vadd.f32 %v13737_v62, %v11351_v59  ;;  %v2570_v55 = vsub.f32 %v11293_v31, %v2398_v5  ;;  %v11484_v58 = vpop.f32.mrb[45].mxu1  ;;  %v2572_v21 = vsub.f32 %v11307_v3, %v2398_v5 }
 0x4ab   :  { %v9081_v57 = vpop.eup %9080  ;;  %v3013_v33 = vadd.f32 %v3012_v37, %v3011_v25  ;;  %v3364_v6 = vrot.slane %v3363_v20, 4  ;;  %v2918_v63 = vmul.f32 %v9079_v22, %v11414_v8  ;;  %v2402_v24 = vrot.slane %v2401_v26, 2 }
 0x4ac   :  { %v9083_v54 = vpop.eup %9082  ;;  %v11487_v48 = vmul.f32 %v9081_v57, %v11404_v30  ;;  %v2409_v59 = vrot.slane %v2408_v13, 2  ;;  %v2651_v22 = vmul.f32 1.442695, %v2570_v55  ;;  %v2655_v31 = vmul.f32 1.442695, %v2572_v21  ;;  %v11496_v30 = vpop.permute.xlu0 %2787 }
 0x4ad   :  { %v3014_v62 = vrot.slane %v3013_v33, 2  ;;  %v3365_v51 = vadd.f32 %v3364_v6, %v3363_v20  ;;  %v2920_v52 = vmul.f32 %v9083_v54, %v11427_v50  ;;  %v3270_v25 = vmul.f32 %v2918_v63, %v10951_v35  ;;  %v11492_v37 = vpop.eup %9084  ;;  %v11494_v27 = vpop.f32.mrb[46].mxu1  ;;  %13740 = vst [vmem:[#allocation138_spill] sm:$0xff] %v11496_v30 }
 0x4ae   :  { %13738 = vst [vmem:[#allocation128_spill] sm:$0xff] %v11487_v48  ;;  %13739 = vst [vmem:[#allocation137_spill] sm:$0xff] %v11492_v37  ;;  %v2403_v8 = vmax.f32 %v2401_v26, %v2402_v24  ;;  %v2410_v45 = vmax.f32 %v2408_v13, %v2409_v59  ;;  %v9087_v57 = vpop.eup %9086  ;;  %v11499_v6 = vpop.f32.mrb[47].mxu1  ;;  %9090 = vpow2.f32 %v2651_v22 }
 0x4af   :  { %v3015_v3 = vadd.f32 %v3014_v62, %v3013_v33  ;;  %v3366_v5 = vrot.slane %v3365_v51, 2  ;;  %v3018_v48 = vadd.f32 %v2920_v52, %v2918_v63  ;;  %v3272_v20 = vmul.f32 %v2920_v52, %v10959_v41  ;;  %v9089_v54 = vpop.eup %9088  ;;  %v11502_v26 = vpop.permute.xlu1 %2792 }
 0x4b0   :  { %v2921_v50 = vmul.f32 %v9087_v57, %v11496_v30  ;;  %v2404_v55 = vrot.slane %v2403_v8, 1  ;;  %v2411_v21 = vrot.slane %v2410_v45, 1  ;;  %13741 = vst [vmem:[#allocation139_spill] sm:$0xff] %v11502_v26  ;;  %v2923_v62 = vmul.f32 %v9089_v54, %v11502_v26 }
 0x4b1   :  { %v3016_v13 = vrot.slane %v3015_v3, 1  ;;  %v3367_v24 = vadd.f32 %v3366_v5, %v3365_v51  ;;  %v3019_v59 = vrot.slane %v3018_v48, 4  ;;  %v3370_v9 = vadd.f32 %v3272_v20, %v3270_v25  ;;  %v11506_v63 = vpop.f32.mrb[48].mxu1 }
 0x4b2   :  { %v3273_v33 = vmul.f32 %v2921_v50, %v10949_v34  ;;  %9092 = vpow2.f32 %v2655_v31  ;;  %v2405_v52 = vmax.f32 %v2403_v8, %v2404_v55  ;;  %13742 = vst [vmem:[#allocation140_spill] sm:$0xff] %v11506_v63  ;;  %v11508_v36 = vpop.f32.mrb[49].mxu1  ;;  %v3025_v44 = vadd.f32 %v2923_v62, %v2921_v50 }
 0x4b3   :  { %v3017_v0 = vadd.f32 %v3016_v13, %v3015_v3  ;;  %v3368_v37 = vrot.slane %v3367_v24, 1  ;;  %v3020_v57 = vadd.f32 %v3019_v59, %v3018_v48  ;;  %v3371_v22 = vrot.slane %v3370_v9, 4  ;;  %13743 = vst [vmem:[#allocation141_spill] sm:$0xff] %v11508_v36 }
 0x4b4   :  { %v3275_v29 = vmul.f32 %v2923_v62, %v10957_v38  ;;  %v2573_v51 = vsub.f32 %v11412_v14, %v2405_v52  ;;  %v2575_v25 = vsub.f32 %v11431_v16, %v2405_v52  ;;  %v3026_v8 = vrot.slane %v3025_v44, 4 }
 0x4b5   :  { %v3199_v5 = vmax.f32 %v3017_v0, 1e-20  ;;  %v3369_v20 = vadd.f32 %v3368_v37, %v3367_v24  ;;  %v3021_v54 = vrot.slane %v3020_v57, 2  ;;  %v3372_v31 = vadd.f32 %v3371_v22, %v3370_v9  ;;  %v11513_v13 = vpop.f32.mrb[50].mxu1 }
 0x4b6   :  { %v3377_v55 = vadd.f32 %v3275_v29, %v3273_v33  ;;  %v2657_v63 = vmul.f32 1.442695, %v2573_v51  ;;  %v2661_v3 = vmul.f32 1.442695, %v2575_v25  ;;  %v2412_v50 = vmax.f32 %v2410_v45, %v2411_v21  ;;  %v11515_v36 = vpop.f32.mrb[51].mxu1 }
 0x4b7   :  { %9094 = vrcp.f32 %v3199_v5  ;;  %v3022_v48 = vadd.f32 %v3021_v54, %v3020_v57  ;;  %v3373_v59 = vrot.slane %v3372_v31, 2  ;;  %v3027_v62 = vadd.f32 %v3026_v8, %v3025_v44 }
 0x4b8   :  { %v3378_v14 = vrot.slane %v3377_v55, 4  ;;  %9096 = vpow2.f32 %v2657_v63  ;;  %v2414_v0 = vrot.slane %v11470_v56, 4  ;;  %v2574_v29 = vsub.f32 %v11423_v39, %v2412_v50  ;;  %v9091_v9 = vpop.eup %9090 }
 0x4b9   :  { %v3023_v16 = vrot.slane %v3022_v48, 1  ;;  %v3374_v37 = vadd.f32 %v3373_v59, %v3372_v31  ;;  %9098 = vpow2.f32 %v2661_v3  ;;  %v3028_v24 = vrot.slane %v3027_v62, 2  ;;  %v11521_v45 = vpop.f32.mrb[52].mxu1 }
 0x4ba   :  { %v3379_v33 = vadd.f32 %v3378_v14, %v3377_v55  ;;  %v2576_v52 = vsub.f32 %v11435_v43, %v2412_v50  ;;  %v2415_v57 = vmax.f32 %v11470_v56, %v2414_v0  ;;  %v2922_v63 = vmul.f32 %v9091_v9, %v11496_v30  ;;  %v11524_v51 = vpop.f32.mrb[53].mxu1 }
 0x4bb   :  { %v3024_v21 = vadd.f32 %v3023_v16, %v3022_v48  ;;  %v3375_v44 = vrot.slane %v3374_v37, 1  ;;  %v2659_v22 = vmul.f32 1.442695, %v2574_v29  ;;  %v3029_v5 = vadd.f32 %v3028_v24, %v3027_v62 }
 0x4bc   :  { %v9093_v25 = vpop.eup %9092  ;;  %v3380_v54 = vrot.slane %v3379_v33, 2  ;;  %v2663_v39 = vmul.f32 1.442695, %v2576_v52  ;;  %v2416_v31 = vrot.slane %v2415_v57, 2  ;;  %v3274_v56 = vmul.f32 %v2922_v63, %v10951_v35 }
 0x4bd   :  { %v3200_v8 = vmax.f32 %v3024_v21, 1e-20  ;;  %v11526_v55 = vadd.f32 %v3375_v44, %v3374_v37  ;;  %v2924_v43 = vmul.f32 %v9093_v25, %v11502_v26  ;;  %v3030_v3 = vrot.slane %v3029_v5, 1  ;;  %v11530_v50 = vpop.f32.mrb[54].mxu1 }
 0x4be   :  { %v3381_v48 = vadd.f32 %v3380_v54, %v3379_v33  ;;  %9100 = vpow2.f32 %v2659_v22  ;;  %v2417_v59 = vmax.f32 %v2415_v57, %v2416_v31  ;;  %v2421_v0 = vrot.slane %v11474_v47, 4  ;;  %v11534_v16 = vpop.f32.mrb[55].mxu1  ;;  %v13745_v57 = vld [vmem:[#allocation100_spill] sm:$0xff]  ;;  %v11541_v22 = vpop.permute.xlu0 %2797 }
 0x4bf   :  { %13744 = vst [vmem:[#allocation142_spill] sm:$0xff] %v11526_v55  ;;  %9102 = vrcp.f32 %v3200_v8  ;;  %v3032_v14 = vadd.f32 %v2924_v43, %v2922_v63  ;;  %v3276_v62 = vmul.f32 %v2924_v43, %v10959_v41  ;;  %v3031_v37 = vadd.f32 %v3030_v3, %v3029_v5  ;;  %13746 = vst [vmem:[#allocation143_spill] sm:$0xff] %v11541_v22  ;;  %v11549_v43 = vpop.permute.xlu1 %2802 }
 0x4c0   :  { %v3382_v29 = vrot.slane %v3381_v48, 1  ;;  %9104 = vpow2.f32 %v2663_v39  ;;  %v2418_v9 = vrot.slane %v2417_v59, 1  ;;  %v2422_v33 = vmax.f32 %v11474_v47, %v2421_v0  ;;  %13749 = vst [vmem:[#allocation146_spill] sm:$0xff] %v11549_v43 }
 0x4c1   :  { %v9095_v24 = vpop.eup %9094  ;;  %v3033_v52 = vrot.slane %v3032_v14, 4  ;;  %v3384_v21 = vadd.f32 %v3276_v62, %v3274_v56  ;;  %v11539_v44 = vadd.f32 %v13745_v57, %v11356_v40  ;;  %v3201_v54 = vmax.f32 %v3031_v37, 1e-20  ;;  %v11547_v39 = vpop.f32.mrb[56].mxu1 }
 0x4c2   :  { %v9097_v63 = vpop.eup %9096  ;;  %v11543_v25 = vmul.f32 %v9095_v24, %v3369_v20  ;;  %v11545_v31 = vadd.f32 %v3382_v29, %v3381_v48  ;;  %v2419_v5 = vmax.f32 %v2417_v59, %v2418_v9  ;;  %v2423_v40 = vrot.slane %v2422_v33, 2  ;;  %v11552_v62 = vpop.f32.mrb[57].mxu1 }
 0x4c3   :  { %v9099_v8 = vpop.eup %9098  ;;  %v3034_v56 = vadd.f32 %v3033_v52, %v3032_v14  ;;  %v3385_v47 = vrot.slane %v3384_v21, 4  ;;  %v2925_v3 = vmul.f32 %v9097_v63, %v11541_v22  ;;  %9106 = vrcp.f32 %v3201_v54 }
 0x4c4   :  { %13747 = vst [vmem:[#allocation144_spill] sm:$0xff] %v11543_v25  ;;  %13748 = vst [vmem:[#allocation145_spill] sm:$0xff] %v11545_v31  ;;  %v2927_v20 = vmul.f32 %v9099_v8, %v11549_v43  ;;  %v2577_v0 = vsub.f32 %v11439_v2, %v2419_v5  ;;  %v2579_v48 = vsub.f32 %v11456_v49, %v2419_v5 }
 0x4c5   :  { %v3035_v59 = vrot.slane %v3034_v56, 2  ;;  %v3386_v37 = vadd.f32 %v3385_v47, %v3384_v21  ;;  %v3277_v29 = vmul.f32 %v2925_v3, %v10949_v34  ;;  %v2424_v9 = vmax.f32 %v2422_v33, %v2423_v40  ;;  %v11559_v26 = vpop.f32.mrb[58].mxu1 }
 0x4c6   :  { %v3039_v24 = vadd.f32 %v2927_v20, %v2925_v3  ;;  %v3279_v14 = vmul.f32 %v2927_v20, %v10957_v38  ;;  %v2665_v52 = vmul.f32 1.442695, %v2577_v0  ;;  %v2669_v63 = vmul.f32 1.442695, %v2579_v48 }
 0x4c7   :  { %v3036_v30 = vadd.f32 %v3035_v59, %v3034_v56  ;;  %v3387_v54 = vrot.slane %v3386_v37, 2  ;;  %v2425_v25 = vrot.slane %v2424_v9, 1  ;;  %v2427_v2 = vmax.f32 %v11466_v10, %v11539_v44 }
 0x4c8   :  { %v9101_v8 = vpop.eup %9100  ;;  %v3040_v49 = vrot.slane %v3039_v24, 4  ;;  %v3391_v5 = vadd.f32 %v3279_v14, %v3277_v29  ;;  %9108 = vpow2.f32 %v2665_v52  ;;  %v11565_v21 = vadd.f32 %v13745_v57, %v11361_v18 }
 0x4c9   :  { %v11567_v33 = vpop.eup %9102  ;;  %v3037_v47 = vrot.slane %v3036_v30, 1  ;;  %v11569_v3 = vadd.f32 %v3387_v54, %v3386_v37  ;;  %v2926_v56 = vmul.f32 %v9101_v8, %v11541_v22  ;;  %9110 = vpow2.f32 %v2669_v63 }
 0x4ca   :  { %13750 = vst [vmem:[#allocation147_spill] sm:$0xff] %v11567_v33  ;;  %v9105_v40 = vpop.eup %9104  ;;  %v3041_v20 = vadd.f32 %v3040_v49, %v3039_v24  ;;  %v3392_v0 = vrot.slane %v3391_v5, 4  ;;  %v2426_v48 = vmax.f32 %v2424_v9, %v2425_v25  ;;  %v2428_v59 = vrot.slane %v2427_v2, 4  ;;  %v11578_v25 = vpop.f32.mrb[59].mxu1 }
 0x4cb   :  { %13751 = vst [vmem:[#allocation148_spill] sm:$0xff] %v11569_v3  ;;  %v3038_v31 = vadd.f32 %v3037_v47, %v3036_v30  ;;  %v2928_v14 = vmul.f32 %v9105_v40, %v11549_v43  ;;  %v3278_v18 = vmul.f32 %v2926_v56, %v10951_v35 }
 0x4cc   :  { %v3042_v52 = vrot.slane %v3041_v20, 2  ;;  %v3393_v57 = vadd.f32 %v3392_v0, %v3391_v5  ;;  %v2578_v37 = vsub.f32 %v11449_v28, %v2426_v48  ;;  %v2580_v54 = vsub.f32 %v11462_v53, %v2426_v48 }
 0x4cd   :  { %v3202_v8 = vmax.f32 %v3038_v31, 1e-20  ;;  %v3046_v63 = vadd.f32 %v2928_v14, %v2926_v56  ;;  %v3280_v24 = vmul.f32 %v2928_v14, %v10959_v41  ;;  %v2429_v49 = vmax.f32 %v2427_v2, %v2428_v59  ;;  %v11580_v30 = vpop.eup %9106  ;;  %v11584_v59 = vpop.permute.xlu0 %2807 }
 0x4ce   :  { %13752 = vst [vmem:[#allocation149_spill] sm:$0xff] %v11580_v30  ;;  %v3043_v9 = vadd.f32 %v3042_v52, %v3041_v20  ;;  %v3394_v47 = vrot.slane %v3393_v57, 2  ;;  %v2667_v40 = vmul.f32 1.442695, %v2578_v37  ;;  %v2671_v29 = vmul.f32 1.442695, %v2580_v54 }
 0x4cf   :  { %9112 = vrcp.f32 %v3202_v8  ;;  %v3047_v43 = vrot.slane %v3046_v63, 4  ;;  %v3398_v5 = vadd.f32 %v3280_v24, %v3278_v18  ;;  %v2430_v0 = vrot.slane %v2429_v49, 2  ;;  %13753 = vst [vmem:[#allocation150_spill] sm:$0xff] %v11584_v59  ;;  %v13754_v37 = vld [vmem:[#allocation105_spill] sm:$0xff]  ;;  %v11590_v54 = vpop.f32.mrb[60].mxu1  ;;  %v11592_v8 = vpop.permute.xlu1 %2812 }
 0x4d0   :  { %v3044_v28 = vrot.slane %v3043_v9, 1  ;;  %v3395_v22 = vadd.f32 %v3394_v47, %v3393_v57  ;;  %9114 = vpow2.f32 %v2667_v40  ;;  %v2434_v53 = vmax.f32 %v11478_v23, %v11565_v21  ;;  %13755 = vst [vmem:[#allocation151_spill] sm:$0xff] %v11592_v8 }
 0x4d1   :  { %v3048_v31 = vadd.f32 %v3047_v43, %v3046_v63  ;;  %v3399_v2 = vrot.slane %v3398_v5, 4  ;;  %9116 = vpow2.f32 %v2671_v29  ;;  %v2431_v56 = vmax.f32 %v2429_v49, %v2430_v0  ;;  %v11598_v0 = vpop.f32.mrb[61].mxu1 }
 0x4d2   :  { %v9109_v48 = vpop.eup %9108  ;;  %v3045_v20 = vadd.f32 %v3044_v28, %v3043_v9  ;;  %v3396_v14 = vrot.slane %v3395_v22, 1  ;;  %v2435_v52 = vrot.slane %v2434_v53, 4  ;;  %v11588_v18 = vadd.f32 %v13754_v37, %v11369_v11 }
 0x4d3   :  { %v9111_v57 = vpop.eup %9110  ;;  %v3049_v24 = vrot.slane %v3048_v31, 2  ;;  %v3400_v43 = vadd.f32 %v3399_v2, %v3398_v5  ;;  %v2929_v29 = vmul.f32 %v9109_v48, %v11584_v59  ;;  %v2432_v63 = vrot.slane %v2431_v56, 1 }
 0x4d4   :  { %v3203_v49 = vmax.f32 %v3045_v20, 1e-20  ;;  %v11595_v47 = vadd.f32 %v3396_v14, %v3395_v22  ;;  %v2931_v9 = vmul.f32 %v9111_v57, %v11592_v8  ;;  %v2436_v40 = vmax.f32 %v2434_v53, %v2435_v52  ;;  %v11606_v53 = vpop.f32.mrb[62].mxu1 }
 0x4d5   :  { %v3050_v11 = vadd.f32 %v3049_v24, %v3048_v31  ;;  %v3401_v28 = vrot.slane %v3400_v43, 2  ;;  %v3281_v30 = vmul.f32 %v2929_v29, %v10949_v34  ;;  %v2433_v33 = vmax.f32 %v2431_v56, %v2432_v63 }
 0x4d6   :  { %13756 = vst [vmem:[#allocation152_spill] sm:$0xff] %v11595_v47  ;;  %9118 = vrcp.f32 %v3203_v49  ;;  %v3053_v55 = vadd.f32 %v2931_v9, %v2929_v29  ;;  %v3283_v5 = vmul.f32 %v2931_v9, %v10957_v38  ;;  %v2437_v2 = vrot.slane %v2436_v40, 2 }
 0x4d7   :  { %v3051_v48 = vrot.slane %v3050_v11, 1  ;;  %v11602_v3 = vadd.f32 %v3401_v28, %v3400_v43  ;;  %v2581_v22 = vsub.f32 %v11466_v10, %v2433_v33  ;;  %v2583_v20 = vsub.f32 %v11539_v44, %v2433_v33  ;;  %v13759_v43 = vld [vmem:[#allocation106_spill] sm:$0xff] }
 0x4d8   :  { %v3054_v14 = vrot.slane %v3053_v55, 4  ;;  %v3405_v31 = vadd.f32 %v3283_v5, %v3281_v30  ;;  %v2438_v52 = vmax.f32 %v2436_v40, %v2437_v2  ;;  %v11610_v56 = vadd.f32 %v13754_v37, %v11372_v17 }
 0x4d9   :  { %13757 = vst [vmem:[#allocation153_spill] sm:$0xff] %v11602_v3  ;;  %v11612_v57 = vpop.eup %9112  ;;  %v3052_v24 = vadd.f32 %v3051_v48, %v3050_v11  ;;  %v2673_v29 = vmul.f32 1.442695, %v2581_v22  ;;  %v2677_v63 = vmul.f32 1.442695, %v2583_v20  ;;  %v11616_v49 = vadd.f32 %v13759_v43, %v11381_v19 }
 0x4da   :  { %13758 = vst [vmem:[#allocation154_spill] sm:$0xff] %v11612_v57  ;;  %v9115_v10 = vpop.eup %9114  ;;  %v3055_v44 = vadd.f32 %v3054_v14, %v3053_v55  ;;  %v3406_v33 = vrot.slane %v3405_v31, 4  ;;  %v2439_v9 = vrot.slane %v2438_v52, 1  ;;  %v11620_v30 = vadd.f32 %v13759_v43, %v11383_v1 }
 0x4db   :  { %v9117_v40 = vpop.eup %9116  ;;  %v3204_v17 = vmax.f32 %v3052_v24, 1e-20  ;;  %v2930_v28 = vmul.f32 %v9115_v10, %v11584_v59  ;;  %9120 = vpow2.f32 %v2673_v29  ;;  %v2441_v11 = vmax.f32 %v11588_v18, %v11616_v49  ;;  %v11628_v10 = vpop.f32.mrb[63].mxu1 }
 0x4dc   :  { %v3056_v5 = vrot.slane %v3055_v44, 2  ;;  %v3407_v2 = vadd.f32 %v3406_v33, %v3405_v31  ;;  %v2932_v19 = vmul.f32 %v9117_v40, %v11592_v8  ;;  %9122 = vpow2.f32 %v2677_v63 }
 0x4dd   :  { %9124 = vrcp.f32 %v3204_v17  ;;  %v3282_v55 = vmul.f32 %v2930_v28, %v10951_v35  ;;  %v2440_v48 = vmax.f32 %v2438_v52, %v2439_v9  ;;  %v2442_v22 = vrot.slane %v2441_v11, 4 }
 0x4de   :  { %v3057_v1 = vadd.f32 %v3056_v5, %v3055_v44  ;;  %v3408_v20 = vrot.slane %v3407_v2, 2  ;;  %v3060_v14 = vadd.f32 %v2932_v19, %v2930_v28  ;;  %v3284_v24 = vmul.f32 %v2932_v19, %v10959_v41 }
 0x4df   :  { %v2582_v29 = vsub.f32 %v11478_v23, %v2440_v48  ;;  %v2584_v59 = vsub.f32 %v11565_v21, %v2440_v48  ;;  %v2443_v31 = vmax.f32 %v2441_v11, %v2442_v22  ;;  %v2448_v63 = vmax.f32 %v11610_v56, %v11620_v30  ;;  %v3954_v11 = vld [vmem:[#allocation25 + $0x80] sm:$0xff]  ;;  %v3955_v48 = vld [vmem:[#allocation25 + $0x88] sm:$0xff] }
 0x4e0   :  { %v11634_v33 = vpop.eup %9118  ;;  %v3058_v40 = vrot.slane %v3057_v1, 1  ;;  %v11636_v52 = vadd.f32 %v3408_v20, %v3407_v2  ;;  %v3061_v44 = vrot.slane %v3060_v14, 4  ;;  %v3412_v9 = vadd.f32 %v3284_v24, %v3282_v55 }
 0x4e1   :  { %13760 = vst [vmem:[#allocation155_spill] sm:$0xff] %v11634_v33  ;;  %v2675_v17 = vmul.f32 1.442695, %v2582_v29  ;;  %v2679_v28 = vmul.f32 1.442695, %v2584_v59  ;;  %v2444_v5 = vrot.slane %v2443_v31, 2  ;;  %v8806_v23 = vpack.c.bf16 %v3955_v48, %v3954_v11 }
 0x4e2   :  { %13761 = vst [vmem:[#allocation156_spill] sm:$0xff] %v11636_v52  ;;  %v2449_v19 = vrot.slane %v2448_v63, 4  ;;  %v3059_v8 = vadd.f32 %v3058_v40, %v3057_v1  ;;  %v3062_v37 = vadd.f32 %v3061_v44, %v3060_v14  ;;  %v3413_v21 = vrot.slane %v3412_v9, 4  ;;  %v13762_v33 = vld [vmem:[#allocation101_spill] sm:$0xff]  ;;  %v3938_v59 = vld [vmem:[#allocation25] sm:$0xff]  ;;  %v3939_v1 = vld [vmem:[#allocation25 + $0x8] sm:$0xff]  ;;  %v11645_v40 = vpop.permute.xlu0 %2817 }
 0x4e3   :  { %9126 = vpow2.f32 %v2675_v17  ;;  %v2445_v22 = vmax.f32 %v2443_v31, %v2444_v5  ;;  %v11641_v2 = vadd.f32 %v13762_v33, %v11391_v12  ;;  %13764 = vst [vmem:[#allocation158_spill] sm:$0xff] %v11645_v40  ;;  %v11649_v31 = vadd.f32 %v13762_v33, %v11393_v61  ;;  %v11651_v12 = vpop.permute.xlu1 %2822  ;;  %8807 = vmatprep.subr.bf16.mxu1 %v8806_v23  ;;  %v11658_v48 = vpop.f32.mrb[74].mxu0 }
 0x4e4   :  { %v2450_v43 = vmax.f32 %v2448_v63, %v2449_v19  ;;  %v3205_v20 = vmax.f32 %v3059_v8, 1e-20  ;;  %v3063_v55 = vrot.slane %v3062_v37, 2  ;;  %v11643_v24 = vadd.f32 %v3413_v21, %v3412_v9  ;;  %13765 = vst [vmem:[#allocation159_spill] sm:$0xff] %v11651_v12  ;;  %13767 = vst [vmem:[#allocation161_spill] sm:$0xff] %v11658_v48 }
 0x4e5   :  { %9128 = vpow2.f32 %v2679_v28  ;;  %v9121_v29 = vpop.eup %9120  ;;  %v2446_v14 = vrot.slane %v2445_v22, 1  ;;  %v8808_v11 = vpack.c.bf16 %v3939_v1, %v3938_v59 }
 0x4e6   :  { %13763 = vst [vmem:[#allocation157_spill] sm:$0xff] %v11643_v24  ;;  %v2451_v44 = vrot.slane %v2450_v43, 2  ;;  %v9123_v63 = vpop.eup %9122  ;;  %9130 = vrcp.f32 %v3205_v20  ;;  %v3064_v8 = vadd.f32 %v3063_v55, %v3062_v37  ;;  %v2933_v17 = vmul.f32 %v9121_v29, %v11645_v40  ;;  %v13768_v20 = vld [vmem:[#allocation102_spill] sm:$0xff]  ;;  %v11669_v29 = vpop.f32.mrb[75].mxu0 }
 0x4e7   :  { %v11655_v28 = vpop.eup %9124  ;;  %v2935_v5 = vmul.f32 %v9123_v63, %v11651_v12  ;;  %v2447_v19 = vmax.f32 %v2445_v22, %v2446_v14  ;;  %v11663_v37 = vadd.f32 %v13768_v20, %v11397_v46  ;;  %v11667_v55 = vadd.f32 %v13768_v20, %v11406_v7  ;;  %13769 = vst [vmem:[#allocation162_spill] sm:$0xff] %v11669_v29  ;;  %v11678_v7 = vpop.permute.xlu0 %2837 }
 0x4e8   :  { %13766 = vst [vmem:[#allocation160_spill] sm:$0xff] %v11655_v28  ;;  %v2452_v21 = vmax.f32 %v2450_v43, %v2451_v44  ;;  %v3065_v61 = vrot.slane %v3064_v8, 1  ;;  %v3285_v33 = vmul.f32 %v2933_v17, %v10949_v34  ;;  %8809 = vmatpush3.bf16.msra.mxu1 %v8808_v11  ;;  %13770 = vst [vmem:[#allocation163_spill] sm:$0xff] %v11678_v7 }
 0x4e9   :  { %v3067_v63 = vadd.f32 %v2935_v5, %v2933_v17  ;;  %v3287_v43 = vmul.f32 %v2935_v5, %v10957_v38  ;;  %v2585_v23 = vsub.f32 %v11588_v18, %v2447_v19  ;;  %v2587_v22 = vsub.f32 %v11616_v49, %v2447_v19  ;;  %v11680_v19 = vpop.permute.xlu1 %2842 }
 0x4ea   :  { %v3066_v59 = vadd.f32 %v3065_v61, %v3064_v8  ;;  %v2453_v1 = vrot.slane %v2452_v21, 1  ;;  %v2455_v46 = vmax.f32 %v11641_v2, %v11663_v37  ;;  %v2462_v14 = vmax.f32 %v11649_v31, %v11667_v55  ;;  %13771 = vst [vmem:[#allocation164_spill] sm:$0xff] %v11680_v19  ;;  %v13772_v61 = vld [vmem:[#allocation103_spill] sm:$0xff] }
 0x4eb   :  { %v3068_v44 = vrot.slane %v3067_v63, 4  ;;  %v3419_v9 = vadd.f32 %v3287_v43, %v3285_v33  ;;  %v2681_v17 = vmul.f32 1.442695, %v2585_v23  ;;  %v2685_v20 = vmul.f32 1.442695, %v2587_v22  ;;  %v11693_v24 = vpop.permute.xlu0 %2847 }
 0x4ec   :  { %v3206_v5 = vmax.f32 %v3066_v59, 1e-20  ;;  %v2454_v47 = vmax.f32 %v2452_v21, %v2453_v1  ;;  %v2456_v18 = vrot.slane %v2455_v46, 4  ;;  %v2463_v52 = vrot.slane %v2462_v14, 4  ;;  %13774 = vst [vmem:[#allocation166_spill] sm:$0xff] %v11693_v24 }
 0x4ed   :  { %v9127_v49 = vpop.eup %9126  ;;  %v3069_v8 = vadd.f32 %v3068_v44, %v3067_v63  ;;  %v3420_v11 = vrot.slane %v3419_v9, 4  ;;  %9132 = vpow2.f32 %v2681_v17  ;;  %v11684_v28 = vadd.f32 %v13772_v61, %v11418_v42 }
 0x4ee   :  { %9134 = vrcp.f32 %v3206_v5  ;;  %v2934_v33 = vmul.f32 %v9127_v49, %v11645_v40  ;;  %v2586_v43 = vsub.f32 %v11610_v56, %v2454_v47  ;;  %v2588_v21 = vsub.f32 %v11620_v30, %v2454_v47 }
 0x4ef   :  { %v9129_v57 = vpop.eup %9128  ;;  %v3070_v23 = vrot.slane %v3069_v8, 2  ;;  %v3421_v22 = vadd.f32 %v3420_v11, %v3419_v9  ;;  %9136 = vpow2.f32 %v2685_v20  ;;  %v2457_v17 = vmax.f32 %v2455_v46, %v2456_v18  ;;  %v11700_v9 = vpop.permute.xlu1 %2852 }
 0x4f0   :  { %v2936_v59 = vmul.f32 %v9129_v57, %v11651_v12  ;;  %v11690_v63 = vpop.eup %9130  ;;  %v3286_v1 = vmul.f32 %v2934_v33, %v10951_v35  ;;  %v2683_v44 = vmul.f32 1.442695, %v2586_v43  ;;  %v2687_v42 = vmul.f32 1.442695, %v2588_v21  ;;  %13775 = vst [vmem:[#allocation167_spill] sm:$0xff] %v11700_v9  ;;  %v3956_v43 = vld [vmem:[#allocation25 + $0x90] sm:$0xff] }
 0x4f1   :  { %13773 = vst [vmem:[#allocation165_spill] sm:$0xff] %v11690_v63  ;;  %v3071_v5 = vadd.f32 %v3070_v23, %v3069_v8  ;;  %v3422_v49 = vrot.slane %v3421_v22, 2  ;;  %v2458_v47 = vrot.slane %v2457_v17, 2  ;;  %v2464_v30 = vmax.f32 %v2462_v14, %v2463_v52  ;;  %v3957_v8 = vld [vmem:[#allocation25 + $0x98] sm:$0xff]  ;;  %v13777_v23 = vld [vmem:[#allocation104_spill] sm:$0xff] }
 0x4f2   :  { %v3074_v40 = vadd.f32 %v2936_v59, %v2934_v33  ;;  %v3288_v56 = vmul.f32 %v2936_v59, %v10959_v41  ;;  %9138 = vpow2.f32 %v2683_v44  ;;  %v11698_v57 = vadd.f32 %v13772_v61, %v11425_v15 }
 0x4f3   :  { %v3072_v20 = vrot.slane %v3071_v5, 1  ;;  %v11702_v11 = vadd.f32 %v3422_v49, %v3421_v22  ;;  %9140 = vpow2.f32 %v2687_v42  ;;  %v2459_v33 = vmax.f32 %v2457_v17, %v2458_v47  ;;  %v11714_v17 = vpop.permute.xlu0 %2827 }
 0x4f4   :  { %v3075_v46 = vrot.slane %v3074_v40, 4  ;;  %v3426_v18 = vadd.f32 %v3288_v56, %v3286_v1  ;;  %v2465_v21 = vrot.slane %v2464_v30, 2  ;;  %v11706_v59 = vadd.f32 %v13777_v23, %v11451_v4  ;;  %13778 = vst [vmem:[#allocation169_spill] sm:$0xff] %v11714_v17 }
 0x4f5   :  { %13776 = vst [vmem:[#allocation168_spill] sm:$0xff] %v11702_v11  ;;  %v3073_v52 = vadd.f32 %v3072_v20, %v3071_v5  ;;  %v11710_v44 = vadd.f32 %v13777_v23, %v11458_v32  ;;  %v2460_v22 = vrot.slane %v2459_v33, 1  ;;  %v8810_v56 = vpack.c.bf16 %v3957_v8, %v3956_v43  ;;  %v11723_v43 = vpop.permute.xlu1 %2832 }
 0x4f6   :  { %v3076_v14 = vadd.f32 %v3075_v46, %v3074_v40  ;;  %v3427_v15 = vrot.slane %v3426_v18, 4  ;;  %v2466_v49 = vmax.f32 %v2464_v30, %v2465_v21  ;;  %v2469_v1 = vmax.f32 %v11684_v28, %v11706_v59  ;;  %13781 = vst [vmem:[#allocation172_spill] sm:$0xff] %v11723_v43 }
 0x4f7   :  { %v9133_v42 = vpop.eup %9132  ;;  %v3207_v47 = vmax.f32 %v3073_v52, 1e-20  ;;  %v2476_v40 = vmax.f32 %v11698_v57, %v11710_v44  ;;  %v2461_v20 = vmax.f32 %v2459_v33, %v2460_v22  ;;  %8811 = vmatprep.subr.bf16.mxu1 %v8810_v56 }
 0x4f8   :  { %v3077_v12 = vrot.slane %v3076_v14, 2  ;;  %v11716_v4 = vadd.f32 %v3427_v15, %v3426_v18  ;;  %v11720_v5 = vpop.eup %9134  ;;  %v2937_v32 = vmul.f32 %v9133_v42, %v11714_v17  ;;  %v2467_v30 = vrot.slane %v2466_v49, 1  ;;  %v13782_v18 = vld [vmem:[#allocation107_spill] sm:$0xff] }
 0x4f9   :  { %13780 = vst [vmem:[#allocation171_spill] sm:$0xff] %v11720_v5  ;;  %v2470_v46 = vrot.slane %v2469_v1, 4  ;;  %v9137_v21 = vpop.eup %9136  ;;  %9142 = vrcp.f32 %v3207_v47  ;;  %v2477_v52 = vrot.slane %v2476_v40, 4  ;;  %v11727_v15 = vadd.f32 %v13782_v18, %v11480_v60 }
 0x4fa   :  { %13779 = vst [vmem:[#allocation170_spill] sm:$0xff] %v11716_v4  ;;  %v3078_v8 = vadd.f32 %v3077_v12, %v3076_v14  ;;  %v2939_v61 = vmul.f32 %v9137_v21, %v11723_v43  ;;  %v3289_v23 = vmul.f32 %v2937_v32, %v10949_v34  ;;  %v2589_v42 = vsub.f32 %v11641_v2, %v2461_v20 }
 0x4fb   :  { %v2591_v33 = vsub.f32 %v11663_v37, %v2461_v20  ;;  %v2468_v56 = vmax.f32 %v2466_v49, %v2467_v30  ;;  %v2471_v63 = vmax.f32 %v2469_v1, %v2470_v46  ;;  %v2478_v11 = vmax.f32 %v2476_v40, %v2477_v52  ;;  %v3941_v52 = vld [vmem:[#allocation25 + $0x18] sm:$0xff] }
 0x4fc   :  { %v3079_v22 = vrot.slane %v3078_v8, 1  ;;  %v9139_v5 = vpop.eup %9138  ;;  %v3081_v47 = vadd.f32 %v2939_v61, %v2937_v32  ;;  %v3291_v12 = vmul.f32 %v2939_v61, %v10957_v38  ;;  %v2689_v14 = vmul.f32 1.442695, %v2589_v42 }
 0x4fd   :  { %v2693_v4 = vmul.f32 1.442695, %v2591_v33  ;;  %v2938_v3 = vmul.f32 %v9139_v5, %v11714_v17  ;;  %v2590_v21 = vsub.f32 %v11649_v31, %v2468_v56  ;;  %v2592_v29 = vsub.f32 %v11667_v55, %v2468_v56  ;;  %v9141_v2 = vpop.eup %9140 }
 0x4fe   :  { %v3080_v60 = vadd.f32 %v3079_v22, %v3078_v8  ;;  %v3082_v48 = vrot.slane %v3081_v47, 4  ;;  %v3433_v37 = vadd.f32 %v3291_v12, %v3289_v23  ;;  %9144 = vpow2.f32 %v2689_v14  ;;  %v3940_v8 = vld [vmem:[#allocation25 + $0x10] sm:$0xff] }
 0x4ff   :  { %v2472_v49 = vrot.slane %v2471_v63, 2  ;;  %v2940_v40 = vmul.f32 %v9141_v2, %v11723_v43  ;;  %v3290_v32 = vmul.f32 %v2938_v3, %v10951_v35  ;;  %9146 = vpow2.f32 %v2693_v4 }
 0x500   :  { %v3208_v1 = vmax.f32 %v3080_v60, 1e-20  ;;  %v3083_v61 = vadd.f32 %v3082_v48, %v3081_v47  ;;  %v3434_v20 = vrot.slane %v3433_v37, 4  ;;  %v2691_v30 = vmul.f32 1.442695, %v2590_v21 }
 0x501   :  { %v2695_v46 = vmul.f32 1.442695, %v2592_v29  ;;  %v3088_v5 = vadd.f32 %v2940_v40, %v2938_v3  ;;  %v3292_v31 = vmul.f32 %v2940_v40, %v10959_v41  ;;  %v2473_v55 = vmax.f32 %v2471_v63, %v2472_v49 }
 0x502   :  { %9148 = vrcp.f32 %v3208_v1  ;;  %v3084_v23 = vrot.slane %v3083_v61, 2  ;;  %v3435_v42 = vadd.f32 %v3434_v20, %v3433_v37  ;;  %v2479_v33 = vrot.slane %v2478_v11, 2  ;;  %v13783_v1 = vld [vmem:[#allocation108_spill] sm:$0xff] }
 0x503   :  { %9150 = vpow2.f32 %v2691_v30  ;;  %v11740_v22 = vpop.eup %9142  ;;  %v3089_v56 = vrot.slane %v3088_v5, 4  ;;  %v3440_v12 = vadd.f32 %v3292_v31, %v3290_v32  ;;  %v2474_v48 = vrot.slane %v2473_v55, 1 }
 0x504   :  { %9152 = vpow2.f32 %v2695_v46  ;;  %v3085_v4 = vadd.f32 %v3084_v23, %v3083_v61  ;;  %v3436_v47 = vrot.slane %v3435_v42, 2  ;;  %v2480_v29 = vmax.f32 %v2478_v11, %v2479_v33 }
 0x505   :  { %v8812_v14 = vpack.c.bf16 %v3941_v52, %v3940_v8  ;;  %v3090_v3 = vadd.f32 %v3089_v56, %v3088_v5  ;;  %v3441_v60 = vrot.slane %v3440_v12, 4  ;;  %v2475_v21 = vmax.f32 %v2473_v55, %v2474_v48 }
 0x506   :  { %v11744_v63 = vadd.f32 %v13782_v18, %v11484_v58  ;;  %v3086_v2 = vrot.slane %v3085_v4, 1  ;;  %v3437_v37 = vadd.f32 %v3436_v47, %v3435_v42  ;;  %v2481_v49 = vrot.slane %v2480_v29, 1 }
 0x507   :  { %8813 = vmatpush3.bf16.msra.mxu1 %v8812_v14  ;;  %v11748_v40 = vadd.f32 %v13783_v1, %v11494_v27  ;;  %v3091_v32 = vrot.slane %v3090_v3, 2  ;;  %v3442_v61 = vadd.f32 %v3441_v60, %v3440_v12  ;;  %v2593_v11 = vsub.f32 %v11684_v28, %v2475_v21 }
 0x508   :  { %v2595_v20 = vsub.f32 %v11706_v59, %v2475_v21  ;;  %v9145_v30 = vpop.eup %9144  ;;  %v3087_v46 = vadd.f32 %v3086_v2, %v3085_v4  ;;  %v3438_v5 = vrot.slane %v3437_v37, 1  ;;  %v2482_v31 = vmax.f32 %v2480_v29, %v2481_v49 }
 0x509   :  { %v2483_v58 = vmax.f32 %v11727_v15, %v11748_v40  ;;  %v9147_v55 = vpop.eup %9146  ;;  %v3092_v8 = vadd.f32 %v3091_v32, %v3090_v3  ;;  %v3443_v52 = vrot.slane %v3442_v61, 2  ;;  %v2941_v23 = vmul.f32 %v9145_v30, %v11678_v7 }
 0x50a   :  { %v2697_v27 = vmul.f32 1.442695, %v2593_v11  ;;  %v3209_v42 = vmax.f32 %v3087_v46, 1e-20  ;;  %v11755_v33 = vadd.f32 %v3438_v5, %v3437_v37  ;;  %v2943_v28 = vmul.f32 %v9147_v55, %v11680_v19 }
 0x50b   :  { %v2701_v56 = vmul.f32 1.442695, %v2595_v20  ;;  %v3093_v12 = vrot.slane %v3092_v8, 1  ;;  %v3444_v48 = vadd.f32 %v3443_v52, %v3442_v61  ;;  %v3293_v4 = vmul.f32 %v2941_v23, %v10949_v34 }
 0x50c   :  { %v11758_v59 = vpop.eup %9148  ;;  %9154 = vpow2.f32 %v2697_v27  ;;  %v3095_v29 = vadd.f32 %v2943_v28, %v2941_v23  ;;  %v3295_v14 = vmul.f32 %v2943_v28, %v10957_v38  ;;  %v2594_v3 = vsub.f32 %v11698_v57, %v2482_v31 }
 0x50d   :  { %v9151_v47 = vpop.eup %9150  ;;  %9156 = vrcp.f32 %v3209_v42  ;;  %v3094_v21 = vadd.f32 %v3093_v12, %v3092_v8  ;;  %v3445_v2 = vrot.slane %v3444_v48, 1  ;;  %v2596_v11 = vsub.f32 %v11710_v44, %v2482_v31 }
 0x50e   :  { %v9153_v60 = vpop.eup %9152  ;;  %v2942_v37 = vmul.f32 %v9151_v47, %v11678_v7  ;;  %9158 = vpow2.f32 %v2701_v56  ;;  %v3096_v49 = vrot.slane %v3095_v29, 4  ;;  %v3447_v32 = vadd.f32 %v3295_v14, %v3293_v4  ;;  %v13784_v4 = vld [vmem:[#allocation140_spill] sm:$0xff]  ;;  %v13785_v47 = vld [vmem:[#allocation109_spill] sm:$0xff] }
 0x50f   :  { %v2944_v61 = vmul.f32 %v9153_v60, %v11680_v19  ;;  %v3210_v20 = vmax.f32 %v3094_v21, 1e-20  ;;  %v11766_v30 = vadd.f32 %v3445_v2, %v3444_v48  ;;  %v2699_v5 = vmul.f32 1.442695, %v2594_v3 }
 0x510   :  { %v3294_v46 = vmul.f32 %v2942_v37, %v10951_v35  ;;  %v3097_v55 = vadd.f32 %v3096_v49, %v3095_v29  ;;  %v3448_v57 = vrot.slane %v3447_v32, 4  ;;  %v2703_v23 = vmul.f32 1.442695, %v2596_v11  ;;  %v13786_v49 = vld [vmem:[#allocation141_spill] sm:$0xff] }
 0x511   :  { %v3102_v52 = vadd.f32 %v2944_v61, %v2942_v37  ;;  %v3296_v8 = vmul.f32 %v2944_v61, %v10959_v41  ;;  %9160 = vrcp.f32 %v3210_v20  ;;  %v2484_v27 = vrot.slane %v2483_v58, 4 }
 0x512   :  { %v11772_v42 = vadd.f32 %v13783_v1, %v11499_v6  ;;  %v3098_v28 = vrot.slane %v3097_v55, 2  ;;  %v3449_v44 = vadd.f32 %v3448_v57, %v3447_v32  ;;  %9162 = vpow2.f32 %v2699_v5  ;;  %v11973_v1 = vld [vmem:[#allocation28] sm:$0xff] }
 0x513   :  { %v3103_v31 = vrot.slane %v3102_v52, 4  ;;  %v3454_v56 = vadd.f32 %v3296_v8, %v3294_v46  ;;  %v2485_v12 = vmax.f32 %v2483_v58, %v2484_v27  ;;  %v11778_v29 = vadd.f32 %v13785_v47, %v13784_v4  ;;  %v13787_v8 = vld [vmem:[#allocation110_spill] sm:$0xff] }
 0x514   :  { %v2490_v48 = vmax.f32 %v11744_v63, %v11772_v42  ;;  %v3099_v14 = vadd.f32 %v3098_v28, %v3097_v55  ;;  %v3450_v3 = vrot.slane %v3449_v44, 2  ;;  %9164 = vpow2.f32 %v2703_v23 }
 0x515   :  { %v3104_v60 = vadd.f32 %v3103_v31, %v3102_v52  ;;  %v3455_v21 = vrot.slane %v3454_v56, 4  ;;  %v2486_v6 = vrot.slane %v2485_v12, 2  ;;  %v11782_v32 = vadd.f32 %v13785_v47, %v13786_v49 }
 0x516   :  { %v9155_v2 = vpop.eup %9154  ;;  %v2491_v37 = vrot.slane %v2490_v48, 4  ;;  %v3100_v61 = vrot.slane %v3099_v14, 1  ;;  %v3451_v11 = vadd.f32 %v3450_v3, %v3449_v44  ;;  %v11789_v23 = vadd.f32 %v13787_v8, %v11513_v13 }
 0x517   :  { %v11784_v58 = vpop.eup %9156  ;;  %v3105_v20 = vrot.slane %v3104_v60, 2  ;;  %v3456_v46 = vadd.f32 %v3455_v21, %v3454_v56  ;;  %v2945_v55 = vmul.f32 %v9155_v2, %v11693_v24  ;;  %v2487_v57 = vmax.f32 %v2485_v12, %v2486_v6 }
 0x518   :  { %v9159_v5 = vpop.eup %9158  ;;  %v2492_v52 = vmax.f32 %v2490_v48, %v2491_v37  ;;  %v3101_v27 = vadd.f32 %v3100_v61, %v3099_v14  ;;  %v3452_v28 = vrot.slane %v3451_v11, 1  ;;  %v2497_v61 = vmax.f32 %v11778_v29, %v11789_v23 }
 0x519   :  { %v3106_v31 = vadd.f32 %v3105_v20, %v3104_v60  ;;  %v3457_v4 = vrot.slane %v3456_v46, 2  ;;  %v2947_v49 = vmul.f32 %v9159_v5, %v11700_v9  ;;  %v3297_v19 = vmul.f32 %v2945_v55, %v10949_v34 }
 0x51a   :  { %v2488_v44 = vrot.slane %v2487_v57, 1  ;;  %v2493_v3 = vrot.slane %v2492_v52, 2  ;;  %v3211_v56 = vmax.f32 %v3101_v27, 1e-20  ;;  %v3453_v21 = vadd.f32 %v3452_v28, %v3451_v11 }
 0x51b   :  { %v3107_v7 = vrot.slane %v3106_v31, 1  ;;  %v3458_v2 = vadd.f32 %v3457_v4, %v3456_v46  ;;  %v11793_v12 = vpop.eup %9160  ;;  %v3109_v48 = vadd.f32 %v2947_v49, %v2945_v55  ;;  %v3299_v13 = vmul.f32 %v2947_v49, %v10957_v38 }
 0x51c   :  { %v2489_v6 = vmax.f32 %v2487_v57, %v2488_v44  ;;  %v2494_v14 = vmax.f32 %v2492_v52, %v2493_v3  ;;  %9166 = vrcp.f32 %v3211_v56  ;;  %v9163_v20 = vpop.eup %9162 }
 0x51d   :  { %v3108_v60 = vadd.f32 %v3107_v7, %v3106_v31  ;;  %v3459_v37 = vrot.slane %v3458_v2, 1  ;;  %v3110_v5 = vrot.slane %v3109_v48, 4  ;;  %v3461_v43 = vadd.f32 %v3299_v13, %v3297_v19 }
 0x51e   :  { %v2597_v11 = vsub.f32 %v11727_v15, %v2489_v6  ;;  %v2599_v46 = vsub.f32 %v11748_v40, %v2489_v6  ;;  %v2946_v55 = vmul.f32 %v9163_v20, %v11693_v24  ;;  %v2495_v57 = vrot.slane %v2494_v14, 1  ;;  %v9165_v52 = vpop.eup %9164 }
 0x51f   :  { %v3212_v27 = vmax.f32 %v3108_v60, 1e-20  ;;  %v11800_v28 = vadd.f32 %v3459_v37, %v3458_v2  ;;  %v3111_v4 = vadd.f32 %v3110_v5, %v3109_v48  ;;  %v3462_v7 = vrot.slane %v3461_v43, 4 }
 0x520   :  { %v2705_v31 = vmul.f32 1.442695, %v2597_v11  ;;  %v2709_v49 = vmul.f32 1.442695, %v2599_v46  ;;  %v2948_v44 = vmul.f32 %v9165_v52, %v11700_v9  ;;  %v3298_v19 = vmul.f32 %v2946_v55, %v10951_v35  ;;  %v3921_v52 = vld [vmem:[#allocation22 + $0x80] sm:$0xff] }
 0x521   :  { %9168 = vrcp.f32 %v3212_v27  ;;  %v2496_v3 = vmax.f32 %v2494_v14, %v2495_v57  ;;  %v3112_v15 = vrot.slane %v3111_v4, 2  ;;  %v3463_v56 = vadd.f32 %v3462_v7, %v3461_v43 }
 0x522   :  { %9170 = vpow2.f32 %v2705_v31  ;;  %v2498_v40 = vrot.slane %v2497_v61, 4  ;;  %v3116_v2 = vadd.f32 %v2948_v44, %v2946_v55  ;;  %v3300_v13 = vmul.f32 %v2948_v44, %v10959_v41 }
 0x523   :  { %9172 = vpow2.f32 %v2709_v49  ;;  %v2598_v6 = vsub.f32 %v11744_v63, %v2496_v3  ;;  %v3113_v48 = vadd.f32 %v3112_v15, %v3111_v4  ;;  %v3464_v60 = vrot.slane %v3463_v56, 2  ;;  %v3959_v4 = vld [vmem:[#allocation25 + $0xa8] sm:$0xff] }
 0x524   :  { %v2600_v37 = vsub.f32 %v11772_v42, %v2496_v3  ;;  %v2499_v20 = vmax.f32 %v2497_v61, %v2498_v40  ;;  %v3117_v5 = vrot.slane %v3116_v2, 4  ;;  %v3468_v11 = vadd.f32 %v3300_v13, %v3298_v19  ;;  %v3958_v61 = vld [vmem:[#allocation25 + $0xa0] sm:$0xff] }
 0x525   :  { %v2707_v46 = vmul.f32 1.442695, %v2598_v6  ;;  %v11810_v14 = vadd.f32 %v13787_v8, %v11515_v36  ;;  %v3114_v43 = vrot.slane %v3113_v48, 1  ;;  %v3465_v27 = vadd.f32 %v3464_v60, %v3463_v56  ;;  %v3922_v49 = vld [vmem:[#allocation22 + $0x88] sm:$0xff] }
 0x526   :  { %v2711_v55 = vmul.f32 1.442695, %v2600_v37  ;;  %v2500_v57 = vrot.slane %v2499_v20, 2  ;;  %v9167_v7 = vpop.eup %9166  ;;  %v3118_v31 = vadd.f32 %v3117_v5, %v3116_v2  ;;  %v3469_v63 = vrot.slane %v3468_v11, 4  ;;  %v3942_v13 = vld [vmem:[#allocation25 + $0x20] sm:$0xff]  ;;  %v3943_v6 = vld [vmem:[#allocation25 + $0x28] sm:$0xff] }
 0x527   :  { %9174 = vpow2.f32 %v2707_v46  ;;  %v2504_v42 = vmax.f32 %v11782_v32, %v11810_v14  ;;  %v11814_v44 = vmul.f32 %v9167_v7, %v3453_v21  ;;  %v3115_v19 = vadd.f32 %v3114_v43, %v3113_v48  ;;  %v3905_v7 = vld [vmem:[#allocation22] sm:$0xff]  ;;  %v3906_v48 = vld [vmem:[#allocation22 + $0x8] sm:$0xff] }
 0x528   :  { %v3466_v36 = vrot.slane %v3465_v27, 1  ;;  %9176 = vpow2.f32 %v2711_v55  ;;  %v3119_v3 = vrot.slane %v3118_v31, 2  ;;  %v3470_v15 = vadd.f32 %v3469_v63, %v3468_v11  ;;  %v11818_v55 = vpop.permute.xlu0 %2857 }
 0x529   :  { %13788 = vst [vmem:[#allocation140_spill] sm:$0xff] %v11814_v44  ;;  %v2501_v56 = vmax.f32 %v2499_v20, %v2500_v57  ;;  %v2505_v40 = vrot.slane %v2504_v42, 4  ;;  %v3213_v2 = vmax.f32 %v3115_v19, 1e-20  ;;  %v8814_v37 = vpack.c.bf16 %v3959_v4, %v3958_v61  ;;  %13789 = vst [vmem:[#allocation141_spill] sm:$0xff] %v11818_v55 }
 0x52a   :  { %v11816_v60 = vadd.f32 %v3466_v36, %v3465_v27  ;;  %v8774_v5 = vpack.c.bf16 %v3922_v49, %v3921_v52  ;;  %v3120_v9 = vadd.f32 %v3119_v3, %v3118_v31  ;;  %v3471_v24 = vrot.slane %v3470_v15, 2  ;;  %v13790_v27 = vld [vmem:[#allocation111_spill] sm:$0xff]  ;;  %v11827_v31 = vpop.permute.xlu1 %2862  ;;  %v3923_v3 = vld [vmem:[#allocation22 + $0x90] sm:$0xff] }
 0x52b   :  { %v9169_v46 = vpop.eup %9168  ;;  %v2502_v17 = vrot.slane %v2501_v56, 1  ;;  %v2506_v21 = vmax.f32 %v2504_v42, %v2505_v40  ;;  %9178 = vrcp.f32 %v3213_v2  ;;  %8815 = vmatprep.subr.bf16.mxu1 %v8814_v37  ;;  %v8816_v11 = vpack.c.bf16 %v3943_v6, %v3942_v13  ;;  %13791 = vst [vmem:[#allocation173_spill] sm:$0xff] %v11827_v31 }
 0x52c   :  { %v9171_v43 = vpop.eup %9170  ;;  %v11821_v20 = vmul.f32 %v9169_v46, %v11800_v28  ;;  %8775 = vmatprep.subr.bf16.mxu0 %v8774_v5  ;;  %v11825_v57 = vadd.f32 %v13790_v27, %v11521_v45  ;;  %v3121_v63 = vrot.slane %v3120_v9, 1  ;;  %v3472_v42 = vadd.f32 %v3471_v24, %v3470_v15  ;;  %v3924_v45 = vld [vmem:[#allocation22 + $0x98] sm:$0xff] }
 0x52d   :  { %v9173_v52 = vpop.eup %9172  ;;  %v2949_v61 = vmul.f32 %v9171_v43, %v11818_v55  ;;  %v2503_v4 = vmax.f32 %v2501_v56, %v2502_v17  ;;  %v2507_v28 = vrot.slane %v2506_v21, 2  ;;  %8817 = vmatpush3.bf16.msra.mxu1 %v8816_v11  ;;  %v8776_v19 = vpack.c.bf16 %v3906_v48, %v3905_v7 }
 0x52e   :  { %v2951_v49 = vmul.f32 %v9173_v52, %v11827_v31  ;;  %v11833_v36 = vadd.f32 %v13790_v27, %v11524_v51  ;;  %v3122_v40 = vadd.f32 %v3121_v63, %v3120_v9  ;;  %v3473_v13 = vrot.slane %v3472_v42, 1 }
 0x52f   :  { %v3301_v6 = vmul.f32 %v2949_v61, %v10949_v34  ;;  %v2601_v24 = vsub.f32 %v11778_v29, %v2503_v4  ;;  %v2603_v56 = vsub.f32 %v11789_v23, %v2503_v4  ;;  %v2508_v2 = vmax.f32 %v2506_v21, %v2507_v28  ;;  %8777 = vmatpush3.bf16.msra.mxu0 %v8776_v19  ;;  %v13792_v23 = vld [vmem:[#allocation112_spill] sm:$0xff] }
 0x530   :  { %v3123_v15 = vadd.f32 %v2951_v49, %v2949_v61  ;;  %v3303_v17 = vmul.f32 %v2951_v49, %v10957_v38  ;;  %v3214_v5 = vmax.f32 %v3122_v40, 1e-20  ;;  %v11839_v46 = vadd.f32 %v3473_v13, %v3472_v42  ;;  %v3907_v61 = vld [vmem:[#allocation22 + $0x10] sm:$0xff]  ;;  %v3908_v42 = vld [vmem:[#allocation22 + $0x18] sm:$0xff] }
 0x531   :  { %v9175_v37 = vpop.eup %9174  ;;  %v2713_v51 = vmul.f32 1.442695, %v2601_v24  ;;  %v8778_v7 = vpack.c.bf16 %v3924_v45, %v3923_v3  ;;  %v2717_v52 = vmul.f32 1.442695, %v2603_v56  ;;  %v2509_v63 = vrot.slane %v2508_v2, 1 }
 0x532   :  { %v9177_v48 = vpop.eup %9176  ;;  %v3124_v9 = vrot.slane %v3123_v15, 4  ;;  %v3475_v43 = vadd.f32 %v3303_v17, %v3301_v6  ;;  %v2950_v11 = vmul.f32 %v9175_v37, %v11818_v55  ;;  %9180 = vrcp.f32 %v3214_v5 }
 0x533   :  { %v2952_v29 = vmul.f32 %v9177_v48, %v11827_v31  ;;  %8779 = vmatprep.subr.bf16.mxu0 %v8778_v7  ;;  %v11845_v21 = vadd.f32 %v13792_v23, %v11530_v50  ;;  %9182 = vpow2.f32 %v2713_v51  ;;  %v2510_v45 = vmax.f32 %v2508_v2, %v2509_v63  ;;  %v3925_v48 = vld [vmem:[#allocation22 + $0xa0] sm:$0xff] }
 0x534   :  { %v3125_v4 = vadd.f32 %v3124_v9, %v3123_v15  ;;  %v3476_v49 = vrot.slane %v3475_v43, 4  ;;  %v3302_v28 = vmul.f32 %v2950_v11, %v10951_v35  ;;  %9184 = vpow2.f32 %v2717_v52  ;;  %v3926_v9 = vld [vmem:[#allocation22 + $0xa8] sm:$0xff] }
 0x535   :  { %v3130_v19 = vadd.f32 %v2952_v29, %v2950_v11  ;;  %v3304_v3 = vmul.f32 %v2952_v29, %v10959_v41  ;;  %v11849_v40 = vpop.eup %9178  ;;  %v2511_v50 = vmax.f32 %v11825_v57, %v11845_v21  ;;  %v8780_v24 = vpack.c.bf16 %v3908_v42, %v3907_v61 }
 0x536   :  { %v3126_v13 = vrot.slane %v3125_v4, 2  ;;  %v3477_v6 = vadd.f32 %v3476_v49, %v3475_v43  ;;  %v2602_v15 = vsub.f32 %v11782_v32, %v2510_v45  ;;  %v2604_v37 = vsub.f32 %v11810_v14, %v2510_v45 }
 0x537   :  { %v3131_v17 = vrot.slane %v3130_v19, 4  ;;  %v3482_v56 = vadd.f32 %v3304_v3, %v3302_v28  ;;  %v2512_v7 = vrot.slane %v2511_v50, 4  ;;  %8781 = vmatpush3.bf16.msra.mxu0 %v8780_v24  ;;  %v11857_v2 = vadd.f32 %v13792_v23, %v11534_v16  ;;  %v3909_v28 = vld [vmem:[#allocation22 + $0x20] sm:$0xff]  ;;  %v3910_v3 = vld [vmem:[#allocation22 + $0x28] sm:$0xff] }
 0x538   :  { %v3127_v5 = vadd.f32 %v3126_v13, %v3125_v4  ;;  %v3478_v51 = vrot.slane %v3477_v6, 2  ;;  %v2715_v52 = vmul.f32 1.442695, %v2602_v15  ;;  %v2719_v29 = vmul.f32 1.442695, %v2604_v37 }
 0x539   :  { %v3132_v43 = vadd.f32 %v3131_v17, %v3130_v19  ;;  %v3483_v11 = vrot.slane %v3482_v56, 4  ;;  %v2513_v42 = vmax.f32 %v2511_v50, %v2512_v7  ;;  %v2518_v32 = vmax.f32 %v11833_v36, %v11857_v2 }
 0x53a   :  { %v3128_v63 = vrot.slane %v3127_v5, 1  ;;  %v3479_v61 = vadd.f32 %v3478_v51, %v3477_v6  ;;  %9186 = vpow2.f32 %v2715_v52  ;;  %v8782_v49 = vpack.c.bf16 %v3926_v9, %v3925_v48  ;;  %v13793_v6 = vld [vmem:[#allocation113_spill] sm:$0xff] }
 0x53b   :  { %v3133_v14 = vrot.slane %v3132_v43, 2  ;;  %v3484_v4 = vadd.f32 %v3483_v11, %v3482_v56  ;;  %9188 = vpow2.f32 %v2719_v29  ;;  %v2514_v13 = vrot.slane %v2513_v42, 2  ;;  %v11867_v56 = vpop.permute.xlu0 %2867  ;;  %v11871_v11 = vpop.permute.xlu1 %2872 }
 0x53c   :  { %v3129_v16 = vadd.f32 %v3128_v63, %v3127_v5  ;;  %v3480_v45 = vrot.slane %v3479_v61, 1  ;;  %v11861_v19 = vpop.eup %9180  ;;  %v2519_v15 = vrot.slane %v2518_v32, 4  ;;  %8783 = vmatprep.subr.bf16.mxu0 %v8782_v49  ;;  %v11865_v50 = vadd.f32 %v13793_v6, %v11547_v39  ;;  %13794 = vst [vmem:[#allocation174_spill] sm:$0xff] %v11867_v56  ;;  %13795 = vst [vmem:[#allocation175_spill] sm:$0xff] %v11871_v11  ;;  %v3928_v49 = vld [vmem:[#allocation22 + $0xb8] sm:$0xff] }
 0x53d   :  { %v3134_v24 = vadd.f32 %v3133_v14, %v3132_v43  ;;  %v3485_v17 = vrot.slane %v3484_v4, 2  ;;  %v9183_v37 = vpop.eup %9182  ;;  %v2515_v5 = vmax.f32 %v2513_v42, %v2514_v13  ;;  %v8784_v48 = vpack.c.bf16 %v3910_v3, %v3909_v28  ;;  %v3927_v14 = vld [vmem:[#allocation22 + $0xb0] sm:$0xff]  ;;  %v3961_v28 = vld [vmem:[#allocation25 + $0xb8] sm:$0xff] }
 0x53e   :  { %v3215_v51 = vmax.f32 %v3129_v16, 1e-20  ;;  %v11869_v7 = vadd.f32 %v3480_v45, %v3479_v61  ;;  %v9185_v9 = vpop.eup %9184  ;;  %v2953_v29 = vmul.f32 %v9183_v37, %v11867_v56  ;;  %v2520_v63 = vmax.f32 %v2518_v32, %v2519_v15  ;;  %v3960_v42 = vld [vmem:[#allocation25 + $0xb0] sm:$0xff] }
 0x53f   :  { %v3135_v52 = vrot.slane %v3134_v24, 1  ;;  %v3486_v43 = vadd.f32 %v3485_v17, %v3484_v4  ;;  %v2955_v39 = vmul.f32 %v9185_v9, %v11871_v11  ;;  %v2516_v31 = vrot.slane %v2515_v5, 1  ;;  %8785 = vmatpush3.bf16.msra.mxu0 %v8784_v48  ;;  %v3911_v37 = vld [vmem:[#allocation22 + $0x30] sm:$0xff] }
 0x540   :  { %9190 = vrcp.f32 %v3215_v51  ;;  %v11877_v61 = vadd.f32 %v13793_v6, %v11552_v62  ;;  %v3305_v4 = vmul.f32 %v2953_v29, %v10949_v34  ;;  %v2521_v45 = vrot.slane %v2520_v63, 2  ;;  %v3912_v51 = vld [vmem:[#allocation22 + $0x38] sm:$0xff] }
 0x541   :  { %v3136_v3 = vadd.f32 %v3135_v52, %v3134_v24  ;;  %v3487_v16 = vrot.slane %v3486_v43, 1  ;;  %v3137_v13 = vadd.f32 %v2955_v39, %v2953_v29  ;;  %v3307_v32 = vmul.f32 %v2955_v39, %v10957_v38 }
 0x542   :  { %v2517_v17 = vmax.f32 %v2515_v5, %v2516_v31  ;;  %v8786_v15 = vpack.c.bf16 %v3928_v49, %v3927_v14  ;;  %v2522_v55 = vmax.f32 %v2520_v63, %v2521_v45  ;;  %v8818_v62 = vpack.c.bf16 %v3961_v28, %v3960_v42  ;;  %v13796_v31 = vld [vmem:[#allocation114_spill] sm:$0xff]  ;;  %v3944_v45 = vld [vmem:[#allocation25 + $0x30] sm:$0xff] }
 0x543   :  { %v3216_v9 = vmax.f32 %v3136_v3, 1e-20  ;;  %v11881_v48 = vadd.f32 %v3487_v16, %v3486_v43  ;;  %v3138_v6 = vrot.slane %v3137_v13, 4  ;;  %v3489_v27 = vadd.f32 %v3307_v32, %v3305_v4  ;;  %v3945_v32 = vld [vmem:[#allocation25 + $0x38] sm:$0xff] }
 0x544   :  { %v2605_v24 = vsub.f32 %v11825_v57, %v2517_v17  ;;  %v2607_v52 = vsub.f32 %v11845_v21, %v2517_v17  ;;  %8787 = vmatprep.subr.bf16.mxu0 %v8786_v15  ;;  %v9187_v23 = vpop.eup %9186  ;;  %v2523_v29 = vrot.slane %v2522_v55, 1  ;;  %8819 = vmatprep.subr.bf16.mxu1 %v8818_v62  ;;  %v11887_v5 = vadd.f32 %v13796_v31, %v11559_v26 }
 0x545   :  { %9192 = vrcp.f32 %v3216_v9  ;;  %v8788_v14 = vpack.c.bf16 %v3912_v51, %v3911_v37  ;;  %v9189_v43 = vpop.eup %9188  ;;  %v3139_v49 = vadd.f32 %v3138_v6, %v3137_v13  ;;  %v3490_v63 = vrot.slane %v3489_v27, 4 }
 0x546   :  { %v2954_v39 = vmul.f32 %v9187_v23, %v11867_v56  ;;  %v2721_v42 = vmul.f32 1.442695, %v2605_v24  ;;  %v2956_v57 = vmul.f32 %v9189_v43, %v11871_v11  ;;  %v2725_v28 = vmul.f32 1.442695, %v2607_v52  ;;  %v3965_v11 = vld [vmem:[#allocation25 + $0xd8] sm:$0xff] }
 0x547   :  { %v2524_v21 = vmax.f32 %v2522_v55, %v2523_v29  ;;  %v2525_v3 = vmax.f32 %v11865_v50, %v11887_v5  ;;  %8789 = vmatpush3.bf16.msra.mxu0 %v8788_v14  ;;  %v3140_v16 = vrot.slane %v3139_v49, 2  ;;  %v3491_v4 = vadd.f32 %v3490_v63, %v3489_v27  ;;  %v3929_v63 = vld [vmem:[#allocation22 + $0xc0] sm:$0xff] }
 0x548   :  { %v3306_v26 = vmul.f32 %v2954_v39, %v10951_v35  ;;  %9194 = vpow2.f32 %v2721_v42  ;;  %v3144_v6 = vadd.f32 %v2956_v57, %v2954_v39  ;;  %v3308_v13 = vmul.f32 %v2956_v57, %v10959_v41  ;;  %v3930_v39 = vld [vmem:[#allocation22 + $0xc8] sm:$0xff] }
 0x549   :  { %9196 = vpow2.f32 %v2725_v28  ;;  %v2606_v23 = vsub.f32 %v11833_v36, %v2524_v21  ;;  %v3141_v55 = vadd.f32 %v3140_v16, %v3139_v49  ;;  %v3492_v15 = vrot.slane %v3491_v4, 2  ;;  %v3963_v57 = vld [vmem:[#allocation25 + $0xc8] sm:$0xff] }
 0x54a   :  { %v11896_v17 = vpop.eup %9190  ;;  %v2608_v37 = vsub.f32 %v11857_v2, %v2524_v21  ;;  %v2526_v51 = vrot.slane %v2525_v3, 4  ;;  %v3145_v9 = vrot.slane %v3144_v6, 4  ;;  %v3496_v27 = vadd.f32 %v3308_v13, %v3306_v26  ;;  %v3962_v2 = vld [vmem:[#allocation25 + $0xc0] sm:$0xff] }
 0x54b   :  { %v2723_v62 = vmul.f32 1.442695, %v2606_v23  ;;  %v8820_v24 = vpack.c.bf16 %v3945_v32, %v3944_v45  ;;  %v3142_v52 = vrot.slane %v3141_v55, 1  ;;  %v11899_v29 = vadd.f32 %v3492_v15, %v3491_v4  ;;  %v3913_v4 = vld [vmem:[#allocation22 + $0x40] sm:$0xff]  ;;  %v3914_v26 = vld [vmem:[#allocation22 + $0x48] sm:$0xff] }
 0x54c   :  { %v2727_v14 = vmul.f32 1.442695, %v2608_v37  ;;  %v2527_v43 = vmax.f32 %v2525_v3, %v2526_v51  ;;  %v3146_v42 = vadd.f32 %v3145_v9, %v3144_v6  ;;  %v3497_v36 = vrot.slane %v3496_v27, 4  ;;  %v3946_v23 = vld [vmem:[#allocation25 + $0x40] sm:$0xff] }
 0x54d   :  { %9198 = vpow2.f32 %v2723_v62  ;;  %8821 = vmatpush3.bf16.msra.mxu1 %v8820_v24  ;;  %v11903_v49 = vadd.f32 %v13796_v31, %v11578_v25  ;;  %v3143_v28 = vadd.f32 %v3142_v52, %v3141_v55  ;;  %v8790_v13 = vpack.c.bf16 %v3930_v39, %v3929_v63  ;;  %v3947_v25 = vld [vmem:[#allocation25 + $0x48] sm:$0xff]  ;;  %v13797_v55 = vld [vmem:[#allocation117_spill] sm:$0xff]  ;;  %v11914_v63 = vpop.permute.xlu0 %2877 }
 0x54e   :  { %9200 = vpow2.f32 %v2727_v14  ;;  %v2528_v16 = vrot.slane %v2527_v43, 2  ;;  %v3147_v45 = vrot.slane %v3146_v42, 2  ;;  %v3498_v32 = vadd.f32 %v3497_v36, %v3496_v27  ;;  %v3931_v62 = vld [vmem:[#allocation22 + $0xd0] sm:$0xff]  ;;  %v3932_v27 = vld [vmem:[#allocation22 + $0xd8] sm:$0xff]  ;;  %13798 = vst [vmem:[#allocation176_spill] sm:$0xff] %v11914_v63 }
 0x54f   :  { %v11906_v3 = vpop.eup %9192  ;;  %v2532_v6 = vmax.f32 %v11877_v61, %v11903_v49  ;;  %v3217_v15 = vmax.f32 %v3143_v28, 1e-20  ;;  %v8822_v51 = vpack.c.bf16 %v3963_v57, %v3962_v2  ;;  %v11912_v9 = vadd.f32 %v13797_v55, %v11590_v54  ;;  %8791 = vmatprep.subr.bf16.mxu0 %v8790_v13  ;;  %v3964_v36 = vld [vmem:[#allocation25 + $0xd0] sm:$0xff] }
 0x550   :  { %v2529_v37 = vmax.f32 %v2527_v43, %v2528_v16  ;;  %v3148_v24 = vadd.f32 %v3147_v45, %v3146_v42  ;;  %v3499_v52 = vrot.slane %v3498_v32, 2  ;;  %v8792_v21 = vpack.c.bf16 %v3914_v26, %v3913_v4  ;;  %v11920_v42 = vpop.permute.xlu1 %2882 }
 0x551   :  { %v2533_v14 = vrot.slane %v2532_v6, 4  ;;  %9202 = vrcp.f32 %v3217_v15  ;;  %8823 = vmatprep.subr.bf16.mxu1 %v8822_v51  ;;  %v8824_v43 = vpack.c.bf16 %v3947_v25, %v3946_v23  ;;  %v11918_v54 = vadd.f32 %v13797_v55, %v11598_v0  ;;  %13799 = vst [vmem:[#allocation177_spill] sm:$0xff] %v11920_v42  ;;  %v3915_v25 = vld [vmem:[#allocation22 + $0x50] sm:$0xff]  ;;  %v3916_v15 = vld [vmem:[#allocation22 + $0x58] sm:$0xff] }
 0x552   :  { %v9195_v56 = vpop.eup %9194  ;;  %v2530_v39 = vrot.slane %v2529_v37, 1  ;;  %v3149_v57 = vrot.slane %v3148_v24, 1  ;;  %v11922_v28 = vadd.f32 %v3499_v52, %v3498_v32  ;;  %8793 = vmatpush3.bf16.msra.mxu0 %v8792_v21  ;;  %v8794_v13 = vpack.c.bf16 %v3932_v27, %v3931_v62 }
 0x553   :  { %v9197_v2 = vpop.eup %9196  ;;  %v2957_v16 = vmul.f32 %v9195_v56, %v11914_v63  ;;  %v2534_v4 = vmax.f32 %v2532_v6, %v2533_v14  ;;  %8825 = vmatpush3.bf16.msra.mxu1 %v8824_v43  ;;  %v8826_v23 = vpack.c.bf16 %v3965_v11, %v3964_v36  ;;  %v13800_v11 = vld [vmem:[#allocation118_spill] sm:$0xff]  ;;  %v8796_v14 = vpack.c.bf16 %v3916_v15, %v3915_v25 }
 0x554   :  { %v2959_v26 = vmul.f32 %v9197_v2, %v11920_v42  ;;  %v2531_v45 = vmax.f32 %v2529_v37, %v2530_v39  ;;  %v3150_v0 = vadd.f32 %v3149_v57, %v3148_v24  ;;  %8795 = vmatprep.subr.bf16.mxu0 %v8794_v13  ;;  %v11933_v24 = vadd.f32 %v13800_v11, %v11606_v53 }
 0x555   :  { %v3309_v55 = vmul.f32 %v2957_v16, %v10949_v34  ;;  %v2535_v31 = vrot.slane %v2534_v4, 2  ;;  %8827 = vmatprep.subr.bf16.mxu1 %v8826_v23 }
 0x556   :  { %v3151_v32 = vadd.f32 %v2959_v26, %v2957_v16  ;;  %v3311_v52 = vmul.f32 %v2959_v26, %v10957_v38  ;;  %v2609_v56 = vsub.f32 %v11865_v50, %v2531_v45  ;;  %v2611_v21 = vsub.f32 %v11887_v5, %v2531_v45  ;;  %8797 = vmatpush3.bf16.msra.mxu0 %v8796_v14  ;;  %v3948_v16 = vld [vmem:[#allocation25 + $0x50] sm:$0xff] }
 0x557   :  { %v9199_v6 = vpop.eup %9198  ;;  %v3218_v37 = vmax.f32 %v3150_v0, 1e-20  ;;  %v2536_v62 = vmax.f32 %v2534_v4, %v2535_v31  ;;  %v3949_v31 = vld [vmem:[#allocation25 + $0x58] sm:$0xff]  ;;  %v2539_v0 = vmax.f32 %v11912_v9, %v11933_v24 }
 0x558   :  { %v9201_v27 = vpop.eup %9200  ;;  %v3152_v36 = vrot.slane %v3151_v32, 4  ;;  %v3503_v39 = vadd.f32 %v3311_v52, %v3309_v55  ;;  %v2958_v43 = vmul.f32 %v9199_v6, %v11914_v63  ;;  %v2729_v2 = vmul.f32 1.442695, %v2609_v56 }
 0x559   :  { %9204 = vrcp.f32 %v3218_v37  ;;  %v2960_v50 = vmul.f32 %v9201_v27, %v11920_v42  ;;  %v2733_v5 = vmul.f32 1.442695, %v2611_v21  ;;  %v2537_v57 = vrot.slane %v2536_v62, 1  ;;  %v11955_v42 = vpop.permute.xlu0 %2887 }
 0x55a   :  { %v3153_v4 = vadd.f32 %v3152_v36, %v3151_v32  ;;  %v3504_v26 = vrot.slane %v3503_v39, 4  ;;  %v3310_v53 = vmul.f32 %v2958_v43, %v10951_v35  ;;  %9206 = vpow2.f32 %v2729_v2  ;;  %v3933_v36 = vld [vmem:[#allocation22 + $0xe0] sm:$0xff]  ;;  %13802 = vst [vmem:[#allocation179_spill] sm:$0xff] %v11955_v42 }
 0x55b   :  { %v3158_v45 = vadd.f32 %v2960_v50, %v2958_v43  ;;  %v3312_v13 = vmul.f32 %v2960_v50, %v10959_v41  ;;  %9208 = vpow2.f32 %v2733_v5  ;;  %v2538_v55 = vmax.f32 %v2536_v62, %v2537_v57  ;;  %v11939_v23 = vpop.eup %9202  ;;  %v3966_v57 = vld [vmem:[#allocation25 + $0xe0] sm:$0xff] }
 0x55c   :  { %13801 = vst [vmem:[#allocation178_spill] sm:$0xff] %v11939_v23  ;;  %v3154_v25 = vrot.slane %v3153_v4, 2  ;;  %v3505_v15 = vadd.f32 %v3504_v26, %v3503_v39  ;;  %v8828_v52 = vpack.c.bf16 %v3949_v31, %v3948_v16  ;;  %v2540_v27 = vrot.slane %v2539_v0, 4  ;;  %v3934_v39 = vld [vmem:[#allocation22 + $0xe8] sm:$0xff]  ;;  %v3917_v26 = vld [vmem:[#allocation22 + $0x60] sm:$0xff] }
 0x55d   :  { %v3159_v56 = vrot.slane %v3158_v45, 4  ;;  %v3510_v21 = vadd.f32 %v3312_v13, %v3310_v53  ;;  %v2610_v32 = vsub.f32 %v11877_v61, %v2538_v55  ;;  %v2612_v6 = vsub.f32 %v11903_v49, %v2538_v55  ;;  %v3918_v53 = vld [vmem:[#allocation22 + $0x68] sm:$0xff] }
 0x55e   :  { %v3155_v37 = vadd.f32 %v3154_v25, %v3153_v4  ;;  %v3506_v14 = vrot.slane %v3505_v15, 2  ;;  %8829 = vmatpush3.bf16.msra.mxu1 %v8828_v52  ;;  %v11947_v62 = vadd.f32 %v13800_v11, %v11628_v10  ;;  %v2541_v61 = vmax.f32 %v2539_v0, %v2540_v27  ;;  %v3967_v4 = vld [vmem:[#allocation25 + $0xe8] sm:$0xff]  ;;  %v3950_v25 = vld [vmem:[#allocation25 + $0x60] sm:$0xff] }
 0x55f   :  { %v3160_v43 = vadd.f32 %v3159_v56, %v3158_v45  ;;  %v3511_v2 = vrot.slane %v3510_v21, 4  ;;  %v2731_v50 = vmul.f32 1.442695, %v2610_v32  ;;  %v2735_v5 = vmul.f32 1.442695, %v2612_v6  ;;  %v3951_v45 = vld [vmem:[#allocation25 + $0x68] sm:$0xff] }
 0x560   :  { %v3156_v16 = vrot.slane %v3155_v37, 1  ;;  %v11949_v31 = vadd.f32 %v3506_v14, %v3505_v15  ;;  %v2546_v49 = vmax.f32 %v11918_v54, %v11947_v62  ;;  %v8798_v55 = vpack.c.bf16 %v3934_v39, %v3933_v36  ;;  %v3935_v39 = vld [vmem:[#allocation22 + $0xf0] sm:$0xff] }
 0x561   :  { %v3161_v13 = vrot.slane %v3160_v43, 2  ;;  %v3512_v10 = vadd.f32 %v3511_v2, %v3510_v21  ;;  %9210 = vpow2.f32 %v2731_v50  ;;  %v2542_v56 = vrot.slane %v2541_v61, 2  ;;  %v3936_v50 = vld [vmem:[#allocation22 + $0xf8] sm:$0xff] }
 0x562   :  { %v3157_v52 = vadd.f32 %v3156_v16, %v3155_v37  ;;  %9212 = vpow2.f32 %v2735_v5  ;;  %v2547_v32 = vrot.slane %v2546_v49, 4  ;;  %8799 = vmatprep.subr.bf16.mxu0 %v8798_v55  ;;  %v8830_v14 = vpack.c.bf16 %v3967_v4, %v3966_v57  ;;  %v11957_v5 = vpop.permute.xlu1 %2892  ;;  %v13804_v57 = vld [vmem:[#allocation116_spill] sm:$0xff]  ;;  %v13805_v4 = vld [vmem:[#allocation161_spill] sm:$0xff] }
 0x563   :  { %v11953_v6 = vpop.eup %9204  ;;  %v3162_v15 = vadd.f32 %v3161_v13, %v3160_v43  ;;  %v3513_v0 = vrot.slane %v3512_v10, 2  ;;  %v8800_v27 = vpack.c.bf16 %v3918_v53, %v3917_v26  ;;  %v2543_v21 = vmax.f32 %v2541_v61, %v2542_v56  ;;  %13803 = vst [vmem:[#allocation180_spill] sm:$0xff] %v11957_v5  ;;  %v3968_v53 = vld [vmem:[#allocation25 + $0xf0] sm:$0xff]  ;;  %v3969_v61 = vld [vmem:[#allocation25 + $0xf8] sm:$0xff] }
 0x564   :  { %v9207_v51 = vpop.eup %9206  ;;  %v3219_v63 = vmax.f32 %v3157_v52, 1e-20  ;;  %v2548_v2 = vmax.f32 %v2546_v49, %v2547_v32  ;;  %v8832_v36 = vpack.c.bf16 %v3951_v45, %v3950_v25  ;;  %8831 = vmatprep.subr.bf16.mxu1 %v8830_v14  ;;  %v11964_v26 = vadd.f32 %v13805_v4, %v13804_v57  ;;  %v3919_v49 = vld [vmem:[#allocation22 + $0x70] sm:$0xff]  ;;  %v3920_v45 = vld [vmem:[#allocation22 + $0x78] sm:$0xff]  ;;  %v13807_v32 = vld [vmem:[#allocation119_spill] sm:$0xff] }
 0x565   :  { %v9209_v37 = vpop.eup %9208  ;;  %v3163_v16 = vrot.slane %v3162_v15, 1  ;;  %v11959_v11 = vadd.f32 %v3513_v0, %v3512_v10  ;;  %v2961_v43 = vmul.f32 %v9207_v51, %v11955_v42  ;;  %8801 = vmatpush3.bf16.msra.mxu0 %v8800_v27  ;;  %v2544_v55 = vrot.slane %v2543_v21, 1  ;;  %v3952_v10 = vld [vmem:[#allocation25 + $0x70] sm:$0xff]  ;;  %v3953_v52 = vld [vmem:[#allocation25 + $0x78] sm:$0xff] }
 0x566   :  { %13806 = vst [vmem:[#allocation116_spill] sm:$0xff] %v11964_v26  ;;  %9214 = vrcp.f32 %v3219_v63  ;;  %v2963_v13 = vmul.f32 %v9209_v37, %v11957_v5  ;;  %v2549_v25 = vrot.slane %v2548_v2, 2  ;;  %8833 = vmatpush3.bf16.msra.mxu1 %v8832_v36  ;;  %v13808_v0 = vld [vmem:[#allocation162_spill] sm:$0xff]  ;;  %v8802_v27 = vpack.c.bf16 %v3936_v50, %v3935_v39 }
 0x567   :  { %v3164_v56 = vadd.f32 %v3163_v16, %v3162_v15  ;;  %v3313_v51 = vmul.f32 %v2961_v43, %v10949_v34  ;;  %v11970_v14 = vadd.f32 %v13808_v0, %v13807_v32  ;;  %v2545_v63 = vmax.f32 %v2543_v21, %v2544_v55  ;;  %v13809_v21 = vld [vmem:[#allocation148_spill] sm:$0xff] }
 0x568   :  { %v3165_v57 = vadd.f32 %v2963_v13, %v2961_v43  ;;  %v3315_v4 = vmul.f32 %v2963_v13, %v10957_v38  ;;  %v2550_v47 = vmax.f32 %v2548_v2, %v2549_v25  ;;  %8803 = vmatprep.subr.bf16.mxu0 %v8802_v27  ;;  %v8834_v8 = vpack.c.bf16 %v3969_v61, %v3968_v53  ;;  %v13811_v43 = vld [vmem:[#allocation153_spill] sm:$0xff] }
 0x569   :  { %v3220_v37 = vmax.f32 %v3164_v56, 1e-20  ;;  %v8804_v36 = vpack.c.bf16 %v3920_v45, %v3919_v49  ;;  %v8836_v18 = vpack.c.bf16 %v3953_v52, %v3952_v10  ;;  %v2613_v26 = vsub.f32 %v11912_v9, %v2545_v63 }
 0x56a   :  { %v3166_v15 = vrot.slane %v3165_v57, 4  ;;  %v3517_v16 = vadd.f32 %v3315_v4, %v3313_v51  ;;  %v2615_v32 = vsub.f32 %v11933_v24, %v2545_v63  ;;  %v2551_v39 = vrot.slane %v2550_v47, 1  ;;  %8835 = vmatprep.subr.bf16.mxu1 %v8834_v8  ;;  %v13813_v63 = vld [vmem:[#allocation157_spill] sm:$0xff] }
 0x56b   :  { %v9211_v0 = vpop.eup %9210  ;;  %9216 = vrcp.f32 %v3220_v37  ;;  %8805 = vmatpush3.bf16.msra.mxu0 %v8804_v36  ;;  %v13810_v2 = vrot.slane %v13809_v21, 1  ;;  %v3403_v53 = vrot.slane %v13811_v43, 1  ;;  %v2737_v25 = vmul.f32 1.442695, %v2613_v26  ;;  %8837 = vmatpush3.bf16.msra.mxu1 %v8836_v18 }
 0x56c   :  { %v9213_v61 = vpop.eup %9212  ;;  %v3167_v49 = vadd.f32 %v3166_v15, %v3165_v57  ;;  %v3518_v13 = vrot.slane %v3517_v16, 4  ;;  %v2962_v55 = vmul.f32 %v9211_v0, %v11955_v42  ;;  %8387 = vmatprep.subr.mxu0 %v11973_v1  ;;  %v2741_v24 = vmul.f32 1.442695, %v2615_v32  ;;  %v13815_v0 = vld [vmem:[#allocation170_spill] sm:$0xff] }
 0x56d   :  { %v3390_v50 = vadd.f32 %v13810_v2, %v13809_v21  ;;  %v2964_v9 = vmul.f32 %v9213_v61, %v11957_v5  ;;  %v2552_v8 = vmax.f32 %v2550_v47, %v2551_v39  ;;  %v3404_v45 = vadd.f32 %v3403_v53, %v13811_v43  ;;  %v13817_v53 = vld [vmem:[#allocation131_spill] sm:$0xff] }
 0x56e   :  { %v3168_v10 = vrot.slane %v3167_v49, 2  ;;  %v11985_v52 = vadd.f32 %v3518_v13, %v3517_v16  ;;  %v3314_v56 = vmul.f32 %v2962_v55, %v10951_v35  ;;  %9218 = vpow2.f32 %v2737_v25 }
 0x56f   :  { %v3172_v51 = vadd.f32 %v2964_v9, %v2962_v55  ;;  %v3316_v27 = vmul.f32 %v2964_v9, %v10959_v41  ;;  %9220 = vpow2.f32 %v2741_v24  ;;  %v2614_v18 = vsub.f32 %v11918_v54, %v2552_v8  ;;  %v13816_v54 = vld [vmem:[#allocation129_spill] sm:$0xff]  ;;  %v13818_v9 = vld [vmem:[#allocation135_spill] sm:$0xff] }
 0x570   :  { %v11990_v26 = vpop.eup %9214  ;;  %v3169_v57 = vadd.f32 %v3168_v10, %v3167_v49  ;;  %v2616_v47 = vsub.f32 %v11947_v62, %v2552_v8  ;;  %v13814_v37 = vrot.slane %v13813_v63, 2  ;;  %v3429_v39 = vrot.slane %v13815_v0, 2  ;;  %v13819_v24 = vld [vmem:[#allocation137_spill] sm:$0xff] }
 0x571   :  { %13812 = vst [vmem:[#allocation161_spill] sm:$0xff] %v11990_v26  ;;  %v3173_v15 = vrot.slane %v3172_v51, 4  ;;  %v3524_v16 = vadd.f32 %v3316_v27, %v3314_v56  ;;  %v2739_v32 = vmul.f32 1.442695, %v2614_v18  ;;  %v3546_v61 = vmul.f32 %v13817_v53, %v13816_v54  ;;  %v13823_v54 = vld [vmem:[#allocation160_spill] sm:$0xff]  ;;  %v13825_v53 = vld [vmem:[#allocation83_spill] sm:$0xff] }
 0x572   :  { %v3416_v36 = vadd.f32 %v13814_v37, %v13813_v63  ;;  %v3170_v21 = vrot.slane %v3169_v57, 1  ;;  %v2743_v2 = vmul.f32 1.442695, %v2616_v47  ;;  %v3430_v62 = vadd.f32 %v3429_v39, %v13815_v0  ;;  %v13820_v47 = vld [vmem:[#allocation142_spill] sm:$0xff]  ;;  %v13821_v63 = vld [vmem:[#allocation147_spill] sm:$0xff] }
 0x573   :  { %v3174_v49 = vadd.f32 %v3173_v15, %v3172_v51  ;;  %v3525_v13 = vrot.slane %v3524_v16, 4  ;;  %9222 = vpow2.f32 %v2739_v32  ;;  %v3550_v8 = vmul.f32 %v13819_v24, %v13818_v9  ;;  %v13822_v15 = vld [vmem:[#allocation154_spill] sm:$0xff]  ;;  %v13827_v24 = vld [vmem:[#allocation125_spill] sm:$0xff] }
 0x574   :  { %v3417_v43 = vrot.slane %v3416_v36, 1  ;;  %v3171_v55 = vadd.f32 %v3170_v21, %v3169_v57  ;;  %9224 = vpow2.f32 %v2743_v2  ;;  %v3431_v18 = vrot.slane %v3430_v62, 1  ;;  %v13824_v57 = vld [vmem:[#allocation171_spill] sm:$0xff] }
 0x575   :  { %v12003_v10 = vpop.eup %9216  ;;  %v3175_v56 = vrot.slane %v3174_v49, 2  ;;  %v12005_v27 = vadd.f32 %v3525_v13, %v3524_v16  ;;  %v3552_v37 = vmul.f32 %v13821_v63, %v13820_v47  ;;  %v3554_v32 = vmul.f32 %v13822_v15, %v3390_v50  ;;  %v12016_v13 = vpop.permute.xlu0 %2897  ;;  %v13829_v15 = vld [vmem:[#allocation133_spill] sm:$0xff] }
 0x576   :  { %v3418_v25 = vadd.f32 %v3417_v43, %v3416_v36  ;;  %v3221_v51 = vmax.f32 %v3171_v55, 1e-20  ;;  %v3556_v0 = vmul.f32 %v13823_v54, %v3404_v45  ;;  %v3432_v2 = vadd.f32 %v3431_v18, %v3430_v62  ;;  %v9468_v43 = vld [vmem:[#allocation17] sm:$0x3]  ;;  %13826 = vst [vmem:[#allocation119_spill] sm:$0xff] %v12016_v13 }
 0x577   :  { %v3176_v36 = vadd.f32 %v3175_v56, %v3174_v49  ;;  %v12014_v9 = vrot.slane %v9468_v43, %v13825_v53  ;;  %v3718_v55 = vrot.slane %v13827_v24, 1  ;;  %v3720_v50 = vrot.slane %v13827_v24, 2 }
 0x578   :  { %v3558_v39 = vmul.f32 %v13824_v57, %v3418_v25  ;;  %v9219_v16 = vpop.eup %9218  ;;  %9226 = vrcp.f32 %v3221_v51  ;;  %v3722_v45 = vrot.slane %v13827_v24, 3  ;;  %v12021_v25 = vpop.permute.xlu1 %2902  ;;  %v3560_v56 = vmul.f32 %v11758_v59, %v3432_v2 }
 0x579   :  { %v9221_v47 = vpop.eup %9220  ;;  %13828 = vst [vmem:[#allocation162_spill] sm:$0xff] %v12021_v25  ;;  %v3177_v49 = vrot.slane %v3176_v36, 1  ;;  %v2965_v62 = vmul.f32 %v9219_v16, %v12016_v13  ;;  %v3589_v18 = vadd.f32 %v12014_v9, %v3546_v61  ;;  %v3591_v51 = vadd.f32 %v12014_v9, %v13829_v15 }
 0x57a   :  { %v2967_v63 = vmul.f32 %v9221_v47, %v12021_v25  ;;  %v3593_v54 = vadd.f32 %v12014_v9, %v3550_v8  ;;  %v3595_v57 = vadd.f32 %v12014_v9, %v3552_v37  ;;  %v3597_v4 = vadd.f32 %v12014_v9, %v3554_v32 }
 0x57b   :  { %v3178_v43 = vadd.f32 %v3177_v49, %v3176_v36  ;;  %v3317_v53 = vmul.f32 %v2965_v62, %v10949_v34  ;;  %v3599_v16 = vadd.f32 %v12014_v9, %v3556_v0  ;;  %v3601_v61 = vadd.f32 %v12014_v9, %v3558_v39 }
 0x57c   :  { %v3179_v21 = vadd.f32 %v2967_v63, %v2965_v62  ;;  %v3319_v59 = vmul.f32 %v2967_v63, %v10957_v38  ;;  %v3603_v2 = vadd.f32 %v12014_v9, %v3560_v56  ;;  %v3724_v8 = vrot.slane %v13827_v24, 4 }
 0x57d   :  { %v9223_v47 = vpop.eup %9222  ;;  %v3222_v15 = vmax.f32 %v3178_v43, 1e-20  ;;  %v3726_v37 = vrot.slane %v13827_v24, 5  ;;  %v3728_v36 = vrot.slane %v13827_v24, 6  ;;  %v3730_v62 = vrot.slane %v13827_v24, 7 }
 0x57e   :  { %v9225_v34 = vpop.eup %9224  ;;  %v3180_v49 = vrot.slane %v3179_v21, 4  ;;  %v3531_v32 = vadd.f32 %v3319_v59, %v3317_v53  ;;  %v2966_v0 = vmul.f32 %v9223_v47, %v12016_v13  ;;  %v3778_v39 = vadd.f32 %v13827_v24, %v3589_v18 }
 0x57f   :  { %9228 = vrcp.f32 %v3222_v15  ;;  %v2968_v38 = vmul.f32 %v9225_v34, %v12021_v25  ;;  %v3780_v56 = vadd.f32 %v3718_v55, %v3591_v51  ;;  %v3782_v42 = vadd.f32 %v3720_v50, %v3593_v54 }
 0x580   :  { %v3181_v63 = vadd.f32 %v3180_v49, %v3179_v21  ;;  %v3532_v43 = vrot.slane %v3531_v32, 4  ;;  %v3318_v5 = vmul.f32 %v2966_v0, %v10951_v35  ;;  %v3784_v23 = vadd.f32 %v3722_v45, %v3595_v57 }
 0x581   :  { %v3186_v44 = vadd.f32 %v2968_v38, %v2966_v0  ;;  %v3320_v26 = vmul.f32 %v2968_v38, %v10959_v41  ;;  %v3786_v53 = vadd.f32 %v3724_v8, %v3597_v4  ;;  %v3788_v15 = vadd.f32 %v3726_v37, %v3599_v16 }
 0x582   :  { %v12046_v59 = vpop.eup %9226  ;;  %v3182_v47 = vrot.slane %v3181_v63, 2  ;;  %v12048_v13 = vadd.f32 %v3532_v43, %v3531_v32  ;;  %v3790_v34 = vadd.f32 %v3728_v36, %v3601_v61  ;;  %v3792_v55 = vadd.f32 %v3730_v62, %v3603_v2 }
 0x583   :  { %v3187_v25 = vrot.slane %v3186_v44, 4  ;;  %v3538_v24 = vadd.f32 %v3320_v26, %v3318_v5  ;;  %vm3810_vm10 = vcmp.gt.f32.partialorder %v3778_v39, 0.0  ;;  %vm3812_vm11 = vcmp.gt.f32.partialorder %v3780_v56, 0.0 }
 0x584   :  { %v3183_v21 = vadd.f32 %v3182_v47, %v3181_v63  ;;  %vm3814_vm12 = vcmp.gt.f32.partialorder %v3782_v42, 0.0  ;;  %vm3816_vm13 = vcmp.gt.f32.partialorder %v3784_v23, 0.0  ;;  %vm3818_vm14 = vcmp.gt.f32.partialorder %v3786_v53, 0.0 }
 0x585   :  { %v3188_v35 = vadd.f32 %v3187_v25, %v3186_v44  ;;  %v3539_v50 = vrot.slane %v3538_v24, 4  ;;  %vm3820_vm15 = vcmp.gt.f32.partialorder %v3788_v15, 0.0  ;;  %vm3822_vm2 = vcmp.gt.f32.partialorder %v3790_v34, 0.0 }
 0x586   :  { %v3184_v41 = vrot.slane %v3183_v21, 1  ;;  %vm3824_vm3 = vcmp.gt.f32.partialorder %v3792_v55, 0.0  ;;  %v3842_v4 = vmul.f32 0.2, %v3778_v39  ;;  %v3844_v51 = vmul.f32 0.2, %v3780_v56 }
 0x587   :  { %v3189_v45 = vrot.slane %v3188_v35, 2  ;;  %v12050_v18 = vadd.f32 %v3539_v50, %v3538_v24  ;;  %v3846_v54 = vmul.f32 0.2, %v3782_v42  ;;  %v3848_v26 = vmul.f32 0.2, %v3784_v23 }
 0x588   :  { %v3185_v5 = vadd.f32 %v3184_v41, %v3183_v21  ;;  %v3850_v57 = vmul.f32 0.2, %v3786_v53  ;;  %v3852_v16 = vmul.f32 0.2, %v3788_v15  ;;  %v3854_v44 = vmul.f32 0.2, %v3790_v34 }
 0x589   :  { %v12052_v61 = vpop.eup %9228  ;;  %v3190_v2 = vadd.f32 %v3189_v45, %v3188_v35  ;;  %v3856_v25 = vmul.f32 0.2, %v3792_v55  ;;  %v3874_v8 = vsel %vm3810_vm10, %v3778_v39, %v3842_v4  ;;  %v3876_v36 = vsel %vm3812_vm11, %v3780_v56, %v3844_v51  ;;  %v13830_v35 = vld [vmem:[#allocation156_spill] sm:$0xff]  ;;  %v13833_v51 = vld [vmem:[#allocation145_spill] sm:$0xff] }
 0x58a   :  { %v3223_v37 = vmax.f32 %v3185_v5, 1e-20  ;;  %v3878_v49 = vsel %vm3814_vm12, %v3782_v42, %v3846_v54  ;;  %v3880_v32 = vsel %vm3816_vm13, %v3784_v23, %v3848_v26  ;;  %v3882_v62 = vsel %vm3818_vm14, %v3786_v53, %v3850_v57  ;;  %v13832_v4 = vld [vmem:[#allocation168_spill] sm:$0xff]  ;;  %v13834_v54 = vld [vmem:[#allocation149_spill] sm:$0xff] }
 0x58b   :  { %v3191_v0 = vrot.slane %v3190_v2, 1  ;;  %v3884_v38 = vsel %vm3820_vm15, %v3788_v15, %v3852_v16  ;;  %v3886_v63 = vsel %vm3822_vm2, %v3790_v34, %v3854_v44  ;;  %v3888_v43 = vsel %vm3824_vm3, %v3792_v55, %v3856_v25  ;;  %v13835_v57 = vld [vmem:[#allocation152_spill] sm:$0xff]  ;;  %v13836_v16 = vld [vmem:[#allocation155_spill] sm:$0xff]  ;;  %v13837_v44 = vld [vmem:[#allocation165_spill] sm:$0xff] }
 0x58c   :  { %9230 = vrcp.f32 %v3223_v37  ;;  %vm4062_vm10 = vcmask 1047559   ;;  %v4064_v42 = vrot.slane %v3876_v36, 7  ;;  %v4066_v23 = vrot.slane %v3878_v49, 6  ;;  %v13839_v37 = vld [vmem:[#allocation115_spill] sm:$0xff] }
 0x58d   :  { %v3192_v39 = vadd.f32 %v3191_v0, %v3190_v2  ;;  %v4068_v47 = vrot.slane %v3880_v32, 5  ;;  %v4070_v53 = vrot.slane %v3882_v62, 4  ;;  %v4072_v24 = vrot.slane %v3884_v38, 3  ;;  %v13840_v0 = vld [vmem:[#allocation128_spill] sm:$0xff] }
 0x58e   :  { %v4065_v15 = vsel %vm4044_vm4, %v4064_v42, %v3874_v8  ;;  %v4074_v34 = vrot.slane %v3886_v63, 2  ;;  %v4076_v21 = vrot.slane %v3888_v43, 1  ;;  %v13831_v55 = vrot.slane %v13830_v35, 1  ;;  %v13838_v8 = vld [vmem:[#allocation130_spill] sm:$0xff]  ;;  %v13841_v38 = vld [vmem:[#allocation144_spill] sm:$0xff] }
 0x58f   :  { %v3224_v56 = vmax.f32 %v3192_v39, 1e-20  ;;  %v4067_v41 = vsel %vm4047_vm5, %v4066_v23, %v4065_v15  ;;  %v3424_v45 = vrot.slane %v13832_v4, 1  ;;  %v3553_v5 = vmul.f32 %v13834_v54, %v13833_v51  ;;  %v13843_v54 = vld [vmem:[#allocation132_spill] sm:$0xff] }
 0x590   :  { %v3411_v50 = vadd.f32 %v13831_v55, %v13830_v35  ;;  %v4069_v26 = vsel %vm4050_vm6, %v4068_v47, %v4067_v41  ;;  %v3555_v2 = vmul.f32 %v13836_v16, %v13835_v57  ;;  %v3588_v36 = vadd.f32 %v13839_v37, %v13838_v8 }
 0x591   :  { %9232 = vrcp.f32 %v3224_v56  ;;  %v4071_v49 = vsel %vm4053_vm7, %v4070_v53, %v4069_v26  ;;  %v3425_v32 = vadd.f32 %v3424_v45, %v13832_v4  ;;  %v3592_v62 = vadd.f32 %v13839_v37, %v13840_v0  ;;  %v13842_v53 = vld [vmem:[#allocation120_spill] sm:$0xff] }
 0x592   :  { %v3557_v25 = vmul.f32 %v13837_v44, %v3411_v50  ;;  %v3594_v63 = vadd.f32 %v13839_v37, %v13841_v38  ;;  %v4073_v43 = vsel %vm4056_vm8, %v4072_v24, %v4071_v49  ;;  %v3596_v39 = vadd.f32 %v13839_v37, %v3553_v5 }
 0x593   :  { %v3598_v42 = vadd.f32 %v13839_v37, %v3555_v2  ;;  %v4075_v56 = vsel %vm4059_vm9, %v4074_v34, %v4073_v43  ;;  %v3559_v47 = vmul.f32 %v11740_v22, %v3425_v32  ;;  %v3717_v15 = vrot.slane %v13842_v53, 1 }
 0x594   :  { %v3600_v23 = vadd.f32 %v13839_v37, %v3557_v25  ;;  %v3719_v35 = vrot.slane %v13842_v53, 2  ;;  %v4077_v50 = vsel %vm4062_vm10, %v4076_v21, %v4075_v56  ;;  %v3721_v24 = vrot.slane %v13842_v53, 3 }
 0x595   :  { %v3723_v41 = vrot.slane %v13842_v53, 4  ;;  %v3725_v4 = vrot.slane %v13842_v53, 5  ;;  %4174 = vmatprep.mubr.f32.mxu0 %v4077_v50  ;;  %4255 = vmatprep.mubr.f32.mxu1 %v4077_v50  ;;  %v3602_v34 = vadd.f32 %v13839_v37, %v3559_v47  ;;  %v3727_v22 = vrot.slane %v13842_v53, 6 }
 0x596   :  { %v12090_v55 = vpop.eup %9230  ;;  %v3729_v45 = vrot.slane %v13842_v53, 7  ;;  %v3777_v51 = vadd.f32 %v13842_v53, %v3588_v36  ;;  %v3779_v5 = vadd.f32 %v3717_v15, %v13843_v54  ;;  %v3781_v26 = vadd.f32 %v3719_v35, %v3592_v62 }
 0x597   :  { %v3783_v21 = vadd.f32 %v3721_v24, %v3594_v63  ;;  %v3785_v57 = vadd.f32 %v3723_v41, %v3596_v39  ;;  %v3787_v16 = vadd.f32 %v3725_v4, %v3598_v42  ;;  %v3789_v2 = vadd.f32 %v3727_v22, %v3600_v23 }
 0x598   :  { %v3791_v44 = vadd.f32 %v3729_v45, %v3602_v34  ;;  %vm3809_vm11 = vcmp.gt.f32.partialorder %v3777_v51, 0.0  ;;  %vm3811_vm12 = vcmp.gt.f32.partialorder %v3779_v5, 0.0  ;;  %vm3813_vm13 = vcmp.gt.f32.partialorder %v3781_v26, 0.0 }
 0x599   :  { %vm3815_vm14 = vcmp.gt.f32.partialorder %v3783_v21, 0.0  ;;  %vm3817_vm15 = vcmp.gt.f32.partialorder %v3785_v57, 0.0  ;;  %vm3819_vm2 = vcmp.gt.f32.partialorder %v3787_v16, 0.0  ;;  %vm3821_vm3 = vcmp.gt.f32.partialorder %v3789_v2, 0.0 }
 0x59a   :  { %vm3823_vm0 = vcmp.gt.f32.partialorder %v3791_v44, 0.0  ;;  %v3841_v8 = vmul.f32 0.2, %v3777_v51  ;;  %v3843_v36 = vmul.f32 0.2, %v3779_v5  ;;  %v13844_v0 = vrot.slane %v11922_v28, 1 }
 0x59b   :  { %v12101_v25 = vpop.eup %9232  ;;  %v3845_v49 = vmul.f32 0.2, %v3781_v26  ;;  %v3847_v32 = vmul.f32 0.2, %v3783_v21  ;;  %v3849_v38 = vmul.f32 0.2, %v3785_v57 }
 0x59c   :  { %v3502_v62 = vadd.f32 %v13844_v0, %v11922_v28  ;;  %v3851_v63 = vmul.f32 0.2, %v3787_v16  ;;  %v3853_v43 = vmul.f32 0.2, %v3789_v2  ;;  %v3873_v39 = vsel %vm3809_vm11, %v3777_v51, %v3841_v8 }
 0x59d   :  { %v3855_v42 = vmul.f32 0.2, %v3791_v44  ;;  %v3875_v23 = vsel %vm3811_vm12, %v3779_v5, %v3843_v36  ;;  %v3877_v56 = vsel %vm3813_vm13, %v3781_v26, %v3845_v49  ;;  %v3879_v47 = vsel %vm3815_vm14, %v3783_v21, %v3847_v32 }
 0x59e   :  { %v3881_v53 = vsel %vm3817_vm15, %v3785_v57, %v3849_v38  ;;  %v3883_v15 = vsel %vm3819_vm2, %v3787_v16, %v3851_v63  ;;  %v3885_v35 = vsel %vm3821_vm3, %v3789_v2, %v3853_v43  ;;  %v4043_v50 = vrot.slane %v3875_v23, 7 }
 0x59f   :  { %v3887_v28 = vsel %vm3823_vm0, %v3791_v44, %v3855_v42  ;;  %v4046_v24 = vrot.slane %v3877_v56, 6  ;;  %v4049_v41 = vrot.slane %v3879_v47, 5  ;;  %v4052_v4 = vrot.slane %v3881_v53, 4 }
 0x5a0   :  { %v4045_v34 = vsel %vm4044_vm4, %v4043_v50, %v3873_v39  ;;  %v4055_v22 = vrot.slane %v3883_v15, 3  ;;  %v4058_v45 = vrot.slane %v3885_v35, 2  ;;  %v4061_v51 = vrot.slane %v3887_v28, 1 }
 0x5a1   :  { %v4048_v54 = vsel %vm4047_vm5, %v4046_v24, %v4045_v34  ;;  %v3515_v5 = vrot.slane %v11959_v11, 1  ;;  %v13845_v26 = vrot.slane %v12005_v27, 2  ;;  %v3541_v57 = vrot.slane %v12050_v18, 2 }
 0x5a2   :  { %v4051_v16 = vsel %vm4050_vm6, %v4049_v41, %v4048_v54  ;;  %v3562_v2 = vmul.f32 %v11793_v12, %v11766_v30  ;;  %v3566_v44 = vmul.f32 %v11861_v19, %v11839_v46  ;;  %v3568_v8 = vmul.f32 %v11906_v3, %v11881_v48 }
 0x5a3   :  { %v3528_v21 = vadd.f32 %v13845_v26, %v12005_v27  ;;  %v4054_v36 = vsel %vm4053_vm7, %v4052_v4, %v4051_v16  ;;  %v3516_v49 = vadd.f32 %v3515_v5, %v11959_v11  ;;  %v3542_v27 = vadd.f32 %v3541_v57, %v12050_v18 }
 0x5a4   :  { %v4057_v0 = vsel %vm4056_vm8, %v4055_v22, %v4054_v36  ;;  %v3570_v38 = vmul.f32 %v11953_v6, %v3502_v62  ;;  %v3605_v63 = vadd.f32 %v12014_v9, %v3562_v2  ;;  %v3607_v30 = vadd.f32 %v12014_v9, %v11821_v20 }
 0x5a5   :  { %v3529_v32 = vrot.slane %v3528_v21, 1  ;;  %v4060_v12 = vsel %vm4059_vm9, %v4058_v45, %v4057_v0  ;;  %v3543_v19 = vrot.slane %v3542_v27, 1  ;;  %v3572_v48 = vmul.f32 %v12003_v10, %v3516_v49 }
 0x5a6   :  { %v4063_v3 = vsel %vm4062_vm10, %v4061_v51, %v4060_v12  ;;  %v3609_v11 = vadd.f32 %v12014_v9, %v3566_v44  ;;  %v3611_v18 = vadd.f32 %v12014_v9, %v3568_v8  ;;  %v3613_v43 = vadd.f32 %v12014_v9, %v3570_v38 }
 0x5a7   :  { %v3530_v46 = vadd.f32 %v3529_v32, %v3528_v21  ;;  %4175 = vmatmul.mubr.f32.vlgmr.msra.gmra.mrb[76].mxu0 %v4063_v3  ;;  %4256 = vmatmul.mubr.f32.vlgmr.msra.gmra.mrb[64].mxu1 %v4063_v3  ;;  %v3544_v6 = vadd.f32 %v3543_v19, %v3542_v27  ;;  %v3615_v20 = vadd.f32 %v12014_v9, %v3572_v48  ;;  %v3732_v39 = vrot.slane %v11970_v14, 1 }
 0x5a8   :  { %8388 = vmatpush3.msra.mxu0 %v11973_v1  ;;  %v3734_v10 = vrot.slane %v11970_v14, 2  ;;  %v3736_v42 = vrot.slane %v11970_v14, 3  ;;  %v3738_v23 = vrot.slane %v11970_v14, 4  ;;  %v3740_v56 = vrot.slane %v11970_v14, 5 }
 0x5a9   :  { %v3574_v62 = vmul.f32 %v12052_v61, %v3530_v46  ;;  %v3576_v47 = vmul.f32 %v12101_v25, %v3544_v6  ;;  %v3742_v61 = vrot.slane %v11970_v14, 6  ;;  %v3744_v15 = vrot.slane %v11970_v14, 7 }
 0x5aa   :  { %v3794_v35 = vadd.f32 %v11970_v14, %v3605_v63  ;;  %v3796_v50 = vadd.f32 %v3732_v39, %v3607_v30  ;;  %v3798_v1 = vadd.f32 %v3734_v10, %v3609_v11  ;;  %v3800_v28 = vadd.f32 %v3736_v42, %v3611_v18 }
 0x5ab   :  { %v3617_v53 = vadd.f32 %v12014_v9, %v3574_v62  ;;  %v3619_v24 = vadd.f32 %v12014_v9, %v3576_v47  ;;  %v3802_v41 = vadd.f32 %v3738_v23, %v3613_v43  ;;  %v3804_v4 = vadd.f32 %v3740_v56, %v3615_v20  ;;  %v13849_v47 = vld [vmem:[#allocation161_spill] sm:$0xff] }
 0x5ac   :  { %vm3826_vm0 = vcmp.gt.f32.partialorder %v3794_v35, 0.0  ;;  %vm3828_vm11 = vcmp.gt.f32.partialorder %v3796_v50, 0.0  ;;  %vm3830_vm12 = vcmp.gt.f32.partialorder %v3798_v1, 0.0  ;;  %vm3832_vm13 = vcmp.gt.f32.partialorder %v3800_v28, 0.0 }
 0x5ad   :  { %v3806_v34 = vadd.f32 %v3742_v61, %v3617_v53  ;;  %v3808_v25 = vadd.f32 %v3744_v15, %v3619_v24  ;;  %vm3834_vm14 = vcmp.gt.f32.partialorder %v3802_v41, 0.0  ;;  %vm3836_vm15 = vcmp.gt.f32.partialorder %v3804_v4, 0.0 }
 0x5ae   :  { %v3858_v22 = vmul.f32 0.2, %v3794_v35  ;;  %v3860_v45 = vmul.f32 0.2, %v3796_v50  ;;  %v3862_v51 = vmul.f32 0.2, %v3798_v1  ;;  %v3561_v62 = vmul.f32 %v11784_v58, %v11755_v33 }
 0x5af   :  { %vm3838_vm2 = vcmp.gt.f32.partialorder %v3806_v34, 0.0  ;;  %v13846_v14 = vrot.slane %v11899_v29, 1  ;;  %vm3840_vm3 = vcmp.gt.f32.partialorder %v3808_v25, 0.0  ;;  %v3864_v9 = vmul.f32 0.2, %v3800_v28  ;;  %v13850_v58 = vld [vmem:[#allocation140_spill] sm:$0xff] }
 0x5b0   :  { %v3866_v5 = vmul.f32 0.2, %v3802_v41  ;;  %v3508_v26 = vrot.slane %v11949_v31, 1  ;;  %v3868_v21 = vmul.f32 0.2, %v3804_v4  ;;  %v3890_v2 = vsel %vm3826_vm0, %v3794_v35, %v3858_v22 }
 0x5b1   :  { %v3495_v54 = vadd.f32 %v13846_v14, %v11899_v29  ;;  %v3870_v57 = vmul.f32 0.2, %v3806_v34  ;;  %v3872_v16 = vmul.f32 0.2, %v3808_v25  ;;  %v3892_v44 = vsel %vm3828_vm11, %v3796_v50, %v3860_v45 }
 0x5b2   :  { %v3894_v8 = vsel %vm3830_vm12, %v3798_v1, %v3862_v51  ;;  %v3896_v36 = vsel %vm3832_vm13, %v3800_v28, %v3864_v9  ;;  %v3898_v49 = vsel %vm3834_vm14, %v3802_v41, %v3866_v5  ;;  %v3900_v29 = vsel %vm3836_vm15, %v3804_v4, %v3868_v21  ;;  %v13851_v28 = vld [vmem:[#allocation116_spill] sm:$0xff] }
 0x5b3   :  { %v3902_v32 = vsel %vm3838_vm2, %v3806_v34, %v3870_v57  ;;  %v3904_v27 = vsel %vm3840_vm3, %v3808_v25, %v3872_v16  ;;  %v4092_v0 = vrot.slane %v3892_v44, 7  ;;  %v4094_v38 = vrot.slane %v3894_v8, 6 }
 0x5b4   :  { %v4096_v63 = vrot.slane %v3896_v36, 5  ;;  %v4098_v30 = vrot.slane %v3898_v49, 4  ;;  %v4100_v12 = vrot.slane %v3900_v29, 3  ;;  %v4102_v19 = vrot.slane %v3902_v32, 2 }
 0x5b5   :  { %v4093_v46 = vsel %vm4044_vm4, %v4092_v0, %v3890_v2  ;;  %v4104_v48 = vrot.slane %v3904_v27, 1  ;;  %v3509_v3 = vadd.f32 %v3508_v26, %v11949_v31  ;;  %v13847_v18 = vrot.slane %v11985_v52, 2  ;;  %v13848_v31 = vld [vmem:[#allocation178_spill] sm:$0xff] }
 0x5b6   :  { %v4095_v11 = vsel %vm4047_vm5, %v4094_v38, %v4093_v46  ;;  %v3534_v6 = vrot.slane %v12048_v13, 2  ;;  %v3565_v39 = vmul.f32 %v11849_v40, %v11816_v60  ;;  %v3567_v10 = vmul.f32 %v11896_v17, %v11869_v7 }
 0x5b7   :  { %v3521_v43 = vadd.f32 %v13847_v18, %v11985_v52  ;;  %v4097_v20 = vsel %vm4050_vm6, %v4096_v63, %v4095_v11  ;;  %v3569_v42 = vmul.f32 %v13848_v31, %v3495_v54  ;;  %v3571_v53 = vmul.f32 %v13849_v47, %v3509_v3 }
 0x5b8   :  { %v4099_v23 = vsel %vm4053_vm7, %v4098_v30, %v4097_v20  ;;  %v3535_v52 = vadd.f32 %v3534_v6, %v12048_v13  ;;  %v3604_v33 = vadd.f32 %v13839_v37, %v3561_v62  ;;  %v3606_v15 = vadd.f32 %v13839_v37, %v13850_v58  ;;  %v9472_v58 = vld [vmem:[#allocation7 + $0x18] sm:$0xff] }
 0x5b9   :  { %v3522_v56 = vrot.slane %v3521_v43, 1  ;;  %v4101_v61 = vsel %vm4056_vm8, %v4100_v12, %v4099_v23  ;;  %v3608_v60 = vadd.f32 %v13839_v37, %v3565_v39  ;;  %v3610_v35 = vadd.f32 %v13839_v37, %v3567_v10 }
 0x5ba   :  { %v4103_v40 = vsel %vm4059_vm9, %v4102_v19, %v4101_v61  ;;  %v3536_v17 = vrot.slane %v3535_v52, 1  ;;  %v3612_v13 = vadd.f32 %v13839_v37, %v3569_v42  ;;  %v3614_v1 = vadd.f32 %v13839_v37, %v3571_v53  ;;  %v9469_v53 = vld [vmem:[#allocation7] sm:$0xff]  ;;  %v9470_v61 = vld [vmem:[#allocation7 + $0x8] sm:$0xff] }
 0x5bb   :  { %v3523_v7 = vadd.f32 %v3522_v56, %v3521_v43  ;;  %v4105_v50 = vsel %vm4062_vm10, %v4104_v48, %v4103_v40  ;;  %v3731_v24 = vrot.slane %v13851_v28, 1  ;;  %v3733_v34 = vrot.slane %v13851_v28, 2  ;;  %v9475_v40 = vld [vmem:[#allocation7 + $0x30] sm:$0xff] }
 0x5bc   :  { %4179 = vmatprep.mubr.f32.mxu0 %v4105_v50  ;;  %4260 = vmatprep.mubr.f32.mxu1 %v4105_v50  ;;  %v3537_v41 = vadd.f32 %v3536_v17, %v3535_v52  ;;  %v3735_v25 = vrot.slane %v13851_v28, 3  ;;  %v3737_v22 = vrot.slane %v13851_v28, 4  ;;  %v3739_v45 = vrot.slane %v13851_v28, 5  ;;  %v9477_v17 = vld [vmem:[#allocation7 + $0x40] sm:$0xff]  ;;  %v9479_v50 = vld [vmem:[#allocation7 + $0x50] sm:$0xff] }
 0x5bd   :  { %v3573_v4 = vmul.f32 %v12046_v59, %v3523_v7  ;;  %v3741_v51 = vrot.slane %v13851_v28, 6  ;;  %v3743_v14 = vrot.slane %v13851_v28, 7  ;;  %v3793_v5 = vadd.f32 %v13851_v28, %v3604_v33  ;;  %v9471_v33 = vld [vmem:[#allocation7 + $0x10] sm:$0xff]  ;;  %v9476_v7 = vld [vmem:[#allocation7 + $0x38] sm:$0xff]  ;;  %v9482_v28 = vld [vmem:[#allocation7 + $0x68] sm:$0xff] }
 0x5be   :  { %v3575_v54 = vmul.f32 %v12090_v55, %v3537_v41  ;;  %v3795_v26 = vadd.f32 %v3731_v24, %v3606_v15  ;;  %v3797_v59 = vadd.f32 %v3733_v34, %v3608_v60  ;;  %v3799_v21 = vadd.f32 %v3735_v25, %v3610_v35  ;;  %v9473_v15 = vld [vmem:[#allocation7 + $0x20] sm:$0xff]  ;;  %v9474_v60 = vld [vmem:[#allocation7 + $0x28] sm:$0xff]  ;;  %v9483_v24 = vld [vmem:[#allocation7 + $0x70] sm:$0xff] }
 0x5bf   :  { %v3616_v9 = vadd.f32 %v13839_v37, %v3573_v4  ;;  %v3801_v57 = vadd.f32 %v3737_v22, %v3612_v13  ;;  %v3803_v16 = vadd.f32 %v3739_v45, %v3614_v1  ;;  %vm3825_vm0 = vcmp.gt.f32.partialorder %v3793_v5, 0.0  ;;  %v9478_v35 = vld [vmem:[#allocation7 + $0x48] sm:$0xff]  ;;  %v9480_v13 = vld [vmem:[#allocation7 + $0x58] sm:$0xff]  ;;  %v9481_v1 = vld [vmem:[#allocation7 + $0x60] sm:$0xff] }
 0x5c0   :  { %v3618_v2 = vadd.f32 %v13839_v37, %v3575_v54  ;;  %vm3827_vm11 = vcmp.gt.f32.partialorder %v3795_v26, 0.0  ;;  %vm3829_vm12 = vcmp.gt.f32.partialorder %v3797_v59, 0.0  ;;  %vm3831_vm13 = vcmp.gt.f32.partialorder %v3799_v21, 0.0  ;;  %v9484_v41 = vld [vmem:[#allocation7 + $0x78] sm:$0xff]  ;;  %v9485_v4 = vld [vmem:[#allocation7 + $0x80] sm:$0xff]  ;;  %v9486_v34 = vld [vmem:[#allocation7 + $0x88] sm:$0xff] }
 0x5c1   :  { %v3805_v44 = vadd.f32 %v3741_v51, %v3616_v9  ;;  %vm3833_vm14 = vcmp.gt.f32.partialorder %v3801_v57, 0.0  ;;  %vm3835_vm15 = vcmp.gt.f32.partialorder %v3803_v16, 0.0  ;;  %v3857_v55 = vmul.f32 0.2, %v3793_v5  ;;  %v9487_v25 = vld [vmem:[#allocation7 + $0x90] sm:$0xff]  ;;  %v9488_v22 = vld [vmem:[#allocation7 + $0x98] sm:$0xff] }
 0x5c2   :  { %v3807_v8 = vadd.f32 %v3743_v14, %v3618_v2  ;;  %v3859_v36 = vmul.f32 0.2, %v3795_v26  ;;  %v3861_v49 = vmul.f32 0.2, %v3797_v59  ;;  %v3863_v29 = vmul.f32 0.2, %v3799_v21 }
 0x5c3   :  { %vm3837_vm2 = vcmp.gt.f32.partialorder %v3805_v44, 0.0  ;;  %v3865_v32 = vmul.f32 0.2, %v3801_v57  ;;  %v3867_v27 = vmul.f32 0.2, %v3803_v16  ;;  %v3889_v38 = vsel %vm3825_vm0, %v3793_v5, %v3857_v55  ;;  %v9489_v45 = vld [vmem:[#allocation7 + $0xa0] sm:$0xff] }
 0x5c4   :  { %vm3839_vm3 = vcmp.gt.f32.partialorder %v3807_v8, 0.0  ;;  %v3869_v0 = vmul.f32 0.2, %v3805_v44  ;;  %v3871_v37 = vmul.f32 0.2, %v3807_v8  ;;  %v3891_v63 = vsel %vm3827_vm11, %v3795_v26, %v3859_v36  ;;  %v9490_v51 = vld [vmem:[#allocation7 + $0xa8] sm:$0xff] }
 0x5c5   :  { %v3893_v30 = vsel %vm3829_vm12, %v3797_v59, %v3861_v49  ;;  %v3895_v12 = vsel %vm3831_vm13, %v3799_v21, %v3863_v29  ;;  %v3897_v46 = vsel %vm3833_vm14, %v3801_v57, %v3865_v32  ;;  %v3899_v19 = vsel %vm3835_vm15, %v3803_v16, %v3867_v27  ;;  %v9491_v14 = vld [vmem:[#allocation7 + $0xb0] sm:$0xff]  ;;  %v9492_v54 = vld [vmem:[#allocation7 + $0xb8] sm:$0xff]  ;;  %v9493_v9 = vld [vmem:[#allocation7 + $0xc0] sm:$0xff] }
 0x5c6   :  { %v3901_v48 = vsel %vm3837_vm2, %v3805_v44, %v3869_v0  ;;  %v4078_v3 = vrot.slane %v3891_v63, 7  ;;  %v3903_v11 = vsel %vm3839_vm3, %v3807_v8, %v3871_v37  ;;  %v4080_v18 = vrot.slane %v3893_v30, 6  ;;  %v9494_v5 = vld [vmem:[#allocation7 + $0xc8] sm:$0xff]  ;;  %v3974_v21 = vld [vmem:[#allocation29 + $0x10] sm:$0xff]  ;;  %v3975_v2 = vld [vmem:[#allocation29 + $0x18] sm:$0xff] }
 0x5c7   :  { %v4082_v43 = vrot.slane %v3895_v12, 5  ;;  %v4084_v6 = vrot.slane %v3897_v46, 4  ;;  %v4086_v20 = vrot.slane %v3899_v19, 3  ;;  %v4088_v10 = vrot.slane %v3901_v48, 2  ;;  %v3972_v26 = vld [vmem:[#allocation29] sm:$0xff]  ;;  %v3973_v59 = vld [vmem:[#allocation29 + $0x8] sm:$0xff] }
 0x5c8   :  { %v4079_v62 = vsel %vm4044_vm4, %v4078_v3, %v3889_v38  ;;  %v4090_v42 = vrot.slane %v3903_v11, 1  ;;  %v9495_v57 = vld [vmem:[#allocation7 + $0xd0] sm:$0xff]  ;;  %v8838_v16 = vpack.c.bf16 %v3973_v59, %v3972_v26  ;;  %v8842_v44 = vpack.c.bf16 %v3975_v2, %v3974_v21  ;;  %v3976_v8 = vld [vmem:[#allocation29 + $0x20] sm:$0xff]  ;;  %v9496_v36 = vld [vmem:[#allocation7 + $0xd8] sm:$0xff] }
 0x5c9   :  { %v4081_v39 = vsel %vm4047_vm5, %v4080_v18, %v4079_v62  ;;  %v3977_v55 = vld [vmem:[#allocation29 + $0x28] sm:$0xff]  ;;  %v9497_v49 = vld [vmem:[#allocation7 + $0xe0] sm:$0xff]  ;;  %v3978_v32 = vld [vmem:[#allocation29 + $0x30] sm:$0xff] }
 0x5ca   :  { %v4083_v31 = vsel %vm4050_vm6, %v4082_v43, %v4081_v39  ;;  %8839 = vmatprep.subr.bf16.mxu1 %v8838_v16  ;;  %v8846_v29 = vpack.c.bf16 %v3977_v55, %v3976_v8  ;;  %v3979_v27 = vld [vmem:[#allocation29 + $0x38] sm:$0xff]  ;;  %v9498_v0 = vld [vmem:[#allocation7 + $0xe8] sm:$0xff]  ;;  %v9499_v38 = vld [vmem:[#allocation7 + $0xf0] sm:$0xff] }
 0x5cb   :  { %v4085_v23 = vsel %vm4053_vm7, %v4084_v6, %v4083_v31  ;;  %8841 = vmatpush3.bf16.msra.mxu1 %v8838_v16  ;;  %v8850_v37 = vpack.c.bf16 %v3979_v27, %v3978_v32  ;;  %v3980_v63 = vld [vmem:[#allocation29 + $0x40] sm:$0xff]  ;;  %v3981_v30 = vld [vmem:[#allocation29 + $0x48] sm:$0xff]  ;;  %v9500_v12 = vld [vmem:[#allocation7 + $0xf8] sm:$0xff] }
 0x5cc   :  { %v4087_v56 = vsel %vm4056_vm8, %v4086_v20, %v4085_v23  ;;  %8843 = vmatprep.subr.bf16.mxu1 %v8842_v44  ;;  %v8854_v46 = vpack.c.bf16 %v3981_v30, %v3980_v63  ;;  %v3982_v19 = vld [vmem:[#allocation29 + $0x50] sm:$0xff]  ;;  %v3983_v48 = vld [vmem:[#allocation29 + $0x58] sm:$0xff]  ;;  %v3984_v11 = vld [vmem:[#allocation29 + $0x60] sm:$0xff] }
 0x5cd   :  { %v4089_v52 = vsel %vm4059_vm9, %v4088_v10, %v4087_v56  ;;  %v8858_v3 = vpack.c.bf16 %v3983_v48, %v3982_v19  ;;  %v3985_v18 = vld [vmem:[#allocation29 + $0x68] sm:$0xff]  ;;  %v3986_v43 = vld [vmem:[#allocation29 + $0x70] sm:$0xff]  ;;  %v3987_v62 = vld [vmem:[#allocation29 + $0x78] sm:$0xff] }
 0x5ce   :  { %v4091_v47 = vsel %vm4062_vm10, %v4090_v42, %v4089_v52  ;;  %v8862_v6 = vpack.c.bf16 %v3985_v18, %v3984_v11  ;;  %v8866_v20 = vpack.c.bf16 %v3987_v62, %v3986_v43  ;;  %v12253_v52 = vld [vmem:[#allocation26] ss:$0 sm:$0xff] }
 0x5cf   :  { %4180 = vmatmul.mubr.f32.gmra.mrb[78].mxu0 %v4091_v47  ;;  %4261 = vmatmul.mubr.f32.gmra.mrb[66].mxu1 %v4091_v47 }
 0x5d0   :  { %8389 = vmatprep.mubr.msk.f32.mxu0 %vm910_vm1, %v9469_v53  ;;  %8845 = vmatpush3.bf16.msra.mxu1 %v8842_v44  ;;  %v13852_v53 = vld [vmem:[#allocation84_spill] sm:$0xff] }
 0x5d1   :  { %8847 = vmatprep.subr.bf16.mxu1 %v8846_v29 }
 0x5d3   :  { %8390 = vmatmul.mubr.msk.f32.vlgmr.msra.gmra.mrb[80].mxu0 %vm910_vm1, %v9470_v61 }
 0x5d4   :  { %8392 = vmatprep.mubr.msk.f32.mxu0 %vm910_vm1, %v9471_v33  ;;  %8849 = vmatpush3.bf16.msra.mxu1 %v8846_v29 }
 0x5d5   :  { %8851 = vmatprep.subr.bf16.mxu1 %v8850_v37 }
 0x5d7   :  { %8393 = vmatmul.mubr.msk.f32.gmra.mrb[82].mxu0 %vm910_vm1, %v9472_v58 }
 0x5d8   :  { %8395 = vmatprep.mubr.msk.f32.mxu0 %vm910_vm1, %v9473_v15  ;;  %8853 = vmatpush3.bf16.msra.mxu1 %v8850_v37  ;;  %v7989_v15 = vld [vmem:[#allocation23] ss:$0 sm:$0xff] }
 0x5d9   :  { %8855 = vmatprep.subr.bf16.mxu1 %v8854_v46 }
 0x5db   :  { %8396 = vmatmul.mubr.msk.f32.gmra.mrb[84].mxu0 %vm910_vm1, %v9474_v60 }
 0x5dc   :  { %8398 = vmatprep.mubr.msk.f32.mxu0 %vm910_vm1, %v9475_v40  ;;  %8857 = vmatpush3.bf16.msra.mxu1 %v8854_v46 }
 0x5dd   :  { %8859 = vmatprep.subr.bf16.mxu1 %v8858_v3 }
 0x5df   :  { %8399 = vmatmul.mubr.msk.f32.gmra.mrb[86].mxu0 %vm910_vm1, %v9476_v7  ;;  %v13853_v7 = vld [vmem:[#allocation82_spill] sm:$0xff] }
 0x5e0   :  { %8401 = vmatprep.mubr.msk.f32.mxu0 %vm910_vm1, %v9477_v17  ;;  %8861 = vmatpush3.bf16.msra.mxu1 %v8858_v3 }
 0x5e1   :  { %8863 = vmatprep.subr.bf16.mxu1 %v8862_v6 }
 0x5e3   :  { %8402 = vmatmul.mubr.msk.f32.gmra.mrb[88].mxu0 %vm910_vm1, %v9478_v35 }
 0x5e4   :  { %8404 = vmatprep.mubr.msk.f32.mxu0 %vm910_vm1, %v9479_v50  ;;  %8865 = vmatpush3.bf16.msra.mxu1 %v8862_v6 }
 0x5e5   :  { %8867 = vmatprep.subr.bf16.mxu1 %v8866_v20 }
 0x5e7   :  { %8405 = vmatmul.mubr.msk.f32.gmra.mrb[90].mxu0 %vm910_vm1, %v9480_v13 }
 0x5e8   :  { %8407 = vmatprep.mubr.msk.f32.mxu0 %vm910_vm1, %v9481_v1  ;;  %8869 = vmatpush3.bf16.msra.mxu1 %v8866_v20 }
 0x5eb   :  { %8408 = vmatmul.mubr.msk.f32.gmra.mrb[92].mxu0 %vm910_vm1, %v9482_v28 }
 0x5ec   :  { %8410 = vmatprep.mubr.msk.f32.mxu0 %vm910_vm1, %v9483_v24 }
 0x5ef   :  { %8411 = vmatmul.mubr.msk.f32.gmra.mrb[94].mxu0 %vm910_vm1, %v9484_v41 }
 0x5f0   :  { %8413 = vmatprep.mubr.msk.f32.mxu0 %vm910_vm1, %v9485_v4 }
 0x5f3   :  { %8414 = vmatmul.mubr.msk.f32.gmra.mrb[96].mxu0 %vm910_vm1, %v9486_v34 }
 0x5f4   :  { %8416 = vmatprep.mubr.msk.f32.mxu0 %vm910_vm1, %v9487_v25 }
 0x5f7   :  { %8417 = vmatmul.mubr.msk.f32.gmra.mrb[98].mxu0 %vm910_vm1, %v9488_v22 }
 0x5f8   :  { %8419 = vmatprep.mubr.msk.f32.mxu0 %vm910_vm1, %v9489_v45 }
 0x5fb   :  { %8420 = vmatmul.mubr.msk.f32.gmra.mrb[100].mxu0 %vm910_vm1, %v9490_v51 }
 0x5fc   :  { %8422 = vmatprep.mubr.msk.f32.mxu0 %vm910_vm1, %v9491_v14 }
 0x5ff   :  { %8423 = vmatmul.mubr.msk.f32.gmra.mrb[102].mxu0 %vm910_vm1, %v9492_v54 }
 0x600   :  { %8425 = vmatprep.mubr.msk.f32.mxu0 %vm910_vm1, %v9493_v9 }
 0x603   :  { %8426 = vmatmul.mubr.msk.f32.gmra.mrb[104].mxu0 %vm910_vm1, %v9494_v5 }
 0x604   :  { %8428 = vmatprep.mubr.msk.f32.mxu0 %vm910_vm1, %v9495_v57 }
 0x607   :  { %8429 = vmatmul.mubr.msk.f32.gmra.mrb[106].mxu0 %vm910_vm1, %v9496_v36 }
 0x608   :  { %8431 = vmatprep.mubr.msk.f32.mxu0 %vm910_vm1, %v9497_v49 }
 0x60b   :  { %8432 = vmatmul.mubr.msk.f32.gmra.mrb[108].mxu0 %vm910_vm1, %v9498_v0 }
 0x60c   :  { %8434 = vmatprep.mubr.msk.f32.mxu0 %vm910_vm1, %v9499_v38 }
 0x60f   :  { %8435 = vmatmul.mubr.msk.f32.gmra.mrb[110].mxu0 %vm910_vm1, %v9500_v12 }
 0x67a   :  { %v8153_v39 = vpop.f32.mrb[76].mxu0  ;;  %v8191_v10 = vpop.f32.mrb[64].mxu1 }
 0x67b   :  { %v8154_v31 = vpop.f32.mrb[77].mxu0  ;;  %v8192_v42 = vpop.f32.mrb[65].mxu1 }
 0x67c   :  { %v8155_v23 = vadd.f32 %v8154_v31, %v8153_v39  ;;  %v8193_v56 = vadd.f32 %v8192_v42, %v8191_v10 }
 0x67e   :  { %v4258_v47 = vadd.f32 %v8193_v56, %v12253_v52  ;;  %v12260_v28 = vadd.f32 %v8155_v23, %v7989_v15 }
 0x680   :  { %v4500_v61 = vrot.slane %v4258_v47, %v13852_v53  ;;  %v4493_v50 = vcombine.high %v4258_v47, %v4258_v47 }
 0x682   :  { %v4508_v33 = vcombine.high %v4500_v61, %v4500_v61  ;;  %v4516_v58 = vrot.slane %v4500_v61, %v13852_v53  ;;  %v4507_v51 = vrot.slane %v4493_v50, %v13852_v53 }
 0x684   :  { %v4594_v17 = vrot.slane %v4516_v58, %v13853_v7  ;;  %v4530_v35 = vrot.slane %v4508_v33, %v13852_v53  ;;  %v4538_v4 = vcombine.high %v4516_v58, %v4516_v58  ;;  %v4523_v55 = vrot.slane %v4507_v51, %v13852_v53 }
 0x685   :  { %v4509_v38 = vcombine.high %v4507_v51, %v4507_v51 }
 0x686   :  { %v4671_v22 = vadd.f32 %v4594_v17, %v12260_v28  ;;  %v4598_v45 = vrot.slane %v4530_v35, %v13853_v7  ;;  %v4602_v26 = vrot.slane %v4538_v4, %v13853_v7  ;;  %v4540_v59 = vcombine.high %v4530_v35, %v4530_v35 }
 0x687   :  { %v4610_v43 = vrot.slane %v4523_v55, %v13853_v7  ;;  %v4537_v6 = vrot.slane %v4509_v38, %v13852_v53  ;;  %v4539_v47 = vcombine.high %v4523_v55, %v4523_v55 }
 0x688   :  { %v4673_v2 = vadd.f32 %v4598_v45, %v12260_v28  ;;  %v4675_v27 = vadd.f32 %v4602_v26, %v12260_v28  ;;  %v4606_v0 = vrot.slane %v4540_v59, %v13853_v7 }
 0x689   :  { %v4679_v58 = vadd.f32 %v4610_v43, %v12260_v28 }
 0x68a   :  { %v4677_v18 = vadd.f32 %v4606_v0, %v12260_v28 }
 0x6a2   :  { %v8156_v60 = vpop.f32.mrb[78].mxu0  ;;  %v8194_v40 = vpop.f32.mrb[66].mxu1 }
 0x6a3   :  { %v8157_v13 = vpop.f32.mrb[79].mxu0  ;;  %v8195_v1 = vpop.f32.mrb[67].mxu1 }
 0x6a4   :  { %v8158_v24 = vadd.f32 %v8157_v13, %v8156_v60  ;;  %v8196_v41 = vadd.f32 %v8195_v1, %v8194_v40 }
 0x6a6   :  { %v12262_v34 = vadd.f32 %v8158_v24, %v7989_v15  ;;  %v8391_v25 = vpop.f32.mrb[80].mxu0  ;;  %v12280_v61 = vadd.f32 %v8196_v41, %v12253_v52  ;;  %v4614_v15 = vrot.slane %v4537_v6, %v13853_v7  ;;  %v4618_v52 = vrot.slane %v4539_v47, %v13853_v7 }
 0x6a7   :  { %v4332_v14 = vpop.f32.mrb[81].mxu0 }
 0x6a8   :  { %v4672_v54 = vadd.f32 %v4594_v17, %v12262_v34  ;;  %v4703_v9 = vadd.f32 %v4671_v22, %v4332_v14  ;;  %v4674_v5 = vadd.f32 %v4598_v45, %v12262_v34  ;;  %v4676_v32 = vadd.f32 %v4602_v26, %v12262_v34 }
 0x6a9   :  { %v4678_v11 = vadd.f32 %v4606_v0, %v12262_v34  ;;  %v4680_v33 = vadd.f32 %v4610_v43, %v12262_v34  ;;  %v4549_v41 = vrot.slane %v12280_v61, %v13852_v53  ;;  %v4682_v4 = vadd.f32 %v4614_v15, %v12262_v34 }
 0x6aa   :  { %v4704_v21 = vadd.f32 %v8391_v25, %v4672_v54  ;;  %v4767_v57 = vmul.f32 0.2, %v4703_v9  ;;  %v8394_v16 = vpop.f32.mrb[82].mxu0  ;;  %vm4735_vm0 = vcmp.gt.f32.partialorder %v4703_v9, 0.0  ;;  %v4681_v25 = vadd.f32 %v4614_v15, %v12260_v28 }
 0x6ab   :  { %v4706_v44 = vadd.f32 %v8394_v16, %v4674_v5  ;;  %v4342_v8 = vpop.f32.mrb[83].mxu0  ;;  %v4541_v22 = vcombine.high %v4537_v6, %v4537_v6  ;;  %v4684_v16 = vadd.f32 %v4618_v52, %v12262_v34 }
 0x6ac   :  { %vm4736_vm11 = vcmp.gt.f32.partialorder %v4704_v21, 0.0  ;;  %v4768_v36 = vmul.f32 0.2, %v4704_v21  ;;  %v4705_v49 = vadd.f32 %v4673_v2, %v4342_v8  ;;  %v4799_v29 = vsel %vm4735_vm0, %v4703_v9, %v4767_v57 }
 0x6ad   :  { %8469 = vmatprep.mubr.f32.mxu1 %v4799_v29  ;;  %v4770_v63 = vmul.f32 0.2, %v4706_v44  ;;  %vm4738_vm13 = vcmp.gt.f32.partialorder %v4706_v44, 0.0  ;;  %v4557_v57 = vcombine.high %v4549_v41, %v4549_v41  ;;  %v4622_v2 = vrot.slane %v4541_v22, %v13853_v7 }
 0x6ae   :  { %v4800_v37 = vsel %vm4736_vm11, %v4704_v21, %v4768_v36  ;;  %v4769_v30 = vmul.f32 0.2, %v4705_v49  ;;  %v8397_v12 = vpop.f32.mrb[84].mxu0  ;;  %vm4737_vm12 = vcmp.gt.f32.partialorder %v4705_v49, 0.0  ;;  %v4683_v21 = vadd.f32 %v4618_v52, %v12260_v28 }
 0x6af   :  { %v4708_v46 = vadd.f32 %v8397_v12, %v4676_v32  ;;  %v4352_v19 = vpop.f32.mrb[85].mxu0  ;;  %8470 = vmatmul.mubr.f32.vlgmr.msra.gmra.mrb[68].mxu1 %v4800_v37  ;;  %v4802_v10 = vsel %vm4738_vm13, %v4706_v44, %v4770_v63  ;;  %v4565_v44 = vrot.slane %v4549_v41, %v13852_v53  ;;  %v4686_v38 = vadd.f32 %v4622_v2, %v12262_v34 }
 0x6b0   :  { %v4707_v48 = vadd.f32 %v4675_v27, %v4352_v19  ;;  %v4801_v3 = vsel %vm4737_vm12, %v4705_v49, %v4769_v30  ;;  %v4685_v37 = vadd.f32 %v4622_v2, %v12260_v28  ;;  %v4579_v30 = vrot.slane %v4557_v57, %v13852_v53 }
 0x6b1   :  { %8472 = vmatprep.mubr.f32.mxu1 %v4801_v3  ;;  %v4772_v62 = vmul.f32 0.2, %v4708_v46  ;;  %vm4740_vm15 = vcmp.gt.f32.partialorder %v4708_v46, 0.0  ;;  %v4626_v63 = vrot.slane %v4565_v44, %v13853_v7 }
 0x6b2   :  { %v4771_v20 = vmul.f32 0.2, %v4707_v48  ;;  %v8400_v39 = vpop.f32.mrb[86].mxu0  ;;  %vm4739_vm14 = vcmp.gt.f32.partialorder %v4707_v48, 0.0  ;;  %v4589_v15 = vcombine.high %v4579_v30, %v4579_v30 }
 0x6b3   :  { %v4710_v31 = vadd.f32 %v8400_v39, %v4678_v11  ;;  %v4362_v42 = vpop.f32.mrb[87].mxu0  ;;  %8473 = vmatmul.mubr.f32.gmra.mrb[70].mxu1 %v4802_v10  ;;  %v4804_v35 = vsel %vm4740_vm15, %v4708_v46, %v4772_v62  ;;  %v4688_v62 = vadd.f32 %v4626_v63, %v12262_v34  ;;  %v4630_v39 = vrot.slane %v4579_v30, %v13853_v7 }
 0x6b4   :  { %v4709_v23 = vadd.f32 %v4677_v18, %v4362_v42  ;;  %v4803_v56 = vsel %vm4739_vm14, %v4707_v48, %v4771_v20  ;;  %v4542_v18 = vcombine.high %v12280_v61, %v12280_v61  ;;  %v4687_v20 = vadd.f32 %v4626_v63, %v12260_v28 }
 0x6b5   :  { %8475 = vmatprep.mubr.f32.mxu1 %v4803_v56  ;;  %v4774_v60 = vmul.f32 0.2, %v4710_v31  ;;  %vm4742_vm3 = vcmp.gt.f32.partialorder %v4710_v31, 0.0  ;;  %v4587_v10 = vcombine.high %v4565_v44, %v4565_v44  ;;  %v4638_v22 = vrot.slane %v4589_v15, %v13853_v7 }
 0x6b6   :  { %v4773_v40 = vmul.f32 0.2, %v4709_v23  ;;  %v8403_v17 = vpop.f32.mrb[88].mxu0  ;;  %vm4741_vm2 = vcmp.gt.f32.partialorder %v4709_v23, 0.0 }
 0x6b7   :  { %v4712_v50 = vadd.f32 %v8403_v17, %v4680_v33  ;;  %v4372_v13 = vpop.f32.mrb[89].mxu0  ;;  %8476 = vmatmul.mubr.f32.gmra.mrb[72].mxu1 %v4804_v35  ;;  %v4806_v54 = vsel %vm4742_vm3, %v4710_v31, %v4774_v60  ;;  %v4556_v60 = vrot.slane %v4542_v18, %v13852_v53  ;;  %v4689_v17 = vadd.f32 %v4630_v39, %v12260_v28 }
 0x6b8   :  { %v4711_v1 = vadd.f32 %v4679_v58, %v4372_v13  ;;  %v4805_v24 = vsel %vm4741_vm2, %v4709_v23, %v4773_v40  ;;  %v4690_v40 = vadd.f32 %v4630_v39, %v12262_v34  ;;  %v4634_v35 = vrot.slane %v4587_v10, %v13853_v7 }
 0x6b9   :  { %8478 = vmatprep.mubr.f32.mxu1 %v4805_v24  ;;  %v4776_v45 = vmul.f32 0.2, %v4712_v50  ;;  %vm4744_vm11 = vcmp.gt.f32.partialorder %v4712_v50, 0.0  ;;  %v4694_v44 = vadd.f32 %v4638_v22, %v12262_v34 }
 0x6ba   :  { %v4775_v51 = vmul.f32 0.2, %v4711_v1  ;;  %v8406_v14 = vpop.f32.mrb[90].mxu0  ;;  %vm4743_vm0 = vcmp.gt.f32.partialorder %v4711_v1, 0.0 }
 0x6bb   :  { %v4714_v9 = vadd.f32 %v8406_v14, %v4682_v4  ;;  %v4382_v5 = vpop.f32.mrb[91].mxu0  ;;  %8479 = vmatmul.mubr.f32.gmra.mrb[74].mxu1 %v4806_v54  ;;  %v4808_v49 = vsel %vm4744_vm11, %v4712_v50, %v4776_v45  ;;  %v4692_v45 = vadd.f32 %v4634_v35, %v12262_v34  ;;  %v4572_v14 = vrot.slane %v4556_v60, %v13852_v53 }
 0x6bc   :  { %v4713_v26 = vadd.f32 %v4681_v25, %v4382_v5  ;;  %v4807_v59 = vsel %vm4743_vm0, %v4711_v1, %v4775_v51  ;;  %v4691_v51 = vadd.f32 %v4634_v35, %v12260_v28  ;;  %v4558_v54 = vcombine.high %v4556_v60, %v4556_v60 }
 0x6bd   :  { %8481 = vmatprep.mubr.f32.mxu1 %v4807_v59  ;;  %v4778_v8 = vmul.f32 0.2, %v4714_v9  ;;  %vm4746_vm13 = vcmp.gt.f32.partialorder %v4714_v9, 0.0 }
 0x6be   :  { %v4777_v55 = vmul.f32 0.2, %v4713_v26  ;;  %v8409_v36 = vpop.f32.mrb[92].mxu0  ;;  %vm4745_vm12 = vcmp.gt.f32.partialorder %v4713_v26, 0.0 }
 0x6bf   :  { %v4716_v29 = vadd.f32 %v8409_v36, %v4684_v16  ;;  %v4392_v32 = vpop.f32.mrb[93].mxu0  ;;  %8482 = vmatmul.mubr.f32.gmra.mrb[76].mxu1 %v4808_v49  ;;  %v4810_v48 = vsel %vm4746_vm13, %v4714_v9, %v4778_v8  ;;  %v4693_v8 = vadd.f32 %v4638_v22, %v12260_v28  ;;  %v4586_v36 = vrot.slane %v4558_v54, %v13852_v53 }
 0x6c0   :  { %v4715_v27 = vadd.f32 %v4683_v21, %v4392_v32  ;;  %v4809_v0 = vsel %vm4745_vm12, %v4713_v26, %v4777_v55  ;;  %v4642_v55 = vrot.slane %v4572_v14, %v13853_v7 }
 0x6c1   :  { %8484 = vmatprep.mubr.f32.mxu1 %v4809_v0  ;;  %v4780_v12 = vmul.f32 0.2, %v4716_v29  ;;  %vm4748_vm15 = vcmp.gt.f32.partialorder %v4716_v29, 0.0 }
 0x6c2   :  { %v4779_v46 = vmul.f32 0.2, %v4715_v27  ;;  %v8412_v19 = vpop.f32.mrb[94].mxu0  ;;  %vm4747_vm14 = vcmp.gt.f32.partialorder %v4715_v27, 0.0  ;;  %v4696_v30 = vadd.f32 %v4642_v55, %v12262_v34 }
 0x6c3   :  { %v4718_v3 = vadd.f32 %v8412_v19, %v4686_v38  ;;  %v4402_v11 = vpop.f32.mrb[95].mxu0  ;;  %8485 = vmatmul.mubr.f32.gmra.mrb[78].mxu1 %v4810_v48  ;;  %v4812_v56 = vsel %vm4748_vm15, %v4716_v29, %v4780_v12  ;;  %v4695_v12 = vadd.f32 %v4642_v55, %v12260_v28  ;;  %v4588_v19 = vcombine.high %v4572_v14, %v4572_v14 }
 0x6c4   :  { %v4717_v43 = vadd.f32 %v4685_v37, %v4402_v11  ;;  %v4811_v6 = vsel %vm4747_vm14, %v4715_v27, %v4779_v46  ;;  %v4646_v46 = vrot.slane %v4586_v36, %v13853_v7 }
 0x6c5   :  { %8487 = vmatprep.mubr.f32.mxu1 %v4811_v6  ;;  %v4782_v31 = vmul.f32 0.2, %v4718_v3  ;;  %vm4750_vm3 = vcmp.gt.f32.partialorder %v4718_v3, 0.0 }
 0x6c6   :  { %v4781_v42 = vmul.f32 0.2, %v4717_v43  ;;  %v8415_v23 = vpop.f32.mrb[96].mxu0  ;;  %vm4749_vm2 = vcmp.gt.f32.partialorder %v4717_v43, 0.0  ;;  %v4698_v39 = vadd.f32 %v4646_v46, %v12262_v34  ;;  %v4697_v10 = vadd.f32 %v4646_v46, %v12260_v28  ;;  %v13857_v46 = vld [vmem:[#allocation85_spill] sm:$0xff] }
 0x6c7   :  { %v4720_v47 = vadd.f32 %v8415_v23, %v4688_v62  ;;  %v4412_v33 = vpop.f32.mrb[97].mxu0  ;;  %8488 = vmatmul.mubr.f32.gmra.mrb[80].mxu1 %v4812_v56  ;;  %v4814_v24 = vsel %vm4750_vm3, %v4718_v3, %v4782_v31  ;;  %v4650_v31 = vrot.slane %v4588_v19, %v13853_v7 }
 0x6c8   :  { %v4719_v61 = vadd.f32 %v4687_v20, %v4412_v33  ;;  %v4813_v58 = vsel %vm4749_vm2, %v4717_v43, %v4781_v42  ;;  %v4590_v42 = vcombine.high %v4586_v36, %v4586_v36  ;;  %v13854_v36 = vld [vmem:[#allocation90_spill] sm:$0xff] }
 0x6c9   :  { %8490 = vmatprep.mubr.f32.mxu1 %v4813_v58  ;;  %v4784_v50 = vmul.f32 0.2, %v4720_v47  ;;  %vm4752_vm11 = vcmp.gt.f32.partialorder %v4720_v47, 0.0 }
 0x6ca   :  { %v4783_v13 = vmul.f32 0.2, %v4719_v61  ;;  %v8418_v1 = vpop.f32.mrb[98].mxu0  ;;  %vm4751_vm0 = vcmp.gt.f32.partialorder %v4719_v61, 0.0  ;;  %v4654_v35 = vrot.slane %v4590_v42, %v13853_v7 }
 0x6cb   :  { %v4722_v52 = vadd.f32 %v8418_v1, %v4690_v40  ;;  %v4422_v41 = vpop.f32.mrb[99].mxu0  ;;  %8491 = vmatmul.mubr.f32.gmra.mrb[82].mxu1 %v4814_v24  ;;  %v4816_v59 = vsel %vm4752_vm11, %v4720_v47, %v4784_v50  ;;  %v4700_v40 = vadd.f32 %v4650_v31, %v12262_v34 }
 0x6cc   :  { %v4721_v4 = vadd.f32 %v4689_v17, %v4422_v41  ;;  %v4815_v25 = vsel %vm4751_vm0, %v4719_v61, %v4783_v13  ;;  %v4699_v17 = vadd.f32 %v4650_v31, %v12260_v28  ;;  %v4702_v22 = vadd.f32 %v4654_v35, %v12262_v34 }
 0x6cd   :  { %8493 = vmatprep.mubr.f32.mxu1 %v4815_v25  ;;  %v4786_v9 = vmul.f32 0.2, %v4722_v52  ;;  %vm4754_vm13 = vcmp.gt.f32.partialorder %v4722_v52, 0.0 }
 0x6ce   :  { %v4785_v5 = vmul.f32 0.2, %v4721_v4  ;;  %v8421_v26 = vpop.f32.mrb[100].mxu0  ;;  %vm4753_vm12 = vcmp.gt.f32.partialorder %v4721_v4, 0.0 }
 0x6cf   :  { %v4724_v21 = vadd.f32 %v8421_v26, %v4692_v45  ;;  %v4432_v57 = vpop.f32.mrb[101].mxu0  ;;  %8494 = vmatmul.mubr.f32.gmra.mrb[84].mxu1 %v4816_v59  ;;  %v4818_v27 = vsel %vm4754_vm13, %v4722_v52, %v4786_v9  ;;  %v4701_v45 = vadd.f32 %v4654_v35, %v12260_v28 }
 0x6d0   :  { %v4723_v16 = vadd.f32 %v4691_v51, %v4432_v57  ;;  %v4817_v2 = vsel %vm4753_vm12, %v4721_v4, %v4785_v5 }
 0x6d1   :  { %8496 = vmatprep.mubr.f32.mxu1 %v4817_v2  ;;  %v4788_v49 = vmul.f32 0.2, %v4724_v21  ;;  %vm4756_vm15 = vcmp.gt.f32.partialorder %v4724_v21, 0.0 }
 0x6d2   :  { %v4787_v29 = vmul.f32 0.2, %v4723_v16  ;;  %v8424_v32 = vpop.f32.mrb[102].mxu0  ;;  %vm4755_vm14 = vcmp.gt.f32.partialorder %v4723_v16, 0.0 }
 0x6d3   :  { %v4726_v0 = vadd.f32 %v8424_v32, %v4694_v44  ;;  %v4442_v38 = vpop.f32.mrb[103].mxu0  ;;  %8497 = vmatmul.mubr.f32.gmra.mrb[86].mxu1 %v4818_v27  ;;  %v4820_v18 = vsel %vm4756_vm15, %v4724_v21, %v4788_v49  ;;  %v13855_v32 = vld [vmem:[#allocation89_spill] sm:$0xff] }
 0x6d4   :  { %v4725_v37 = vadd.f32 %v4693_v8, %v4442_v38  ;;  %v4819_v63 = vsel %vm4755_vm14, %v4723_v16, %v4787_v29 }
 0x6d5   :  { %8499 = vmatprep.mubr.f32.mxu1 %v4819_v63  ;;  %v4790_v48 = vmul.f32 0.2, %v4726_v0  ;;  %vm4758_vm3 = vcmp.gt.f32.partialorder %v4726_v0, 0.0 }
 0x6d6   :  { %v4789_v3 = vmul.f32 0.2, %v4725_v37  ;;  %v8427_v11 = vpop.f32.mrb[104].mxu0  ;;  %vm4757_vm2 = vcmp.gt.f32.partialorder %v4725_v37, 0.0 }
 0x6d7   :  { %v4728_v43 = vadd.f32 %v8427_v11, %v4696_v30  ;;  %v4452_v6 = vpop.f32.mrb[105].mxu0  ;;  %8500 = vmatmul.mubr.f32.gmra.mrb[88].mxu1 %v4820_v18  ;;  %v4822_v33 = vsel %vm4758_vm3, %v4726_v0, %v4790_v48  ;;  %v13858_v18 = vld [vmem:[#allocation88_spill] sm:$0xff] }
 0x6d8   :  { %v4727_v62 = vadd.f32 %v4695_v12, %v4452_v6  ;;  %v4821_v20 = vsel %vm4757_vm2, %v4725_v37, %v4789_v3  ;;  %v13856_v37 = vld [vmem:[#allocation87_spill] sm:$0xff] }
 0x6d9   :  { %8502 = vmatprep.mubr.f32.mxu1 %v4821_v20  ;;  %v4792_v23 = vmul.f32 0.2, %v4728_v43  ;;  %vm4760_vm11 = vcmp.gt.f32.partialorder %v4728_v43, 0.0 }
 0x6da   :  { %v4791_v56 = vmul.f32 0.2, %v4727_v62  ;;  %v8430_v47 = vpop.f32.mrb[106].mxu0  ;;  %vm4759_vm0 = vcmp.gt.f32.partialorder %v4727_v62, 0.0 }
 0x6db   :  { %v4730_v61 = vadd.f32 %v8430_v47, %v4698_v39  ;;  %v4462_v58 = vpop.f32.mrb[107].mxu0  ;;  %8503 = vmatmul.mubr.f32.gmra.mrb[90].mxu1 %v4822_v33  ;;  %v4824_v24 = vsel %vm4760_vm11, %v4728_v43, %v4792_v23  ;;  %v13859_v39 = vld [vmem:[#allocation86_spill] sm:$0xff]  ;;  %v13860_v47 = vld [vmem:[#allocation92_spill] sm:$0xff] }
 0x6dc   :  { %v4729_v15 = vadd.f32 %v4697_v10, %v4462_v58  ;;  %v4823_v60 = vsel %vm4759_vm0, %v4727_v62, %v4791_v56  ;;  %vm5779_vm0 = vcmask 261120  }
 0x6dd   :  { %8505 = vmatprep.mubr.f32.mxu1 %v4823_v60  ;;  %v4794_v50 = vmul.f32 0.2, %v4730_v61  ;;  %vm4762_vm13 = vcmp.gt.f32.partialorder %v4730_v61, 0.0 }
 0x6de   :  { %v4793_v13 = vmul.f32 0.2, %v4729_v15  ;;  %v8433_v1 = vpop.f32.mrb[108].mxu0  ;;  %vm4761_vm12 = vcmp.gt.f32.partialorder %v4729_v15, 0.0 }
 0x6df   :  { %v4732_v52 = vadd.f32 %v8433_v1, %v4700_v40  ;;  %v4472_v41 = vpop.f32.mrb[109].mxu0  ;;  %8506 = vmatmul.mubr.f32.gmra.mrb[92].mxu1 %v4824_v24  ;;  %v4826_v9 = vsel %vm4762_vm13, %v4730_v61, %v4794_v50  ;;  %v13861_v40 = vld [vmem:[#allocation91_spill] sm:$0xff] }
 0x6e0   :  { %v4731_v4 = vadd.f32 %v4699_v17, %v4472_v41  ;;  %v4825_v25 = vsel %vm4761_vm12, %v4729_v15, %v4793_v13 }
 0x6e1   :  { %8508 = vmatprep.mubr.f32.mxu1 %v4825_v25  ;;  %v4796_v51 = vmul.f32 0.2, %v4732_v52  ;;  %vm4764_vm15 = vcmp.gt.f32.partialorder %v4732_v52, 0.0 }
 0x6e2   :  { %v4795_v14 = vmul.f32 0.2, %v4731_v4  ;;  %v8436_v54 = vpop.f32.mrb[110].mxu0  ;;  %vm4763_vm14 = vcmp.gt.f32.partialorder %v4731_v4, 0.0 }
 0x6e3   :  { %v4734_v5 = vadd.f32 %v8436_v54, %v4702_v22  ;;  %v4482_v26 = vpop.f32.mrb[111].mxu0  ;;  %8509 = vmatmul.mubr.f32.gmra.mrb[94].mxu1 %v4826_v9  ;;  %v4828_v2 = vsel %vm4764_vm15, %v4732_v52, %v4796_v51  ;;  %v13862_v52 = vld [vmem:[#allocation94_spill] sm:$0xff]  ;;  %v13863_v54 = vld [vmem:[#allocation93_spill] sm:$0xff] }
 0x6e4   :  { %v4733_v59 = vadd.f32 %v4701_v45, %v4482_v26  ;;  %v4827_v21 = vsel %vm4763_vm14, %v4731_v4, %v4795_v14 }
 0x6e5   :  { %8511 = vmatprep.mubr.f32.mxu1 %v4827_v21  ;;  %v4798_v57 = vmul.f32 0.2, %v4734_v5  ;;  %vm4766_vm3 = vcmp.gt.f32.partialorder %v4734_v5, 0.0 }
 0x6e6   :  { %v4797_v16 = vmul.f32 0.2, %v4733_v59  ;;  %vm4765_vm2 = vcmp.gt.f32.partialorder %v4733_v59, 0.0 }
 0x6e7   :  { %8512 = vmatmul.mubr.f32.gmra.mrb[96].mxu1 %v4828_v2  ;;  %v4830_v8 = vsel %vm4766_vm3, %v4734_v5, %v4798_v57 }
 0x6e8   :  { %v4829_v44 = vsel %vm4765_vm2, %v4733_v59, %v4797_v16 }
 0x6e9   :  { %8514 = vmatprep.mubr.f32.mxu1 %v4829_v44  ;;  %v13864_v44 = vld [vmem:[#allocation96_spill] sm:$0xff] }
 0x6eb   :  { %8515 = vmatmul.mubr.f32.gmra.mrb[98].mxu1 %v4830_v8 }
 0x782   :  { %v8471_v55 = vpop.f32.mrb[68].mxu1 }
 0x783   :  { %v5057_v49 = vadd.f32 %v8471_v55, %v13854_v36  ;;  %v4897_v29 = vpop.f32.mrb[69].mxu1 }
 0x784   :  { %v5056_v27 = vadd.f32 %v4897_v29, %v13855_v32 }
 0x786   :  { %v5088_v0 = vmax.f32 %v5056_v27, %v5057_v49  ;;  %v8474_v38 = vpop.f32.mrb[70].mxu1 }
 0x787   :  { %v5059_v63 = vadd.f32 %v8474_v38, %v13856_v37  ;;  %v4907_v30 = vpop.f32.mrb[71].mxu1 }
 0x788   :  { %v5089_v12 = vrot.slane %v5088_v0, 4  ;;  %v5058_v19 = vadd.f32 %v4907_v30, %v13857_v46  ;;  %v13865_v30 = vld [vmem:[#allocation95_spill] sm:$0xff] }
 0x78a   :  { %v5090_v48 = vmax.f32 %v5088_v0, %v5089_v12  ;;  %v5095_v3 = vmax.f32 %v5058_v19, %v5059_v63  ;;  %v8477_v11 = vpop.f32.mrb[72].mxu1 }
 0x78b   :  { %v12331_v43 = vadd.f32 %v8477_v11, %v13858_v18  ;;  %v4917_v6 = vpop.f32.mrb[73].mxu1 }
 0x78c   :  { %v5091_v62 = vrot.slane %v5090_v48, 2  ;;  %v5096_v20 = vrot.slane %v5095_v3, 4  ;;  %v5060_v10 = vadd.f32 %v4917_v6, %v13859_v39 }
 0x78e   :  { %v5092_v31 = vmax.f32 %v5090_v48, %v5091_v62  ;;  %v5097_v42 = vmax.f32 %v5095_v3, %v5096_v20  ;;  %v5102_v23 = vmax.f32 %v5060_v10, %v12331_v43  ;;  %v8480_v56 = vpop.f32.mrb[74].mxu1 }
 0x78f   :  { %v12336_v33 = vadd.f32 %v8480_v56, %v13860_v47  ;;  %v4927_v61 = vpop.f32.mrb[75].mxu1 }
 0x790   :  { %v5093_v58 = vrot.slane %v5092_v31, 1  ;;  %v5098_v15 = vrot.slane %v5097_v42, 2  ;;  %v5103_v60 = vrot.slane %v5102_v23, 4  ;;  %v12339_v17 = vadd.f32 %v4927_v61, %v13861_v40  ;;  %v13867_v61 = vld [vmem:[#allocation97_spill] sm:$0xff]  ;;  %v13896_v40 = vld [vmem:[#allocation114_spill] sm:$0xff] }
 0x792   :  { %v5094_v35 = vmax.f32 %v5092_v31, %v5093_v58  ;;  %v5099_v50 = vmax.f32 %v5097_v42, %v5098_v15  ;;  %v5104_v13 = vmax.f32 %v5102_v23, %v5103_v60  ;;  %v5109_v1 = vmax.f32 %v12339_v17, %v12336_v33  ;;  %v8483_v24 = vpop.f32.mrb[76].mxu1  ;;  %v13866_v42 = vld [vmem:[#allocation98_spill] sm:$0xff]  ;;  %v3989_v15 = vld [vmem:[#allocation32] sm:$0xff]  ;;  %v3990_v60 = vld [vmem:[#allocation32 + $0x8] sm:$0xff] }
 0x793   :  { %v12344_v41 = vadd.f32 %v8483_v24, %v13862_v52  ;;  %v4937_v4 = vpop.f32.mrb[77].mxu1  ;;  %v3992_v24 = vld [vmem:[#allocation32 + $0x18] sm:$0xff] }
 0x794   :  { %v5200_v25 = vsub.f32 %v5056_v27, %v5094_v35  ;;  %v5201_v22 = vsub.f32 %v5057_v49, %v5094_v35  ;;  %v5100_v45 = vrot.slane %v5099_v50, 1  ;;  %v5105_v51 = vrot.slane %v5104_v13, 2 }
 0x795   :  { %v5110_v14 = vrot.slane %v5109_v1, 4  ;;  %v12347_v9 = vadd.f32 %v4937_v4, %v13863_v54 }
 0x796   :  { %v5232_v5 = vmul.f32 1.442695, %v5200_v25  ;;  %v5234_v26 = vmul.f32 1.442695, %v5201_v22  ;;  %v5101_v59 = vmax.f32 %v5099_v50, %v5100_v45  ;;  %v5106_v21 = vmax.f32 %v5104_v13, %v5105_v51  ;;  %v8486_v57 = vpop.f32.mrb[78].mxu1 }
 0x797   :  { %v5111_v16 = vmax.f32 %v5109_v1, %v5110_v14  ;;  %v5116_v2 = vmax.f32 %v12347_v9, %v12344_v41  ;;  %v12352_v8 = vadd.f32 %v8486_v57, %v13864_v44  ;;  %v4947_v55 = vpop.f32.mrb[79].mxu1  ;;  %v3991_v1 = vld [vmem:[#allocation32 + $0x10] sm:$0xff]  ;;  %v3994_v57 = vld [vmem:[#allocation32 + $0x28] sm:$0xff] }
 0x798   :  { %9234 = vpow2.f32 %v5232_v5  ;;  %v5202_v49 = vsub.f32 %v5058_v19, %v5101_v59  ;;  %v5203_v29 = vsub.f32 %v5059_v63, %v5101_v59  ;;  %v5107_v27 = vrot.slane %v5106_v21, 1  ;;  %v13868_v5 = vld [vmem:[#allocation100_spill] sm:$0xff] }
 0x799   :  { %9236 = vpow2.f32 %v5234_v26  ;;  %v5112_v0 = vrot.slane %v5111_v16, 2  ;;  %v5117_v38 = vrot.slane %v5116_v2, 4  ;;  %v12355_v12 = vadd.f32 %v4947_v55, %v13865_v30 }
 0x79a   :  { %v5236_v48 = vmul.f32 1.442695, %v5202_v49  ;;  %v5238_v3 = vmul.f32 1.442695, %v5203_v29  ;;  %v5108_v11 = vmax.f32 %v5106_v21, %v5107_v27  ;;  %v8489_v6 = vpop.f32.mrb[80].mxu1  ;;  %v3993_v21 = vld [vmem:[#allocation32 + $0x20] sm:$0xff]  ;;  %v8874_v49 = vpack.c.bf16 %v3992_v24, %v3991_v1 }
 0x79b   :  { %v5113_v62 = vmax.f32 %v5111_v16, %v5112_v0  ;;  %v5118_v20 = vmax.f32 %v5116_v2, %v5117_v38  ;;  %v5123_v31 = vmax.f32 %v12355_v12, %v12352_v8  ;;  %v12360_v23 = vadd.f32 %v8489_v6, %v13866_v42  ;;  %v4957_v63 = vpop.f32.mrb[81].mxu1  ;;  %v13869_v2 = vld [vmem:[#allocation99_spill] sm:$0xff] }
 0x79c   :  { %9238 = vpow2.f32 %v5236_v48  ;;  %v5204_v19 = vsub.f32 %v5060_v10, %v5108_v11  ;;  %v5205_v56 = vsub.f32 %v12331_v43, %v5108_v11  ;;  %v12364_v58 = vadd.f32 %v4957_v63, %v13867_v61  ;;  %v13890_v61 = vld [vmem:[#allocation110_spill] sm:$0xff] }
 0x79d   :  { %9240 = vpow2.f32 %v5238_v3  ;;  %v5114_v35 = vrot.slane %v5113_v62, 1  ;;  %v5119_v50 = vrot.slane %v5118_v20, 2  ;;  %v5124_v13 = vrot.slane %v5123_v31, 4 }
 0x79e   :  { %v5240_v4 = vmul.f32 1.442695, %v5204_v19  ;;  %v5242_v25 = vmul.f32 1.442695, %v5205_v56  ;;  %v5130_v22 = vmax.f32 %v12364_v58, %v12360_v23  ;;  %v8492_v45 = vpop.f32.mrb[82].mxu1  ;;  %v8870_v10 = vpack.c.bf16 %v3990_v60, %v3989_v15 }
 0x79f   :  { %v5115_v51 = vmax.f32 %v5113_v62, %v5114_v35  ;;  %v5120_v43 = vmax.f32 %v5118_v20, %v5119_v50  ;;  %v5125_v14 = vmax.f32 %v5123_v31, %v5124_v13  ;;  %v12369_v26 = vadd.f32 %v8492_v45, %v13868_v5  ;;  %v4967_v59 = vpop.f32.mrb[83].mxu1  ;;  %v13870_v31 = vld [vmem:[#allocation126_spill] sm:$0xff]  ;;  %v13883_v5 = vld [vmem:[#allocation105_spill] sm:$0xff] }
 0x7a0   :  { %9242 = vpow2.f32 %v5240_v4  ;;  %v5131_v16 = vrot.slane %v5130_v22, 4  ;;  %v12372_v55 = vadd.f32 %v4967_v59, %v13869_v2  ;;  %8871 = vmatprep.subr.bf16.mxu0 %v8870_v10  ;;  %v8878_v62 = vpack.c.bf16 %v3994_v57, %v3993_v21 }
 0x7a1   :  { %9244 = vpow2.f32 %v5242_v25  ;;  %v5206_v29 = vsub.f32 %v12339_v17, %v5115_v51  ;;  %v5207_v27 = vsub.f32 %v12336_v33, %v5115_v51  ;;  %v5121_v0 = vrot.slane %v5120_v43, 1  ;;  %8873 = vmatpush3.bf16.msra.mxu0 %v8870_v10  ;;  %v13871_v33 = vld [vmem:[#allocation127_spill] sm:$0xff] }
 0x7a2   :  { %v9235_v38 = vpop.eup %9234  ;;  %v5126_v48 = vrot.slane %v5125_v14, 2  ;;  %v5132_v3 = vmax.f32 %v5130_v22, %v5131_v16  ;;  %v5137_v11 = vmax.f32 %v12372_v55, %v12369_v26  ;;  %v12378_v6 = vpop.f32.mrb[84].mxu1  ;;  %8875 = vmatprep.subr.bf16.mxu0 %v8874_v49 }
 0x7a3   :  { %v9237_v20 = vpop.eup %9236  ;;  %v5296_v63 = vmul.f32 %v9235_v38, %v13870_v31  ;;  %v5244_v19 = vmul.f32 1.442695, %v5206_v29  ;;  %v5246_v56 = vmul.f32 1.442695, %v5207_v27  ;;  %v5122_v17 = vmax.f32 %v5120_v43, %v5121_v0  ;;  %v12381_v15 = vpop.f32.mrb[85].mxu1 }
 0x7a4   :  { %v5297_v60 = vmul.f32 %v9237_v20, %v13871_v33  ;;  %v5127_v35 = vmax.f32 %v5125_v14, %v5126_v48  ;;  %v5133_v50 = vrot.slane %v5132_v3, 2  ;;  %v5138_v13 = vrot.slane %v5137_v11, 4  ;;  %v13872_v14 = vld [vmem:[#allocation121_spill] sm:$0xff] }
 0x7a5   :  { %v5472_v1 = vmul.f32 %v5296_v63, %v12260_v28  ;;  %9246 = vpow2.f32 %v5244_v19  ;;  %v5208_v24 = vsub.f32 %v12347_v9, %v5122_v17  ;;  %v5209_v4 = vsub.f32 %v12344_v41, %v5122_v17  ;;  %8877 = vmatpush3.bf16.msra.mxu0 %v8874_v49  ;;  %v13873_v49 = vld [vmem:[#allocation122_spill] sm:$0xff] }
 0x7a6   :  { %v9239_v25 = vpop.eup %9238  ;;  %v5328_v22 = vadd.f32 %v5297_v60, %v5296_v63  ;;  %v5473_v45 = vmul.f32 %v5297_v60, %v12262_v34  ;;  %9248 = vpow2.f32 %v5246_v56  ;;  %v5128_v10 = vrot.slane %v5127_v35, 1  ;;  %v12388_v51 = vpop.f32.mrb[86].mxu1  ;;  %8879 = vmatprep.subr.bf16.mxu0 %v8878_v62 }
 0x7a7   :  { %v9241_v43 = vpop.eup %9240  ;;  %v5298_v59 = vmul.f32 %v9239_v25, %v13872_v14  ;;  %v5248_v21 = vmul.f32 1.442695, %v5208_v24  ;;  %v5250_v57 = vmul.f32 1.442695, %v5209_v4  ;;  %v5134_v16 = vmax.f32 %v5132_v3, %v5133_v50  ;;  %v12391_v29 = vpop.f32.mrb[87].mxu1 }
 0x7a8   :  { %v5329_v9 = vrot.slane %v5328_v22, 4  ;;  %v5504_v41 = vadd.f32 %v5473_v45, %v5472_v1  ;;  %v5299_v27 = vmul.f32 %v9241_v43, %v13873_v49  ;;  %v5129_v0 = vmax.f32 %v5127_v35, %v5128_v10  ;;  %v13874_v1 = vld [vmem:[#allocation123_spill] sm:$0xff]  ;;  %v13875_v45 = vld [vmem:[#allocation124_spill] sm:$0xff] }
 0x7a9   :  { %v5474_v38 = vmul.f32 %v5298_v59, %v12260_v28  ;;  %9250 = vpow2.f32 %v5248_v21  ;;  %v5135_v48 = vrot.slane %v5134_v16, 1  ;;  %v12395_v20 = vmax.f32 %v5137_v11, %v5138_v13  ;;  %8881 = vmatpush3.bf16.msra.mxu0 %v8878_v62 }
 0x7aa   :  { %v9243_v63 = vpop.eup %9242  ;;  %v5330_v19 = vadd.f32 %v5329_v9, %v5328_v22  ;;  %v5505_v56 = vrot.slane %v5504_v41, 4  ;;  %v5335_v17 = vadd.f32 %v5299_v27, %v5298_v59  ;;  %v5475_v3 = vmul.f32 %v5299_v27, %v12262_v34  ;;  %v12398_v60 = vpop.f32.mrb[88].mxu1 }
 0x7ab   :  { %v9245_v50 = vpop.eup %9244  ;;  %v5300_v24 = vmul.f32 %v9243_v63, %v13874_v1  ;;  %9252 = vpow2.f32 %v5250_v57  ;;  %v5210_v35 = vsub.f32 %v12355_v12, %v5129_v0  ;;  %v5211_v4 = vsub.f32 %v12352_v8, %v5129_v0  ;;  %v12403_v25 = vpop.f32.mrb[89].mxu1 }
 0x7ac   :  { %v5331_v11 = vrot.slane %v5330_v19, 2  ;;  %v5506_v62 = vadd.f32 %v5505_v56, %v5504_v41  ;;  %v5336_v13 = vrot.slane %v5335_v17, 4  ;;  %v5511_v22 = vadd.f32 %v5475_v3, %v5474_v38 }
 0x7ad   :  { %v5301_v10 = vmul.f32 %v9245_v50, %v13875_v45  ;;  %v5476_v43 = vmul.f32 %v5300_v24, %v12260_v28  ;;  %v5252_v59 = vmul.f32 1.442695, %v5210_v35  ;;  %v5254_v21 = vmul.f32 1.442695, %v5211_v4  ;;  %v13877_v45 = vld [vmem:[#allocation136_spill] sm:$0xff] }
 0x7ae   :  { %v5332_v9 = vadd.f32 %v5331_v11, %v5330_v19  ;;  %v5507_v27 = vrot.slane %v5506_v62, 2  ;;  %v5337_v63 = vadd.f32 %v5336_v13, %v5335_v17  ;;  %v5512_v57 = vrot.slane %v5511_v22, 4  ;;  %v12407_v1 = vpop.f32.mrb[90].mxu1  ;;  %v13876_v11 = vld [vmem:[#allocation134_spill] sm:$0xff] }
 0x7af   :  { %v9247_v12 = vpop.eup %9246  ;;  %v5342_v8 = vadd.f32 %v5301_v10, %v5300_v24  ;;  %v5477_v0 = vmul.f32 %v5301_v10, %v12262_v34  ;;  %9254 = vpow2.f32 %v5252_v59  ;;  %v12410_v41 = vmax.f32 %v5134_v16, %v5135_v48  ;;  %v12412_v38 = vpop.f32.mrb[91].mxu1 }
 0x7b0   :  { %v9249_v56 = vpop.eup %9248  ;;  %v5333_v3 = vrot.slane %v5332_v9, 1  ;;  %v12414_v50 = vadd.f32 %v5507_v27, %v5506_v62  ;;  %v5338_v35 = vrot.slane %v5337_v63, 2  ;;  %v5513_v19 = vadd.f32 %v5512_v57, %v5511_v22 }
 0x7b1   :  { %v5343_v4 = vrot.slane %v5342_v8, 4  ;;  %v5518_v17 = vadd.f32 %v5477_v0, %v5476_v43  ;;  %v5302_v13 = vmul.f32 %v9247_v12, %v13876_v11  ;;  %v5303_v49 = vmul.f32 %v9249_v56, %v13877_v45  ;;  %v13878_v56 = vld [vmem:[#allocation138_spill] sm:$0xff] }
 0x7b2   :  { %v5334_v24 = vadd.f32 %v5333_v3, %v5332_v9  ;;  %v5339_v14 = vadd.f32 %v5338_v35, %v5337_v63  ;;  %v5514_v10 = vrot.slane %v5513_v19, 2  ;;  %9256 = vpow2.f32 %v5254_v21  ;;  %v12418_v16 = vpop.f32.mrb[92].mxu1 }
 0x7b3   :  { %v9251_v48 = vpop.eup %9250  ;;  %v5344_v59 = vadd.f32 %v5343_v4, %v5342_v8  ;;  %v5519_v33 = vrot.slane %v5518_v17, 4  ;;  %v5349_v31 = vadd.f32 %v5303_v49, %v5302_v13  ;;  %v5478_v62 = vmul.f32 %v5302_v13, %v12260_v28  ;;  %v12421_v27 = vpop.f32.mrb[93].mxu1  ;;  %v13879_v4 = vld [vmem:[#allocation139_spill] sm:$0xff] }
 0x7b4   :  { %v5440_v22 = vmax.f32 %v5334_v24, 1e-20  ;;  %v5340_v43 = vrot.slane %v5339_v14, 1  ;;  %v12423_v57 = vadd.f32 %v5514_v10, %v5513_v19  ;;  %v5479_v12 = vmul.f32 %v5303_v49, %v12262_v34 }
 0x7b5   :  { %v9253_v9 = vpop.eup %9252  ;;  %v5345_v63 = vrot.slane %v5344_v59, 2  ;;  %v12426_v0 = vadd.f32 %v5519_v33, %v5518_v17  ;;  %v5350_v21 = vrot.slane %v5349_v31, 4  ;;  %v5304_v3 = vmul.f32 %v9251_v48, %v13878_v56 }
 0x7b6   :  { %9258 = vrcp.f32 %v5440_v22  ;;  %v5341_v8 = vadd.f32 %v5340_v43, %v5339_v14  ;;  %v5525_v35 = vadd.f32 %v5479_v12, %v5478_v62  ;;  %v5305_v13 = vmul.f32 %v9253_v9, %v13879_v4  ;;  %v12430_v45 = vpop.f32.mrb[94].mxu1 }
 0x7b7   :  { %v5346_v24 = vadd.f32 %v5345_v63, %v5344_v59  ;;  %v5351_v10 = vadd.f32 %v5350_v21, %v5349_v31  ;;  %v5480_v49 = vmul.f32 %v5304_v3, %v12260_v28  ;;  %v12434_v11 = vpop.f32.mrb[95].mxu1  ;;  %v5212_v43 = vsub.f32 %v12364_v58, %v12410_v41 }
 0x7b8   :  { %v5441_v33 = vmax.f32 %v5341_v8, 1e-20  ;;  %v5526_v17 = vrot.slane %v5525_v35, 4  ;;  %v5356_v2 = vadd.f32 %v5305_v13, %v5304_v3  ;;  %v5481_v48 = vmul.f32 %v5305_v13, %v12262_v34  ;;  %v13880_v8 = vld [vmem:[#allocation143_spill] sm:$0xff] }
 0x7b9   :  { %v9255_v22 = vpop.eup %9254  ;;  %v5347_v14 = vrot.slane %v5346_v24, 1  ;;  %v5352_v62 = vrot.slane %v5351_v10, 2  ;;  %v5213_v59 = vsub.f32 %v12360_v23, %v12410_v41  ;;  %v5256_v19 = vmul.f32 1.442695, %v5212_v43 }
 0x7ba   :  { %9260 = vrcp.f32 %v5441_v33  ;;  %v12441_v31 = vadd.f32 %v5526_v17, %v5525_v35  ;;  %v5357_v12 = vrot.slane %v5356_v2, 4  ;;  %v12443_v9 = vadd.f32 %v5481_v48, %v5480_v49  ;;  %v12445_v63 = vpop.f32.mrb[96].mxu1  ;;  %v13881_v49 = vld [vmem:[#allocation146_spill] sm:$0xff] }
 0x7bb   :  { %v5348_v21 = vadd.f32 %v5347_v14, %v5346_v24  ;;  %v5353_v3 = vadd.f32 %v5352_v62, %v5351_v10  ;;  %v5306_v13 = vmul.f32 %v9255_v22, %v13880_v8  ;;  %v12448_v4 = vpop.f32.mrb[97].mxu1  ;;  %v5258_v23 = vmul.f32 1.442695, %v5213_v59  ;;  %v13882_v22 = vld [vmem:[#allocation106_spill] sm:$0xff] }
 0x7bc   :  { %v9257_v56 = vpop.eup %9256  ;;  %v5358_v58 = vadd.f32 %v5357_v12, %v5356_v2  ;;  %v5140_v41 = vrot.slane %v12395_v20, 2  ;;  %9262 = vpow2.f32 %v5256_v19  ;;  %v12457_v14 = vadd.f32 %v12378_v6, %v13882_v22 }
 0x7bd   :  { %v5442_v35 = vmax.f32 %v5348_v21, 1e-20  ;;  %v5354_v33 = vrot.slane %v5353_v3, 1  ;;  %v5307_v17 = vmul.f32 %v9257_v56, %v13881_v49  ;;  %v5482_v48 = vmul.f32 %v5306_v13, %v12260_v28 }
 0x7be   :  { %v5359_v24 = vrot.slane %v5358_v58, 2  ;;  %v5141_v10 = vmax.f32 %v12395_v20, %v5140_v41  ;;  %v12459_v2 = vpop.f32.mrb[98].mxu1  ;;  %v12468_v20 = vadd.f32 %v12381_v15, %v13883_v5  ;;  %v12508_v42 = vadd.f32 %v12418_v16, %v13890_v61  ;;  %v13893_v61 = vld [vmem:[#allocation151_spill] sm:$0xff] }
 0x7bf   :  { %9264 = vrcp.f32 %v5442_v35  ;;  %v5355_v62 = vadd.f32 %v5354_v33, %v5353_v3  ;;  %v5363_v43 = vadd.f32 %v5307_v17, %v5306_v13  ;;  %v5483_v59 = vmul.f32 %v5307_v17, %v12262_v34  ;;  %v12462_v12 = vpop.f32.mrb[99].mxu1  ;;  %v13884_v35 = vld [vmem:[#allocation102_spill] sm:$0xff] }
 0x7c0   :  { %v12464_v56 = vpop.eup %9258  ;;  %v5360_v21 = vadd.f32 %v5359_v24, %v5358_v58  ;;  %9266 = vpow2.f32 %v5258_v23  ;;  %v5142_v19 = vrot.slane %v5141_v10, 1  ;;  %v12474_v3 = vadd.f32 %v12388_v51, %v13884_v35  ;;  %v13885_v58 = vld [vmem:[#allocation101_spill] sm:$0xff]  ;;  %v13886_v24 = vld [vmem:[#allocation104_spill] sm:$0xff] }
 0x7c1   :  { %v5443_v6 = vmax.f32 %v5355_v62, 1e-20  ;;  %v5364_v41 = vrot.slane %v5363_v43, 4  ;;  %v12470_v49 = vadd.f32 %v5483_v59, %v5482_v48  ;;  %v5144_v17 = vmax.f32 %v12468_v20, %v12457_v14  ;;  %v13887_v48 = vld [vmem:[#allocation103_spill] sm:$0xff] }
 0x7c2   :  { %v5361_v13 = vrot.slane %v5360_v21, 1  ;;  %v5143_v33 = vmax.f32 %v5141_v10, %v5142_v19  ;;  %v12480_v23 = vadd.f32 %v12391_v29, %v13885_v58  ;;  %v12484_v62 = vadd.f32 %v12398_v60, %v13886_v24 }
 0x7c3   :  { %9268 = vrcp.f32 %v5443_v6  ;;  %v5365_v15 = vadd.f32 %v5364_v41, %v5363_v43  ;;  %v12488_v59 = vadd.f32 %v12403_v25, %v13887_v48  ;;  %v5145_v35 = vrot.slane %v5144_v17, 4  ;;  %v13888_v6 = vld [vmem:[#allocation108_spill] sm:$0xff] }
 0x7c4   :  { %v12490_v51 = vpop.eup %9260  ;;  %v5362_v10 = vadd.f32 %v5361_v13, %v5360_v21  ;;  %v5214_v19 = vsub.f32 %v12372_v55, %v5143_v33  ;;  %v5215_v8 = vsub.f32 %v12369_v26, %v5143_v33  ;;  %v5151_v43 = vmax.f32 %v12480_v23, %v12474_v3  ;;  %v13889_v26 = vld [vmem:[#allocation107_spill] sm:$0xff] }
 0x7c5   :  { %v5366_v29 = vrot.slane %v5365_v15, 2  ;;  %v5158_v60 = vmax.f32 %v12488_v59, %v12484_v62  ;;  %v12500_v41 = vadd.f32 %v12407_v1, %v13888_v6  ;;  %v5146_v21 = vmax.f32 %v5144_v17, %v5145_v35  ;;  %v13891_v1 = vld [vmem:[#allocation109_spill] sm:$0xff]  ;;  %v13892_v17 = vld [vmem:[#allocation150_spill] sm:$0xff] }
 0x7c6   :  { %v5444_v25 = vmax.f32 %v5362_v10, 1e-20  ;;  %v5260_v48 = vmul.f32 1.442695, %v5214_v19  ;;  %v5262_v24 = vmul.f32 1.442695, %v5215_v8  ;;  %v12504_v33 = vadd.f32 %v12412_v38, %v13889_v26  ;;  %v9263_v5 = vpop.eup %9262 }
 0x7c7   :  { %v5367_v13 = vadd.f32 %v5366_v29, %v5365_v15  ;;  %v5152_v55 = vrot.slane %v5151_v43, 4  ;;  %v5159_v58 = vrot.slane %v5158_v60, 4  ;;  %v5147_v22 = vrot.slane %v5146_v21, 2 }
 0x7c8   :  { %9270 = vrcp.f32 %v5444_v25  ;;  %v12512_v10 = vadd.f32 %v12421_v27, %v13891_v1  ;;  %v5308_v15 = vmul.f32 %v9263_v5, %v13892_v17  ;;  %v5165_v26 = vmax.f32 %v12504_v33, %v12500_v41 }
 0x7c9   :  { %v12514_v8 = vpop.eup %9264  ;;  %v5368_v35 = vrot.slane %v5367_v13, 1  ;;  %9272 = vpow2.f32 %v5260_v48  ;;  %v5153_v19 = vmax.f32 %v5151_v43, %v5152_v55  ;;  %v5148_v29 = vmax.f32 %v5146_v21, %v5147_v22 }
 0x7ca   :  { %v9267_v38 = vpop.eup %9266  ;;  %9274 = vpow2.f32 %v5262_v24  ;;  %v5160_v25 = vmax.f32 %v5158_v60, %v5159_v58  ;;  %v12525_v27 = vmul.f32 %v5308_v15, %v12260_v28  ;;  %v5166_v48 = vrot.slane %v5165_v26, 4  ;;  %v13894_v60 = vld [vmem:[#allocation112_spill] sm:$0xff] }
 0x7cb   :  { %v12519_v16 = vadd.f32 %v5368_v35, %v5367_v13  ;;  %v12522_v6 = vmul.f32 %v9267_v38, %v13893_v61  ;;  %v5154_v1 = vrot.slane %v5153_v19, 2  ;;  %v5149_v30 = vrot.slane %v5148_v29, 1  ;;  %v13895_v13 = vld [vmem:[#allocation111_spill] sm:$0xff] }
 0x7cc   :  { %v5161_v5 = vrot.slane %v5160_v25, 2  ;;  %v5172_v24 = vmax.f32 %v12512_v10, %v12508_v42  ;;  %v12534_v21 = vadd.f32 %v12430_v45, %v13894_v60  ;;  %v12538_v55 = vadd.f32 %v12434_v11, %v13895_v13 }
 0x7cd   :  { %v12529_v22 = vpop.eup %9268  ;;  %v5370_v58 = vadd.f32 %v12522_v6, %v5308_v15  ;;  %v5155_v43 = vmax.f32 %v5153_v19, %v5154_v1  ;;  %v5150_v35 = vmax.f32 %v5148_v29, %v5149_v30  ;;  %v5167_v61 = vmax.f32 %v5165_v26, %v5166_v48 }
 0x7ce   :  { %v5162_v38 = vmax.f32 %v5160_v25, %v5161_v5  ;;  %v5173_v17 = vrot.slane %v5172_v24, 4  ;;  %v5179_v52 = vmax.f32 %v12538_v55, %v12534_v21  ;;  %v12544_v1 = vadd.f32 %v12445_v63, %v13896_v40 }
 0x7cf   :  { %v5371_v44 = vrot.slane %v5370_v58, 4  ;;  %v5156_v54 = vrot.slane %v5155_v43, 1  ;;  %v5216_v45 = vsub.f32 %v12468_v20, %v5150_v35  ;;  %v5217_v15 = vsub.f32 %v12457_v14, %v5150_v35  ;;  %v13897_v35 = vld [vmem:[#allocation158_spill] sm:$0xff] }
 0x7d0   :  { %v5163_v19 = vrot.slane %v5162_v38, 1  ;;  %v5168_v11 = vrot.slane %v5167_v61, 2  ;;  %v5174_v29 = vmax.f32 %v5172_v24, %v5173_v17  ;;  %v5180_v26 = vrot.slane %v5179_v52, 4  ;;  %v13898_v24 = vld [vmem:[#allocation159_spill] sm:$0xff] }
 0x7d1   :  { %v5372_v13 = vadd.f32 %v5371_v44, %v5370_v58  ;;  %v5157_v30 = vmax.f32 %v5155_v43, %v5156_v54  ;;  %v5264_v5 = vmul.f32 1.442695, %v5216_v45  ;;  %v5266_v48 = vmul.f32 1.442695, %v5217_v15 }
 0x7d2   :  { %v12548_v25 = vpop.eup %9270  ;;  %v5164_v60 = vmax.f32 %v5162_v38, %v5163_v19  ;;  %v5169_v47 = vmax.f32 %v5167_v61, %v5168_v11  ;;  %v5175_v40 = vrot.slane %v5174_v29, 2  ;;  %v5181_v15 = vmax.f32 %v5179_v52, %v5180_v26  ;;  %v13901_v52 = vld [vmem:[#allocation117_spill] sm:$0xff] }
 0x7d3   :  { %v9273_v39 = vpop.eup %9272  ;;  %v5373_v18 = vrot.slane %v5372_v13, 2  ;;  %v5218_v63 = vsub.f32 %v12480_v23, %v5157_v30  ;;  %v5219_v20 = vsub.f32 %v12474_v3, %v5157_v30  ;;  %9276 = vpow2.f32 %v5264_v5 }
 0x7d4   :  { %v9275_v14 = vpop.eup %9274  ;;  %v12553_v46 = vmul.f32 %v9273_v39, %v13897_v35  ;;  %v5220_v54 = vsub.f32 %v12488_v59, %v5164_v60  ;;  %v5221_v44 = vsub.f32 %v12484_v62, %v5164_v60  ;;  %9278 = vpow2.f32 %v5266_v48  ;;  %v13899_v62 = vld [vmem:[#allocation113_spill] sm:$0xff]  ;;  %v13900_v60 = vld [vmem:[#allocation118_spill] sm:$0xff] }
 0x7d5   :  { %v12557_v17 = vadd.f32 %v5373_v18, %v5372_v13  ;;  %v12560_v61 = vmul.f32 %v9275_v14, %v13898_v24  ;;  %v5268_v58 = vmul.f32 1.442695, %v5218_v63  ;;  %v5270_v23 = vmul.f32 1.442695, %v5219_v20 }
 0x7d6   :  { %v5272_v43 = vmul.f32 1.442695, %v5220_v54  ;;  %v5274_v3 = vmul.f32 1.442695, %v5221_v44  ;;  %v5176_v38 = vmax.f32 %v5174_v29, %v5175_v40  ;;  %v5170_v45 = vrot.slane %v5169_v47, 1  ;;  %v3995_v54 = vld [vmem:[#allocation32 + $0x30] sm:$0xff] }
 0x7d7   :  { %v5377_v39 = vadd.f32 %v12560_v61, %v12553_v46  ;;  %9280 = vpow2.f32 %v5268_v58  ;;  %v12566_v18 = vadd.f32 %v12448_v4, %v13899_v62  ;;  %v12570_v13 = vadd.f32 %v12459_v2, %v13900_v60  ;;  %v3996_v44 = vld [vmem:[#allocation32 + $0x38] sm:$0xff] }
 0x7d8   :  { %9282 = vpow2.f32 %v5270_v23  ;;  %v5177_v59 = vrot.slane %v5176_v38, 1  ;;  %v5171_v11 = vmax.f32 %v5169_v47, %v5170_v45  ;;  %v5182_v40 = vrot.slane %v5181_v15, 2 }
 0x7d9   :  { %v5378_v19 = vrot.slane %v5377_v39, 4  ;;  %9284 = vpow2.f32 %v5272_v43  ;;  %v5186_v29 = vmax.f32 %v12566_v18, %v12544_v1  ;;  %v12576_v26 = vadd.f32 %v12462_v12, %v13901_v52  ;;  %v13907_v52 = vld [vmem:[#allocation167_spill] sm:$0xff] }
 0x7da   :  { %9286 = vpow2.f32 %v5274_v3  ;;  %v5178_v30 = vmax.f32 %v5176_v38, %v5177_v59  ;;  %v5222_v4 = vsub.f32 %v12504_v33, %v5171_v11  ;;  %v5223_v2 = vsub.f32 %v12500_v41, %v5171_v11 }
 0x7db   :  { %v12578_v5 = vadd.f32 %v5378_v19, %v5377_v39  ;;  %v5183_v48 = vmax.f32 %v5181_v15, %v5182_v40  ;;  %v5187_v20 = vrot.slane %v5186_v29, 4  ;;  %v5193_v14 = vmax.f32 %v12576_v26, %v12570_v13  ;;  %v13903_v19 = vld [vmem:[#allocation172_spill] sm:$0xff] }
 0x7dc   :  { %v5224_v63 = vsub.f32 %v12512_v10, %v5178_v30  ;;  %v5225_v47 = vsub.f32 %v12508_v42, %v5178_v30  ;;  %v5276_v58 = vmul.f32 1.442695, %v5222_v4  ;;  %v5278_v23 = vmul.f32 1.442695, %v5223_v2  ;;  %v13902_v10 = vld [vmem:[#allocation169_spill] sm:$0xff] }
 0x7dd   :  { %v5184_v43 = vrot.slane %v5183_v48, 1  ;;  %v9277_v3 = vpop.eup %9276  ;;  %v5188_v41 = vmax.f32 %v5186_v29, %v5187_v20  ;;  %v5194_v39 = vrot.slane %v5193_v14, 4  ;;  %v8882_v59 = vpack.c.bf16 %v3996_v44, %v3995_v54  ;;  %v13904_v54 = vld [vmem:[#allocation163_spill] sm:$0xff] }
 0x7de   :  { %v5280_v33 = vmul.f32 1.442695, %v5224_v63  ;;  %v5282_v38 = vmul.f32 1.442695, %v5225_v47  ;;  %v9279_v45 = vpop.eup %9278  ;;  %v5312_v15 = vmul.f32 %v9277_v3, %v13902_v10  ;;  %9288 = vpow2.f32 %v5276_v58 }
 0x7df   :  { %v5185_v42 = vmax.f32 %v5183_v48, %v5184_v43  ;;  %v5313_v11 = vmul.f32 %v9279_v45, %v13903_v19  ;;  %9290 = vpow2.f32 %v5278_v23  ;;  %v5189_v40 = vrot.slane %v5188_v41, 2  ;;  %8883 = vmatprep.subr.bf16.mxu0 %v8882_v59  ;;  %v13909_v19 = vld [vmem:[#allocation173_spill] sm:$0xff] }
 0x7e0   :  { %v12589_v30 = vmax.f32 %v5193_v14, %v5194_v39  ;;  %v5488_v2 = vmul.f32 %v5312_v15, %v12260_v28  ;;  %9292 = vpow2.f32 %v5280_v33  ;;  %8885 = vmatpush3.bf16.msra.mxu0 %v8882_v59  ;;  %v13905_v14 = vld [vmem:[#allocation164_spill] sm:$0xff] }
 0x7e1   :  { %v9281_v4 = vpop.eup %9280  ;;  %v5226_v63 = vsub.f32 %v12538_v55, %v5185_v42  ;;  %v5227_v29 = vsub.f32 %v12534_v21, %v5185_v42  ;;  %v5384_v20 = vadd.f32 %v5313_v11, %v5312_v15  ;;  %v5489_v48 = vmul.f32 %v5313_v11, %v12262_v34  ;;  %v13906_v42 = vld [vmem:[#allocation166_spill] sm:$0xff] }
 0x7e2   :  { %v9283_v47 = vpop.eup %9282  ;;  %v5314_v44 = vmul.f32 %v9281_v4, %v13904_v54  ;;  %9294 = vpow2.f32 %v5282_v38  ;;  %v5190_v39 = vmax.f32 %v5188_v41, %v5189_v40 }
 0x7e3   :  { %v9285_v58 = vpop.eup %9284  ;;  %v5315_v23 = vmul.f32 %v9283_v47, %v13905_v14  ;;  %v5284_v43 = vmul.f32 1.442695, %v5226_v63  ;;  %v5286_v3 = vmul.f32 1.442695, %v5227_v29  ;;  %v5385_v45 = vrot.slane %v5384_v20, 4 }
 0x7e4   :  { %v9287_v33 = vpop.eup %9286  ;;  %v5560_v55 = vadd.f32 %v5489_v48, %v5488_v2  ;;  %v5490_v21 = vmul.f32 %v5314_v44, %v12260_v28  ;;  %v5316_v12 = vmul.f32 %v9285_v58, %v13906_v42  ;;  %v5191_v60 = vrot.slane %v5190_v39, 1  ;;  %v13908_v42 = vld [vmem:[#allocation141_spill] sm:$0xff] }
 0x7e5   :  { %v5391_v15 = vadd.f32 %v5315_v23, %v5314_v44  ;;  %v5491_v11 = vmul.f32 %v5315_v23, %v12262_v34  ;;  %v5317_v4 = vmul.f32 %v9287_v33, %v13907_v52  ;;  %9296 = vpow2.f32 %v5284_v43 }
 0x7e6   :  { %v5386_v38 = vadd.f32 %v5385_v45, %v5384_v20  ;;  %v5561_v59 = vrot.slane %v5560_v55, 4  ;;  %v5492_v47 = vmul.f32 %v5316_v12, %v12260_v28  ;;  %9298 = vpow2.f32 %v5286_v3 }
 0x7e7   :  { %v5392_v63 = vrot.slane %v5391_v15, 4  ;;  %v5567_v41 = vadd.f32 %v5491_v11, %v5490_v21  ;;  %v5398_v40 = vadd.f32 %v5317_v4, %v5316_v12  ;;  %v5493_v2 = vmul.f32 %v5317_v4, %v12262_v34 }
 0x7e8   :  { %v5387_v29 = vrot.slane %v5386_v38, 2  ;;  %v5562_v48 = vadd.f32 %v5561_v59, %v5560_v55  ;;  %v9289_v58 = vpop.eup %9288  ;;  %v12605_v14 = vmax.f32 %v5190_v39, %v5191_v60 }
 0x7e9   :  { %v5393_v23 = vadd.f32 %v5392_v63, %v5391_v15  ;;  %v5568_v62 = vrot.slane %v5567_v41, 4  ;;  %v5399_v33 = vrot.slane %v5398_v40, 4  ;;  %v5574_v43 = vadd.f32 %v5493_v2, %v5492_v47  ;;  %v9291_v20 = vpop.eup %9290 }
 0x7ea   :  { %v5388_v45 = vadd.f32 %v5387_v29, %v5386_v38  ;;  %v5563_v52 = vrot.slane %v5562_v48, 2  ;;  %v5318_v3 = vmul.f32 %v9289_v58, %v13908_v42  ;;  %v9293_v12 = vpop.eup %9292  ;;  %v5319_v15 = vmul.f32 %v9291_v20, %v13909_v19 }
 0x7eb   :  { %v5394_v21 = vrot.slane %v5393_v23, 2  ;;  %v5569_v11 = vadd.f32 %v5568_v62, %v5567_v41  ;;  %v5400_v4 = vadd.f32 %v5399_v33, %v5398_v40  ;;  %v5575_v55 = vrot.slane %v5574_v43, 4 }
 0x7ec   :  { %v9295_v59 = vpop.eup %9294  ;;  %v5389_v54 = vrot.slane %v5388_v45, 1  ;;  %v5564_v44 = vadd.f32 %v5563_v52, %v5562_v48  ;;  %v5494_v63 = vmul.f32 %v5318_v3, %v12260_v28  ;;  %v5405_v60 = vadd.f32 %v5319_v15, %v5318_v3  ;;  %v13910_v3 = vld [vmem:[#allocation174_spill] sm:$0xff] }
 0x7ed   :  { %v5395_v47 = vadd.f32 %v5394_v21, %v5393_v23  ;;  %v5570_v2 = vrot.slane %v5569_v11, 2  ;;  %v5401_v38 = vrot.slane %v5400_v4, 2  ;;  %v5576_v29 = vadd.f32 %v5575_v55, %v5574_v43 }
 0x7ee   :  { %v5390_v10 = vadd.f32 %v5389_v54, %v5388_v45  ;;  %v5565_v58 = vrot.slane %v5564_v44, 1  ;;  %v5495_v39 = vmul.f32 %v5319_v15, %v12262_v34  ;;  %v5406_v20 = vrot.slane %v5405_v60, 4 }
 0x7ef   :  { %v9297_v42 = vpop.eup %9296  ;;  %v5396_v62 = vrot.slane %v5395_v47, 1  ;;  %v5571_v41 = vadd.f32 %v5570_v2, %v5569_v11  ;;  %v5402_v40 = vadd.f32 %v5401_v38, %v5400_v4  ;;  %v5577_v33 = vrot.slane %v5576_v29, 2  ;;  %v13911_v38 = vld [vmem:[#allocation175_spill] sm:$0xff] }
 0x7f0   :  { %v9299_v24 = vpop.eup %9298  ;;  %v5448_v52 = vmax.f32 %v5390_v10, 1e-20  ;;  %v12610_v48 = vadd.f32 %v5565_v58, %v5564_v44  ;;  %v5581_v19 = vadd.f32 %v5495_v39, %v5494_v63  ;;  %v5407_v54 = vadd.f32 %v5406_v20, %v5405_v60  ;;  %v13912_v58 = vld [vmem:[#allocation176_spill] sm:$0xff]  ;;  %v13913_v60 = vld [vmem:[#allocation177_spill] sm:$0xff] }
 0x7f1   :  { %v5397_v23 = vadd.f32 %v5396_v62, %v5395_v47  ;;  %v5572_v21 = vrot.slane %v5571_v41, 1  ;;  %v5403_v35 = vrot.slane %v5402_v40, 1  ;;  %v12612_v43 = vadd.f32 %v5577_v33, %v5576_v29 }
 0x7f2   :  { %9300 = vrcp.f32 %v5448_v52  ;;  %v5582_v45 = vrot.slane %v5581_v19, 4  ;;  %v5320_v55 = vmul.f32 %v9293_v12, %v13910_v3  ;;  %v5408_v44 = vrot.slane %v5407_v54, 2 }
 0x7f3   :  { %v5449_v15 = vmax.f32 %v5397_v23, 1e-20  ;;  %v12615_v11 = vadd.f32 %v5572_v21, %v5571_v41  ;;  %v5404_v4 = vadd.f32 %v5403_v35, %v5402_v40  ;;  %v5321_v63 = vmul.f32 %v9295_v59, %v13911_v38 }
 0x7f4   :  { %v5583_v2 = vadd.f32 %v5582_v45, %v5581_v19  ;;  %v5496_v47 = vmul.f32 %v5320_v55, %v12260_v28  ;;  %v5322_v39 = vmul.f32 %v9297_v42, %v13912_v58  ;;  %v5323_v62 = vmul.f32 %v9299_v24, %v13913_v60 }
 0x7f5   :  { %9302 = vrcp.f32 %v5449_v15  ;;  %v5450_v29 = vmax.f32 %v5404_v4, 1e-20  ;;  %v5409_v33 = vadd.f32 %v5408_v44, %v5407_v54  ;;  %v5412_v52 = vadd.f32 %v5321_v63, %v5320_v55 }
 0x7f6   :  { %v5584_v12 = vrot.slane %v5583_v2, 2  ;;  %v5497_v41 = vmul.f32 %v5321_v63, %v12262_v34  ;;  %v5419_v35 = vadd.f32 %v5323_v62, %v5322_v39  ;;  %v5498_v40 = vmul.f32 %v5322_v39, %v12260_v28 }
 0x7f7   :  { %9304 = vrcp.f32 %v5450_v29  ;;  %v5499_v19 = vmul.f32 %v5323_v62, %v12262_v34  ;;  %v5410_v59 = vrot.slane %v5409_v33, 1  ;;  %v5413_v23 = vrot.slane %v5412_v52, 4  ;;  %v3997_v29 = vld [vmem:[#allocation32 + $0x40] sm:$0xff] }
 0x7f8   :  { %v12625_v20 = vadd.f32 %v5584_v12, %v5583_v2  ;;  %v5588_v21 = vadd.f32 %v5497_v41, %v5496_v47  ;;  %v5420_v45 = vrot.slane %v5419_v35, 4  ;;  %v5228_v24 = vsub.f32 %v12566_v18, %v12605_v14  ;;  %v3998_v2 = vld [vmem:[#allocation32 + $0x48] sm:$0xff] }
 0x7f9   :  { %v5595_v42 = vadd.f32 %v5499_v19, %v5498_v40  ;;  %v5229_v54 = vsub.f32 %v12544_v1, %v12605_v14  ;;  %v5411_v55 = vadd.f32 %v5410_v59, %v5409_v33  ;;  %v5414_v15 = vadd.f32 %v5413_v23, %v5412_v52 }
 0x7fa   :  { %v5589_v4 = vrot.slane %v5588_v21, 4  ;;  %v13914_v44 = vrot.slane %v12589_v30, 2  ;;  %v5421_v39 = vadd.f32 %v5420_v45, %v5419_v35  ;;  %v5288_v47 = vmul.f32 1.442695, %v5228_v24 }
 0x7fb   :  { %v5596_v62 = vrot.slane %v5595_v42, 4  ;;  %v5290_v12 = vmul.f32 1.442695, %v5229_v54  ;;  %v5451_v40 = vmax.f32 %v5411_v55, 1e-20  ;;  %v5415_v18 = vrot.slane %v5414_v15, 2 }
 0x7fc   :  { %v5197_v63 = vmax.f32 %v12589_v30, %v13914_v44  ;;  %v12634_v41 = vpop.eup %9300  ;;  %v12636_v19 = vadd.f32 %v5589_v4, %v5588_v21  ;;  %v5422_v14 = vrot.slane %v5421_v39, 2  ;;  %9306 = vpow2.f32 %v5288_v47 }
 0x7fd   :  { %v12638_v33 = vadd.f32 %v5596_v62, %v5595_v42  ;;  %v8886_v52 = vpack.c.bf16 %v3998_v2, %v3997_v29  ;;  %9308 = vrcp.f32 %v5451_v40  ;;  %v5416_v30 = vadd.f32 %v5415_v18, %v5414_v15 }
 0x7fe   :  { %v5198_v1 = vrot.slane %v5197_v63, 1  ;;  %v5423_v45 = vadd.f32 %v5422_v14, %v5421_v39  ;;  %9310 = vpow2.f32 %v5290_v12  ;;  %v5375_v24 = vrot.slane %v12557_v17, 1 }
 0x7ff   :  { %v12641_v23 = vpop.eup %9302  ;;  %8887 = vmatprep.subr.bf16.mxu0 %v8886_v52  ;;  %v13915_v21 = vrot.slane %v12578_v5, 2  ;;  %v5417_v42 = vrot.slane %v5416_v30, 1  ;;  %v5445_v15 = vmax.f32 %v12519_v16, 1e-20  ;;  %v5485_v39 = vmul.f32 %v12522_v6, %v12262_v34 }
 0x800   :  { %v5199_v35 = vmax.f32 %v5197_v63, %v5198_v1  ;;  %8889 = vmatpush3.bf16.msra.mxu0 %v8886_v52  ;;  %v5424_v63 = vrot.slane %v5423_v45, 1  ;;  %v5376_v29 = vadd.f32 %v5375_v24, %v12557_v17  ;;  %v5486_v16 = vmul.f32 %v12553_v46, %v12260_v28 }
 0x801   :  { %v5381_v54 = vadd.f32 %v13915_v21, %v12578_v5  ;;  %v12650_v44 = vpop.eup %9304  ;;  %v5418_v62 = vadd.f32 %v5417_v42, %v5416_v30  ;;  %9312 = vrcp.f32 %v5445_v15  ;;  %v5487_v18 = vmul.f32 %v12560_v61, %v12262_v34 }
 0x802   :  { %v5230_v55 = vsub.f32 %v12576_v26, %v5199_v35  ;;  %v5231_v4 = vsub.f32 %v12570_v13, %v5199_v35  ;;  %v5425_v12 = vadd.f32 %v5424_v63, %v5423_v45  ;;  %v5446_v40 = vmax.f32 %v5376_v29, 1e-20 }
 0x803   :  { %v5382_v2 = vrot.slane %v5381_v54, 1  ;;  %v5452_v13 = vmax.f32 %v5418_v62, 1e-20  ;;  %v5509_v17 = vrot.slane %v12414_v50, 1  ;;  %v5516_v14 = vrot.slane %v12423_v57, 1 }
 0x804   :  { %v5292_v47 = vmul.f32 1.442695, %v5230_v55  ;;  %v5294_v5 = vmul.f32 1.442695, %v5231_v4  ;;  %v5453_v1 = vmax.f32 %v5425_v12, 1e-20 }
 0x805   :  { %v5383_v26 = vadd.f32 %v5382_v2, %v5381_v54  ;;  %v5510_v52 = vadd.f32 %v5509_v17, %v12414_v50  ;;  %v13916_v30 = vrot.slane %v12426_v0, 2  ;;  %v5528_v46 = vrot.slane %v12441_v31, 2  ;;  %v13918_v55 = vld [vmem:[#allocation179_spill] sm:$0xff]  ;;  %v13919_v2 = vld [vmem:[#allocation180_spill] sm:$0xff] }
 0x806   :  { %9314 = vpow2.f32 %v5292_v47  ;;  %v9307_v45 = vpop.eup %9306  ;;  %v5517_v61 = vadd.f32 %v5516_v14, %v12423_v57  ;;  %v13917_v24 = vrot.slane %v12443_v9, 4  ;;  %v5540_v54 = vrot.slane %v12470_v49, 4 }
 0x807   :  { %9316 = vpow2.f32 %v5294_v5  ;;  %v5447_v6 = vmax.f32 %v5383_v26, 1e-20  ;;  %v5522_v35 = vadd.f32 %v13916_v30, %v12426_v0  ;;  %v12671_v42 = vpop.eup %9308  ;;  %v5324_v50 = vmul.f32 %v9307_v45, %v13918_v55 }
 0x808   :  { %9318 = vrcp.f32 %v5452_v13  ;;  %v5534_v21 = vadd.f32 %v13917_v24, %v12443_v9  ;;  %v5529_v0 = vadd.f32 %v5528_v46, %v12441_v31  ;;  %v9311_v15 = vpop.eup %9310  ;;  %v5541_v29 = vadd.f32 %v5540_v54, %v12470_v49 }
 0x809   :  { %9320 = vrcp.f32 %v5453_v1  ;;  %v5523_v4 = vrot.slane %v5522_v35, 1  ;;  %v5546_v57 = vadd.f32 %v5485_v39, %v12525_v27  ;;  %v5325_v62 = vmul.f32 %v9311_v15, %v13919_v2 }
 0x80a   :  { %9322 = vrcp.f32 %v5446_v40  ;;  %v5535_v63 = vrot.slane %v5534_v21, 2  ;;  %v5500_v9 = vmul.f32 %v5324_v50, %v12260_v28  ;;  %v5530_v5 = vrot.slane %v5529_v0, 1 }
 0x80b   :  { %9324 = vrcp.f32 %v5447_v6  ;;  %v5524_v47 = vadd.f32 %v5523_v4, %v5522_v35  ;;  %v5542_v26 = vrot.slane %v5541_v29, 2  ;;  %v5547_v13 = vrot.slane %v5546_v57, 4  ;;  %v9313_v17 = vpop.eup %9312 }
 0x80c   :  { %v5536_v12 = vadd.f32 %v5535_v63, %v5534_v21  ;;  %v5553_v40 = vadd.f32 %v5487_v18, %v5486_v16  ;;  %v5426_v1 = vadd.f32 %v5325_v62, %v5324_v50  ;;  %v5501_v31 = vmul.f32 %v5325_v62, %v12262_v34  ;;  %v13920_v18 = vld [vmem:[#allocation119_spill] sm:$0xff]  ;;  %v3999_v62 = vld [vmem:[#allocation32 + $0x50] sm:$0xff] }
 0x80d   :  { %v5531_v6 = vadd.f32 %v5530_v5, %v5529_v0  ;;  %v5616_v14 = vmul.f32 %v12464_v56, %v5510_v52  ;;  %v5543_v30 = vadd.f32 %v5542_v26, %v5541_v29  ;;  %v5548_v27 = vadd.f32 %v5547_v13, %v5546_v57  ;;  %v13921_v52 = vld [vmem:[#allocation162_spill] sm:$0xff] }
 0x80e   :  { %v5537_v49 = vrot.slane %v5536_v12, 1  ;;  %v5554_v39 = vrot.slane %v5553_v40, 4  ;;  %v5427_v45 = vrot.slane %v5426_v1, 4  ;;  %v12681_v24 = vadd.f32 %v5501_v31, %v5500_v9  ;;  %v4000_v9 = vld [vmem:[#allocation32 + $0x58] sm:$0xff] }
 0x80f   :  { %v5617_v35 = vmul.f32 %v12490_v51, %v5517_v61  ;;  %v5618_v21 = vmul.f32 %v12514_v8, %v5524_v47  ;;  %v5544_v4 = vrot.slane %v5543_v30, 1  ;;  %v5549_v0 = vrot.slane %v5548_v27, 2 }
 0x810   :  { %v9315_v46 = vpop.eup %9314  ;;  %v5538_v50 = vadd.f32 %v5537_v49, %v5536_v12  ;;  %v5428_v56 = vadd.f32 %v5427_v45, %v5426_v1  ;;  %v5555_v29 = vadd.f32 %v5554_v39, %v5553_v40  ;;  %v5619_v57 = vmul.f32 %v12529_v22, %v5531_v6  ;;  %v4001_v12 = vld [vmem:[#allocation32 + $0x60] sm:$0xff]  ;;  %v4002_v40 = vld [vmem:[#allocation32 + $0x68] sm:$0xff]  ;;  %v4003_v39 = vld [vmem:[#allocation32 + $0x70] sm:$0xff] }
 0x811   :  { %v9317_v16 = vpop.eup %9316  ;;  %v5326_v54 = vmul.f32 %v9315_v46, %v13920_v18  ;;  %v5545_v8 = vadd.f32 %v5544_v4, %v5543_v30  ;;  %v5550_v61 = vadd.f32 %v5549_v0, %v5548_v27  ;;  %v5654_v49 = vsel %vm4044_vm4, %v5617_v35, %v5616_v14  ;;  %v4004_v22 = vld [vmem:[#allocation32 + $0x78] sm:$0xff] }
 0x812   :  { %v12686_v15 = vpop.eup %9318  ;;  %v5327_v63 = vmul.f32 %v9317_v16, %v13921_v52  ;;  %v5620_v47 = vmul.f32 %v12548_v25, %v5538_v50  ;;  %v5429_v13 = vrot.slane %v5428_v56, 2  ;;  %v5556_v1 = vrot.slane %v5555_v29, 2 }
 0x813   :  { %v12690_v5 = vpop.eup %9320  ;;  %v5502_v51 = vmul.f32 %v5326_v54, %v12260_v28  ;;  %v5551_v46 = vrot.slane %v5550_v61, 1  ;;  %v5621_v45 = vmul.f32 %v9313_v17, %v5545_v8  ;;  %v5655_v16 = vsel %vm4047_vm5, %v5618_v21, %v5654_v49 }
 0x814   :  { %v9323_v26 = vpop.eup %9322  ;;  %v5433_v31 = vadd.f32 %v5327_v63, %v5326_v54  ;;  %v8890_v28 = vpack.c.bf16 %v4000_v9, %v3999_v62  ;;  %v5430_v30 = vadd.f32 %v5429_v13, %v5428_v56  ;;  %v5557_v4 = vadd.f32 %v5556_v1, %v5555_v29 }
 0x815   :  { %v9325_v6 = vpop.eup %9324  ;;  %v5656_v25 = vsel %vm4050_vm6, %v5619_v57, %v5655_v16  ;;  %v5552_v50 = vadd.f32 %v5551_v46, %v5550_v61  ;;  %v8894_v0 = vpack.c.bf16 %v4002_v40, %v4001_v12  ;;  %v8898_v14 = vpack.c.bf16 %v4004_v22, %v4003_v39 }
 0x816   :  { %v5434_v27 = vrot.slane %v5433_v31, 4  ;;  %v5657_v54 = vsel %vm4053_vm7, %v5620_v47, %v5656_v25  ;;  %8891 = vmatprep.subr.bf16.mxu0 %v8890_v28  ;;  %v5431_v35 = vrot.slane %v5430_v30, 1  ;;  %v5558_v10 = vrot.slane %v5557_v4, 1 }
 0x817   :  { %v5658_v52 = vsel %vm4056_vm8, %v5621_v45, %v5657_v54  ;;  %8893 = vmatpush3.bf16.msra.mxu0 %v8890_v28  ;;  %v5622_v17 = vmul.f32 %v9323_v26, %v5552_v50  ;;  %v5503_v21 = vmul.f32 %v5327_v63, %v12262_v34  ;;  %v13922_v56 = vrot.slane %v12612_v43, 1 }
 0x818   :  { %v5435_v59 = vadd.f32 %v5434_v27, %v5433_v31  ;;  %8895 = vmatprep.subr.bf16.mxu0 %v8894_v0  ;;  %v5586_v57 = vrot.slane %v12625_v20, 1  ;;  %v5432_v62 = vadd.f32 %v5431_v35, %v5430_v30  ;;  %v5559_v8 = vadd.f32 %v5558_v10, %v5557_v4 }
 0x819   :  { %v5580_v29 = vadd.f32 %v13922_v56, %v12612_v43  ;;  %v13923_v61 = vrot.slane %v12636_v19, 2  ;;  %v5659_v12 = vsel %vm4059_vm9, %v5622_v17, %v5658_v52  ;;  %v5598_v13 = vrot.slane %v12638_v33, 2 }
 0x81a   :  { %v5436_v9 = vrot.slane %v5435_v59, 2  ;;  %v5587_v26 = vadd.f32 %v5586_v57, %v12625_v20  ;;  %v5603_v34 = vrot.slane %v12681_v24, 4  ;;  %v5454_v63 = vmax.f32 %v5432_v62, 1e-20  ;;  %v5758_v57 = vld [vmem:[#allocation34 + $0x8] sm:$0xff]  ;;  %v5759_v62 = vld [vmem:[#allocation34 + $0x10] sm:$0xff] }
 0x81b   :  { %v5592_v47 = vadd.f32 %v13923_v61, %v12636_v19  ;;  %v5623_v43 = vmul.f32 %v9325_v6, %v5559_v8  ;;  %8897 = vmatpush3.bf16.msra.mxu0 %v8894_v0  ;;  %v5599_v10 = vadd.f32 %v5598_v13, %v12638_v33  ;;  %v5609_v40 = vadd.f32 %v5503_v21, %v5502_v51  ;;  %v5760_v8 = vld [vmem:[#allocation34 + $0x18] sm:$0xff]  ;;  %v5768_v13 = vld [vmem:[#allocation41] sm:$0xff] }
 0x81c   :  { %v5437_v31 = vadd.f32 %v5436_v9, %v5435_v59  ;;  %8899 = vmatprep.subr.bf16.mxu0 %v8898_v14  ;;  %v5604_v49 = vadd.f32 %v5603_v34, %v12681_v24  ;;  %v5624_v19 = vmul.f32 %v12634_v41, %v12610_v48  ;;  %9326 = vrcp.f32 %v5454_v63  ;;  %v5769_v34 = vld [vmem:[#allocation41 + $0x8] sm:$0xff]  ;;  %v5770_v63 = vld [vmem:[#allocation41 + $0x10] sm:$0xff] }
 0x81d   :  { %v5593_v1 = vrot.slane %v5592_v47, 1  ;;  %v5660_v20 = vsel %vm4062_vm10, %v5623_v43, %v5659_v12  ;;  %v5600_v22 = vrot.slane %v5599_v10, 1  ;;  %v5610_v6 = vrot.slane %v5609_v40, 4  ;;  %v5763_v12 = vld [vmem:[#allocation37 + $0x8] sm:$0xff] }
 0x81e   :  { %v5438_v52 = vrot.slane %v5437_v31, 1  ;;  %8549 = vmatprep.mubr.f32.mxu0 %v5660_v20  ;;  %v5605_v59 = vrot.slane %v5604_v49, 2  ;;  %v5625_v46 = vmul.f32 %v12641_v23, %v12615_v11  ;;  %v5626_v24 = vmul.f32 %v12650_v44, %v5580_v29  ;;  %v5771_v43 = vld [vmem:[#allocation41 + $0x18] sm:$0xff] }
 0x81f   :  { %v5594_v39 = vadd.f32 %v5593_v1, %v5592_v47  ;;  %8901 = vmatpush3.bf16.msra.mxu0 %v8898_v14  ;;  %v5627_v51 = vmul.f32 %v12671_v42, %v5587_v26  ;;  %v5601_v41 = vadd.f32 %v5600_v22, %v5599_v10  ;;  %v5611_v16 = vadd.f32 %v5610_v6, %v5609_v40  ;;  %v5762_v47 = vld [vmem:[#allocation37] sm:$0xff]  ;;  %v8023_v10 = vld [vmem:[#allocation31] ss:$0 sm:$0xff] }
 0x820   :  { %v5439_v33 = vadd.f32 %v5438_v52, %v5437_v31  ;;  %v5606_v45 = vadd.f32 %v5605_v59, %v5604_v49  ;;  %v5661_v28 = vsel %vm4044_vm4, %v5625_v46, %v5624_v19  ;;  %v8906_v61 = vpack.c.bf16 %v5760_v8, %v5759_v62  ;;  %v9521_v62 = vld [vmem:[#allocation7 + $0xa0] sm:$0xff]  ;;  %v9523_v8 = vld [vmem:[#allocation7 + $0xb0] sm:$0xff] }
 0x821   :  { %v5628_v48 = vmul.f32 %v12686_v15, %v5594_v39  ;;  %v5662_v27 = vsel %vm4047_vm5, %v5626_v24, %v5661_v28  ;;  %v5612_v25 = vrot.slane %v5611_v16, 2  ;;  %v5629_v11 = vmul.f32 %v12690_v5, %v5601_v41  ;;  %v5757_v5 = vld [vmem:[#allocation34] sm:$0xff]  ;;  %v5764_v24 = vld [vmem:[#allocation37 + $0x10] sm:$0xff] }
 0x822   :  { %v5455_v30 = vmax.f32 %v5439_v33, 1e-20  ;;  %v5607_v4 = vrot.slane %v5606_v45, 1  ;;  %v5663_v23 = vsel %vm4050_vm6, %v5627_v51, %v5662_v27  ;;  %v8902_v9 = vpack.c.bf16 %v5758_v57, %v5757_v5  ;;  %v5765_v51 = vld [vmem:[#allocation37 + $0x18] sm:$0xff]  ;;  %v5767_v28 = vld [vmem:[#allocation40] sm:$0xff]  ;;  %v9520_v57 = vld [vmem:[#allocation7 + $0x98] sm:$0xff] }
 0x823   :  { %v5664_v44 = vsel %vm4053_vm7, %v5628_v48, %v5663_v23  ;;  %v5613_v42 = vadd.f32 %v5612_v25, %v5611_v16  ;;  %v8910_v26 = vpack.c.bf16 %v5763_v12, %v5762_v47  ;;  %v8918_v31 = vpack.c.bf16 %v5769_v34, %v5768_v13  ;;  %v9502_v27 = vld [vmem:[#allocation7 + $0x8] sm:$0xff]  ;;  %v9504_v25 = vld [vmem:[#allocation7 + $0x18] sm:$0xff]  ;;  %v9519_v5 = vld [vmem:[#allocation7 + $0x90] sm:$0xff] }
 0x824   :  { %9328 = vrcp.f32 %v5455_v30  ;;  %v5665_v15 = vsel %vm4056_vm8, %v5629_v11, %v5664_v44  ;;  %v5608_v50 = vadd.f32 %v5607_v4, %v5606_v45  ;;  %8903 = vmatprep.subr.bf16.mxu0 %v8902_v9  ;;  %v8922_v1 = vpack.c.bf16 %v5771_v43, %v5770_v63  ;;  %v9501_v30 = vld [vmem:[#allocation7] sm:$0xff]  ;;  %v9503_v4 = vld [vmem:[#allocation7 + $0x10] sm:$0xff]  ;;  %v9506_v23 = vld [vmem:[#allocation7 + $0x28] sm:$0xff] }
 0x825   :  { %v5614_v0 = vrot.slane %v5613_v42, 1  ;;  %8919 = vmatprep.subr.bf16.mxu1 %v8918_v31  ;;  %v8914_v45 = vpack.c.bf16 %v5765_v51, %v5764_v24  ;;  %v9505_v11 = vld [vmem:[#allocation7 + $0x20] sm:$0xff]  ;;  %v9507_v44 = vld [vmem:[#allocation7 + $0x30] sm:$0xff]  ;;  %v9526_v12 = vld [vmem:[#allocation7 + $0xc8] sm:$0xff] }
 0x826   :  { %v9327_v54 = vpop.eup %9326  ;;  %8921 = vmatpush3.bf16.msra.mxu1 %v8918_v31  ;;  %v9525_v47 = vld [vmem:[#allocation7 + $0xc0] sm:$0xff]  ;;  %v9528_v13 = vld [vmem:[#allocation7 + $0xd8] sm:$0xff]  ;;  %v9530_v63 = vld [vmem:[#allocation7 + $0xe8] sm:$0xff] }
 0x827   :  { %v5630_v14 = vmul.f32 %v9327_v54, %v5608_v50  ;;  %v5615_v17 = vadd.f32 %v5614_v0, %v5613_v42  ;;  %8923 = vmatprep.subr.bf16.mxu1 %v8922_v1  ;;  %v9508_v42 = vld [vmem:[#allocation7 + $0x38] sm:$0xff]  ;;  %v9510_v50 = vld [vmem:[#allocation7 + $0x48] sm:$0xff]  ;;  %v9511_v54 = vld [vmem:[#allocation7 + $0x50] sm:$0xff] }
 0x828   :  { %v9512_v0 = vld [vmem:[#allocation7 + $0x58] sm:$0xff]  ;;  %v9529_v34 = vld [vmem:[#allocation7 + $0xe0] sm:$0xff]  ;;  %v9531_v31 = vld [vmem:[#allocation7 + $0xf0] sm:$0xff] }
 0x829   :  { %v5666_v35 = vsel %vm4059_vm9, %v5630_v14, %v5665_v15  ;;  %v9509_v15 = vld [vmem:[#allocation7 + $0x40] sm:$0xff]  ;;  %v9532_v43 = vld [vmem:[#allocation7 + $0xf8] sm:$0xff] }
 0x82a   :  { %8925 = vmatpush3.bf16.msra.mxu1 %v8922_v1  ;;  %v9513_v14 = vld [vmem:[#allocation7 + $0x60] sm:$0xff] }
 0x82e   :  { %v9329_v21 = vpop.eup %9328 }
 0x82f   :  { %v5631_v56 = vmul.f32 %v9329_v21, %v5615_v17  ;;  %v9515_v17 = vld [vmem:[#allocation7 + $0x70] sm:$0xff]  ;;  %v9516_v21 = vld [vmem:[#allocation7 + $0x78] sm:$0xff] }
 0x831   :  { %v5667_v29 = vsel %vm4062_vm10, %v5631_v56, %v5666_v35  ;;  %v9514_v35 = vld [vmem:[#allocation7 + $0x68] sm:$0xff]  ;;  %v9517_v56 = vld [vmem:[#allocation7 + $0x80] sm:$0xff] }
 0x832   :  { %8550 = vmatmul.mubr.f32.vlgmr.msra.gmra.mrb[112].mxu0 %v5667_v29  ;;  %v9518_v29 = vld [vmem:[#allocation7 + $0x88] sm:$0xff] }
 0x833   :  { %8905 = vmatpush3.bf16.msra.mxu0 %v8902_v9  ;;  %v9522_v9 = vld [vmem:[#allocation7 + $0xa8] sm:$0xff] }
 0x834   :  { %8907 = vmatprep.subr.bf16.mxu0 %v8906_v61 }
 0x837   :  { %8909 = vmatpush3.bf16.msra.mxu0 %v8906_v61  ;;  %v9524_v61 = vld [vmem:[#allocation7 + $0xb8] sm:$0xff] }
 0x838   :  { %8911 = vmatprep.subr.bf16.mxu0 %v8910_v26 }
 0x905   :  { %v8551_v49 = vpop.f32.mrb[112].mxu0 }
 0x906   :  { %v5742_v40 = vadd.f32 %v8551_v49, %v8023_v10  ;;  %v5736_v19 = vpop.f32.mrb[113].mxu0  ;;  %v8029_v49 = vld [vmem:[#allocation38] ss:$0 sm:$0xff] }
 0x907   :  { %v5737_v52 = vadd.f32 %v8023_v10, %v5736_v19 }
 0x908   :  { %v5748_v20 = vmin.f32 %v5742_v40, 0.0  ;;  %vm5746_vm12 = vcmp.gt.f32.partialorder %v5742_v40, 0.0 }
 0x909   :  { %v5747_v39 = vmin.f32 %v5737_v52, 0.0  ;;  %vm5745_vm11 = vcmp.gt.f32.partialorder %v5737_v52, 0.0 }
 0x90a   :  { %v5751_v22 = vmul.f32 1.442695, %v5748_v20  ;;  %v8026_v20 = vld [vmem:[#allocation35] ss:$0 sm:$0xff] }
 0x90b   :  { %v5749_v59 = vmul.f32 1.442695, %v5747_v39 }
 0x90c   :  { %9330 = vpow2.f32 %v5751_v22 }
 0x90d   :  { %9332 = vpow2.f32 %v5749_v59 }
 0x916   :  { %v9331_v6 = vpop.eup %9330 }
 0x917   :  { %v9333_v46 = vpop.eup %9332  ;;  %v8025_v33 = vadd.f32 -1.0, %v9331_v6 }
 0x918   :  { %v8024_v48 = vadd.f32 -1.0, %v9333_v46 }
 0x919   :  { %v5756_v16 = vsel %vm5746_vm12, %v5742_v40, %v8025_v33 }
 0x91a   :  { %v5755_v41 = vsel %vm5745_vm11, %v5737_v52, %v8024_v48 }
 0x91b   :  { %8560 = vmatprep.mubr.msk.f32.mxu0 %vm5779_vm0, %v5755_v41 }
 0x91c   :  { %8561 = vmatmul.mubr.msk.f32.vlgmr.msra.gmra.mrb[114].mxu0 %vm5779_vm0, %v5756_v16 }
 0x91d   :  { %8913 = vmatpush3.bf16.msra.mxu0 %v8910_v26  ;;  %8571 = vmatprep.mubr.msk.f32.mxu0 %vm5779_vm0, %v5755_v41  ;;  %v9527_v26 = vld [vmem:[#allocation7 + $0xd0] sm:$0xff] }
 0x91e   :  { %8915 = vmatprep.subr.bf16.mxu0 %v8914_v45 }
 0x921   :  { %8917 = vmatpush3.bf16.msra.mxu0 %v8914_v45 }
 0x922   :  { %8574 = vmatprep.subr.mxu0 %v5767_v28 }
 0x924   :  { %8572 = vmatmul.mubr.msk.f32.vlgmr.msra.gmra.mrb[116].mxu0 %vm5779_vm0, %v5756_v16 }
 0x925   :  { %8575 = vmatpush3.msra.mxu0 %v5767_v28  ;;  %8576 = vmatprep.mubr.msk.f32.mxu0 %vm910_vm1, %v9501_v30 }
 0x928   :  { %8577 = vmatmul.mubr.msk.f32.vlgmr.msra.gmra.mrb[118].mxu0 %vm910_vm1, %v9502_v27 }
 0x929   :  { %8579 = vmatprep.mubr.msk.f32.mxu0 %vm910_vm1, %v9503_v4 }
 0x92c   :  { %8580 = vmatmul.mubr.msk.f32.gmra.mrb[120].mxu0 %vm910_vm1, %v9504_v25 }
 0x92d   :  { %8582 = vmatprep.mubr.msk.f32.mxu0 %vm910_vm1, %v9505_v11 }
 0x930   :  { %8583 = vmatmul.mubr.msk.f32.gmra.mrb[122].mxu0 %vm910_vm1, %v9506_v23 }
 0x931   :  { %8585 = vmatprep.mubr.msk.f32.mxu0 %vm910_vm1, %v9507_v44 }
 0x934   :  { %8586 = vmatmul.mubr.msk.f32.gmra.mrb[124].mxu0 %vm910_vm1, %v9508_v42 }
 0x935   :  { %8588 = vmatprep.mubr.msk.f32.mxu0 %vm910_vm1, %v9509_v15 }
 0x938   :  { %8589 = vmatmul.mubr.msk.f32.gmra.mrb[126].mxu0 %vm910_vm1, %v9510_v50 }
 0x939   :  { %8591 = vmatprep.mubr.msk.f32.mxu0 %vm910_vm1, %v9511_v54 }
 0x93c   :  { %8592 = vmatmul.mubr.msk.f32.gmra.mrb[128].mxu0 %vm910_vm1, %v9512_v0 }
 0x93d   :  { %8594 = vmatprep.mubr.msk.f32.mxu0 %vm910_vm1, %v9513_v14 }
 0x940   :  { %8595 = vmatmul.mubr.msk.f32.gmra.mrb[130].mxu0 %vm910_vm1, %v9514_v35 }
 0x941   :  { %8597 = vmatprep.mubr.msk.f32.mxu0 %vm910_vm1, %v9515_v17 }
 0x944   :  { %8598 = vmatmul.mubr.msk.f32.gmra.mrb[132].mxu0 %vm910_vm1, %v9516_v21 }
 0x945   :  { %8600 = vmatprep.mubr.msk.f32.mxu0 %vm910_vm1, %v9517_v56 }
 0x948   :  { %8601 = vmatmul.mubr.msk.f32.gmra.mrb[134].mxu0 %vm910_vm1, %v9518_v29 }
 0x949   :  { %8603 = vmatprep.mubr.msk.f32.mxu0 %vm910_vm1, %v9519_v5 }
 0x94c   :  { %8604 = vmatmul.mubr.msk.f32.gmra.mrb[136].mxu0 %vm910_vm1, %v9520_v57 }
 0x94d   :  { %8606 = vmatprep.mubr.msk.f32.mxu0 %vm910_vm1, %v9521_v62 }
 0x950   :  { %8607 = vmatmul.mubr.msk.f32.gmra.mrb[138].mxu0 %vm910_vm1, %v9522_v9 }
 0x951   :  { %8609 = vmatprep.mubr.msk.f32.mxu0 %vm910_vm1, %v9523_v8 }
 0x954   :  { %8610 = vmatmul.mubr.msk.f32.gmra.mrb[140].mxu0 %vm910_vm1, %v9524_v61 }
 0x955   :  { %8612 = vmatprep.mubr.msk.f32.mxu0 %vm910_vm1, %v9525_v47 }
 0x958   :  { %8613 = vmatmul.mubr.msk.f32.gmra.mrb[142].mxu0 %vm910_vm1, %v9526_v12 }
 0x959   :  { %8615 = vmatprep.mubr.msk.f32.mxu0 %vm910_vm1, %v9527_v26 }
 0x95c   :  { %8616 = vmatmul.mubr.msk.f32.gmra.mrb[144].mxu0 %vm910_vm1, %v9528_v13 }
 0x95d   :  { %8618 = vmatprep.mubr.msk.f32.mxu0 %vm910_vm1, %v9529_v34 }
 0x960   :  { %8619 = vmatmul.mubr.msk.f32.gmra.mrb[146].mxu0 %vm910_vm1, %v9530_v63 }
 0x961   :  { %8621 = vmatprep.mubr.msk.f32.mxu0 %vm910_vm1, %v9531_v31 }
 0x964   :  { %8622 = vmatmul.mubr.msk.f32.gmra.mrb[148].mxu0 %vm910_vm1, %v9532_v43 }
 0x9ef   :  { %v8562_v1 = vpop.f32.mrb[114].mxu0 }
 0x9f0   :  { %v5852_v10 = vpop.f32.mrb[115].mxu0  ;;  %v12768_v51 = vadd.f32 %v8562_v1, %v8026_v20 }
 0x9f1   :  { %v12770_v48 = vadd.f32 %v8026_v20, %v5852_v10 }
 0x9f7   :  { %v8573_v40 = vpop.f32.mrb[116].mxu0 }
 0x9f8   :  { %v5933_v19 = vpop.f32.mrb[117].mxu0  ;;  %v12781_v44 = vadd.f32 %v8573_v40, %v8029_v49 }
 0x9f9   :  { %v5934_v52 = vadd.f32 %v8029_v49, %v5933_v19 }
 0x9fb   :  { %v6169_v39 = vcombine.high %v5934_v52, %v5934_v52  ;;  %v6176_v22 = vrot.slane %v5934_v52, %v13852_v53  ;;  %v8578_v59 = vpop.f32.mrb[118].mxu0 }
 0x9fc   :  { %v6008_v6 = vpop.f32.mrb[119].mxu0 }
 0x9fd   :  { %v6183_v46 = vrot.slane %v6169_v39, %v13852_v53  ;;  %v6184_v33 = vcombine.high %v6176_v22, %v6176_v22  ;;  %v6192_v24 = vrot.slane %v6176_v22, %v13852_v53  ;;  %v6225_v39 = vrot.slane %v12781_v44, %v13852_v53 }
 0x9ff   :  { %v6270_v41 = vrot.slane %v6192_v24, %v13853_v7  ;;  %v8581_v45 = vpop.f32.mrb[120].mxu0  ;;  %v6206_v16 = vrot.slane %v6184_v33, %v13852_v53  ;;  %v6214_v28 = vcombine.high %v6192_v24, %v6192_v24  ;;  %v12775_v27 = vrot.slane %v6183_v46, %v13852_v53 }
 0xa00   :  { %v6018_v30 = vpop.f32.mrb[121].mxu0  ;;  %v6185_v42 = vcombine.high %v6183_v46, %v6183_v46 }
 0xa01   :  { %v6348_v4 = vadd.f32 %v6270_v41, %v12768_v51  ;;  %v6347_v25 = vadd.f32 %v6270_v41, %v12770_v48  ;;  %v6274_v11 = vrot.slane %v6206_v16, %v13853_v7  ;;  %v6278_v23 = vrot.slane %v6214_v28, %v13853_v7 }
 0xa02   :  { %v6216_v15 = vcombine.high %v6206_v16, %v6206_v16  ;;  %v6286_v5 = vrot.slane %v12775_v27, %v13853_v7  ;;  %v6213_v63 = vrot.slane %v6185_v42, %v13852_v53  ;;  %v6215_v49 = vcombine.high %v12775_v27, %v12775_v27 }
 0xa03   :  { %v6380_v50 = vadd.f32 %v8578_v59, %v6348_v4  ;;  %v6379_v54 = vadd.f32 %v6347_v25, %v6008_v6  ;;  %v6350_v0 = vadd.f32 %v6274_v11, %v12768_v51  ;;  %v6349_v14 = vadd.f32 %v6274_v11, %v12770_v48  ;;  %v8584_v35 = vpop.f32.mrb[122].mxu0 }
 0xa04   :  { %v6352_v17 = vadd.f32 %v6278_v23, %v12768_v51  ;;  %v6028_v21 = vpop.f32.mrb[123].mxu0  ;;  %v6351_v56 = vadd.f32 %v6278_v23, %v12770_v48  ;;  %v6282_v29 = vrot.slane %v6216_v15, %v13853_v7  ;;  %v6356_v20 = vadd.f32 %v6286_v5, %v12768_v51 }
 0xa05   :  { %vm6412_vm1 = vcmp.gt.f32.partialorder %v6380_v50, 0.0  ;;  %v6444_v57 = vmul.f32 0.2, %v6380_v50  ;;  %vm6411_vm13 = vcmp.gt.f32.partialorder %v6379_v54, 0.0  ;;  %v6443_v62 = vmul.f32 0.2, %v6379_v54 }
 0xa06   :  { %v6382_v9 = vadd.f32 %v8581_v45, %v6350_v0  ;;  %v6381_v8 = vadd.f32 %v6349_v14, %v6018_v30  ;;  %v6384_v61 = vadd.f32 %v8584_v35, %v6352_v17  ;;  %v6383_v47 = vadd.f32 %v6351_v56, %v6028_v21 }
 0xa07   :  { %v6476_v12 = vsel %vm6412_vm1, %v6380_v50, %v6444_v57  ;;  %v8587_v26 = vpop.f32.mrb[124].mxu0  ;;  %v6354_v13 = vadd.f32 %v6282_v29, %v12768_v51  ;;  %v6475_v34 = vsel %vm6411_vm13, %v6379_v54, %v6443_v62  ;;  %v6353_v10 = vadd.f32 %v6282_v29, %v12770_v48 }
 0xa08   :  { %v6446_v31 = vmul.f32 0.2, %v6382_v9  ;;  %vm6413_vm14 = vcmp.gt.f32.partialorder %v6381_v8, 0.0  ;;  %v6445_v43 = vmul.f32 0.2, %v6381_v8  ;;  %8632 = vmatprep.mubr.msk.f32.mxu1 %vm5779_vm0, %v6475_v34  ;;  %vm6414_vm15 = vcmp.gt.f32.partialorder %v6382_v9, 0.0 }
 0xa09   :  { %v6447_v1 = vmul.f32 0.2, %v6383_v47  ;;  %8633 = vmatmul.mubr.msk.f32.vlgmr.msra.gmra.mrb[100].mxu1 %vm5779_vm0, %v6476_v12  ;;  %vm6415_vm2 = vcmp.gt.f32.partialorder %v6383_v47, 0.0  ;;  %v6386_v40 = vadd.f32 %v8587_v26, %v6354_v13  ;;  %v6038_v19 = vpop.f32.mrb[125].mxu0  ;;  %v6355_v6 = vadd.f32 %v6286_v5, %v12770_v48 }
 0xa0a   :  { %v6477_v52 = vsel %vm6413_vm14, %v6381_v8, %v6445_v43  ;;  %v6385_v22 = vadd.f32 %v6353_v10, %v6038_v19  ;;  %v6290_v46 = vrot.slane %v6213_v63, %v13853_v7  ;;  %v6448_v33 = vmul.f32 0.2, %v6384_v61 }
 0xa0b   :  { %8635 = vmatprep.mubr.msk.f32.mxu1 %vm5779_vm0, %v6477_v52  ;;  %v8590_v59 = vpop.f32.mrb[126].mxu0  ;;  %v6478_v45 = vsel %vm6414_vm15, %v6382_v9, %v6446_v31  ;;  %vm6416_vm3 = vcmp.gt.f32.partialorder %v6384_v61, 0.0  ;;  %v6479_v30 = vsel %vm6415_vm2, %v6383_v47, %v6447_v1  ;;  %v6294_v4 = vrot.slane %v6215_v49, %v13853_v7 }
 0xa0c   :  { %v6388_v24 = vadd.f32 %v8590_v59, %v6356_v20  ;;  %v6048_v41 = vpop.f32.mrb[127].mxu0  ;;  %v6449_v16 = vmul.f32 0.2, %v6385_v22  ;;  %vm6417_vm11 = vcmp.gt.f32.partialorder %v6385_v22, 0.0  ;;  %v6358_v27 = vadd.f32 %v6290_v46, %v12768_v51 }
 0xa0d   :  { %v6387_v28 = vadd.f32 %v6355_v6, %v6048_v41  ;;  %8636 = vmatmul.mubr.msk.f32.gmra.mrb[102].mxu1 %vm5779_vm0, %v6478_v45  ;;  %v6233_v25 = vcombine.high %v6225_v39, %v6225_v39  ;;  %v6357_v23 = vadd.f32 %v6290_v46, %v12770_v48  ;;  %v6450_v42 = vmul.f32 0.2, %v6386_v40 }
 0xa0e   :  { %8638 = vmatprep.mubr.msk.f32.mxu1 %vm5779_vm0, %v6479_v30  ;;  %v6480_v54 = vsel %vm6416_vm3, %v6384_v61, %v6448_v33  ;;  %v6217_v0 = vcombine.high %v6213_v63, %v6213_v63  ;;  %vm6418_vm12 = vcmp.gt.f32.partialorder %v6386_v40, 0.0  ;;  %v6481_v17 = vsel %vm6417_vm11, %v6385_v22, %v6449_v16 }
 0xa0f   :  { %v8593_v11 = vpop.f32.mrb[128].mxu0  ;;  %v6451_v14 = vmul.f32 0.2, %v6387_v28  ;;  %v6241_v21 = vrot.slane %v6225_v39, %v13852_v53  ;;  %vm6419_vm1 = vcmp.gt.f32.partialorder %v6387_v28, 0.0  ;;  %v6360_v56 = vadd.f32 %v6294_v4, %v12768_v51 }
 0xa10   :  { %v6390_v15 = vadd.f32 %v8593_v11, %v6358_v27  ;;  %v6058_v50 = vpop.f32.mrb[129].mxu0  ;;  %v6298_v29 = vrot.slane %v6217_v0, %v13853_v7  ;;  %v6359_v57 = vadd.f32 %v6294_v4, %v12770_v48  ;;  %v6452_v62 = vmul.f32 0.2, %v6388_v24 }
 0xa11   :  { %v6389_v35 = vadd.f32 %v6357_v23, %v6058_v50  ;;  %8639 = vmatmul.mubr.msk.f32.gmra.mrb[104].mxu1 %vm5779_vm0, %v6480_v54  ;;  %v6482_v61 = vsel %vm6418_vm12, %v6386_v40, %v6450_v42  ;;  %vm6420_vm13 = vcmp.gt.f32.partialorder %v6388_v24, 0.0  ;;  %v6483_v26 = vsel %vm6419_vm1, %v6387_v28, %v6451_v14 }
 0xa12   :  { %8641 = vmatprep.mubr.msk.f32.mxu1 %vm5779_vm0, %v6481_v17  ;;  %v6362_v13 = vadd.f32 %v6298_v29, %v12768_v51  ;;  %v6302_v34 = vrot.slane %v6241_v21, %v13853_v7  ;;  %v6255_v63 = vrot.slane %v6233_v25, %v13852_v53  ;;  %v6361_v43 = vadd.f32 %v6298_v29, %v12770_v48 }
 0xa13   :  { %v8596_v5 = vpop.f32.mrb[130].mxu0  ;;  %v6453_v47 = vmul.f32 0.2, %v6389_v35  ;;  %vm6421_vm14 = vcmp.gt.f32.partialorder %v6389_v35, 0.0  ;;  %v6218_v1 = vcombine.high %v12781_v44, %v12781_v44  ;;  %v6454_v10 = vmul.f32 0.2, %v6390_v15 }
 0xa14   :  { %v6392_v9 = vadd.f32 %v8596_v5, %v6360_v56  ;;  %v6068_v8 = vpop.f32.mrb[131].mxu0  ;;  %v6484_v19 = vsel %vm6420_vm13, %v6388_v24, %v6452_v62  ;;  %vm6422_vm15 = vcmp.gt.f32.partialorder %v6390_v15, 0.0  ;;  %v6364_v22 = vadd.f32 %v6302_v34, %v12768_v51 }
 0xa15   :  { %v6391_v12 = vadd.f32 %v6359_v57, %v6068_v8  ;;  %8642 = vmatmul.mubr.msk.f32.gmra.mrb[106].mxu1 %vm5779_vm0, %v6482_v61  ;;  %v6485_v39 = vsel %vm6421_vm14, %v6389_v35, %v6453_v47  ;;  %v6306_v59 = vrot.slane %v6255_v63, %v13853_v7  ;;  %v6263_v44 = vcombine.high %v6241_v21, %v6241_v21 }
 0xa16   :  { %8644 = vmatprep.mubr.msk.f32.mxu1 %vm5779_vm0, %v6483_v26  ;;  %v6363_v46 = vadd.f32 %v6302_v34, %v12770_v48  ;;  %v6232_v33 = vrot.slane %v6218_v1, %v13852_v53  ;;  %v6456_v24 = vmul.f32 0.2, %v6392_v9  ;;  %v6486_v16 = vsel %vm6422_vm15, %v6390_v15, %v6454_v10 }
 0xa17   :  { %v8599_v31 = vpop.f32.mrb[132].mxu0  ;;  %v6455_v52 = vmul.f32 0.2, %v6391_v12  ;;  %vm6423_vm2 = vcmp.gt.f32.partialorder %v6391_v12, 0.0  ;;  %vm6424_vm3 = vcmp.gt.f32.partialorder %v6392_v9, 0.0  ;;  %v6366_v4 = vadd.f32 %v6306_v59, %v12768_v51 }
 0xa18   :  { %v6394_v49 = vadd.f32 %v8599_v31, %v6362_v13  ;;  %v6078_v40 = vpop.f32.mrb[133].mxu0  ;;  %v6310_v25 = vrot.slane %v6263_v44, %v13853_v7  ;;  %v6265_v11 = vcombine.high %v6255_v63, %v6255_v63  ;;  %v6365_v42 = vadd.f32 %v6306_v59, %v12770_v48 }
 0xa19   :  { %v6393_v20 = vadd.f32 %v6361_v43, %v6078_v40  ;;  %8645 = vmatmul.mubr.msk.f32.gmra.mrb[108].mxu1 %vm5779_vm0, %v6484_v19  ;;  %v6487_v27 = vsel %vm6423_vm2, %v6391_v12, %v6455_v52  ;;  %v6234_v50 = vcombine.high %v6232_v33, %v6232_v33  ;;  %v6488_v14 = vsel %vm6424_vm3, %v6392_v9, %v6456_v24 }
 0xa1a   :  { %8647 = vmatprep.mubr.msk.f32.mxu1 %vm5779_vm0, %v6485_v39  ;;  %v6458_v15 = vmul.f32 0.2, %v6394_v49  ;;  %vm6426_vm12 = vcmp.gt.f32.partialorder %v6394_v49, 0.0  ;;  %v6368_v56 = vadd.f32 %v6310_v25, %v12768_v51  ;;  %v6314_v29 = vrot.slane %v6265_v11, %v13853_v7 }
 0xa1b   :  { %v8602_v6 = vpop.f32.mrb[134].mxu0  ;;  %v6457_v28 = vmul.f32 0.2, %v6393_v20  ;;  %vm6425_vm11 = vcmp.gt.f32.partialorder %v6393_v20, 0.0  ;;  %v6248_v5 = vrot.slane %v6232_v33, %v13852_v53  ;;  %v6367_v62 = vadd.f32 %v6310_v25, %v12770_v48 }
 0xa1c   :  { %v6396_v41 = vadd.f32 %v8602_v6, %v6364_v22  ;;  %v6088_v45 = vpop.f32.mrb[135].mxu0  ;;  %v6490_v47 = vsel %vm6426_vm12, %v6394_v49, %v6458_v15  ;;  %v6370_v34 = vadd.f32 %v6314_v29, %v12768_v51  ;;  %v6262_v31 = vrot.slane %v6234_v50, %v13852_v53 }
 0xa1d   :  { %v6395_v30 = vadd.f32 %v6363_v46, %v6088_v45  ;;  %8648 = vmatmul.mubr.msk.f32.gmra.mrb[110].mxu1 %vm5779_vm0, %v6486_v16  ;;  %v6489_v21 = vsel %vm6425_vm11, %v6393_v20, %v6457_v28  ;;  %v6318_v63 = vrot.slane %v6248_v5, %v13853_v7  ;;  %v6369_v1 = vadd.f32 %v6314_v29, %v12770_v48 }
 0xa1e   :  { %8650 = vmatprep.mubr.msk.f32.mxu1 %vm5779_vm0, %v6487_v27  ;;  %v6460_v9 = vmul.f32 0.2, %v6396_v41  ;;  %vm6428_vm13 = vcmp.gt.f32.partialorder %v6396_v41, 0.0  ;;  %v6322_v53 = vrot.slane %v6262_v31, %v13853_v7  ;;  %v6264_v59 = vcombine.high %v6248_v5, %v6248_v5 }
 0xa1f   :  { %v8605_v23 = vpop.f32.mrb[136].mxu0  ;;  %v6459_v35 = vmul.f32 0.2, %v6395_v30  ;;  %vm6427_vm1 = vcmp.gt.f32.partialorder %v6395_v30, 0.0  ;;  %v6372_v22 = vadd.f32 %v6318_v63, %v12768_v51  ;;  %v6371_v6 = vadd.f32 %v6318_v63, %v12770_v48 }
 0xa20   :  { %v6398_v54 = vadd.f32 %v8605_v23, %v6366_v4  ;;  %v6098_v0 = vpop.f32.mrb[137].mxu0  ;;  %v6492_v19 = vsel %vm6428_vm13, %v6396_v41, %v6460_v9  ;;  %v6326_v27 = vrot.slane %v6264_v59, %v13853_v7  ;;  %v6266_v4 = vcombine.high %v6262_v31, %v6262_v31 }
 0xa21   :  { %v6397_v17 = vadd.f32 %v6365_v42, %v6098_v0  ;;  %8651 = vmatmul.mubr.msk.f32.gmra.mrb[112].mxu1 %vm5779_vm0, %v6488_v14  ;;  %v6491_v13 = vsel %vm6427_vm1, %v6395_v30, %v6459_v35  ;;  %v6374_v30 = vadd.f32 %v6322_v53, %v12768_v51  ;;  %v6373_v11 = vadd.f32 %v6322_v53, %v12770_v48 }
 0xa22   :  { %8653 = vmatprep.mubr.msk.f32.mxu1 %vm5779_vm0, %v6489_v21  ;;  %v6462_v10 = vmul.f32 0.2, %v6398_v54  ;;  %vm6430_vm15 = vcmp.gt.f32.partialorder %v6398_v54, 0.0  ;;  %v6376_v35 = vadd.f32 %v6326_v27, %v12768_v51 }
 0xa23   :  { %v8608_v57 = vpop.f32.mrb[138].mxu0  ;;  %v6461_v12 = vmul.f32 0.2, %v6397_v17  ;;  %vm6429_vm14 = vcmp.gt.f32.partialorder %v6397_v17, 0.0 }
 0xa24   :  { %v6400_v8 = vadd.f32 %v8608_v57, %v6368_v56  ;;  %v6108_v61 = vpop.f32.mrb[139].mxu0  ;;  %v6494_v41 = vsel %vm6430_vm15, %v6398_v54, %v6462_v10  ;;  %v6375_v56 = vadd.f32 %v6326_v27, %v12770_v48 }
 0xa25   :  { %v6399_v26 = vadd.f32 %v6367_v62, %v6108_v61  ;;  %8654 = vmatmul.mubr.msk.f32.gmra.mrb[114].mxu1 %vm5779_vm0, %v6490_v47  ;;  %v6493_v39 = vsel %vm6429_vm14, %v6397_v17, %v6461_v12  ;;  %v6330_v17 = vrot.slane %v6266_v4, %v13853_v7 }
 0xa26   :  { %8656 = vmatprep.mubr.msk.f32.mxu1 %vm5779_vm0, %v6491_v13  ;;  %v6464_v46 = vmul.f32 0.2, %v6400_v8  ;;  %vm6432_vm3 = vcmp.gt.f32.partialorder %v6400_v8, 0.0 }
 0xa27   :  { %v8611_v43 = vpop.f32.mrb[140].mxu0  ;;  %v6463_v52 = vmul.f32 0.2, %v6399_v26  ;;  %vm6431_vm2 = vcmp.gt.f32.partialorder %v6399_v26, 0.0  ;;  %v6378_v47 = vadd.f32 %v6330_v17, %v12768_v51  ;;  %v6377_v7 = vadd.f32 %v6330_v17, %v12770_v48 }
 0xa28   :  { %v6402_v49 = vadd.f32 %v8611_v43, %v6370_v34  ;;  %v6118_v40 = vpop.f32.mrb[141].mxu0  ;;  %v6496_v15 = vsel %vm6432_vm3, %v6400_v8, %v6464_v46 }
 0xa29   :  { %v6401_v20 = vadd.f32 %v6369_v1, %v6118_v40  ;;  %8657 = vmatmul.mubr.msk.f32.gmra.mrb[116].mxu1 %vm5779_vm0, %v6492_v19  ;;  %v6495_v28 = vsel %vm6431_vm2, %v6399_v26, %v6463_v52 }
 0xa2a   :  { %8659 = vmatprep.mubr.msk.f32.mxu1 %vm5779_vm0, %v6493_v39  ;;  %v6466_v23 = vmul.f32 0.2, %v6402_v49  ;;  %vm6434_vm12 = vcmp.gt.f32.partialorder %v6402_v49, 0.0 }
 0xa2b   :  { %v8614_v44 = vpop.f32.mrb[142].mxu0  ;;  %v6465_v45 = vmul.f32 0.2, %v6401_v20  ;;  %vm6433_vm11 = vcmp.gt.f32.partialorder %v6401_v20, 0.0 }
 0xa2c   :  { %v6404_v33 = vadd.f32 %v8614_v44, %v6372_v22  ;;  %v6128_v24 = vpop.f32.mrb[143].mxu0  ;;  %v6498_v62 = vsel %vm6434_vm12, %v6402_v49, %v6466_v23  ;;  %v13925_v23 = vld [vmem:[#allocation88_spill] sm:$0xff] }
 0xa2d   :  { %v6403_v16 = vadd.f32 %v6371_v6, %v6128_v24  ;;  %8660 = vmatmul.mubr.msk.f32.gmra.mrb[118].mxu1 %vm5779_vm0, %v6494_v41  ;;  %v6497_v14 = vsel %vm6433_vm11, %v6401_v20, %v6465_v45 }
 0xa2e   :  { %8662 = vmatprep.mubr.msk.f32.mxu1 %vm5779_vm0, %v6495_v28  ;;  %v6468_v29 = vmul.f32 0.2, %v6404_v33  ;;  %vm6436_vm13 = vcmp.gt.f32.partialorder %v6404_v33, 0.0  ;;  %v13924_v28 = vld [vmem:[#allocation85_spill] sm:$0xff] }
 0xa2f   :  { %v8617_v25 = vpop.f32.mrb[144].mxu0  ;;  %v6467_v54 = vmul.f32 0.2, %v6403_v16  ;;  %vm6435_vm1 = vcmp.gt.f32.partialorder %v6403_v16, 0.0 }
 0xa30   :  { %v6406_v42 = vadd.f32 %v8617_v25, %v6374_v30  ;;  %v6138_v50 = vpop.f32.mrb[145].mxu0  ;;  %v6500_v63 = vsel %vm6436_vm13, %v6404_v33, %v6468_v29 }
 0xa31   :  { %v6405_v0 = vadd.f32 %v6373_v11, %v6138_v50  ;;  %8663 = vmatmul.mubr.msk.f32.gmra.mrb[120].mxu1 %vm5779_vm0, %v6496_v15  ;;  %v6499_v61 = vsel %vm6435_vm1, %v6403_v16, %v6467_v54  ;;  %v13926_v15 = vld [vmem:[#allocation86_spill] sm:$0xff] }
 0xa32   :  { %8665 = vmatprep.mubr.msk.f32.mxu1 %vm5779_vm0, %v6497_v14  ;;  %v6470_v26 = vmul.f32 0.2, %v6406_v42  ;;  %vm6438_vm15 = vcmp.gt.f32.partialorder %v6406_v42, 0.0 }
 0xa33   :  { %v8620_v21 = vpop.f32.mrb[146].mxu0  ;;  %v6469_v9 = vmul.f32 0.2, %v6405_v0  ;;  %vm6437_vm14 = vcmp.gt.f32.partialorder %v6405_v0, 0.0 }
 0xa34   :  { %v6408_v5 = vadd.f32 %v8620_v21, %v6376_v35  ;;  %v6148_v57 = vpop.f32.mrb[147].mxu0  ;;  %v6502_v49 = vsel %vm6438_vm15, %v6406_v42, %v6470_v26 }
 0xa35   :  { %v6407_v8 = vadd.f32 %v6375_v56, %v6148_v57  ;;  %8666 = vmatmul.mubr.msk.f32.gmra.mrb[122].mxu1 %vm5779_vm0, %v6498_v62  ;;  %v6501_v1 = vsel %vm6437_vm14, %v6405_v0, %v6469_v9  ;;  %v13928_v9 = vld [vmem:[#allocation91_spill] sm:$0xff] }
 0xa36   :  { %8668 = vmatprep.mubr.msk.f32.mxu1 %vm5779_vm0, %v6499_v61  ;;  %v6472_v10 = vmul.f32 0.2, %v6408_v5  ;;  %vm6440_vm3 = vcmp.gt.f32.partialorder %v6408_v5, 0.0 }
 0xa37   :  { %v8623_v12 = vpop.f32.mrb[148].mxu0  ;;  %v6471_v31 = vmul.f32 0.2, %v6407_v8  ;;  %vm6439_vm2 = vcmp.gt.f32.partialorder %v6407_v8, 0.0 }
 0xa38   :  { %v6410_v13 = vadd.f32 %v8623_v12, %v6378_v47  ;;  %v6158_v34 = vpop.f32.mrb[149].mxu0  ;;  %v6504_v20 = vsel %vm6440_vm3, %v6408_v5, %v6472_v10  ;;  %v13927_v5 = vld [vmem:[#allocation92_spill] sm:$0xff]  ;;  %v13929_v10 = vld [vmem:[#allocation94_spill] sm:$0xff] }
 0xa39   :  { %v6409_v43 = vadd.f32 %v6377_v7, %v6158_v34  ;;  %8669 = vmatmul.mubr.msk.f32.gmra.mrb[124].mxu1 %vm5779_vm0, %v6500_v63  ;;  %v6503_v19 = vsel %vm6439_vm2, %v6407_v8, %v6471_v31 }
 0xa3a   :  { %8671 = vmatprep.mubr.msk.f32.mxu1 %vm5779_vm0, %v6501_v1  ;;  %v6474_v52 = vmul.f32 0.2, %v6410_v13  ;;  %vm6442_vm12 = vcmp.gt.f32.partialorder %v6410_v13, 0.0 }
 0xa3b   :  { %v6473_v40 = vmul.f32 0.2, %v6409_v43  ;;  %vm6441_vm11 = vcmp.gt.f32.partialorder %v6409_v43, 0.0 }
 0xa3c   :  { %v6506_v22 = vsel %vm6442_vm12, %v6410_v13, %v6474_v52 }
 0xa3d   :  { %8672 = vmatmul.mubr.msk.f32.gmra.mrb[126].mxu1 %vm5779_vm0, %v6502_v49  ;;  %v6505_v39 = vsel %vm6441_vm11, %v6409_v43, %v6473_v40  ;;  %v13930_v40 = vld [vmem:[#allocation93_spill] sm:$0xff] }
 0xa3e   :  { %8674 = vmatprep.mubr.msk.f32.mxu1 %vm5779_vm0, %v6503_v19 }
 0xa41   :  { %8675 = vmatmul.mubr.msk.f32.gmra.mrb[128].mxu1 %vm5779_vm0, %v6504_v20 }
 0xa42   :  { %8677 = vmatprep.mubr.msk.f32.mxu1 %vm5779_vm0, %v6505_v39 }
 0xa45   :  { %8678 = vmatmul.mubr.msk.f32.gmra.mrb[130].mxu1 %vm5779_vm0, %v6506_v22 }
 0xadc   :  { %v8634_v53 = vpop.f32.mrb[100].mxu1 }
 0xadd   :  { %v6829_v59 = vadd.f32 %v8634_v53, %v13854_v36  ;;  %v6669_v44 = vpop.f32.mrb[101].mxu1 }
 0xade   :  { %v6828_v6 = vadd.f32 %v6669_v44, %v13855_v32 }
 0xadf   :  { %v6861_v46 = vsel %vm5779_vm0, %v6829_v59, -inf }
 0xae0   :  { %v6860_v33 = vsel %vm5779_vm0, %v6828_v6, -inf  ;;  %v8637_v24 = vpop.f32.mrb[102].mxu1 }
 0xae1   :  { %v6862_v41 = vmax.f32 %v6860_v33, %v6861_v46  ;;  %v12885_v45 = vadd.f32 %v8637_v24, %v13856_v37  ;;  %v6679_v16 = vpop.f32.mrb[103].mxu1 }
 0xae2   :  { %v6830_v30 = vadd.f32 %v6679_v16, %v13924_v28 }
 0xae3   :  { %v6863_v27 = vrot.slane %v6862_v41, 4  ;;  %v6870_v4 = vsel %vm5779_vm0, %v12885_v45, -inf }
 0xae4   :  { %v6869_v36 = vsel %vm5779_vm0, %v6830_v30, -inf  ;;  %v8640_v25 = vpop.f32.mrb[104].mxu1 }
 0xae5   :  { %v6864_v32 = vmax.f32 %v6862_v41, %v6863_v27  ;;  %v6871_v11 = vmax.f32 %v6869_v36, %v6870_v4  ;;  %v12892_v42 = vadd.f32 %v8640_v25, %v13925_v23  ;;  %v6689_v50 = vpop.f32.mrb[105].mxu1  ;;  %v13931_v25 = vld [vmem:[#allocation96_spill] sm:$0xff] }
 0xae6   :  { %v12895_v54 = vadd.f32 %v6689_v50, %v13926_v15 }
 0xae7   :  { %v6865_v37 = vrot.slane %v6864_v32, 2  ;;  %v6872_v0 = vrot.slane %v6871_v11, 4  ;;  %v6879_v14 = vsel %vm5779_vm0, %v12892_v42, -inf }
 0xae8   :  { %v6878_v35 = vsel %vm5779_vm0, %v12895_v54, -inf  ;;  %v8643_v17 = vpop.f32.mrb[106].mxu1 }
 0xae9   :  { %v6866_v21 = vmax.f32 %v6864_v32, %v6865_v37  ;;  %v6873_v56 = vmax.f32 %v6871_v11, %v6872_v0  ;;  %v6880_v29 = vmax.f32 %v6878_v35, %v6879_v14  ;;  %v12902_v57 = vadd.f32 %v8643_v17, %v13927_v5  ;;  %v6699_v62 = vpop.f32.mrb[107].mxu1 }
 0xaea   :  { %v12905_v8 = vadd.f32 %v6699_v62, %v13928_v9  ;;  %v13933_v9 = vld [vmem:[#allocation98_spill] sm:$0xff] }
 0xaeb   :  { %v6867_v61 = vrot.slane %v6866_v21, 1  ;;  %v6874_v47 = vrot.slane %v6873_v56, 2  ;;  %v6881_v12 = vrot.slane %v6880_v29, 4  ;;  %v6888_v7 = vsel %vm5779_vm0, %v12902_v57, -inf }
 0xaec   :  { %v6887_v26 = vsel %vm5779_vm0, %v12905_v8, -inf  ;;  %v8646_v13 = vpop.f32.mrb[108].mxu1 }
 0xaed   :  { %v6868_v34 = vmax.f32 %v6866_v21, %v6867_v61  ;;  %v6875_v63 = vmax.f32 %v6873_v56, %v6874_v47  ;;  %v6882_v31 = vmax.f32 %v6880_v29, %v6881_v12  ;;  %v6889_v43 = vmax.f32 %v6887_v26, %v6888_v7  ;;  %v6709_v1 = vpop.f32.mrb[109].mxu1  ;;  %v13934_v12 = vld [vmem:[#allocation97_spill] sm:$0xff] }
 0xaee   :  { %v12912_v49 = vadd.f32 %v8646_v13, %v13929_v10  ;;  %v12915_v19 = vadd.f32 %v6709_v1, %v13930_v40 }
 0xaef   :  { %v7004_v52 = vsub.f32 %v6828_v6, %v6868_v34  ;;  %v7005_v20 = vsub.f32 %v6829_v59, %v6868_v34  ;;  %v6876_v39 = vrot.slane %v6875_v63, 1  ;;  %v6883_v22 = vrot.slane %v6882_v31, 2  ;;  %v13932_v59 = vld [vmem:[#allocation95_spill] sm:$0xff] }
 0xaf0   :  { %v6890_v53 = vrot.slane %v6889_v43, 4  ;;  %v6897_v44 = vsel %vm5779_vm0, %v12912_v49, -inf  ;;  %v6896_v46 = vsel %vm5779_vm0, %v12915_v19, -inf  ;;  %v8649_v33 = vpop.f32.mrb[110].mxu1 }
 0xaf1   :  { %v7036_v24 = vmul.f32 1.442695, %v7004_v52  ;;  %v7038_v41 = vmul.f32 1.442695, %v7005_v20  ;;  %v6877_v16 = vmax.f32 %v6875_v63, %v6876_v39  ;;  %v6884_v28 = vmax.f32 %v6882_v31, %v6883_v22  ;;  %v6719_v27 = vpop.f32.mrb[111].mxu1  ;;  %v13935_v20 = vld [vmem:[#allocation100_spill] sm:$0xff] }
 0xaf2   :  { %v6891_v4 = vmax.f32 %v6889_v43, %v6890_v53  ;;  %v6898_v36 = vmax.f32 %v6896_v46, %v6897_v44  ;;  %v12922_v6 = vadd.f32 %v8649_v33, %v13931_v25  ;;  %v12925_v32 = vadd.f32 %v6719_v27, %v13932_v59  ;;  %v13936_v22 = vld [vmem:[#allocation99_spill] sm:$0xff] }
 0xaf3   :  { %9334 = vpow2.f32 %v7036_v24  ;;  %v7006_v11 = vsub.f32 %v6830_v30, %v6877_v16  ;;  %v7007_v23 = vsub.f32 %v12885_v45, %v6877_v16  ;;  %v6885_v50 = vrot.slane %v6884_v28, 1 }
 0xaf4   :  { %9336 = vpow2.f32 %v7038_v41  ;;  %v6892_v15 = vrot.slane %v6891_v4, 2  ;;  %v6899_v37 = vrot.slane %v6898_v36, 4  ;;  %v6906_v0 = vsel %vm5779_vm0, %v12922_v6, -inf  ;;  %v8652_v14 = vpop.f32.mrb[112].mxu1 }
 0xaf5   :  { %v7040_v35 = vmul.f32 1.442695, %v7006_v11  ;;  %v7042_v17 = vmul.f32 1.442695, %v7007_v23  ;;  %v6886_v21 = vmax.f32 %v6884_v28, %v6885_v50  ;;  %v6905_v56 = vsel %vm5779_vm0, %v12925_v32, -inf  ;;  %v6729_v29 = vpop.f32.mrb[113].mxu1 }
 0xaf6   :  { %v6893_v5 = vmax.f32 %v6891_v4, %v6892_v15  ;;  %v6900_v62 = vmax.f32 %v6898_v36, %v6899_v37  ;;  %v6907_v30 = vmax.f32 %v6905_v56, %v6906_v0  ;;  %v12933_v45 = vadd.f32 %v8652_v14, %v13933_v9  ;;  %v13937_v36 = vld [vmem:[#allocation126_spill] sm:$0xff]  ;;  %v13938_v23 = vld [vmem:[#allocation127_spill] sm:$0xff] }
 0xaf7   :  { %9338 = vpow2.f32 %v7040_v35  ;;  %v7008_v61 = vsub.f32 %v12895_v54, %v6886_v21  ;;  %v7009_v47 = vsub.f32 %v12892_v42, %v6886_v21  ;;  %v12938_v7 = vadd.f32 %v6729_v29, %v13934_v12 }
 0xaf8   :  { %9340 = vpow2.f32 %v7042_v17  ;;  %v6894_v26 = vrot.slane %v6893_v5, 1  ;;  %v6901_v13 = vrot.slane %v6900_v62, 2  ;;  %v8655_v34 = vpop.f32.mrb[114].mxu1  ;;  %v6915_v43 = vsel %vm5779_vm0, %v12933_v45, -inf }
 0xaf9   :  { %v7044_v63 = vmul.f32 1.442695, %v7008_v61  ;;  %v7046_v31 = vmul.f32 1.442695, %v7009_v47  ;;  %v6914_v1 = vsel %vm5779_vm0, %v12938_v7, -inf  ;;  %v6739_v42 = vpop.f32.mrb[115].mxu1  ;;  %v12947_v39 = vadd.f32 %v8655_v34, %v13935_v20 }
 0xafa   :  { %v6895_v10 = vmax.f32 %v6893_v5, %v6894_v26  ;;  %v6902_v40 = vmax.f32 %v6900_v62, %v6901_v13  ;;  %v12944_v54 = vmax.f32 %v6914_v1, %v6915_v43  ;;  %v6908_v52 = vrot.slane %v6907_v30, 4  ;;  %v13939_v61 = vld [vmem:[#allocation121_spill] sm:$0xff]  ;;  %v13940_v26 = vld [vmem:[#allocation122_spill] sm:$0xff] }
 0xafb   :  { %9342 = vpow2.f32 %v7044_v63  ;;  %v12950_v53 = vadd.f32 %v6739_v42, %v13936_v22  ;;  %v6924_v16 = vsel %vm5779_vm0, %v12947_v39, -inf }
 0xafc   :  { %9344 = vpow2.f32 %v7046_v31  ;;  %v7010_v44 = vsub.f32 %v12905_v8, %v6895_v10  ;;  %v7011_v46 = vsub.f32 %v12902_v57, %v6895_v10  ;;  %v6903_v33 = vrot.slane %v6902_v40, 1  ;;  %v12954_v24 = vpop.f32.mrb[116].mxu1 }
 0xafd   :  { %v9335_v41 = vpop.eup %9334  ;;  %v6923_v28 = vsel %vm5779_vm0, %v12950_v53, -inf  ;;  %v12960_v27 = vpop.f32.mrb[117].mxu1  ;;  %v6909_v50 = vmax.f32 %v6907_v30, %v6908_v52 }
 0xafe   :  { %v9337_v4 = vpop.eup %9336  ;;  %v7100_v25 = vmul.f32 %v9335_v41, %v13937_v36  ;;  %v7048_v59 = vmul.f32 1.442695, %v7010_v44  ;;  %v7050_v11 = vmul.f32 1.442695, %v7011_v46  ;;  %v6904_v8 = vmax.f32 %v6902_v40, %v6903_v33  ;;  %v13942_v36 = vld [vmem:[#allocation124_spill] sm:$0xff] }
 0xaff   :  { %v7101_v57 = vmul.f32 %v9337_v4, %v13938_v23  ;;  %v12964_v15 = vmax.f32 %v6923_v28, %v6924_v16  ;;  %v6910_v52 = vrot.slane %v6909_v50, 2  ;;  %v13941_v28 = vld [vmem:[#allocation123_spill] sm:$0xff] }
 0xb00   :  { %v7132_v37 = vsel %vm5779_vm0, %v7100_v25, 0.0  ;;  %v7308_v0 = vmul.f32 %v7100_v25, %v12770_v48  ;;  %9346 = vpow2.f32 %v7048_v59  ;;  %v7012_v14 = vsub.f32 %v12915_v19, %v6904_v8  ;;  %v12969_v35 = vpop.f32.mrb[118].mxu1 }
 0xb01   :  { %v9339_v17 = vpop.eup %9338  ;;  %v7133_v21 = vsel %vm5779_vm0, %v7101_v57, 0.0  ;;  %v7309_v56 = vmul.f32 %v7101_v57, %v12768_v51  ;;  %9348 = vpow2.f32 %v7050_v11  ;;  %v7013_v29 = vsub.f32 %v12912_v49, %v6904_v8  ;;  %v12974_v5 = vpop.f32.mrb[119].mxu1 }
 0xb02   :  { %v9341_v62 = vpop.eup %9340  ;;  %v7134_v30 = vadd.f32 %v7133_v21, %v7132_v37  ;;  %v7340_v9 = vsel %vm5779_vm0, %v7308_v0, 0.0  ;;  %v7102_v47 = vmul.f32 %v9339_v17, %v13939_v61  ;;  %v7052_v12 = vmul.f32 1.442695, %v7012_v14 }
 0xb03   :  { %v7341_v19 = vsel %vm5779_vm0, %v7309_v56, 0.0  ;;  %v7103_v13 = vmul.f32 %v9341_v62, %v13940_v26  ;;  %v7054_v34 = vmul.f32 1.442695, %v7013_v29 }
 0xb04   :  { %v7135_v63 = vrot.slane %v7134_v30, 4  ;;  %v7342_v31 = vadd.f32 %v7341_v19, %v7340_v9  ;;  %v7141_v43 = vsel %vm5779_vm0, %v7102_v47, 0.0  ;;  %v7310_v49 = vmul.f32 %v7102_v47, %v12770_v48  ;;  %v12982_v1 = vpop.f32.mrb[120].mxu1  ;;  %v13943_v19 = vld [vmem:[#allocation134_spill] sm:$0xff] }
 0xb05   :  { %v9343_v10 = vpop.eup %9342  ;;  %v7142_v40 = vsel %vm5779_vm0, %v7103_v13, 0.0  ;;  %v7311_v42 = vmul.f32 %v7103_v13, %v12768_v51  ;;  %v12986_v20 = vpop.f32.mrb[121].mxu1  ;;  %9350 = vpow2.f32 %v7052_v12 }
 0xb06   :  { %v9345_v22 = vpop.eup %9344  ;;  %v7136_v44 = vadd.f32 %v7135_v63, %v7134_v30  ;;  %v7143_v46 = vadd.f32 %v7142_v40, %v7141_v43  ;;  %v7349_v33 = vsel %vm5779_vm0, %v7310_v49, 0.0  ;;  %v7343_v41 = vrot.slane %v7342_v31, 4 }
 0xb07   :  { %v7350_v16 = vsel %vm5779_vm0, %v7311_v42, 0.0  ;;  %v7104_v4 = vmul.f32 %v9343_v10, %v13941_v28  ;;  %v7105_v25 = vmul.f32 %v9345_v22, %v13942_v36  ;;  %9352 = vpow2.f32 %v7054_v34  ;;  %v13944_v42 = vld [vmem:[#allocation136_spill] sm:$0xff] }
 0xb08   :  { %v7137_v59 = vrot.slane %v7136_v44, 2  ;;  %v7144_v11 = vrot.slane %v7143_v46, 4  ;;  %v7351_v8 = vadd.f32 %v7350_v16, %v7349_v33  ;;  %v12992_v23 = vpop.f32.mrb[122].mxu1  ;;  %v6911_v30 = vmax.f32 %v6909_v50, %v6910_v52 }
 0xb09   :  { %v7150_v57 = vsel %vm5779_vm0, %v7104_v4, 0.0  ;;  %v7151_v37 = vsel %vm5779_vm0, %v7105_v25, 0.0  ;;  %v7312_v0 = vmul.f32 %v7104_v4, %v12770_v48  ;;  %v7313_v14 = vmul.f32 %v7105_v25, %v12768_v51  ;;  %v12998_v17 = vpop.f32.mrb[123].mxu1 }
 0xb0a   :  { %v9347_v21 = vpop.eup %9346  ;;  %v7138_v56 = vadd.f32 %v7137_v59, %v7136_v44  ;;  %v7145_v29 = vadd.f32 %v7144_v11, %v7143_v46  ;;  %v7352_v62 = vrot.slane %v7351_v8, 4  ;;  %v7152_v61 = vadd.f32 %v7151_v37, %v7150_v57 }
 0xb0b   :  { %v9349_v9 = vpop.eup %9348  ;;  %v7358_v47 = vsel %vm5779_vm0, %v7312_v0, 0.0  ;;  %v7359_v12 = vsel %vm5779_vm0, %v7313_v14, 0.0  ;;  %v7106_v26 = vmul.f32 %v9347_v21, %v13943_v19  ;;  %v7344_v34 = vadd.f32 %v7343_v41, %v7342_v31 }
 0xb0c   :  { %v7139_v13 = vrot.slane %v7138_v56, 1  ;;  %v7146_v63 = vrot.slane %v7145_v29, 2  ;;  %v6917_v43 = vrot.slane %v12944_v54, 4  ;;  %v13004_v49 = vpop.f32.mrb[124].mxu1  ;;  %v7153_v10 = vrot.slane %v7152_v61, 4 }
 0xb0d   :  { %v7360_v40 = vadd.f32 %v7359_v12, %v7358_v47  ;;  %v7107_v22 = vmul.f32 %v9349_v9, %v13944_v42  ;;  %v13007_v50 = vpop.f32.mrb[125].mxu1  ;;  %v7353_v44 = vadd.f32 %v7352_v62, %v7351_v8  ;;  %v7159_v46 = vsel %vm5779_vm0, %v7106_v26, 0.0 }
 0xb0e   :  { %v7147_v52 = vadd.f32 %v7146_v63, %v7145_v29  ;;  %v6912_v33 = vrot.slane %v6911_v30, 1  ;;  %v7154_v16 = vadd.f32 %v7153_v10, %v7152_v61  ;;  %v7314_v41 = vmul.f32 %v7106_v26, %v12770_v48 }
 0xb0f   :  { %v7361_v28 = vrot.slane %v7360_v40, 4  ;;  %v7160_v31 = vsel %vm5779_vm0, %v7107_v22, 0.0  ;;  %v9351_v4 = vpop.eup %9350  ;;  %v7140_v36 = vadd.f32 %v7139_v13, %v7138_v56  ;;  %v7345_v25 = vrot.slane %v7344_v34, 2 }
 0xb10   :  { %v7148_v59 = vrot.slane %v7147_v52, 1  ;;  %v6918_v11 = vmax.f32 %v12944_v54, %v6917_v43  ;;  %v13013_v57 = vpop.f32.mrb[126].mxu1  ;;  %v7155_v37 = vrot.slane %v7154_v16, 2  ;;  %v7161_v8 = vadd.f32 %v7160_v31, %v7159_v46  ;;  %v13945_v43 = vld [vmem:[#allocation138_spill] sm:$0xff] }
 0xb11   :  { %v7362_v0 = vadd.f32 %v7361_v28, %v7360_v40  ;;  %v7315_v14 = vmul.f32 %v7107_v22, %v12768_v51  ;;  %v13016_v21 = vpop.f32.mrb[127].mxu1  ;;  %v9353_v29 = vpop.eup %9352  ;;  %v7354_v9 = vrot.slane %v7353_v44, 2  ;;  %v7367_v61 = vsel %vm5779_vm0, %v7314_v41, 0.0 }
 0xb12   :  { %v7149_v62 = vadd.f32 %v7148_v59, %v7147_v52  ;;  %v6913_v47 = vmax.f32 %v6911_v30, %v6912_v33  ;;  %v7156_v56 = vadd.f32 %v7155_v37, %v7154_v16  ;;  %v7162_v19 = vrot.slane %v7161_v8, 4  ;;  %v13946_v52 = vld [vmem:[#allocation139_spill] sm:$0xff] }
 0xb13   :  { %v7363_v12 = vrot.slane %v7362_v0, 2  ;;  %v7368_v54 = vsel %vm5779_vm0, %v7315_v14, 0.0  ;;  %v7346_v26 = vadd.f32 %v7345_v25, %v7344_v34  ;;  %v7108_v10 = vmul.f32 %v9351_v4, %v13945_v43 }
 0xb14   :  { %v7277_v13 = vmax.f32 %v7149_v62, 1e-20  ;;  %v7369_v63 = vadd.f32 %v7368_v54, %v7367_v61  ;;  %v13021_v40 = vpop.f32.mrb[128].mxu1  ;;  %v7276_v42 = vmax.f32 %v7140_v36, 1e-20  ;;  %v7157_v22 = vrot.slane %v7156_v56, 1 }
 0xb15   :  { %v7163_v46 = vadd.f32 %v7162_v19, %v7161_v8  ;;  %v7109_v28 = vmul.f32 %v9353_v29, %v13946_v52  ;;  %v13024_v31 = vpop.f32.mrb[129].mxu1  ;;  %v7168_v33 = vsel %vm5779_vm0, %v7108_v10, 0.0  ;;  %v7316_v16 = vmul.f32 %v7108_v10, %v12770_v48 }
 0xb16   :  { %9354 = vrcp.f32 %v7277_v13  ;;  %v7370_v30 = vrot.slane %v7369_v63, 4  ;;  %v7355_v34 = vadd.f32 %v7354_v9, %v7353_v44  ;;  %v7364_v41 = vadd.f32 %v7363_v12, %v7362_v0 }
 0xb17   :  { %v7164_v25 = vrot.slane %v7163_v46, 2  ;;  %v7169_v4 = vsel %vm5779_vm0, %v7109_v28, 0.0  ;;  %v7317_v36 = vmul.f32 %v7109_v28, %v12768_v51  ;;  %v7376_v8 = vsel %vm5779_vm0, %v7316_v16, 0.0 }
 0xb18   :  { %v7371_v59 = vadd.f32 %v7370_v30, %v7369_v63  ;;  %v7170_v37 = vadd.f32 %v7169_v4, %v7168_v33  ;;  %v13031_v14 = vpop.f32.mrb[130].mxu1  ;;  %v7347_v29 = vrot.slane %v7346_v26, 1  ;;  %v7158_v62 = vadd.f32 %v7157_v22, %v7156_v56 }
 0xb19   :  { %v7165_v61 = vadd.f32 %v7164_v25, %v7163_v46  ;;  %v7014_v19 = vsub.f32 %v12925_v32, %v6913_v47  ;;  %v13034_v54 = vpop.f32.mrb[131].mxu1  ;;  %9356 = vrcp.f32 %v7276_v42  ;;  %v7377_v0 = vsel %vm5779_vm0, %v7317_v36, 0.0 }
 0xb1a   :  { %v7171_v44 = vrot.slane %v7170_v37, 4  ;;  %v7015_v9 = vsub.f32 %v12922_v6, %v6913_v47  ;;  %v7356_v12 = vrot.slane %v7355_v34, 1  ;;  %v7365_v13 = vrot.slane %v7364_v41, 1  ;;  %v13947_v47 = vld [vmem:[#allocation106_spill] sm:$0xff] }
 0xb1b   :  { %v7378_v63 = vadd.f32 %v7377_v0, %v7376_v8  ;;  %v7056_v43 = vmul.f32 1.442695, %v7014_v19  ;;  %v7372_v10 = vrot.slane %v7371_v59, 2  ;;  %v6919_v30 = vrot.slane %v6918_v11, 2 }
 0xb1c   :  { %v7172_v52 = vadd.f32 %v7171_v44, %v7170_v37  ;;  %v7058_v28 = vmul.f32 1.442695, %v7015_v9  ;;  %v7278_v56 = vmax.f32 %v7158_v62, 1e-20  ;;  %v7166_v22 = vrot.slane %v7165_v61, 1  ;;  %v13948_v62 = vld [vmem:[#allocation105_spill] sm:$0xff] }
 0xb1d   :  { %9358 = vpow2.f32 %v7056_v43  ;;  %v6926_v32 = vrot.slane %v12964_v15, 4  ;;  %v13039_v46 = vadd.f32 %v7347_v29, %v7346_v26  ;;  %v6920_v42 = vmax.f32 %v6918_v11, %v6919_v30  ;;  %v13949_v9 = vld [vmem:[#allocation102_spill] sm:$0xff] }
 0xb1e   :  { %9360 = vpow2.f32 %v7058_v28  ;;  %v7357_v33 = vadd.f32 %v7356_v12, %v7355_v34  ;;  %v7173_v16 = vrot.slane %v7172_v52, 2  ;;  %v13044_v25 = vadd.f32 %v12954_v24, %v13947_v47 }
 0xb1f   :  { %v6927_v6 = vmax.f32 %v12964_v15, %v6926_v32  ;;  %v13046_v37 = vadd.f32 %v7365_v13, %v7364_v41  ;;  %v13048_v36 = vadd.f32 %v7372_v10, %v7371_v59  ;;  %v6921_v8 = vrot.slane %v6920_v42, 1  ;;  %v13950_v10 = vld [vmem:[#allocation101_spill] sm:$0xff] }
 0xb20   :  { %v9355_v4 = vpop.eup %9354  ;;  %v13052_v26 = vadd.f32 %v12960_v27, %v13948_v62  ;;  %9362 = vrcp.f32 %v7278_v56  ;;  %v13056_v11 = vadd.f32 %v7166_v22, %v7165_v61  ;;  %v7379_v34 = vrot.slane %v7378_v63, 4  ;;  %v13951_v22 = vld [vmem:[#allocation104_spill] sm:$0xff]  ;;  %v13953_v62 = vld [vmem:[#allocation143_spill] sm:$0xff] }
 0xb21   :  { %v13054_v29 = vmul.f32 %v9355_v4, %v7357_v33  ;;  %v6928_v15 = vrot.slane %v6927_v6, 2  ;;  %v6922_v19 = vmax.f32 %v6920_v42, %v6921_v8  ;;  %v6933_v24 = vsel %vm5779_vm0, %v13044_v25, -inf }
 0xb22   :  { %v6932_v41 = vsel %vm5779_vm0, %v13052_v26, -inf  ;;  %v7174_v59 = vadd.f32 %v7173_v16, %v7172_v52  ;;  %v13064_v27 = vadd.f32 %v12969_v35, %v13949_v9  ;;  %v13073_v28 = vadd.f32 %v12974_v5, %v13950_v10 }
 0xb23   :  { %v6929_v44 = vmax.f32 %v6927_v6, %v6928_v15  ;;  %v6934_v0 = vmax.f32 %v6932_v41, %v6933_v24  ;;  %v13066_v12 = vpop.eup %9356  ;;  %v7016_v13 = vsub.f32 %v12938_v7, %v6922_v19  ;;  %v7017_v43 = vsub.f32 %v12933_v45, %v6922_v19  ;;  %v13952_v7 = vld [vmem:[#allocation103_spill] sm:$0xff]  ;;  %v13954_v19 = vld [vmem:[#allocation146_spill] sm:$0xff] }
 0xb24   :  { %v6942_v56 = vsel %vm5779_vm0, %v13064_v27, -inf  ;;  %v13079_v35 = vadd.f32 %v12982_v1, %v13951_v22  ;;  %v13081_v32 = vadd.f32 %v7379_v34, %v7378_v63  ;;  %v13085_v45 = vadd.f32 %v12986_v20, %v13952_v7 }
 0xb25   :  { %v6930_v30 = vrot.slane %v6929_v44, 1  ;;  %v6935_v52 = vrot.slane %v6934_v0, 4  ;;  %v7060_v42 = vmul.f32 1.442695, %v7016_v13  ;;  %v7062_v33 = vmul.f32 1.442695, %v7017_v43 }
 0xb26   :  { %v7175_v5 = vrot.slane %v7174_v59, 1  ;;  %v6941_v4 = vsel %vm5779_vm0, %v13073_v28, -inf  ;;  %v6951_v63 = vsel %vm5779_vm0, %v13079_v35, -inf  ;;  %v6950_v34 = vsel %vm5779_vm0, %v13085_v45, -inf }
 0xb27   :  { %v9359_v16 = vpop.eup %9358  ;;  %v6931_v6 = vmax.f32 %v6929_v44, %v6930_v30  ;;  %v6936_v47 = vmax.f32 %v6934_v0, %v6935_v52  ;;  %v6943_v1 = vmax.f32 %v6941_v4, %v6942_v56  ;;  %9364 = vpow2.f32 %v7060_v42 }
 0xb28   :  { %v9361_v8 = vpop.eup %9360  ;;  %v7110_v15 = vmul.f32 %v9359_v16, %v13953_v62  ;;  %9366 = vpow2.f32 %v7062_v33  ;;  %v6952_v7 = vmax.f32 %v6950_v34, %v6951_v63  ;;  %v13955_v16 = vld [vmem:[#allocation108_spill] sm:$0xff]  ;;  %v13109_v62 = vadd.f32 %v7175_v5, %v7174_v59 }
 0xb29   :  { %v7111_v20 = vmul.f32 %v9361_v8, %v13954_v19  ;;  %v7018_v24 = vsub.f32 %v12950_v53, %v6931_v6  ;;  %v7019_v41 = vsub.f32 %v12947_v39, %v6931_v6  ;;  %v6937_v9 = vrot.slane %v6936_v47, 2 }
 0xb2a   :  { %v7177_v44 = vsel %vm5779_vm0, %v7110_v15, 0.0  ;;  %v7318_v0 = vmul.f32 %v7110_v15, %v12770_v48  ;;  %v13099_v13 = vpop.eup %9362  ;;  %v6944_v42 = vrot.slane %v6943_v1, 4  ;;  %v13107_v33 = vadd.f32 %v12992_v23, %v13955_v16 }
 0xb2b   :  { %v7178_v43 = vsel %vm5779_vm0, %v7111_v20, 0.0  ;;  %v7319_v10 = vmul.f32 %v7111_v20, %v12768_v51  ;;  %v7064_v30 = vmul.f32 1.442695, %v7018_v24  ;;  %v7066_v52 = vmul.f32 1.442695, %v7019_v41  ;;  %v13956_v20 = vld [vmem:[#allocation107_spill] sm:$0xff] }
 0xb2c   :  { %v7179_v56 = vadd.f32 %v7178_v43, %v7177_v44  ;;  %v7385_v22 = vsel %vm5779_vm0, %v7318_v0, 0.0  ;;  %v6938_v53 = vmax.f32 %v6936_v47, %v6937_v9  ;;  %v6945_v15 = vmax.f32 %v6943_v1, %v6944_v42  ;;  %v13958_v42 = vld [vmem:[#allocation150_spill] sm:$0xff] }
 0xb2d   :  { %v7386_v39 = vsel %vm5779_vm0, %v7319_v10, 0.0  ;;  %9368 = vpow2.f32 %v7064_v30  ;;  %v6953_v19 = vrot.slane %v6952_v7, 4  ;;  %v13113_v47 = vadd.f32 %v12998_v17, %v13956_v20 }
 0xb2e   :  { %v7180_v6 = vrot.slane %v7179_v56, 4  ;;  %v7387_v4 = vadd.f32 %v7386_v39, %v7385_v22  ;;  %9370 = vpow2.f32 %v7066_v52  ;;  %v6939_v8 = vrot.slane %v6938_v53, 1  ;;  %v13957_v52 = vld [vmem:[#allocation110_spill] sm:$0xff] }
 0xb2f   :  { %v7279_v24 = vmax.f32 %v13056_v11, 1e-20  ;;  %v6960_v23 = vsel %vm5779_vm0, %v13107_v33, -inf  ;;  %v7381_v34 = vrot.slane %v13081_v32, 2  ;;  %v6946_v0 = vrot.slane %v6945_v15, 2 }
 0xb30   :  { %v7181_v41 = vadd.f32 %v7180_v6, %v7179_v56  ;;  %v6940_v63 = vmax.f32 %v6938_v53, %v6939_v8  ;;  %v7388_v44 = vrot.slane %v7387_v4, 4  ;;  %v6959_v59 = vsel %vm5779_vm0, %v13113_v47, -inf  ;;  %v13959_v6 = vld [vmem:[#allocation109_spill] sm:$0xff] }
 0xb31   :  { %v6954_v9 = vmax.f32 %v6952_v7, %v6953_v19  ;;  %v9365_v43 = vpop.eup %9364  ;;  %v7280_v11 = vmax.f32 %v13109_v62, 1e-20  ;;  %v6947_v10 = vmax.f32 %v6945_v15, %v6946_v0  ;;  %v13124_v30 = vmax.f32 %v6959_v59, %v6960_v23  ;;  %v13960_v7 = vld [vmem:[#allocation151_spill] sm:$0xff] }
 0xb32   :  { %v7182_v5 = vrot.slane %v7181_v41, 2  ;;  %v7020_v1 = vsub.f32 %v13052_v26, %v6940_v63  ;;  %v7021_v17 = vsub.f32 %v13044_v25, %v6940_v63  ;;  %v13128_v56 = vadd.f32 %v13004_v49, %v13957_v52  ;;  %v9367_v22 = vpop.eup %9366 }
 0xb33   :  { %v7112_v39 = vmul.f32 %v9365_v43, %v13958_v42  ;;  %v13133_v26 = vadd.f32 %v13007_v50, %v13959_v6  ;;  %v13135_v25 = vadd.f32 %v7388_v44, %v7387_v4  ;;  %v7113_v8 = vmul.f32 %v9367_v22, %v13960_v7  ;;  %v13962_v43 = vld [vmem:[#allocation159_spill] sm:$0xff] }
 0xb34   :  { %v7183_v53 = vadd.f32 %v7182_v5, %v7181_v41  ;;  %v7068_v16 = vmul.f32 1.442695, %v7020_v1  ;;  %v7070_v62 = vmul.f32 1.442695, %v7021_v17  ;;  %v6948_v15 = vrot.slane %v6947_v10, 1  ;;  %v13961_v5 = vld [vmem:[#allocation158_spill] sm:$0xff] }
 0xb35   :  { %v7186_v19 = vsel %vm5779_vm0, %v7112_v39, 0.0  ;;  %v7320_v49 = vmul.f32 %v7112_v39, %v12770_v48  ;;  %v6955_v20 = vrot.slane %v6954_v9, 2  ;;  %v7187_v63 = vsel %vm5779_vm0, %v7113_v8, 0.0 }
 0xb36   :  { %9372 = vpow2.f32 %v7068_v16  ;;  %v7321_v23 = vmul.f32 %v7113_v8, %v12768_v51  ;;  %v6949_v50 = vmax.f32 %v6947_v10, %v6948_v15  ;;  %v7184_v4 = vrot.slane %v7183_v53, 1 }
 0xb37   :  { %v9369_v41 = vpop.eup %9368  ;;  %9374 = vpow2.f32 %v7070_v62  ;;  %v7188_v44 = vadd.f32 %v7187_v63, %v7186_v19  ;;  %v7394_v59 = vsel %vm5779_vm0, %v7320_v49, 0.0  ;;  %v6956_v6 = vmax.f32 %v6954_v9, %v6955_v20 }
 0xb38   :  { %v9371_v0 = vpop.eup %9370  ;;  %v7114_v1 = vmul.f32 %v9369_v41, %v13961_v5  ;;  %v7395_v17 = vsel %vm5779_vm0, %v7321_v23, 0.0  ;;  %v7022_v22 = vsub.f32 %v13073_v28, %v6949_v50  ;;  %v7023_v42 = vsub.f32 %v13064_v27, %v6949_v50 }
 0xb39   :  { %v7115_v52 = vmul.f32 %v9371_v0, %v13962_v43  ;;  %v7189_v39 = vrot.slane %v7188_v44, 4  ;;  %v13148_v16 = vadd.f32 %v7395_v17, %v7394_v59  ;;  %v7185_v19 = vadd.f32 %v7184_v4, %v7183_v53 }
 0xb3a   :  { %v7195_v10 = vsel %vm5779_vm0, %v7114_v1, 0.0  ;;  %v7322_v8 = vmul.f32 %v7114_v1, %v12770_v48  ;;  %v7072_v15 = vmul.f32 1.442695, %v7022_v22  ;;  %v6969_v28 = vsel %vm5779_vm0, %v13128_v56, -inf }
 0xb3b   :  { %v7196_v7 = vsel %vm5779_vm0, %v7115_v52, 0.0  ;;  %v7323_v62 = vmul.f32 %v7115_v52, %v12768_v51  ;;  %v7190_v49 = vadd.f32 %v7189_v39, %v7188_v44  ;;  %v7074_v23 = vmul.f32 1.442695, %v7023_v42  ;;  %v13963_v52 = vld [vmem:[#allocation169_spill] sm:$0xff] }
 0xb3c   :  { %v7197_v41 = vadd.f32 %v7196_v7, %v7195_v10  ;;  %v7403_v27 = vsel %vm5779_vm0, %v7322_v8, 0.0  ;;  %9376 = vpow2.f32 %v7072_v15  ;;  %v6957_v0 = vrot.slane %v6956_v6, 1  ;;  %v13964_v10 = vld [vmem:[#allocation172_spill] sm:$0xff] }
 0xb3d   :  { %v7404_v63 = vsel %vm5779_vm0, %v7323_v62, 0.0  ;;  %9378 = vrcp.f32 %v7279_v24  ;;  %v7191_v9 = vrot.slane %v7190_v49, 2  ;;  %v6962_v53 = vrot.slane %v13124_v30, 4 }
 0xb3e   :  { %v7198_v20 = vrot.slane %v7197_v41, 4  ;;  %v13158_v50 = vadd.f32 %v7404_v63, %v7403_v27  ;;  %9380 = vpow2.f32 %v7074_v23  ;;  %v6968_v4 = vsel %vm5779_vm0, %v13133_v26, -inf }
 0xb3f   :  { %v13166_v59 = vadd.f32 %v7381_v34, %v13081_v32  ;;  %v7281_v5 = vmax.f32 %v7185_v19, 1e-20  ;;  %v7192_v1 = vadd.f32 %v7191_v9, %v7190_v49  ;;  %v6970_v24 = vmax.f32 %v6968_v4, %v6969_v28 }
 0xb40   :  { %v9373_v44 = vpop.eup %9372  ;;  %9382 = vrcp.f32 %v7280_v11  ;;  %v7390_v43 = vrot.slane %v13135_v25, 2  ;;  %v6958_v42 = vmax.f32 %v6956_v6, %v6957_v0  ;;  %v7199_v39 = vadd.f32 %v7198_v20, %v7197_v41 }
 0xb41   :  { %v9375_v17 = vpop.eup %9374  ;;  %v7116_v22 = vmul.f32 %v9373_v44, %v13963_v52  ;;  %v6963_v8 = vmax.f32 %v13124_v30, %v6962_v53  ;;  %v6971_v62 = vrot.slane %v6970_v24, 4  ;;  %9384 = vrcp.f32 %v7281_v5  ;;  %v13965_v5 = vld [vmem:[#allocation163_spill] sm:$0xff] }
 0xb42   :  { %v7117_v7 = vmul.f32 %v9375_v17, %v13964_v10  ;;  %v7024_v34 = vsub.f32 %v13085_v45, %v6958_v42  ;;  %v7025_v19 = vsub.f32 %v13079_v35, %v6958_v42  ;;  %v7193_v11 = vrot.slane %v7192_v1, 1 }
 0xb43   :  { %v7204_v15 = vsel %vm5779_vm0, %v7116_v22, 0.0  ;;  %v7324_v32 = vmul.f32 %v7116_v22, %v12770_v48  ;;  %v7397_v63 = vrot.slane %v13148_v16, 4  ;;  %v7200_v23 = vrot.slane %v7199_v39, 2  ;;  %v13966_v22 = vld [vmem:[#allocation112_spill] sm:$0xff] }
 0xb44   :  { %v7205_v49 = vsel %vm5779_vm0, %v7117_v7, 0.0  ;;  %v7325_v6 = vmul.f32 %v7117_v7, %v12768_v51  ;;  %v7076_v27 = vmul.f32 1.442695, %v7024_v34  ;;  %v7078_v30 = vmul.f32 1.442695, %v7025_v19  ;;  %v13967_v19 = vld [vmem:[#allocation164_spill] sm:$0xff] }
 0xb45   :  { %v7206_v41 = vadd.f32 %v7205_v49, %v7204_v15  ;;  %v7412_v28 = vsel %vm5779_vm0, %v7324_v32, 0.0  ;;  %v6964_v20 = vrot.slane %v6963_v8, 2  ;;  %v6972_v53 = vmax.f32 %v6970_v24, %v6971_v62 }
 0xb46   :  { %v7413_v9 = vsel %vm5779_vm0, %v7325_v6, 0.0  ;;  %v9377_v45 = vpop.eup %9376  ;;  %9386 = vpow2.f32 %v7076_v27  ;;  %v13183_v44 = vadd.f32 %v7193_v11, %v7192_v1  ;;  %v13188_v42 = vadd.f32 %v13013_v57, %v13966_v22 }
 0xb47   :  { %v7207_v0 = vrot.slane %v7206_v41, 4  ;;  %v7414_v35 = vadd.f32 %v7413_v9, %v7412_v28  ;;  %v13181_v4 = vpop.eup %9378  ;;  %v7118_v17 = vmul.f32 %v9377_v45, %v13965_v5  ;;  %v6965_v52 = vmax.f32 %v6963_v8, %v6964_v20 }
 0xb48   :  { %v9381_v10 = vpop.eup %9380  ;;  %9388 = vpow2.f32 %v7078_v30  ;;  %v6973_v32 = vrot.slane %v6972_v53, 2  ;;  %v13190_v34 = vadd.f32 %v7200_v23, %v7199_v39  ;;  %v7282_v28 = vmax.f32 %v13183_v44, 1e-20 }
 0xb49   :  { %v7208_v7 = vadd.f32 %v7207_v0, %v7206_v41  ;;  %v7415_v15 = vrot.slane %v7414_v35, 4  ;;  %v7119_v24 = vmul.f32 %v9381_v10, %v13967_v19  ;;  %v7213_v62 = vsel %vm5779_vm0, %v7118_v17, 0.0 }
 0xb4a   :  { %v7326_v1 = vmul.f32 %v7118_v17, %v12770_v48  ;;  %v13195_v11 = vpop.eup %9382  ;;  %v6966_v6 = vrot.slane %v6965_v52, 1  ;;  %v6974_v57 = vmax.f32 %v6972_v53, %v6973_v32  ;;  %v7202_v0 = vrot.slane %v13190_v34, 1  ;;  %v13968_v53 = vld [vmem:[#allocation111_spill] sm:$0xff] }
 0xb4b   :  { %v7209_v8 = vrot.slane %v7208_v7, 2  ;;  %v7416_v49 = vadd.f32 %v7415_v15, %v7414_v35  ;;  %v7214_v41 = vsel %vm5779_vm0, %v7119_v24, 0.0  ;;  %v7327_v27 = vmul.f32 %v7119_v24, %v12768_v51  ;;  %v13201_v45 = vpop.eup %9384 }
 0xb4c   :  { %v7421_v39 = vsel %vm5779_vm0, %v7326_v1, 0.0  ;;  %v7215_v9 = vadd.f32 %v7214_v41, %v7213_v62  ;;  %v6967_v20 = vmax.f32 %v6965_v52, %v6966_v6  ;;  %v6975_v5 = vrot.slane %v6974_v57, 1  ;;  %v13969_v41 = vld [vmem:[#allocation166_spill] sm:$0xff] }
 0xb4d   :  { %v7210_v30 = vadd.f32 %v7209_v8, %v7208_v7  ;;  %v7417_v23 = vrot.slane %v7416_v49, 2  ;;  %v7422_v35 = vsel %vm5779_vm0, %v7327_v27, 0.0  ;;  %v13207_v17 = vadd.f32 %v13016_v21, %v13968_v53 }
 0xb4e   :  { %v7216_v15 = vrot.slane %v7215_v9, 4  ;;  %v7423_v32 = vadd.f32 %v7422_v35, %v7421_v39  ;;  %v7026_v7 = vsub.f32 %v13113_v47, %v6967_v20  ;;  %v7027_v19 = vsub.f32 %v13107_v33, %v6967_v20 }
 0xb4f   :  { %v7211_v22 = vrot.slane %v7210_v30, 1  ;;  %v7418_v10 = vadd.f32 %v7417_v23, %v7416_v49  ;;  %v6976_v52 = vmax.f32 %v6974_v57, %v6975_v5  ;;  %v6978_v24 = vsel %vm5779_vm0, %v13188_v42, -inf  ;;  %v13970_v5 = vld [vmem:[#allocation167_spill] sm:$0xff] }
 0xb50   :  { %v9387_v62 = vpop.eup %9386  ;;  %v7217_v8 = vadd.f32 %v7216_v15, %v7215_v9  ;;  %v7424_v6 = vrot.slane %v7423_v32, 4  ;;  %v6977_v21 = vsel %vm5779_vm0, %v13207_v17, -inf  ;;  %v7080_v49 = vmul.f32 1.442695, %v7026_v7 }
 0xb51   :  { %v7212_v1 = vadd.f32 %v7211_v22, %v7210_v30  ;;  %v7120_v27 = vmul.f32 %v9387_v62, %v13969_v41  ;;  %v7082_v23 = vmul.f32 1.442695, %v7027_v19  ;;  %v7028_v39 = vsub.f32 %v13133_v26, %v6976_v52 }
 0xb52   :  { %v9389_v47 = vpop.eup %9388  ;;  %v7419_v33 = vrot.slane %v7418_v10, 1  ;;  %v7218_v57 = vrot.slane %v7217_v8, 2  ;;  %v7425_v20 = vadd.f32 %v7424_v6, %v7423_v32  ;;  %9390 = vpow2.f32 %v7080_v49 }
 0xb53   :  { %v7284_v35 = vmax.f32 %v7212_v1, 1e-20  ;;  %v7121_v53 = vmul.f32 %v9389_v47, %v13970_v5  ;;  %v7222_v30 = vsel %vm5779_vm0, %v7120_v27, 0.0  ;;  %v7328_v9 = vmul.f32 %v7120_v27, %v12770_v48 }
 0xb54   :  { %v7219_v22 = vadd.f32 %v7218_v57, %v7217_v8  ;;  %v7426_v15 = vrot.slane %v7425_v20, 2  ;;  %v7029_v7 = vsub.f32 %v13128_v56, %v6976_v52  ;;  %v7084_v41 = vmul.f32 1.442695, %v7028_v39 }
 0xb55   :  { %9392 = vrcp.f32 %v7284_v35  ;;  %v7223_v19 = vsel %vm5779_vm0, %v7121_v53, 0.0  ;;  %v7329_v26 = vmul.f32 %v7121_v53, %v12768_v51  ;;  %v7430_v62 = vsel %vm5779_vm0, %v7328_v9, 0.0  ;;  %v13971_v35 = vld [vmem:[#allocation114_spill] sm:$0xff] }
 0xb56   :  { %9394 = vpow2.f32 %v7082_v23  ;;  %v7220_v32 = vrot.slane %v7219_v22, 1  ;;  %v7427_v1 = vadd.f32 %v7426_v15, %v7425_v20  ;;  %v7224_v6 = vadd.f32 %v7223_v19, %v7222_v30  ;;  %v13972_v20 = vld [vmem:[#allocation113_spill] sm:$0xff] }
 0xb57   :  { %v7431_v47 = vsel %vm5779_vm0, %v7329_v26, 0.0  ;;  %v7086_v27 = vmul.f32 1.442695, %v7029_v7  ;;  %v6979_v49 = vmax.f32 %v6977_v21, %v6978_v24  ;;  %v13227_v8 = vadd.f32 %v13021_v40, %v13971_v35  ;;  %v7618_v15 = vld [vmem:[#allocation44] sm:$0xff]  ;;  %v7619_v40 = vld [vmem:[#allocation44 + $0x8] sm:$0xff] }
 0xb58   :  { %v7420_v56 = vadd.f32 %v7419_v33, %v7418_v10  ;;  %v7221_v52 = vadd.f32 %v7220_v32, %v7219_v22  ;;  %v7225_v57 = vrot.slane %v7224_v6, 4  ;;  %v7432_v5 = vadd.f32 %v7431_v47, %v7430_v62  ;;  %v13973_v22 = vld [vmem:[#allocation118_spill] sm:$0xff]  ;;  %v7620_v62 = vld [vmem:[#allocation44 + $0x10] sm:$0xff]  ;;  %v7621_v32 = vld [vmem:[#allocation44 + $0x18] sm:$0xff] }
 0xb59   :  { %9396 = vpow2.f32 %v7084_v41  ;;  %v6980_v53 = vrot.slane %v6979_v49, 4  ;;  %v6987_v23 = vsel %vm5779_vm0, %v13227_v8, -inf  ;;  %v13233_v39 = vadd.f32 %v13024_v31, %v13972_v20 }
 0xb5a   :  { %v7285_v30 = vmax.f32 %v7221_v52, 1e-20  ;;  %v7428_v9 = vrot.slane %v7427_v1, 1  ;;  %v7226_v24 = vadd.f32 %v7225_v57, %v7224_v6  ;;  %v7433_v21 = vrot.slane %v7432_v5, 4 }
 0xb5b   :  { %9398 = vpow2.f32 %v7086_v27  ;;  %v6981_v10 = vmax.f32 %v6979_v49, %v6980_v53  ;;  %v6986_v33 = vsel %vm5779_vm0, %v13233_v39, -inf  ;;  %v13239_v7 = vadd.f32 %v13031_v14, %v13973_v22  ;;  %v13974_v27 = vld [vmem:[#allocation117_spill] sm:$0xff] }
 0xb5c   :  { %9400 = vrcp.f32 %v7285_v30  ;;  %v7227_v19 = vrot.slane %v7226_v24, 2  ;;  %v7434_v26 = vadd.f32 %v7433_v21, %v7432_v5  ;;  %v6988_v31 = vmax.f32 %v6986_v33, %v6987_v23  ;;  %v9391_v41 = vpop.eup %9390  ;;  %v13975_v53 = vld [vmem:[#allocation141_spill] sm:$0xff] }
 0xb5d   :  { %v6982_v6 = vrot.slane %v6981_v10, 2  ;;  %v6996_v47 = vsel %vm5779_vm0, %v13239_v7, -inf  ;;  %v13245_v49 = vadd.f32 %v13034_v54, %v13974_v27  ;;  %v8926_v35 = vpack.c.bf16 %v7619_v40, %v7618_v15 }
 0xb5e   :  { %v7228_v57 = vadd.f32 %v7227_v19, %v7226_v24  ;;  %v7435_v14 = vrot.slane %v7434_v26, 2  ;;  %v7122_v20 = vmul.f32 %v9391_v41, %v13975_v53  ;;  %v6989_v30 = vrot.slane %v6988_v31, 4  ;;  %v13976_v24 = vld [vmem:[#allocation173_spill] sm:$0xff] }
 0xb5f   :  { %v9393_v52 = vpop.eup %9392  ;;  %v6983_v21 = vmax.f32 %v6981_v10, %v6982_v6  ;;  %v6995_v33 = vsel %vm5779_vm0, %v13245_v49, -inf  ;;  %8927 = vmatprep.subr.bf16.mxu0 %v8926_v35  ;;  %v8930_v22 = vpack.c.bf16 %v7621_v32, %v7620_v62  ;;  %v13255_v54 = vadd.f32 %v7202_v0, %v13190_v34 }
 0xb60   :  { %v9395_v5 = vpop.eup %9394  ;;  %v13248_v23 = vmul.f32 %v9393_v52, %v7420_v56  ;;  %v7229_v15 = vrot.slane %v7228_v57, 1  ;;  %v7231_v19 = vsel %vm5779_vm0, %v7122_v20, 0.0  ;;  %8929 = vmatpush3.bf16.msra.mxu0 %v8926_v35  ;;  %v7330_v56 = vmul.f32 %v7122_v20, %v12770_v48 }
 0xb61   :  { %v7123_v40 = vmul.f32 %v9395_v5, %v13976_v24  ;;  %v6984_v41 = vrot.slane %v6983_v21, 1  ;;  %v6990_v10 = vmax.f32 %v6988_v31, %v6989_v30  ;;  %v6997_v6 = vmax.f32 %v6995_v33, %v6996_v47  ;;  %8931 = vmatprep.subr.bf16.mxu0 %v8930_v22 }
 0xb62   :  { %v7429_v27 = vadd.f32 %v7428_v9, %v7427_v1  ;;  %v7230_v52 = vadd.f32 %v7229_v15, %v7228_v57  ;;  %v7436_v0 = vadd.f32 %v7435_v14, %v7434_v26  ;;  %v7439_v5 = vsel %vm5779_vm0, %v7330_v56, 0.0 }
 0xb63   :  { %v7232_v62 = vsel %vm5779_vm0, %v7123_v40, 0.0  ;;  %v7331_v32 = vmul.f32 %v7123_v40, %v12768_v51  ;;  %v9397_v34 = vpop.eup %9396  ;;  %v6985_v24 = vmax.f32 %v6983_v21, %v6984_v41  ;;  %v6991_v31 = vrot.slane %v6990_v10, 2 }
 0xb64   :  { %v7233_v53 = vadd.f32 %v7232_v62, %v7231_v19  ;;  %v7286_v61 = vmax.f32 %v7230_v52, 1e-20  ;;  %v7124_v20 = vmul.f32 %v9397_v34, %v13910_v3  ;;  %8933 = vmatpush3.bf16.msra.mxu0 %v8930_v22  ;;  %v7437_v19 = vrot.slane %v7436_v0, 1 }
 0xb65   :  { %v7440_v35 = vsel %vm5779_vm0, %v7331_v32, 0.0  ;;  %v9399_v47 = vpop.eup %9398  ;;  %v7030_v57 = vsub.f32 %v13207_v17, %v6985_v24  ;;  %v7031_v30 = vsub.f32 %v13188_v42, %v6985_v24  ;;  %v6992_v32 = vmax.f32 %v6990_v10, %v6991_v31 }
 0xb66   :  { %v7234_v1 = vrot.slane %v7233_v53, 4  ;;  %v7441_v9 = vadd.f32 %v7440_v35, %v7439_v5  ;;  %v9401_v33 = vpop.eup %9400  ;;  %9402 = vrcp.f32 %v7286_v61  ;;  %v7125_v26 = vmul.f32 %v9399_v47, %v13911_v38 }
 0xb67   :  { %v7240_v14 = vsel %vm5779_vm0, %v7124_v20, 0.0  ;;  %v7332_v21 = vmul.f32 %v7124_v20, %v12770_v48  ;;  %v13270_v15 = vmul.f32 %v9401_v33, %v7429_v27  ;;  %v7088_v22 = vmul.f32 1.442695, %v7030_v57 }
 0xb68   :  { %v7235_v3 = vadd.f32 %v7234_v1, %v7233_v53  ;;  %v7442_v40 = vrot.slane %v7441_v9, 4  ;;  %v7241_v56 = vsel %vm5779_vm0, %v7125_v26, 0.0  ;;  %v7333_v17 = vmul.f32 %v7125_v26, %v12768_v51 }
 0xb69   :  { %v7090_v41 = vmul.f32 1.442695, %v7031_v30  ;;  %v7242_v61 = vadd.f32 %v7241_v56, %v7240_v14  ;;  %v7448_v38 = vsel %vm5779_vm0, %v7332_v21, 0.0  ;;  %9404 = vpow2.f32 %v7088_v22 }
 0xb6a   :  { %v7236_v42 = vrot.slane %v7235_v3, 2  ;;  %v7443_v52 = vadd.f32 %v7442_v40, %v7441_v9  ;;  %v7449_v62 = vsel %vm5779_vm0, %v7333_v17, 0.0  ;;  %v6998_v27 = vrot.slane %v6997_v6, 4 }
 0xb6b   :  { %v7398_v34 = vadd.f32 %v7397_v63, %v13148_v16  ;;  %v7243_v24 = vrot.slane %v7242_v61, 4  ;;  %v7450_v35 = vadd.f32 %v7449_v62, %v7448_v38  ;;  %9406 = vpow2.f32 %v7090_v41 }
 0xb6c   :  { %v7237_v53 = vadd.f32 %v7236_v42, %v7235_v3  ;;  %v7444_v5 = vrot.slane %v7443_v52, 2  ;;  %v6993_v20 = vrot.slane %v6992_v32, 1  ;;  %v6999_v47 = vmax.f32 %v6997_v6, %v6998_v27 }
 0xb6d   :  { %9408 = vrcp.f32 %v7282_v28  ;;  %v7406_v1 = vrot.slane %v13158_v50, 4  ;;  %v7244_v57 = vadd.f32 %v7243_v24, %v7242_v61  ;;  %v7283_v10 = vmax.f32 %v13255_v54, 1e-20 }
 0xb6e   :  { %v7238_v9 = vrot.slane %v7237_v53, 1  ;;  %v7438_v31 = vadd.f32 %v7437_v19, %v7436_v0  ;;  %v6994_v30 = vmax.f32 %v6992_v32, %v6993_v20  ;;  %v7000_v33 = vrot.slane %v6999_v47, 2 }
 0xb6f   :  { %v7445_v63 = vadd.f32 %v7444_v5, %v7443_v52  ;;  %v7245_v26 = vrot.slane %v7244_v57, 2  ;;  %v7383_v14 = vrot.slane %v13166_v59, 1  ;;  %v7451_v3 = vrot.slane %v7450_v35, 4 }
 0xb70   :  { %v7239_v16 = vadd.f32 %v7238_v9, %v7237_v53  ;;  %v9403_v21 = vpop.eup %9402  ;;  %v7032_v6 = vsub.f32 %v13233_v39, %v6994_v30  ;;  %v7033_v44 = vsub.f32 %v13227_v8, %v6994_v30  ;;  %v7001_v28 = vmax.f32 %v6999_v47, %v7000_v33 }
 0xb71   :  { %v13286_v40 = vmul.f32 %v9403_v21, %v7438_v31  ;;  %v7246_v56 = vadd.f32 %v7245_v26, %v7244_v57  ;;  %v7391_v54 = vadd.f32 %v7390_v43, %v13135_v25  ;;  %9410 = vrcp.f32 %v7283_v10 }
 0xb72   :  { %v7287_v22 = vmax.f32 %v7239_v16, 1e-20  ;;  %v7092_v0 = vmul.f32 1.442695, %v7032_v6  ;;  %v7094_v19 = vmul.f32 1.442695, %v7033_v44  ;;  %v7384_v62 = vadd.f32 %v7383_v14, %v13166_v59 }
 0xb73   :  { %v7002_v17 = vrot.slane %v7001_v28, 1  ;;  %v13977_v41 = vrot.slane %v13048_v36, 1  ;;  %v7446_v39 = vrot.slane %v7445_v63, 1  ;;  %v7399_v8 = vrot.slane %v7398_v34, 2  ;;  %v9405_v52 = vpop.eup %9404 }
 0xb74   :  { %9412 = vrcp.f32 %v7287_v22  ;;  %v7247_v61 = vrot.slane %v7246_v56, 1  ;;  %v13295_v32 = vadd.f32 %v7451_v3, %v7450_v35  ;;  %v7126_v25 = vmul.f32 %v9405_v52, %v13912_v58 }
 0xb75   :  { %v7375_v42 = vadd.f32 %v13977_v41, %v13048_v36  ;;  %9414 = vpow2.f32 %v7092_v0  ;;  %v7003_v38 = vmax.f32 %v7001_v28, %v7002_v17  ;;  %v7392_v43 = vrot.slane %v7391_v54, 1  ;;  %v9407_v27 = vpop.eup %9406 }
 0xb76   :  { %9416 = vpow2.f32 %v7094_v19  ;;  %v7400_v5 = vadd.f32 %v7399_v8, %v7398_v34  ;;  %v7407_v24 = vadd.f32 %v7406_v1, %v13158_v50  ;;  %v7447_v47 = vadd.f32 %v7446_v39, %v7445_v63  ;;  %v13324_v8 = vld [vmem:[#allocation43] ss:$0 sm:$0xff] }
 0xb77   :  { %v7034_v53 = vsub.f32 %v13245_v49, %v7003_v38  ;;  %v7035_v36 = vsub.f32 %v13239_v7, %v7003_v38  ;;  %v9409_v20 = vpop.eup %9408  ;;  %v7127_v9 = vmul.f32 %v9407_v27, %v13913_v60  ;;  %v7249_v59 = vsel %vm5779_vm0, %v7126_v25, 0.0 }
 0xb78   :  { %v7334_v35 = vmul.f32 %v7126_v25, %v12770_v48  ;;  %v7248_v57 = vadd.f32 %v7247_v61, %v7246_v56  ;;  %v7401_v31 = vrot.slane %v7400_v5, 1  ;;  %v7393_v34 = vadd.f32 %v7392_v43, %v7391_v54 }
 0xb79   :  { %v7096_v58 = vmul.f32 1.442695, %v7034_v53  ;;  %v7098_v10 = vmul.f32 1.442695, %v7035_v36  ;;  %v7250_v30 = vsel %vm5779_vm0, %v7127_v9, 0.0  ;;  %v7335_v49 = vmul.f32 %v7127_v9, %v12768_v51 }
 0xb7a   :  { %v7457_v7 = vsel %vm5779_vm0, %v7334_v35, 0.0  ;;  %v7251_v50 = vadd.f32 %v7250_v30, %v7249_v59  ;;  %v7402_v1 = vadd.f32 %v7401_v31, %v7400_v5  ;;  %v7408_v33 = vrot.slane %v7407_v24, 2 }
 0xb7b   :  { %9418 = vpow2.f32 %v7096_v58  ;;  %v7458_v60 = vsel %vm5779_vm0, %v7335_v49, 0.0  ;;  %v7484_v16 = vmul.f32 %v13066_v12, %v13039_v46  ;;  %v7486_v63 = vmul.f32 %v13099_v13, %v13046_v37  ;;  %v9411_v26 = vpop.eup %9410 }
 0xb7c   :  { %9420 = vpow2.f32 %v7098_v10  ;;  %v7252_v14 = vrot.slane %v7251_v50, 4  ;;  %v7459_v21 = vadd.f32 %v7458_v60, %v7457_v7  ;;  %v7409_v3 = vadd.f32 %v7408_v33, %v7407_v24 }
 0xb7d   :  { %v7487_v6 = vmul.f32 %v13181_v4, %v7375_v42  ;;  %v7488_v28 = vmul.f32 %v13195_v11, %v7384_v62  ;;  %v7489_v22 = vmul.f32 %v13201_v45, %v7393_v34  ;;  %v13315_v56 = vmul.f32 %v9409_v20, %v7402_v1 }
 0xb7e   :  { %v9413_v44 = vpop.eup %9412  ;;  %v7253_v46 = vadd.f32 %v7252_v14, %v7251_v50  ;;  %v7460_v12 = vrot.slane %v7459_v21, 4  ;;  %v7410_v19 = vrot.slane %v7409_v3, 1  ;;  %v7288_v17 = vmax.f32 %v7248_v57, 1e-20  ;;  %v13978_v57 = vld [vmem:[#allocation162_spill] sm:$0xff] }
 0xb7f   :  { %v9415_v54 = vpop.eup %9414  ;;  %v13317_v0 = vmul.f32 %v9413_v44, %v7447_v47  ;;  %v7453_v41 = vrot.slane %v13295_v32, 2  ;;  %v13337_v59 = vadd.f32 %v13324_v8, %v7484_v16  ;;  %v13342_v10 = vadd.f32 %v13324_v8, %v13054_v29 }
 0xb80   :  { %v9417_v37 = vpop.eup %9416  ;;  %v7128_v13 = vmul.f32 %v9415_v54, %v13918_v55  ;;  %v7254_v4 = vrot.slane %v7253_v46, 2  ;;  %v7411_v39 = vadd.f32 %v7410_v19, %v7409_v3  ;;  %v7461_v61 = vadd.f32 %v7460_v12, %v7459_v21 }
 0xb81   :  { %v7129_v42 = vmul.f32 %v9417_v37, %v13919_v2  ;;  %v13330_v55 = vadd.f32 %v13324_v8, %v13270_v15  ;;  %9422 = vrcp.f32 %v7288_v17  ;;  %v7454_v53 = vadd.f32 %v7453_v41, %v13295_v32 }
 0xb82   :  { %v7258_v11 = vsel %vm5779_vm0, %v7128_v13, 0.0  ;;  %v7336_v45 = vmul.f32 %v7128_v13, %v12770_v48  ;;  %v7255_v52 = vadd.f32 %v7254_v4, %v7253_v46  ;;  %v7491_v43 = vmul.f32 %v9411_v26, %v7411_v39 }
 0xb83   :  { %v7259_v38 = vsel %vm5779_vm0, %v7129_v42, 0.0  ;;  %v7337_v62 = vmul.f32 %v7129_v42, %v12768_v51  ;;  %v7462_v35 = vrot.slane %v7461_v61, 2  ;;  %v13349_v50 = vadd.f32 %v13324_v8, %v7486_v63 }
 0xb84   :  { %v7260_v25 = vadd.f32 %v7259_v38, %v7258_v11  ;;  %v7466_v2 = vsel %vm5779_vm0, %v7336_v45, 0.0  ;;  %v7256_v36 = vrot.slane %v7255_v52, 1  ;;  %v13354_v14 = vadd.f32 %v13324_v8, %v7487_v6 }
 0xb85   :  { %v9419_v27 = vpop.eup %9418  ;;  %v7467_v5 = vsel %vm5779_vm0, %v7337_v62, 0.0  ;;  %v7463_v16 = vadd.f32 %v7462_v35, %v7461_v61  ;;  %v7455_v63 = vrot.slane %v7454_v53, 1  ;;  %v13358_v54 = vadd.f32 %v13324_v8, %v7488_v28 }
 0xb86   :  { %v9421_v24 = vpop.eup %9420  ;;  %v7261_v20 = vrot.slane %v7260_v25, 4  ;;  %v7468_v47 = vadd.f32 %v7467_v5, %v7466_v2  ;;  %v7130_v9 = vmul.f32 %v9419_v27, %v13920_v18  ;;  %v7257_v15 = vadd.f32 %v7256_v36, %v7255_v52 }
 0xb87   :  { %v7131_v58 = vmul.f32 %v9421_v24, %v13978_v57  ;;  %v13361_v46 = vadd.f32 %v13324_v8, %v7489_v22  ;;  %v13365_v6 = vadd.f32 %v13324_v8, %v13315_v56  ;;  %v7464_v17 = vrot.slane %v7463_v16, 1 }
 0xb88   :  { %v7262_v32 = vadd.f32 %v7261_v20, %v7260_v25  ;;  %v7469_v31 = vrot.slane %v7468_v47, 4  ;;  %v7267_v30 = vsel %vm5779_vm0, %v7130_v9, 0.0  ;;  %v7338_v49 = vmul.f32 %v7130_v9, %v12770_v48 }
 0xb89   :  { %v7289_v7 = vmax.f32 %v7257_v15, 1e-20  ;;  %v7268_v18 = vsel %vm5779_vm0, %v7131_v58, 0.0  ;;  %v7339_v34 = vmul.f32 %v7131_v58, %v12768_v51  ;;  %v7547_v51 = vmin.f32 %v13330_v55, 0.0 }
 0xb8a   :  { %v7263_v1 = vrot.slane %v7262_v32, 2  ;;  %v7470_v33 = vadd.f32 %v7469_v31, %v7468_v47  ;;  %v7269_v60 = vadd.f32 %v7268_v18, %v7267_v30  ;;  %v7475_v29 = vsel %vm5779_vm0, %v7338_v49, 0.0 }
 0xb8b   :  { %9424 = vrcp.f32 %v7289_v7  ;;  %v7476_v26 = vsel %vm5779_vm0, %v7339_v34, 0.0  ;;  %v9423_v13 = vpop.eup %9422  ;;  %v7538_v41 = vmin.f32 %v13337_v59, 0.0  ;;  %v7539_v4 = vmin.f32 %v13342_v10, 0.0 }
 0xb8c   :  { %v7264_v48 = vadd.f32 %v7263_v1, %v7262_v32  ;;  %v7471_v21 = vrot.slane %v7470_v33, 2  ;;  %v7270_v3 = vrot.slane %v7269_v60, 4  ;;  %v7477_v44 = vadd.f32 %v7476_v26, %v7475_v29 }
 0xb8d   :  { %v7540_v42 = vmin.f32 %v13349_v50, 0.0  ;;  %v7541_v22 = vmin.f32 %v13354_v14, 0.0  ;;  %v7456_v39 = vadd.f32 %v7455_v63, %v7454_v53  ;;  %v13372_v61 = vadd.f32 %v13324_v8, %v7491_v43 }
 0xb8e   :  { %v7265_v12 = vrot.slane %v7264_v48, 1  ;;  %v7271_v19 = vadd.f32 %v7270_v3, %v7269_v60  ;;  %v7478_v37 = vrot.slane %v7477_v44, 4  ;;  %v7472_v11 = vadd.f32 %v7471_v21, %v7470_v33 }
 0xb8f   :  { %v7542_v56 = vmin.f32 %v13358_v54, 0.0  ;;  %v7543_v25 = vmin.f32 %v13361_v46, 0.0  ;;  %v7554_v2 = vmul.f32 1.442695, %v7538_v41  ;;  %v7465_v27 = vadd.f32 %v7464_v17, %v7463_v16 }
 0xb90   :  { %v7266_v28 = vadd.f32 %v7265_v12, %v7264_v48  ;;  %v7272_v45 = vrot.slane %v7271_v19, 2  ;;  %v7479_v52 = vadd.f32 %v7478_v37, %v7477_v44  ;;  %v7544_v36 = vmin.f32 %v13365_v6, 0.0 }
 0xb91   :  { %v7556_v5 = vmul.f32 1.442695, %v7539_v4  ;;  %v7558_v24 = vmul.f32 1.442695, %v7540_v42  ;;  %v7473_v20 = vrot.slane %v7472_v11, 1  ;;  %v7545_v43 = vmin.f32 %v13372_v61, 0.0 }
 0xb92   :  { %v7290_v38 = vmax.f32 %v7266_v28, 1e-20  ;;  %v7273_v62 = vadd.f32 %v7272_v45, %v7271_v19  ;;  %v7560_v53 = vmul.f32 1.442695, %v7541_v22  ;;  %v7480_v15 = vrot.slane %v7479_v52, 2 }
 0xb93   :  { %v7562_v35 = vmul.f32 1.442695, %v7542_v56  ;;  %v7564_v58 = vmul.f32 1.442695, %v7543_v25  ;;  %v7496_v32 = vmul.f32 %v9423_v13, %v7456_v39  ;;  %v7566_v31 = vmul.f32 1.442695, %v7544_v36 }
 0xb94   :  { %9426 = vrcp.f32 %v7290_v38  ;;  %v7274_v47 = vrot.slane %v7273_v62, 1  ;;  %v13380_v49 = vadd.f32 %v13324_v8, %v13248_v23  ;;  %v13384_v18 = vadd.f32 %v13324_v8, %v13286_v40 }
 0xb95   :  { %v9425_v9 = vpop.eup %9424  ;;  %9428 = vpow2.f32 %v7554_v2  ;;  %v13388_v34 = vadd.f32 %v13324_v8, %v13317_v0  ;;  %v7568_v1 = vmul.f32 1.442695, %v7545_v43  ;;  %v13391_v33 = vadd.f32 %v13324_v8, %v7496_v32 }
 0xb96   :  { %v7275_v57 = vadd.f32 %v7274_v47, %v7273_v62  ;;  %9430 = vpow2.f32 %v7556_v5  ;;  %v7497_v30 = vmul.f32 %v9425_v9, %v7465_v27  ;;  %v7481_v23 = vadd.f32 %v7480_v15, %v7479_v52 }
 0xb97   :  { %9432 = vpow2.f32 %v7558_v24  ;;  %vm7522_vm1 = vcmp.gt.f32.partialorder %v13337_v59, 0.0  ;;  %vm7523_vm13 = vcmp.gt.f32.partialorder %v13342_v10, 0.0  ;;  %vm7524_vm14 = vcmp.gt.f32.partialorder %v13349_v50, 0.0 }
 0xb98   :  { %v7291_v7 = vmax.f32 %v7275_v57, 1e-20  ;;  %9434 = vpow2.f32 %v7560_v53  ;;  %v13394_v60 = vadd.f32 %v13324_v8, %v7497_v30  ;;  %v7474_v40 = vadd.f32 %v7473_v20, %v7472_v11 }
 0xb99   :  { %9436 = vpow2.f32 %v7562_v35  ;;  %v7546_v0 = vmin.f32 %v13380_v49, 0.0  ;;  %v7548_v29 = vmin.f32 %v13384_v18, 0.0  ;;  %v7549_v16 = vmin.f32 %v13388_v34, 0.0 }
 0xb9a   :  { %9438 = vrcp.f32 %v7291_v7  ;;  %v7550_v26 = vmin.f32 %v13391_v33, 0.0  ;;  %v7551_v48 = vmin.f32 %v13394_v60, 0.0  ;;  %v7572_v3 = vmul.f32 1.442695, %v7547_v51 }
 0xb9b   :  { %9440 = vpow2.f32 %v7564_v58  ;;  %v7570_v21 = vmul.f32 1.442695, %v7546_v0  ;;  %vm7525_vm15 = vcmp.gt.f32.partialorder %v13354_v14, 0.0  ;;  %v7482_v63 = vrot.slane %v7481_v23, 1 }
 0xb9c   :  { %9442 = vpow2.f32 %v7566_v31  ;;  %v7574_v12 = vmul.f32 1.442695, %v7548_v29  ;;  %v7576_v19 = vmul.f32 1.442695, %v7549_v16  ;;  %vm7526_vm2 = vcmp.gt.f32.partialorder %v13358_v54, 0.0 }
 0xb9d   :  { %9444 = vpow2.f32 %v7568_v1  ;;  %vm7527_vm3 = vcmp.gt.f32.partialorder %v13361_v46, 0.0  ;;  %vm7528_vm11 = vcmp.gt.f32.partialorder %v13365_v6, 0.0  ;;  %v7578_v4 = vmul.f32 1.442695, %v7550_v26 }
 0xb9e   :  { %v9427_v44 = vpop.eup %9426  ;;  %9446 = vpow2.f32 %v7570_v21  ;;  %v7580_v11 = vmul.f32 1.442695, %v7551_v48  ;;  %vm7529_vm12 = vcmp.gt.f32.partialorder %v13372_v61, 0.0  ;;  %v7483_v39 = vadd.f32 %v7482_v63, %v7481_v23 }
 0xb9f   :  { %v9429_v37 = vpop.eup %9428  ;;  %v7498_v13 = vmul.f32 %v9427_v44, %v7474_v40  ;;  %9448 = vpow2.f32 %v7572_v3 }
 0xba0   :  { %v9431_v17 = vpop.eup %9430  ;;  %v8097_v41 = vadd.f32 -1.0, %v9429_v37  ;;  %9450 = vpow2.f32 %v7574_v12 }
 0xba1   :  { %v9433_v51 = vpop.eup %9432  ;;  %v8098_v42 = vadd.f32 -1.0, %v9431_v17  ;;  %v13411_v28 = vadd.f32 %v13324_v8, %v7498_v13  ;;  %9452 = vpow2.f32 %v7576_v19 }
 0xba2   :  { %v9435_v45 = vpop.eup %9434  ;;  %v8099_v22 = vadd.f32 -1.0, %v9433_v51  ;;  %v7602_v38 = vsel %vm7522_vm1, %v13337_v59, %v8097_v41  ;;  %9454 = vpow2.f32 %v7578_v4  ;;  %vm7530_vm1 = vcmp.gt.f32.partialorder %v13380_v49, 0.0 }
 0xba3   :  { %v9437_v52 = vpop.eup %9436  ;;  %v8100_v56 = vadd.f32 -1.0, %v9435_v45  ;;  %v7603_v62 = vsel %vm7523_vm13, %v13342_v10, %v8098_v42  ;;  %v7552_v25 = vmin.f32 %v13411_v28, 0.0  ;;  %9456 = vpow2.f32 %v7580_v11 }
 0xba4   :  { %v9439_v2 = vpop.eup %9438  ;;  %v8101_v27 = vadd.f32 -1.0, %v9437_v52  ;;  %v7604_v36 = vsel %vm7524_vm14, %v13349_v50, %v8099_v22  ;;  %v7645_v5 = vrot.slane %v7603_v62, 7  ;;  %vm7531_vm13 = vcmp.gt.f32.partialorder %v13330_v55, 0.0 }
 0xba5   :  { %v9441_v24 = vpop.eup %9440  ;;  %v7605_v20 = vsel %vm7525_vm15, %v13354_v14, %v8100_v56  ;;  %v7647_v59 = vrot.slane %v7604_v36, 6  ;;  %v7499_v47 = vmul.f32 %v9439_v2, %v7483_v39  ;;  %v7582_v7 = vmul.f32 1.442695, %v7552_v25 }
 0xba6   :  { %v9443_v53 = vpop.eup %9442  ;;  %v8102_v10 = vadd.f32 -1.0, %v9441_v24  ;;  %v7606_v9 = vsel %vm7526_vm2, %v13358_v54, %v8101_v27  ;;  %v7646_v15 = vsel %vm4044_vm4, %v7645_v5, %v7602_v38  ;;  %v7649_v43 = vrot.slane %v7605_v20, 5 }
 0xba7   :  { %v9445_v50 = vpop.eup %9444  ;;  %v8103_v35 = vadd.f32 -1.0, %v9443_v53  ;;  %v7648_v57 = vsel %vm4047_vm5, %v7647_v59, %v7646_v15  ;;  %v7651_v58 = vrot.slane %v7606_v9, 4  ;;  %v13433_v32 = vadd.f32 %v13324_v8, %v7499_v47  ;;  %v7764_v53 = vld [vmem:[#allocation47] sm:$0xff] }
 0xba8   :  { %v8104_v14 = vadd.f32 -1.0, %v9445_v50  ;;  %v7607_v31 = vsel %vm7527_vm3, %v13361_v46, %v8102_v10  ;;  %v7650_v30 = vsel %vm4050_vm6, %v7649_v43, %v7648_v57  ;;  %v9447_v54 = vpop.eup %9446  ;;  %9458 = vpow2.f32 %v7582_v7  ;;  %v7765_v10 = vld [vmem:[#allocation47 + $0x8] sm:$0xff] }
 0xba9   :  { %v7608_v1 = vsel %vm7528_vm11, %v13365_v6, %v8103_v35  ;;  %v7652_v23 = vsel %vm4053_vm7, %v7651_v58, %v7650_v30  ;;  %v7653_v40 = vrot.slane %v7607_v31, 3  ;;  %v9449_v8 = vpop.eup %9448  ;;  %v7553_v46 = vmin.f32 %v13433_v32, 0.0 }
 0xbaa   :  { %v7609_v0 = vsel %vm7529_vm12, %v13372_v61, %v8104_v14  ;;  %v7655_v29 = vrot.slane %v7608_v1, 2  ;;  %v9451_v16 = vpop.eup %9450  ;;  %v8105_v21 = vadd.f32 -1.0, %v9447_v54  ;;  %v8106_v6 = vadd.f32 -1.0, %v9449_v8 }
 0xbab   :  { %v7654_v26 = vsel %vm4056_vm8, %v7653_v40, %v7652_v23  ;;  %v7657_v48 = vrot.slane %v7609_v0, 1  ;;  %v9453_v3 = vpop.eup %9452  ;;  %v7584_v63 = vmul.f32 1.442695, %v7553_v46  ;;  %v8107_v12 = vadd.f32 -1.0, %v9451_v16  ;;  %v8118_v40 = vld [vmem:[#allocation49] ss:$0 sm:$0xff] }
 0xbac   :  { %v7656_v44 = vsel %vm4059_vm9, %v7655_v29, %v7654_v26  ;;  %vm7532_vm14 = vcmp.gt.f32.partialorder %v13384_v18, 0.0  ;;  %v8108_v61 = vadd.f32 -1.0, %v9453_v3  ;;  %v7611_v37 = vsel %vm7531_vm13, %v13330_v55, %v8106_v6  ;;  %v9455_v13 = vpop.eup %9454 }
 0xbad   :  { %v7658_v19 = vsel %vm4062_vm10, %v7657_v48, %v7656_v44  ;;  %vm7533_vm15 = vcmp.gt.f32.partialorder %v13388_v34, 0.0  ;;  %9460 = vpow2.f32 %v7584_v63  ;;  %v7612_v17 = vsel %vm7532_vm14, %v13384_v18, %v8107_v12  ;;  %v9457_v4 = vpop.eup %9456 }
 0xbae   :  { %8688 = vmatprep.mubr.msk.f32.mxu0 %vm5779_vm0, %v7658_v19  ;;  %v7659_v41 = vrot.slane %v7611_v37, 7  ;;  %v8109_v51 = vadd.f32 -1.0, %v9455_v13  ;;  %v7610_v42 = vsel %vm7530_vm1, %v13380_v49, %v8105_v21  ;;  %v7613_v11 = vsel %vm7533_vm15, %v13388_v34, %v8108_v61 }
 0xbaf   :  { %v7661_v45 = vrot.slane %v7612_v17, 6  ;;  %vm7534_vm2 = vcmp.gt.f32.partialorder %v13391_v33, 0.0  ;;  %v8110_v55 = vadd.f32 -1.0, %v9457_v4  ;;  %v7663_v39 = vrot.slane %v7613_v11, 5 }
 0xbb0   :  { %v7660_v22 = vsel %vm4044_vm4, %v7659_v41, %v7610_v42  ;;  %vm7535_vm3 = vcmp.gt.f32.partialorder %v13394_v60, 0.0  ;;  %v7614_v18 = vsel %vm7534_vm2, %v13391_v33, %v8109_v51  ;;  %vm7536_vm4 = vcmp.gt.f32.partialorder %v13411_v28, 0.0 }
 0xbb1   :  { %v7662_v52 = vsel %vm4047_vm5, %v7661_v45, %v7660_v22  ;;  %v7615_v56 = vsel %vm7535_vm3, %v13394_v60, %v8110_v55  ;;  %v7665_v49 = vrot.slane %v7614_v18, 4  ;;  %vm7537_vm5 = vcmp.gt.f32.partialorder %v13433_v32, 0.0 }
 0xbb2   :  { %v7664_v38 = vsel %vm4050_vm6, %v7663_v39, %v7662_v52  ;;  %v7667_v62 = vrot.slane %v7615_v56, 3  ;;  %v9459_v34 = vpop.eup %9458  ;;  %v8934_v9 = vpack.c.bf16 %v7765_v10, %v7764_v53 }
 0xbb3   :  { %v7666_v25 = vsel %vm4053_vm7, %v7665_v49, %v7664_v38  ;;  %v8111_v2 = vadd.f32 -1.0, %v9459_v34 }
 0xbb4   :  { %v7668_v27 = vsel %vm4056_vm8, %v7667_v62, %v7666_v25  ;;  %8935 = vmatprep.subr.bf16.mxu0 %v8934_v9  ;;  %vm13979_vm8 = vcmask 130048  }
 0xbb5   :  { %v7616_v36 = vsel %vm7536_vm4, %v13411_v28, %v8111_v2  ;;  %v8113_v28 = vld [vmem:[#allocation46] ss:$0 sm:$0xff] }
 0xbb6   :  { %v7669_v33 = vrot.slane %v7616_v36, 2 }
 0xbb7   :  { %v9461_v5 = vpop.eup %9460 }
 0xbb8   :  { %v8112_v24 = vadd.f32 -1.0, %v9461_v5  ;;  %v7670_v60 = vsel %vm4059_vm9, %v7669_v33, %v7668_v27  ;;  %vm13980_vm9 = vmmov %vm13979_vm8 }
 0xbba   :  { %v7617_v20 = vsel %vm7537_vm5, %v13433_v32, %v8112_v24 }
 0xbbb   :  { %v7671_v59 = vrot.slane %v7617_v20, 1 }
 0xbbd   :  { %v7672_v47 = vsel %vm4062_vm10, %v7671_v59, %v7670_v60 }
 0xbbe   :  { %8689 = vmatmul.mubr.msk.f32.vlgmr.msra.gmra.mrb[150].mxu0 %vm5779_vm0, %v7672_v47 }
 0xbbf   :  { %8937 = vmatpush3.bf16.msra.mxu0 %v8934_v9 }
 0xc91   :  { %v8690_v15 = vpop.f32.mrb[150].mxu0 }
 0xc92   :  { %v7749_v43 = vadd.f32 %v8690_v15, %v8113_v28  ;;  %v7743_v50 = vpop.f32.mrb[151].mxu0 }
 0xc93   :  { %v7744_v35 = vadd.f32 %v8113_v28, %v7743_v50 }
 0xc94   :  { %v7755_v57 = vmin.f32 %v7749_v43, 0.0  ;;  %vm7753_vm7 = vcmp.gt.f32.partialorder %v7749_v43, 0.0 }
 0xc95   :  { %v7754_v58 = vmin.f32 %v7744_v35, 0.0  ;;  %vm7752_vm6 = vcmp.gt.f32.partialorder %v7744_v35, 0.0 }
 0xc96   :  { %v7758_v14 = vmul.f32 1.442695, %v7755_v57 }
 0xc97   :  { %v7756_v31 = vmul.f32 1.442695, %v7754_v58 }
 0xc98   :  { %9462 = vpow2.f32 %v7758_v14 }
 0xc99   :  { %9464 = vpow2.f32 %v7756_v31 }
 0xca2   :  { %v9463_v32 = vpop.eup %9462 }
 0xca3   :  { %v9465_v30 = vpop.eup %9464  ;;  %v8117_v7 = vadd.f32 -1.0, %v9463_v32 }
 0xca4   :  { %v8116_v54 = vadd.f32 -1.0, %v9465_v30 }
 0xca5   :  { %v7763_v23 = vsel %vm7753_vm7, %v7749_v43, %v8117_v7 }
 0xca6   :  { %v7762_v1 = vsel %vm7752_vm6, %v7744_v35, %v8116_v54 }
 0xca7   :  { %8695 = vmatprep.mubr.msk.f32.mxu0 %vm13979_vm8, %v7762_v1 }
 0xca8   :  { %8696 = vmatmul.mubr.msk.f32.vlgmr.msra.gmra.mrb[152].mxu0 %vm13980_vm9, %v7763_v23 }
 0xd7b   :  { %v8697_v8 = vpop.f32.mrb[152].mxu0 }
 0xd7c   :  { %v7851_v0 = vadd.f32 %v8697_v8, %v8118_v40  ;;  %v7845_v29 = vpop.f32.mrb[153].mxu0 }
 0xd7d   :  { %v7846_v46 = vadd.f32 %v8118_v40, %v7845_v29 }
 0xd7e   :  { %7855 = vst [vmem:[#allocation50 + $0x8] sm:$0xff] %v7851_v0 }
 0xd7f   :  { %7854 = vst [vmem:[#allocation50] sm:$0xff] %v7846_v46 }
 0xd80   :  { %10226 = shalt.err (!%p10223_p0)
}
 0xd81   :  { %s10227_s26 = scalar_lea.hbm %s10504_s5, 256 }
 0xd82   :  { %p10228_p1 = scmp.ne.s32.totalorder %s10504_s5, %s10227_s26  ;;  %p10231_p2 = scmp.lt.u32.totalorder %s10227_s26, %s10504_s5 }
 0xd84   :  { %p10233_p3 = pnand %p10231_p2, %p10228_p1 }
 0xd86   :  { %10236 = shalt.err (!%p10233_p3)
}
 0xd87   :  { %7867 = dma.vmem_to_hbm [thread:$0]  %s7862_s27, 256, %s10504_s5, [#allocation4], %s10304_s2, %s10304_s2, %s10305_s7  }
 0xd88   :  { %10269 = dma.done.wait [#allocation4], 256  }
 0xd89   :  { %10270 = vsyncadd [#allocation4], 4294967040 }
 0xd8a   :  { %7871 = vsyncpa [#allocation3], 1 }
 0xd8b   :  { %7872 = vsyncpa [#allocation6], 1 }
 0xd8c   :  { %7873 = vsyncpa [#allocation9], 1 }
 0xd8d   :  { %7874 = vsyncpa [#allocation12], 1 }
 0xd8e   :  { %7875 = vsyncpa [#allocation15], 1 }
 0xd8f   :  { %7876 = vsyncpa [#allocation18], 1 }
 0xd90   :  { %7877 = vsyncpa [#allocation21], 1 }
 0xd91   :  { %7878 = vsyncpa [#allocation24], 1 }
 0xd92   :  { %7879 = vsyncpa [#allocation27], 1 }
 0xd93   :  { %7880 = vsyncpa [#allocation30], 1 }
 0xd94   :  { %7881 = vsyncpa [#allocation33], 1 }
 0xd95   :  { %7882 = vsyncpa [#allocation36], 1 }
 0xd96   :  { %7883 = vsyncpa [#allocation39], 1 }
 0xd97   :  { %7884 = vsyncpa [#allocation42], 1 }
 0xd98   :  { %7885 = vsyncpa [#allocation45], 1 }
 0xd99   :  { %7886 = vsyncpa [#allocation48], 1 }
 0xd9a   :  { %7887 = vsyncpa [#allocation4], 1 }

</bundles_post_ra>
